<compile_context>
chip_gen: v5e
topology: v5e:2x2
jax: 0.10.0
libtpu: 0.0.40
codegen_flags: <defaults>
</compile_context>

<pallas_src>
import functools

import jax
import jax.numpy as jnp
from jax.experimental import pallas as pl
from jax.experimental.pallas import tpu as pltpu


# --------------------------------------------------------------------------
# Per-generation tuning (MXU geometry, TC count, VMEM budget)
# --------------------------------------------------------------------------
def _round_up(x, m):
    return ((x + m - 1) // m) * m


def _cdiv(a, b):
    return -(-a // b)


def _device_kind():
    try:
        return jax.devices()[0].device_kind.lower()
    except Exception:
        return ""


def _mxu_dim():
    kind = _device_kind()
    return 256 if ("v6" in kind or "v7" in kind) else 128


def _num_tensorcores():
    # v7x exposes 2 TensorCores per chip; earlier listed generations expose 1.
    return 2 if "v7" in _device_kind() else 1


def _vmem_limit_bytes():
    # ~75% of physical VMEM, capped at 96 MiB (v5e/v6e: 96 MiB, v7x: 48 MiB).
    try:
        cap = pltpu.get_tpu_info().vmem_capacity_bytes
    except Exception:
        return None  # fall back to the compiler's default scoped limit
    return int(min(3 * cap // 4, 96 * 1024 * 1024))


_MXU = _mxu_dim()
_NUM_TC = _num_tensorcores()
_PREF_M = 256          # M tile (output rows)
_PREF_N = _MXU         # N tile (output channels): 256 on v6e/v7x, 128 on v5e
_VMEM_LIMIT = _vmem_limit_bytes()
_TILE_BUDGET = int(0.8 * (_VMEM_LIMIT if _VMEM_LIMIT else 32 * 1024 * 1024))


def _compiler_params(dim_sem):
    return pltpu.CompilerParams(dimension_semantics=dim_sem,
                                vmem_limit_bytes=_VMEM_LIMIT)


def _pick_tk(tm, tn, Kp):
    """Largest K tile (multiple of 128, dividing Kp) that fits the VMEM budget
    with double-buffered bf16 A/B streams plus bias/output/accumulator."""
    fixed = 2 * (tn * 4) + 3 * (tm * tn * 4)      # bias x2, out x2, acc
    per_k = 2 * (tm + tn) * 2                     # bf16 A + B, double-buffered
    tk = max(128, ((_TILE_BUDGET - fixed) // per_k) // 128 * 128)
    tk = min(tk, Kp)
    while Kp % tk:
        tk -= 128
    return tk


# --------------------------------------------------------------------------
# Pallas kernel 1a: full-K  C = (A @ B) + bias   (BN scale folded into B)
# Grid (N, M); weight block (Kp, tn) resident across the whole M loop.
# --------------------------------------------------------------------------
def _matmul_bias_fullk_kernel(a_ref, b_ref, bias_ref, o_ref):
    acc = jnp.dot(a_ref[...], b_ref[...], preferred_element_type=jnp.float32)
    o_ref[...] = (acc + bias_ref[...]).astype(o_ref.dtype)


# --------------------------------------------------------------------------
# Pallas kernel 1b: chunked-K fallback with f32 VMEM accumulator.
# Grid (N, M, K); only used if a full-K tile would not fit the VMEM budget.
# --------------------------------------------------------------------------
def _matmul_bias_acc_kernel(a_ref, b_ref, bias_ref, o_ref, acc_ref):
    @pl.when(pl.program_id(2) == 0)
    def _():
        acc_ref[...] = jnp.zeros_like(acc_ref)

    acc_ref[...] += jnp.dot(a_ref[...], b_ref[...],
                            preferred_element_type=jnp.float32)

    @pl.when(pl.program_id(2) == pl.num_programs(2) - 1)
    def _():
        o_ref[...] = (acc_ref[...] + bias_ref[...]).astype(o_ref.dtype)


def matmul_bias(a, w_pad, bias_pad, cout, out_dtype):
    """a: [M, K] bf16 im2col patches (K already a multiple of 128).
    w_pad: [Kp, Cp] bf16 (scale-folded, channel-padded).  bias_pad: [1, Cp] f32.
    Returns [M, cout] in out_dtype."""
    M, K = a.shape
    Kp, Cp = w_pad.shape
    assert K == Kp, (K, Kp)

    # N tile
    tn = min(_PREF_N, Cp)
    while Cp % tn:
        tn -= 128
    grid_n = Cp // tn

    # M tile: multiple of 16 (bf16 packing); split for 2-TC occupancy on v7x.
    tm = min(_PREF_M, _round_up(M, 16))
    if _NUM_TC > 1:
        while _cdiv(M, tm) * grid_n < _NUM_TC and tm % 32 == 0:
            tm //= 2
    Mp = _round_up(M, tm)
    grid_m = Mp // tm

    if Mp != M:  # only the tiny late layers ever pad (M=18 -> 32)
        a = jnp.pad(a, ((0, Mp - M), (0, 0)))
    a = a.astype(jnp.bfloat16)

    tk = _pick_tk(tm, tn, Kp)

    if tk == Kp:
        # Single K step: no scratch, no init/finalize branches; weight block
        # indexed only by the N tile -> fetched once per N tile.
        out = pl.pallas_call(
            _matmul_bias_fullk_kernel,
            out_shape=jax.ShapeDtypeStruct((Mp, Cp), out_dtype),
            grid=(grid_n, grid_m),
            in_specs=[
                pl.BlockSpec((tm, Kp), lambda j, i: (i, 0)),
                pl.BlockSpec((Kp, tn), lambda j, i: (0, j)),
                pl.BlockSpec((1, tn), lambda j, i: (0, j)),
            ],
            out_specs=pl.BlockSpec((tm, tn), lambda j, i: (i, j)),
            compiler_params=_compiler_params(("parallel", "parallel")),
        )(a, w_pad, bias_pad)
    else:
        grid_k = Kp // tk
        out = pl.pallas_call(
            _matmul_bias_acc_kernel,
            out_shape=jax.ShapeDtypeStruct((Mp, Cp), out_dtype),
            grid=(grid_n, grid_m, grid_k),
            in_specs=[
                pl.BlockSpec((tm, tk), lambda j, i, kk: (i, kk)),
                pl.BlockSpec((tk, tn), lambda j, i, kk: (kk, j)),
                pl.BlockSpec((1, tn), lambda j, i, kk: (0, j)),
            ],
            out_specs=pl.BlockSpec((tm, tn), lambda j, i, kk: (i, j)),
            scratch_shapes=[pltpu.VMEM((tm, tn), jnp.float32)],
            compiler_params=_compiler_params(
                ("parallel", "parallel", "arbitrary")),
        )(a, w_pad, bias_pad)

    return out[:M, :cout]


# --------------------------------------------------------------------------
# Pallas kernel 2: single-output-channel conv (conv5) as a VPU dot-reduce.
# Per-128-lane VPU multiply-adds into a (tm,128) accumulator; a single
# cross-lane reduce + bias in the finalize branch; lane-dense (tm,128) output.
# --------------------------------------------------------------------------
def _matvec_bias_kernel(a_ref, w_ref, bias_ref, o_ref, acc_ref, *, n_chunks):
    @pl.when(pl.program_id(1) == 0)
    def _():
        acc_ref[...] = jnp.zeros_like(acc_ref)

    partial = jnp.zeros(acc_ref.shape, jnp.float32)
    for c in range(n_chunks):            # static unroll; VPU mul/add per chunk
        lo = c * 128
        a_c = a_ref[:, lo:lo + 128].astype(jnp.float32)
        w_c = w_ref[:, lo:lo + 128].astype(jnp.float32)
        partial = partial + a_c * w_c
    acc_ref[...] += partial

    @pl.when(pl.program_id(1) == pl.num_programs(1) - 1)
    def _():
        s = jnp.sum(acc_ref[...], axis=-1, keepdims=True) + bias_ref[...]
        o_ref[...] = jnp.broadcast_to(s, o_ref.shape).astype(o_ref.dtype)


def matvec_bias(a, w_row, bias11, out_dtype):
    """a: [M, K] bf16.  w_row: [1, Kp] bf16 (scale-folded).  bias11: [1,1] f32.
    Returns [M, 1] in out_dtype."""
    M, K = a.shape
    _, Kp = w_row.shape
    assert K == Kp, (K, Kp)

    tm = min(_PREF_M, _round_up(M, 16))
    if _NUM_TC > 1:
        while _cdiv(M, tm) < _NUM_TC and tm % 32 == 0:
            tm //= 2
    Mp = _round_up(M, tm)
    grid_m = Mp // tm
    if Mp != M:
        a = jnp.pad(a, ((0, Mp - M), (0, 0)))
    a = a.astype(jnp.bfloat16)

    # Full K in one step whenever it fits the VMEM budget (always, here).
    per_k = 2 * (tm + 1) * 2
    tk = max(128, min(Kp, (_TILE_BUDGET // per_k) // 128 * 128))
    while Kp % tk:
        tk -= 128
    grid_k = Kp // tk

    kernel = functools.partial(_matvec_bias_kernel, n_chunks=tk // 128)
    out = pl.pallas_call(
        kernel,
        out_shape=jax.ShapeDtypeStruct((Mp, 128), out_dtype),  # lane-dense
        grid=(grid_m, grid_k),
        in_specs=[
            pl.BlockSpec((tm, tk), lambda i, kk: (i, kk)),
            pl.BlockSpec((1, tk), lambda i, kk: (0, kk)),
            pl.BlockSpec((1, 1), lambda i, kk: (0, 0)),
        ],
        out_specs=pl.BlockSpec((tm, 128), lambda i, kk: (i, 0)),
        scratch_shapes=[pltpu.VMEM((tm, 128), jnp.float32)],
        compiler_params=_compiler_params(("parallel", "arbitrary")),
    )(a, w_row, bias11)

    return out[:M, 0:1]


# --------------------------------------------------------------------------
# Glue: im2col patch extraction (pure data rearrangement, plain JAX, bf16)
# --------------------------------------------------------------------------
def im2col_nhwc(x, k, stride, pad):
    """x: [N, H, W, C] -> patches [N*Ho*Wo, k*k*C] (patch order: kh, kw, cin)."""
    N, H, W, C = x.shape
    xp = jnp.pad(x, ((0, 0), (pad, pad), (pad, pad), (0, 0)))
    Ho = (H + 2 * pad - k) // stride + 1
    Wo = (W + 2 * pad - k) // stride + 1
    slabs = []
    for di in range(k):
        for dj in range(k):
            slabs.append(
                xp[:, di:di + stride * Ho:stride, dj:dj + stride * Wo:stride, :]
            )  # [N, Ho, Wo, C]
    patches = jnp.stack(slabs, axis=3)  # [N, Ho, Wo, k*k, C]
    return patches.reshape(N * Ho * Wo, k * k * C), Ho, Wo


# --------------------------------------------------------------------------
# Parameter construction (deterministic, synthetic). BN is folded to
# inference-mode scale/bias; the scale is pre-multiplied into the weights.
# Input channels are padded to a multiple of 8 so every layer's K is a
# multiple of 128 (no K padding of the patch matrix needed).
# --------------------------------------------------------------------------
# (c_in, c_out, k, stride, pad, has_bn)
LAYER_CFG = [
    (6, 64, 4, 2, 1, False),
    (64, 128, 4, 2, 1, True),
    (128, 256, 4, 2, 1, True),
    (256, 512, 4, 1, 1, True),
    (512, 1, 4, 1, 1, True),
]
BN_EPS = 1e-5  # PyTorch BatchNorm2d default


def init_params(key):
    params = []
    for (cin, cout, k, s, p, bn) in LAYER_CFG:
        key, kw, kg, kb, km, kv = jax.random.split(key, 6)
        # PyTorch Conv2d weight layout: [C_out, C_in, kH, kW]
        w = jax.random.normal(kw, (cout, cin, k, k), jnp.float32) * 0.05
        if bn:
            gamma = 1.0 + 0.1 * jax.random.normal(kg, (cout,), jnp.float32)
            beta = 0.1 * jax.random.normal(kb, (cout,), jnp.float32)
            rmean = 0.1 * jax.random.normal(km, (cout,), jnp.float32)
            rvar = jax.random.uniform(kv, (cout,), jnp.float32, 0.5, 1.5)
            scale = gamma / jnp.sqrt(rvar + BN_EPS)
            bias = beta - rmean * scale
        else:
            scale = jnp.ones((cout,), jnp.float32)
            bias = jnp.zeros((cout,), jnp.float32)

        cin_pad = _round_up(cin, 8)  # makes K = k*k*cin_pad a multiple of 128
        if cin_pad != cin:
            w = jnp.pad(w, ((0, 0), (0, cin_pad - cin), (0, 0), (0, 0)))
        K = k * k * cin_pad

        # Matmul form [K, Cout], matching im2col patch order (kh, kw, cin),
        # with the BN scale folded in (f32 fold, then bf16 cast).
        wmat = jnp.transpose(w, (2, 3, 1, 0)).reshape(K, cout) * scale[None, :]

        if cout == 1:
            w_prep = wmat.reshape(1, K).astype(jnp.bfloat16)
            b_prep = bias.reshape(1, 1).astype(jnp.float32)
        else:
            Cp = _round_up(cout, 128)
            w_prep = jnp.pad(wmat, ((0, 0), (0, Cp - cout))).astype(jnp.bfloat16)
            b_prep = jnp.pad(bias.reshape(1, -1),
                             ((0, 0), (0, Cp - cout))).astype(jnp.float32)

        params.append(dict(w=w_prep, bias=b_prep, k=k, s=s, p=p,
                           cout=cout, cin_pad=cin_pad))
    return params


# --------------------------------------------------------------------------
# Forward pass
# --------------------------------------------------------------------------
def discriminator_forward(params, x_nchw):
    # layout: NCHW (PyTorch) -> NHWC (channels to TPU lanes); bf16 activations
    # between layers, f32 final output.
    x = jnp.transpose(x_nchw, (0, 2, 3, 1)).astype(jnp.bfloat16)
    N = x.shape[0]
    n_layers = len(params)
    for li, layer in enumerate(params):
        if x.shape[-1] != layer["cin_pad"]:
            x = jnp.pad(x, ((0, 0), (0, 0), (0, 0),
                            (0, layer["cin_pad"] - x.shape[-1])))
        patches, Ho, Wo = im2col_nhwc(x, layer["k"], layer["s"], layer["p"])
        out_dtype = jnp.float32 if li == n_layers - 1 else jnp.bfloat16
        if layer["cout"] == 1:
            out = matvec_bias(patches, layer["w"], layer["bias"], out_dtype)
        else:
            out = matmul_bias(patches, layer["w"], layer["bias"],
                              layer["cout"], out_dtype)
        x = out.reshape(N, Ho, Wo, layer["cout"])
    # back to NCHW
    return jnp.transpose(x, (0, 3, 1, 2))


if __name__ == "__main__":
    key = jax.random.PRNGKey(0)
    key, kx = jax.random.split(key)

    params = init_params(key)

    # Small shapes consistent with the module: 6 input channels (Pix2Pix
    # concatenated pair); 32x32 spatial is the smallest that keeps every
    # layer's output size positive (32 -> 16 -> 8 -> 4 -> 3 -> 2).
    x = jax.random.normal(kx, (2, 6, 32, 32), jnp.float32)

    fwd = jax.jit(functools.partial(discriminator_forward, params))
    out = fwd(x)
    jax.block_until_ready(out)

    assert out.shape == (2, 1, 2, 2), out.shape
    print("KERNEL_OK")
</pallas_src>

<mosaic_0001>
module attributes {stable_mosaic.version = 11 : i64} {
  func.func @_matmul_bias_fullk_kernel(%arg0: i32, %arg1: i32, %arg2: memref<256x128xbf16, #tpu.memory_space<vmem>>, %arg3: memref<128x128xbf16, #tpu.memory_space<vmem>>, %arg4: memref<1x128xf32, #tpu.memory_space<vmem>>, %arg5: memref<256x128xbf16, #tpu.memory_space<vmem>>) attributes {dimension_semantics = [#tpu.dimension_semantics<parallel>, #tpu.dimension_semantics<parallel>], iteration_bounds = array<i64: 1, 2>, scalar_prefetch = 0 : i64, scratch_operands = 0 : i64, tpu.core_type = #tpu.core_type<tc>, window_params = [{transform_indices = @transform_0, window_bounds = array<i64: 256, 128>}, {transform_indices = @transform_1, window_bounds = array<i64: 128, 128>}, {transform_indices = @transform_2, window_bounds = array<i64: 1, 128>}, {transform_indices = @transform_3, window_bounds = array<i64: 256, 128>}]} {
    %c0 = arith.constant 0 : index
    %c0_0 = arith.constant 0 : index
    %0 = vector.load %arg2[%c0, %c0_0] : memref<256x128xbf16, #tpu.memory_space<vmem>>, vector<256x128xbf16>
    %c0_1 = arith.constant 0 : index
    %c0_2 = arith.constant 0 : index
    %1 = vector.load %arg3[%c0_1, %c0_2] : memref<128x128xbf16, #tpu.memory_space<vmem>>, vector<128x128xbf16>
    %cst = arith.constant dense<0.000000e+00> : vector<256x128xf32>
    %2 = tpu.matmul %0, %1, %cst {dimension_numbers = #tpu.dot_dimension_numbers<[1], [0], [0], [1], [0, 0, 1, 1], [], []>} : vector<256x128xbf16>, vector<128x128xbf16>, vector<256x128xf32> -> vector<256x128xf32>
    %c0_3 = arith.constant 0 : index
    %c0_4 = arith.constant 0 : index
    %3 = vector.load %arg4[%c0_3, %c0_4] : memref<1x128xf32, #tpu.memory_space<vmem>>, vector<1x128xf32>
    %4 = vector.broadcast %3 : vector<1x128xf32> to vector<256x128xf32>
    %5 = arith.addf %2, %4 : vector<256x128xf32>
    %6 = arith.truncf %5 : vector<256x128xf32> to vector<256x128xbf16>
    %c0_5 = arith.constant 0 : index
    %c0_6 = arith.constant 0 : index
    %7 = vector.load %arg5[%c0_5, %c0_6] : memref<256x128xbf16, #tpu.memory_space<vmem>>, vector<256x128xbf16>
    tpu.vector_store %arg5[%c0_5, %c0_6], %6 {strides = array<i32>} : memref<256x128xbf16, #tpu.memory_space<vmem>>, vector<256x128xbf16>,
    return
  }
  func.func @transform_0(%arg0: i32, %arg1: i32) -> (i32, i32) {
    %c0_i32 = arith.constant 0 : i32
    %c0_i32_0 = arith.constant 0 : i32
    return %arg1, %c0_i32 : i32, i32
  }
  func.func @transform_1(%arg0: i32, %arg1: i32) -> (i32, i32) {
    %c0_i32 = arith.constant 0 : i32
    %c0_i32_0 = arith.constant 0 : i32
    return %c0_i32, %arg0 : i32, i32
  }
  func.func @transform_2(%arg0: i32, %arg1: i32) -> (i32, i32) {
    %c0_i32 = arith.constant 0 : i32
    %c0_i32_0 = arith.constant 0 : i32
    return %c0_i32, %arg0 : i32, i32
  }
  func.func @transform_3(%arg0: i32, %arg1: i32) -> (i32, i32) {
    %c0_i32 = arith.constant 0 : i32
    return %arg1, %arg0 : i32, i32
  }
}

module attributes {stable_mosaic.version = 11 : i64} {
  func.func @_matmul_bias_fullk_kernel(%arg0: i32, %arg1: i32, %arg2: memref<128x1024xbf16, #tpu.memory_space<vmem>>, %arg3: memref<1024x128xbf16, #tpu.memory_space<vmem>>, %arg4: memref<1x128xf32, #tpu.memory_space<vmem>>, %arg5: memref<128x128xbf16, #tpu.memory_space<vmem>>) attributes {dimension_semantics = [#tpu.dimension_semantics<parallel>, #tpu.dimension_semantics<parallel>], iteration_bounds = array<i64: 1, 1>, scalar_prefetch = 0 : i64, scratch_operands = 0 : i64, tpu.core_type = #tpu.core_type<tc>, window_params = [{transform_indices = @transform_0, window_bounds = array<i64: 128, 1024>}, {transform_indices = @transform_1, window_bounds = array<i64: 1024, 128>}, {transform_indices = @transform_2, window_bounds = array<i64: 1, 128>}, {transform_indices = @transform_3, window_bounds = array<i64: 128, 128>}]} {
    %c0 = arith.constant 0 : index
    %c0_0 = arith.constant 0 : index
    %0 = vector.load %arg2[%c0, %c0_0] : memref<128x1024xbf16, #tpu.memory_space<vmem>>, vector<128x1024xbf16>
    %c0_1 = arith.constant 0 : index
    %c0_2 = arith.constant 0 : index
    %1 = vector.load %arg3[%c0_1, %c0_2] : memref<1024x128xbf16, #tpu.memory_space<vmem>>, vector<1024x128xbf16>
    %cst = arith.constant dense<0.000000e+00> : vector<128x128xf32>
    %2 = tpu.matmul %0, %1, %cst {dimension_numbers = #tpu.dot_dimension_numbers<[1], [0], [0], [1], [0, 0, 1, 1], [], []>} : vector<128x1024xbf16>, vector<1024x128xbf16>, vector<128x128xf32> -> vector<128x128xf32>
    %c0_3 = arith.constant 0 : index
    %c0_4 = arith.constant 0 : index
    %3 = vector.load %arg4[%c0_3, %c0_4] : memref<1x128xf32, #tpu.memory_space<vmem>>, vector<1x128xf32>
    %4 = vector.broadcast %3 : vector<1x128xf32> to vector<128x128xf32>
    %5 = arith.addf %2, %4 : vector<128x128xf32>
    %6 = arith.truncf %5 : vector<128x128xf32> to vector<128x128xbf16>
    %c0_5 = arith.constant 0 : index
    %c0_6 = arith.constant 0 : index
    %7 = vector.load %arg5[%c0_5, %c0_6] : memref<128x128xbf16, #tpu.memory_space<vmem>>, vector<128x128xbf16>
    tpu.vector_store %arg5[%c0_5, %c0_6], %6 {strides = array<i32>} : memref<128x128xbf16, #tpu.memory_space<vmem>>, vector<128x128xbf16>,
    return
  }
  func.func @transform_0(%arg0: i32, %arg1: i32) -> (i32, i32) {
    %c0_i32 = arith.constant 0 : i32
    %c0_i32_0 = arith.constant 0 : i32
    return %arg1, %c0_i32 : i32, i32
  }
  func.func @transform_1(%arg0: i32, %arg1: i32) -> (i32, i32) {
    %c0_i32 = arith.constant 0 : i32
    %c0_i32_0 = arith.constant 0 : i32
    return %c0_i32, %arg0 : i32, i32
  }
  func.func @transform_2(%arg0: i32, %arg1: i32) -> (i32, i32) {
    %c0_i32 = arith.constant 0 : i32
    %c0_i32_0 = arith.constant 0 : i32
    return %c0_i32, %arg0 : i32, i32
  }
  func.func @transform_3(%arg0: i32, %arg1: i32) -> (i32, i32) {
    %c0_i32 = arith.constant 0 : i32
    return %arg1, %arg0 : i32, i32
  }
}

module attributes {stable_mosaic.version = 11 : i64} {
  func.func @_matmul_bias_fullk_kernel(%arg0: i32, %arg1: i32, %arg2: memref<32x2048xbf16, #tpu.memory_space<vmem>>, %arg3: memref<2048x128xbf16, #tpu.memory_space<vmem>>, %arg4: memref<1x128xf32, #tpu.memory_space<vmem>>, %arg5: memref<32x128xbf16, #tpu.memory_space<vmem>>) attributes {dimension_semantics = [#tpu.dimension_semantics<parallel>, #tpu.dimension_semantics<parallel>], iteration_bounds = array<i64: 2, 1>, scalar_prefetch = 0 : i64, scratch_operands = 0 : i64, tpu.core_type = #tpu.core_type<tc>, window_params = [{transform_indices = @transform_0, window_bounds = array<i64: 32, 2048>}, {transform_indices = @transform_1, window_bounds = array<i64: 2048, 128>}, {transform_indices = @transform_2, window_bounds = array<i64: 1, 128>}, {transform_indices = @transform_3, window_bounds = array<i64: 32, 128>}]} {
    %c0 = arith.constant 0 : index
    %c0_0 = arith.constant 0 : index
    %0 = vector.load %arg2[%c0, %c0_0] : memref<32x2048xbf16, #tpu.memory_space<vmem>>, vector<32x2048xbf16>
    %c0_1 = arith.constant 0 : index
    %c0_2 = arith.constant 0 : index
    %1 = vector.load %arg3[%c0_1, %c0_2] : memref<2048x128xbf16, #tpu.memory_space<vmem>>, vector<2048x128xbf16>
    %cst = arith.constant dense<0.000000e+00> : vector<32x128xf32>
    %2 = tpu.matmul %0, %1, %cst {dimension_numbers = #tpu.dot_dimension_numbers<[1], [0], [0], [1], [0, 0, 1, 1], [], []>} : vector<32x2048xbf16>, vector<2048x128xbf16>, vector<32x128xf32> -> vector<32x128xf32>
    %c0_3 = arith.constant 0 : index
    %c0_4 = arith.constant 0 : index
    %3 = vector.load %arg4[%c0_3, %c0_4] : memref<1x128xf32, #tpu.memory_space<vmem>>, vector<1x128xf32>
    %4 = vector.broadcast %3 : vector<1x128xf32> to vector<32x128xf32>
    %5 = arith.addf %2, %4 : vector<32x128xf32>
    %6 = arith.truncf %5 : vector<32x128xf32> to vector<32x128xbf16>
    %c0_5 = arith.constant 0 : index
    %c0_6 = arith.constant 0 : index
    %7 = vector.load %arg5[%c0_5, %c0_6] : memref<32x128xbf16, #tpu.memory_space<vmem>>, vector<32x128xbf16>
    tpu.vector_store %arg5[%c0_5, %c0_6], %6 {strides = array<i32>} : memref<32x128xbf16, #tpu.memory_space<vmem>>, vector<32x128xbf16>,
    return
  }
  func.func @transform_0(%arg0: i32, %arg1: i32) -> (i32, i32) {
    %c0_i32 = arith.constant 0 : i32
    %c0_i32_0 = arith.constant 0 : i32
    return %arg1, %c0_i32 : i32, i32
  }
  func.func @transform_1(%arg0: i32, %arg1: i32) -> (i32, i32) {
    %c0_i32 = arith.constant 0 : i32
    %c0_i32_0 = arith.constant 0 : i32
    return %c0_i32, %arg0 : i32, i32
  }
  func.func @transform_2(%arg0: i32, %arg1: i32) -> (i32, i32) {
    %c0_i32 = arith.constant 0 : i32
    %c0_i32_0 = arith.constant 0 : i32
    return %c0_i32, %arg0 : i32, i32
  }
  func.func @transform_3(%arg0: i32, %arg1: i32) -> (i32, i32) {
    %c0_i32 = arith.constant 0 : i32
    return %arg1, %arg0 : i32, i32
  }
}

module attributes {stable_mosaic.version = 11 : i64} {
  func.func @_matmul_bias_fullk_kernel(%arg0: i32, %arg1: i32, %arg2: memref<32x4096xbf16, #tpu.memory_space<vmem>>, %arg3: memref<4096x128xbf16, #tpu.memory_space<vmem>>, %arg4: memref<1x128xf32, #tpu.memory_space<vmem>>, %arg5: memref<32x128xbf16, #tpu.memory_space<vmem>>) attributes {dimension_semantics = [#tpu.dimension_semantics<parallel>, #tpu.dimension_semantics<parallel>], iteration_bounds = array<i64: 4, 1>, scalar_prefetch = 0 : i64, scratch_operands = 0 : i64, tpu.core_type = #tpu.core_type<tc>, window_params = [{transform_indices = @transform_0, window_bounds = array<i64: 32, 4096>}, {transform_indices = @transform_1, window_bounds = array<i64: 4096, 128>}, {transform_indices = @transform_2, window_bounds = array<i64: 1, 128>}, {transform_indices = @transform_3, window_bounds = array<i64: 32, 128>}]} {
    %c0 = arith.constant 0 : index
    %c0_0 = arith.constant 0 : index
    %0 = vector.load %arg2[%c0, %c0_0] : memref<32x4096xbf16, #tpu.memory_space<vmem>>, vector<32x4096xbf16>
    %c0_1 = arith.constant 0 : index
    %c0_2 = arith.constant 0 : index
    %1 = vector.load %arg3[%c0_1, %c0_2] : memref<4096x128xbf16, #tpu.memory_space<vmem>>, vector<4096x128xbf16>
    %cst = arith.constant dense<0.000000e+00> : vector<32x128xf32>
    %2 = tpu.matmul %0, %1, %cst {dimension_numbers = #tpu.dot_dimension_numbers<[1], [0], [0], [1], [0, 0, 1, 1], [], []>} : vector<32x4096xbf16>, vector<4096x128xbf16>, vector<32x128xf32> -> vector<32x128xf32>
    %c0_3 = arith.constant 0 : index
    %c0_4 = arith.constant 0 : index
    %3 = vector.load %arg4[%c0_3, %c0_4] : memref<1x128xf32, #tpu.memory_space<vmem>>, vector<1x128xf32>
    %4 = vector.broadcast %3 : vector<1x128xf32> to vector<32x128xf32>
    %5 = arith.addf %2, %4 : vector<32x128xf32>
    %6 = arith.truncf %5 : vector<32x128xf32> to vector<32x128xbf16>
    %c0_5 = arith.constant 0 : index
    %c0_6 = arith.constant 0 : index
    %7 = vector.load %arg5[%c0_5, %c0_6] : memref<32x128xbf16, #tpu.memory_space<vmem>>, vector<32x128xbf16>
    tpu.vector_store %arg5[%c0_5, %c0_6], %6 {strides = array<i32>} : memref<32x128xbf16, #tpu.memory_space<vmem>>, vector<32x128xbf16>,
    return
  }
  func.func @transform_0(%arg0: i32, %arg1: i32) -> (i32, i32) {
    %c0_i32 = arith.constant 0 : i32
    %c0_i32_0 = arith.constant 0 : i32
    return %arg1, %c0_i32 : i32, i32
  }
  func.func @transform_1(%arg0: i32, %arg1: i32) -> (i32, i32) {
    %c0_i32 = arith.constant 0 : i32
    %c0_i32_0 = arith.constant 0 : i32
    return %c0_i32, %arg0 : i32, i32
  }
  func.func @transform_2(%arg0: i32, %arg1: i32) -> (i32, i32) {
    %c0_i32 = arith.constant 0 : i32
    %c0_i32_0 = arith.constant 0 : i32
    return %c0_i32, %arg0 : i32, i32
  }
  func.func @transform_3(%arg0: i32, %arg1: i32) -> (i32, i32) {
    %c0_i32 = arith.constant 0 : i32
    return %arg1, %arg0 : i32, i32
  }
}

module attributes {stable_mosaic.version = 11 : i64} {
  func.func @_matvec_bias_kernel(%arg0: i32, %arg1: i32, %arg2: memref<16x8192xbf16, #tpu.memory_space<vmem>>, %arg3: memref<1x8192xbf16, #tpu.memory_space<vmem>>, %arg4: memref<1x1xf32, #tpu.memory_space<vmem>>, %arg5: memref<16x128xf32, #tpu.memory_space<vmem>>, %arg6: memref<16x128xf32, #tpu.memory_space<vmem>>) attributes {dimension_semantics = [#tpu.dimension_semantics<parallel>, #tpu.dimension_semantics<arbitrary>], iteration_bounds = array<i64: 1, 1>, scalar_prefetch = 0 : i64, scratch_operands = 1 : i64, tpu.core_type = #tpu.core_type<tc>, window_params = [{transform_indices = @transform_0, window_bounds = array<i64: 16, 8192>}, {transform_indices = @transform_1, window_bounds = array<i64: 1, 8192>}, {pipeline_mode = #tpu.pipeline_mode<synchronous>, transform_indices = @transform_2, window_bounds = array<i64: 1, 1>}, {transform_indices = @transform_3, window_bounds = array<i64: 16, 128>}]} {
    %c0_i32 = arith.constant 0 : i32
    %0 = arith.cmpi eq, %arg1, %c0_i32 : i32
    %1 = arith.extui %0 : i1 to i32
    %c0_i32_0 = arith.constant 0 : i32
    %2 = arith.cmpi ne, %1, %c0_i32_0 : i32
    scf.if %2 {
      %cst_199 = arith.constant 0.000000e+00 : f32
      %458 = vector.broadcast %cst_199 : f32 to vector<16x128xf32>
      %c0_200 = arith.constant 0 : index
      %c0_201 = arith.constant 0 : index
      %459 = vector.load %arg6[%c0_200, %c0_201] : memref<16x128xf32, #tpu.memory_space<vmem>>, vector<16x128xf32>
      tpu.vector_store %arg6[%c0_200, %c0_201], %458 {strides = array<i32>} : memref<16x128xf32, #tpu.memory_space<vmem>>, vector<16x128xf32>,
    } else {
    }
    %cst = arith.constant 0.000000e+00 : f32
    %3 = vector.broadcast %cst : f32 to vector<16x128xf32>
    %c0 = arith.constant 0 : index
    %c0_1 = arith.constant 0 : index
    %4 = vector.load %arg2[%c0, %c0_1] : memref<16x8192xbf16, #tpu.memory_space<vmem>>, vector<16x128xbf16>
    %5 = arith.extf %4 : vector<16x128xbf16> to vector<16x128xf32>
    %c0_2 = arith.constant 0 : index
    %c0_3 = arith.constant 0 : index
    %6 = vector.load %arg3[%c0_2, %c0_3] : memref<1x8192xbf16, #tpu.memory_space<vmem>>, vector<1x128xbf16>
    %7 = arith.extf %6 : vector<1x128xbf16> to vector<1x128xf32>
    %8 = vector.broadcast %7 : vector<1x128xf32> to vector<16x128xf32>
    %9 = arith.mulf %5, %8 : vector<16x128xf32>
    %10 = arith.addf %3, %9 : vector<16x128xf32>
    %c0_4 = arith.constant 0 : index
    %c128 = arith.constant 128 : index
    %11 = vector.load %arg2[%c0_4, %c128] : memref<16x8192xbf16, #tpu.memory_space<vmem>>, vector<16x128xbf16>
    %12 = arith.extf %11 : vector<16x128xbf16> to vector<16x128xf32>
    %c0_5 = arith.constant 0 : index
    %c128_6 = arith.constant 128 : index
    %13 = vector.load %arg3[%c0_5, %c128_6] : memref<1x8192xbf16, #tpu.memory_space<vmem>>, vector<1x128xbf16>
    %14 = arith.extf %13 : vector<1x128xbf16> to vector<1x128xf32>
    %15 = vector.broadcast %14 : vector<1x128xf32> to vector<16x128xf32>
    %16 = arith.mulf %12, %15 : vector<16x128xf32>
    %17 = arith.addf %10, %16 : vector<16x128xf32>
    %c0_7 = arith.constant 0 : index
    %c256 = arith.constant 256 : index
    %18 = vector.load %arg2[%c0_7, %c256] : memref<16x8192xbf16, #tpu.memory_space<vmem>>, vector<16x128xbf16>
    %19 = arith.extf %18 : vector<16x128xbf16> to vector<16x128xf32>
    %c0_8 = arith.constant 0 : index
    %c256_9 = arith.constant 256 : index
    %20 = vector.load %arg3[%c0_8, %c256_9] : memref<1x8192xbf16, #tpu.memory_space<vmem>>, vector<1x128xbf16>
    %21 = arith.extf %20 : vector<1x128xbf16> to vector<1x128xf32>
    %22 = vector.broadcast %21 : vector<1x128xf32> to vector<16x128xf32>
    %23 = arith.mulf %19, %22 : vector<16x128xf32>
    %24 = arith.addf %17, %23 : vector<16x128xf32>
    %c0_10 = arith.constant 0 : index
    %c384 = arith.constant 384 : index
    %25 = vector.load %arg2[%c0_10, %c384] : memref<16x8192xbf16, #tpu.memory_space<vmem>>, vector<16x128xbf16>
    %26 = arith.extf %25 : vector<16x128xbf16> to vector<16x128xf32>
    %c0_11 = arith.constant 0 : index
    %c384_12 = arith.constant 384 : index
    %27 = vector.load %arg3[%c0_11, %c384_12] : memref<1x8192xbf16, #tpu.memory_space<vmem>>, vector<1x128xbf16>
    %28 = arith.extf %27 : vector<1x128xbf16> to vector<1x128xf32>
    %29 = vector.broadcast %28 : vector<1x128xf32> to vector<16x128xf32>
    %30 = arith.mulf %26, %29 : vector<16x128xf32>
    %31 = arith.addf %24, %30 : vector<16x128xf32>
    %c0_13 = arith.constant 0 : index
    %c512 = arith.constant 512 : index
    %32 = vector.load %arg2[%c0_13, %c512] : memref<16x8192xbf16, #tpu.memory_space<vmem>>, vector<16x128xbf16>
    %33 = arith.extf %32 : vector<16x128xbf16> to vector<16x128xf32>
    %c0_14 = arith.constant 0 : index
    %c512_15 = arith.constant 512 : index
    %34 = vector.load %arg3[%c0_14, %c512_15] : memref<1x8192xbf16, #tpu.memory_space<vmem>>, vector<1x128xbf16>
    %35 = arith.extf %34 : vector<1x128xbf16> to vector<1x128xf32>
    %36 = vector.broadcast %35 : vector<1x128xf32> to vector<16x128xf32>
    %37 = arith.mulf %33, %36 : vector<16x128xf32>
    %38 = arith.addf %31, %37 : vector<16x128xf32>
    %c0_16 = arith.constant 0 : index
    %c640 = arith.constant 640 : index
    %39 = vector.load %arg2[%c0_16, %c640] : memref<16x8192xbf16, #tpu.memory_space<vmem>>, vector<16x128xbf16>
    %40 = arith.extf %39 : vector<16x128xbf16> to vector<16x128xf32>
    %c0_17 = arith.constant 0 : index
    %c640_18 = arith.constant 640 : index
    %41 = vector.load %arg3[%c0_17, %c640_18] : memref<1x8192xbf16, #tpu.memory_space<vmem>>, vector<1x128xbf16>
    %42 = arith.extf %41 : vector<1x128xbf16> to vector<1x128xf32>
    %43 = vector.broadcast %42 : vector<1x128xf32> to vector<16x128xf32>
    %44 = arith.mulf %40, %43 : vector<16x128xf32>
    %45 = arith.addf %38, %44 : vector<16x128xf32>
    %c0_19 = arith.constant 0 : index
    %c768 = arith.constant 768 : index
    %46 = vector.load %arg2[%c0_19, %c768] : memref<16x8192xbf16, #tpu.memory_space<vmem>>, vector<16x128xbf16>
    %47 = arith.extf %46 : vector<16x128xbf16> to vector<16x128xf32>
    %c0_20 = arith.constant 0 : index
    %c768_21 = arith.constant 768 : index
    %48 = vector.load %arg3[%c0_20, %c768_21] : memref<1x8192xbf16, #tpu.memory_space<vmem>>, vector<1x128xbf16>
    %49 = arith.extf %48 : vector<1x128xbf16> to vector<1x128xf32>
    %50 = vector.broadcast %49 : vector<1x128xf32> to vector<16x128xf32>
    %51 = arith.mulf %47, %50 : vector<16x128xf32>
    %52 = arith.addf %45, %51 : vector<16x128xf32>
    %c0_22 = arith.constant 0 : index
    %c896 = arith.constant 896 : index
    %53 = vector.load %arg2[%c0_22, %c896] : memref<16x8192xbf16, #tpu.memory_space<vmem>>, vector<16x128xbf16>
    %54 = arith.extf %53 : vector<16x128xbf16> to vector<16x128xf32>
    %c0_23 = arith.constant 0 : index
    %c896_24 = arith.constant 896 : index
    %55 = vector.load %arg3[%c0_23, %c896_24] : memref<1x8192xbf16, #tpu.memory_space<vmem>>, vector<1x128xbf16>
    %56 = arith.extf %55 : vector<1x128xbf16> to vector<1x128xf32>
    %57 = vector.broadcast %56 : vector<1x128xf32> to vector<16x128xf32>
    %58 = arith.mulf %54, %57 : vector<16x128xf32>
    %59 = arith.addf %52, %58 : vector<16x128xf32>
    %c0_25 = arith.constant 0 : index
    %c1024 = arith.constant 1024 : index
    %60 = vector.load %arg2[%c0_25, %c1024] : memref<16x8192xbf16, #tpu.memory_space<vmem>>, vector<16x128xbf16>
    %61 = arith.extf %60 : vector<16x128xbf16> to vector<16x128xf32>
    %c0_26 = arith.constant 0 : index
    %c1024_27 = arith.constant 1024 : index
    %62 = vector.load %arg3[%c0_26, %c1024_27] : memref<1x8192xbf16, #tpu.memory_space<vmem>>, vector<1x128xbf16>
    %63 = arith.extf %62 : vector<1x128xbf16> to vector<1x128xf32>
    %64 = vector.broadcast %63 : vector<1x128xf32> to vector<16x128xf32>
    %65 = arith.mulf %61, %64 : vector<16x128xf32>
    %66 = arith.addf %59, %65 : vector<16x128xf32>
    %c0_28 = arith.constant 0 : index
    %c1152 = arith.constant 1152 : index
    %67 = vector.load %arg2[%c0_28, %c1152] : memref<16x8192xbf16, #tpu.memory_space<vmem>>, vector<16x128xbf16>
    %68 = arith.extf %67 : vector<16x128xbf16> to vector<16x128xf32>
    %c0_29 = arith.constant 0 : index
    %c1152_30 = arith.constant 1152 : index
    %69 = vector.load %arg3[%c0_29, %c1152_30] : memref<1x8192xbf16, #tpu.memory_space<vmem>>, vector<1x128xbf16>
    %70 = arith.extf %69 : vector<1x128xbf16> to vector<1x128xf32>
    %71 = vector.broadcast %70 : vector<1x128xf32> to vector<16x128xf32>
    %72 = arith.mulf %68, %71 : vector<16x128xf32>
    %73 = arith.addf %66, %72 : vector<16x128xf32>
    %c0_31 = arith.constant 0 : index
    %c1280 = arith.constant 1280 : index
    %74 = vector.load %arg2[%c0_31, %c1280] : memref<16x8192xbf16, #tpu.memory_space<vmem>>, vector<16x128xbf16>
    %75 = arith.extf %74 : vector<16x128xbf16> to vector<16x128xf32>
    %c0_32 = arith.constant 0 : index
    %c1280_33 = arith.constant 1280 : index
    %76 = vector.load %arg3[%c0_32, %c1280_33] : memref<1x8192xbf16, #tpu.memory_space<vmem>>, vector<1x128xbf16>
    %77 = arith.extf %76 : vector<1x128xbf16> to vector<1x128xf32>
    %78 = vector.broadcast %77 : vector<1x128xf32> to vector<16x128xf32>
    %79 = arith.mulf %75, %78 : vector<16x128xf32>
    %80 = arith.addf %73, %79 : vector<16x128xf32>
    %c0_34 = arith.constant 0 : index
    %c1408 = arith.constant 1408 : index
    %81 = vector.load %arg2[%c0_34, %c1408] : memref<16x8192xbf16, #tpu.memory_space<vmem>>, vector<16x128xbf16>
    %82 = arith.extf %81 : vector<16x128xbf16> to vector<16x128xf32>
    %c0_35 = arith.constant 0 : index
    %c1408_36 = arith.constant 1408 : index
    %83 = vector.load %arg3[%c0_35, %c1408_36] : memref<1x8192xbf16, #tpu.memory_space<vmem>>, vector<1x128xbf16>
    %84 = arith.extf %83 : vector<1x128xbf16> to vector<1x128xf32>
    %85 = vector.broadcast %84 : vector<1x128xf32> to vector<16x128xf32>
    %86 = arith.mulf %82, %85 : vector<16x128xf32>
    %87 = arith.addf %80, %86 : vector<16x128xf32>
    %c0_37 = arith.constant 0 : index
    %c1536 = arith.constant 1536 : index
    %88 = vector.load %arg2[%c0_37, %c1536] : memref<16x8192xbf16, #tpu.memory_space<vmem>>, vector<16x128xbf16>
    %89 = arith.extf %88 : vector<16x128xbf16> to vector<16x128xf32>
    %c0_38 = arith.constant 0 : index
    %c1536_39 = arith.constant 1536 : index
    %90 = vector.load %arg3[%c0_38, %c1536_39] : memref<1x8192xbf16, #tpu.memory_space<vmem>>, vector<1x128xbf16>
    %91 = arith.extf %90 : vector<1x128xbf16> to vector<1x128xf32>
    %92 = vector.broadcast %91 : vector<1x128xf32> to vector<16x128xf32>
    %93 = arith.mulf %89, %92 : vector<16x128xf32>
    %94 = arith.addf %87, %93 : vector<16x128xf32>
    %c0_40 = arith.constant 0 : index
    %c1664 = arith.constant 1664 : index
    %95 = vector.load %arg2[%c0_40, %c1664] : memref<16x8192xbf16, #tpu.memory_space<vmem>>, vector<16x128xbf16>
    %96 = arith.extf %95 : vector<16x128xbf16> to vector<16x128xf32>
    %c0_41 = arith.constant 0 : index
    %c1664_42 = arith.constant 1664 : index
    %97 = vector.load %arg3[%c0_41, %c1664_42] : memref<1x8192xbf16, #tpu.memory_space<vmem>>, vector<1x128xbf16>
    %98 = arith.extf %97 : vector<1x128xbf16> to vector<1x128xf32>
    %99 = vector.broadcast %98 : vector<1x128xf32> to vector<16x128xf32>
    %100 = arith.mulf %96, %99 : vector<16x128xf32>
    %101 = arith.addf %94, %100 : vector<16x128xf32>
    %c0_43 = arith.constant 0 : index
    %c1792 = arith.constant 1792 : index
    %102 = vector.load %arg2[%c0_43, %c1792] : memref<16x8192xbf16, #tpu.memory_space<vmem>>, vector<16x128xbf16>
    %103 = arith.extf %102 : vector<16x128xbf16> to vector<16x128xf32>
    %c0_44 = arith.constant 0 : index
    %c1792_45 = arith.constant 1792 : index
    %104 = vector.load %arg3[%c0_44, %c1792_45] : memref<1x8192xbf16, #tpu.memory_space<vmem>>, vector<1x128xbf16>
    %105 = arith.extf %104 : vector<1x128xbf16> to vector<1x128xf32>
    %106 = vector.broadcast %105 : vector<1x128xf32> to vector<16x128xf32>
    %107 = arith.mulf %103, %106 : vector<16x128xf32>
    %108 = arith.addf %101, %107 : vector<16x128xf32>
    %c0_46 = arith.constant 0 : index
    %c1920 = arith.constant 1920 : index
    %109 = vector.load %arg2[%c0_46, %c1920] : memref<16x8192xbf16, #tpu.memory_space<vmem>>, vector<16x128xbf16>
    %110 = arith.extf %109 : vector<16x128xbf16> to vector<16x128xf32>
    %c0_47 = arith.constant 0 : index
    %c1920_48 = arith.constant 1920 : index
    %111 = vector.load %arg3[%c0_47, %c1920_48] : memref<1x8192xbf16, #tpu.memory_space<vmem>>, vector<1x128xbf16>
    %112 = arith.extf %111 : vector<1x128xbf16> to vector<1x128xf32>
    %113 = vector.broadcast %112 : vector<1x128xf32> to vector<16x128xf32>
    %114 = arith.mulf %110, %113 : vector<16x128xf32>
    %115 = arith.addf %108, %114 : vector<16x128xf32>
    %c0_49 = arith.constant 0 : index
    %c2048 = arith.constant 2048 : index
    %116 = vector.load %arg2[%c0_49, %c2048] : memref<16x8192xbf16, #tpu.memory_space<vmem>>, vector<16x128xbf16>
    %117 = arith.extf %116 : vector<16x128xbf16> to vector<16x128xf32>
    %c0_50 = arith.constant 0 : index
    %c2048_51 = arith.constant 2048 : index
    %118 = vector.load %arg3[%c0_50, %c2048_51] : memref<1x8192xbf16, #tpu.memory_space<vmem>>, vector<1x128xbf16>
    %119 = arith.extf %118 : vector<1x128xbf16> to vector<1x128xf32>
    %120 = vector.broadcast %119 : vector<1x128xf32> to vector<16x128xf32>
    %121 = arith.mulf %117, %120 : vector<16x128xf32>
    %122 = arith.addf %115, %121 : vector<16x128xf32>
    %c0_52 = arith.constant 0 : index
    %c2176 = arith.constant 2176 : index
    %123 = vector.load %arg2[%c0_52, %c2176] : memref<16x8192xbf16, #tpu.memory_space<vmem>>, vector<16x128xbf16>
    %124 = arith.extf %123 : vector<16x128xbf16> to vector<16x128xf32>
    %c0_53 = arith.constant 0 : index
    %c2176_54 = arith.constant 2176 : index
    %125 = vector.load %arg3[%c0_53, %c2176_54] : memref<1x8192xbf16, #tpu.memory_space<vmem>>, vector<1x128xbf16>
    %126 = arith.extf %125 : vector<1x128xbf16> to vector<1x128xf32>
    %127 = vector.broadcast %126 : vector<1x128xf32> to vector<16x128xf32>
    %128 = arith.mulf %124, %127 : vector<16x128xf32>
    %129 = arith.addf %122, %128 : vector<16x128xf32>
    %c0_55 = arith.constant 0 : index
    %c2304 = arith.constant 2304 : index
    %130 = vector.load %arg2[%c0_55, %c2304] : memref<16x8192xbf16, #tpu.memory_space<vmem>>, vector<16x128xbf16>
    %131 = arith.extf %130 : vector<16x128xbf16> to vector<16x128xf32>
    %c0_56 = arith.constant 0 : index
    %c2304_57 = arith.constant 2304 : index
    %132 = vector.load %arg3[%c0_56, %c2304_57] : memref<1x8192xbf16, #tpu.memory_space<vmem>>, vector<1x128xbf16>
    %133 = arith.extf %132 : vector<1x128xbf16> to vector<1x128xf32>
    %134 = vector.broadcast %133 : vector<1x128xf32> to vector<16x128xf32>
    %135 = arith.mulf %131, %134 : vector<16x128xf32>
    %136 = arith.addf %129, %135 : vector<16x128xf32>
    %c0_58 = arith.constant 0 : index
    %c2432 = arith.constant 2432 : index
    %137 = vector.load %arg2[%c0_58, %c2432] : memref<16x8192xbf16, #tpu.memory_space<vmem>>, vector<16x128xbf16>
    %138 = arith.extf %137 : vector<16x128xbf16> to vector<16x128xf32>
    %c0_59 = arith.constant 0 : index
    %c2432_60 = arith.constant 2432 : index
    %139 = vector.load %arg3[%c0_59, %c2432_60] : memref<1x8192xbf16, #tpu.memory_space<vmem>>, vector<1x128xbf16>
    %140 = arith.extf %139 : vector<1x128xbf16> to vector<1x128xf32>
    %141 = vector.broadcast %140 : vector<1x128xf32> to vector<16x128xf32>
    %142 = arith.mulf %138, %141 : vector<16x128xf32>
    %143 = arith.addf %136, %142 : vector<16x128xf32>
    %c0_61 = arith.constant 0 : index
    %c2560 = arith.constant 2560 : index
    %144 = vector.load %arg2[%c0_61, %c2560] : memref<16x8192xbf16, #tpu.memory_space<vmem>>, vector<16x128xbf16>
    %145 = arith.extf %144 : vector<16x128xbf16> to vector<16x128xf32>
    %c0_62 = arith.constant 0 : index
    %c2560_63 = arith.constant 2560 : index
    %146 = vector.load %arg3[%c0_62, %c2560_63] : memref<1x8192xbf16, #tpu.memory_space<vmem>>, vector<1x128xbf16>
    %147 = arith.extf %146 : vector<1x128xbf16> to vector<1x128xf32>
    %148 = vector.broadcast %147 : vector<1x128xf32> to vector<16x128xf32>
    %149 = arith.mulf %145, %148 : vector<16x128xf32>
    %150 = arith.addf %143, %149 : vector<16x128xf32>
    %c0_64 = arith.constant 0 : index
    %c2688 = arith.constant 2688 : index
    %151 = vector.load %arg2[%c0_64, %c2688] : memref<16x8192xbf16, #tpu.memory_space<vmem>>, vector<16x128xbf16>
    %152 = arith.extf %151 : vector<16x128xbf16> to vector<16x128xf32>
    %c0_65 = arith.constant 0 : index
    %c2688_66 = arith.constant 2688 : index
    %153 = vector.load %arg3[%c0_65, %c2688_66] : memref<1x8192xbf16, #tpu.memory_space<vmem>>, vector<1x128xbf16>
    %154 = arith.extf %153 : vector<1x128xbf16> to vector<1x128xf32>
    %155 = vector.broadcast %154 : vector<1x128xf32> to vector<16x128xf32>
    %156 = arith.mulf %152, %155 : vector<16x128xf32>
    %157 = arith.addf %150, %156 : vector<16x128xf32>
    %c0_67 = arith.constant 0 : index
    %c2816 = arith.constant 2816 : index
    %158 = vector.load %arg2[%c0_67, %c2816] : memref<16x8192xbf16, #tpu.memory_space<vmem>>, vector<16x128xbf16>
    %159 = arith.extf %158 : vector<16x128xbf16> to vector<16x128xf32>
    %c0_68 = arith.constant 0 : index
    %c2816_69 = arith.constant 2816 : index
    %160 = vector.load %arg3[%c0_68, %c2816_69] : memref<1x8192xbf16, #tpu.memory_space<vmem>>, vector<1x128xbf16>
    %161 = arith.extf %160 : vector<1x128xbf16> to vector<1x128xf32>
    %162 = vector.broadcast %161 : vector<1x128xf32> to vector<16x128xf32>
    %163 = arith.mulf %159, %162 : vector<16x128xf32>
    %164 = arith.addf %157, %163 : vector<16x128xf32>
    %c0_70 = arith.constant 0 : index
    %c2944 = arith.constant 2944 : index
    %165 = vector.load %arg2[%c0_70, %c2944] : memref<16x8192xbf16, #tpu.memory_space<vmem>>, vector<16x128xbf16>
    %166 = arith.extf %165 : vector<16x128xbf16> to vector<16x128xf32>
    %c0_71 = arith.constant 0 : index
    %c2944_72 = arith.constant 2944 : index
    %167 = vector.load %arg3[%c0_71, %c2944_72] : memref<1x8192xbf16, #tpu.memory_space<vmem>>, vector<1x128xbf16>
    %168 = arith.extf %167 : vector<1x128xbf16> to vector<1x128xf32>
    %169 = vector.broadcast %168 : vector<1x128xf32> to vector<16x128xf32>
    %170 = arith.mulf %166, %169 : vector<16x128xf32>
    %171 = arith.addf %164, %170 : vector<16x128xf32>
    %c0_73 = arith.constant 0 : index
    %c3072 = arith.constant 3072 : index
    %172 = vector.load %arg2[%c0_73, %c3072] : memref<16x8192xbf16, #tpu.memory_space<vmem>>, vector<16x128xbf16>
    %173 = arith.extf %172 : vector<16x128xbf16> to vector<16x128xf32>
    %c0_74 = arith.constant 0 : index
    %c3072_75 = arith.constant 3072 : index
    %174 = vector.load %arg3[%c0_74, %c3072_75] : memref<1x8192xbf16, #tpu.memory_space<vmem>>, vector<1x128xbf16>
    %175 = arith.extf %174 : vector<1x128xbf16> to vector<1x128xf32>
    %176 = vector.broadcast %175 : vector<1x128xf32> to vector<16x128xf32>
    %177 = arith.mulf %173, %176 : vector<16x128xf32>
    %178 = arith.addf %171, %177 : vector<16x128xf32>
    %c0_76 = arith.constant 0 : index
    %c3200 = arith.constant 3200 : index
    %179 = vector.load %arg2[%c0_76, %c3200] : memref<16x8192xbf16, #tpu.memory_space<vmem>>, vector<16x128xbf16>
    %180 = arith.extf %179 : vector<16x128xbf16> to vector<16x128xf32>
    %c0_77 = arith.constant 0 : index
    %c3200_78 = arith.constant 3200 : index
    %181 = vector.load %arg3[%c0_77, %c3200_78] : memref<1x8192xbf16, #tpu.memory_space<vmem>>, vector<1x128xbf16>
    %182 = arith.extf %181 : vector<1x128xbf16> to vector<1x128xf32>
    %183 = vector.broadcast %182 : vector<1x128xf32> to vector<16x128xf32>
    %184 = arith.mulf %180, %183 : vector<16x128xf32>
    %185 = arith.addf %178, %184 : vector<16x128xf32>
    %c0_79 = arith.constant 0 : index
    %c3328 = arith.constant 3328 : index
    %186 = vector.load %arg2[%c0_79, %c3328] : memref<16x8192xbf16, #tpu.memory_space<vmem>>, vector<16x128xbf16>
    %187 = arith.extf %186 : vector<16x128xbf16> to vector<16x128xf32>
    %c0_80 = arith.constant 0 : index
    %c3328_81 = arith.constant 3328 : index
    %188 = vector.load %arg3[%c0_80, %c3328_81] : memref<1x8192xbf16, #tpu.memory_space<vmem>>, vector<1x128xbf16>
    %189 = arith.extf %188 : vector<1x128xbf16> to vector<1x128xf32>
    %190 = vector.broadcast %189 : vector<1x128xf32> to vector<16x128xf32>
    %191 = arith.mulf %187, %190 : vector<16x128xf32>
    %192 = arith.addf %185, %191 : vector<16x128xf32>
    %c0_82 = arith.constant 0 : index
    %c3456 = arith.constant 3456 : index
    %193 = vector.load %arg2[%c0_82, %c3456] : memref<16x8192xbf16, #tpu.memory_space<vmem>>, vector<16x128xbf16>
    %194 = arith.extf %193 : vector<16x128xbf16> to vector<16x128xf32>
    %c0_83 = arith.constant 0 : index
    %c3456_84 = arith.constant 3456 : index
    %195 = vector.load %arg3[%c0_83, %c3456_84] : memref<1x8192xbf16, #tpu.memory_space<vmem>>, vector<1x128xbf16>
    %196 = arith.extf %195 : vector<1x128xbf16> to vector<1x128xf32>
    %197 = vector.broadcast %196 : vector<1x128xf32> to vector<16x128xf32>
    %198 = arith.mulf %194, %197 : vector<16x128xf32>
    %199 = arith.addf %192, %198 : vector<16x128xf32>
    %c0_85 = arith.constant 0 : index
    %c3584 = arith.constant 3584 : index
    %200 = vector.load %arg2[%c0_85, %c3584] : memref<16x8192xbf16, #tpu.memory_space<vmem>>, vector<16x128xbf16>
    %201 = arith.extf %200 : vector<16x128xbf16> to vector<16x128xf32>
    %c0_86 = arith.constant 0 : index
    %c3584_87 = arith.constant 3584 : index
    %202 = vector.load %arg3[%c0_86, %c3584_87] : memref<1x8192xbf16, #tpu.memory_space<vmem>>, vector<1x128xbf16>
    %203 = arith.extf %202 : vector<1x128xbf16> to vector<1x128xf32>
    %204 = vector.broadcast %203 : vector<1x128xf32> to vector<16x128xf32>
    %205 = arith.mulf %201, %204 : vector<16x128xf32>
    %206 = arith.addf %199, %205 : vector<16x128xf32>
    %c0_88 = arith.constant 0 : index
    %c3712 = arith.constant 3712 : index
    %207 = vector.load %arg2[%c0_88, %c3712] : memref<16x8192xbf16, #tpu.memory_space<vmem>>, vector<16x128xbf16>
    %208 = arith.extf %207 : vector<16x128xbf16> to vector<16x128xf32>
    %c0_89 = arith.constant 0 : index
    %c3712_90 = arith.constant 3712 : index
    %209 = vector.load %arg3[%c0_89, %c3712_90] : memref<1x8192xbf16, #tpu.memory_space<vmem>>, vector<1x128xbf16>
    %210 = arith.extf %209 : vector<1x128xbf16> to vector<1x128xf32>
    %211 = vector.broadcast %210 : vector<1x128xf32> to vector<16x128xf32>
    %212 = arith.mulf %208, %211 : vector<16x128xf32>
    %213 = arith.addf %206, %212 : vector<16x128xf32>
    %c0_91 = arith.constant 0 : index
    %c3840 = arith.constant 3840 : index
    %214 = vector.load %arg2[%c0_91, %c3840] : memref<16x8192xbf16, #tpu.memory_space<vmem>>, vector<16x128xbf16>
    %215 = arith.extf %214 : vector<16x128xbf16> to vector<16x128xf32>
    %c0_92 = arith.constant 0 : index
    %c3840_93 = arith.constant 3840 : index
    %216 = vector.load %arg3[%c0_92, %c3840_93] : memref<1x8192xbf16, #tpu.memory_space<vmem>>, vector<1x128xbf16>
    %217 = arith.extf %216 : vector<1x128xbf16> to vector<1x128xf32>
    %218 = vector.broadcast %217 : vector<1x128xf32> to vector<16x128xf32>
    %219 = arith.mulf %215, %218 : vector<16x128xf32>
    %220 = arith.addf %213, %219 : vector<16x128xf32>
    %c0_94 = arith.constant 0 : index
    %c3968 = arith.constant 3968 : index
    %221 = vector.load %arg2[%c0_94, %c3968] : memref<16x8192xbf16, #tpu.memory_space<vmem>>, vector<16x128xbf16>
    %222 = arith.extf %221 : vector<16x128xbf16> to vector<16x128xf32>
    %c0_95 = arith.constant 0 : index
    %c3968_96 = arith.constant 3968 : index
    %223 = vector.load %arg3[%c0_95, %c3968_96] : memref<1x8192xbf16, #tpu.memory_space<vmem>>, vector<1x128xbf16>
    %224 = arith.extf %223 : vector<1x128xbf16> to vector<1x128xf32>
    %225 = vector.broadcast %224 : vector<1x128xf32> to vector<16x128xf32>
    %226 = arith.mulf %222, %225 : vector<16x128xf32>
    %227 = arith.addf %220, %226 : vector<16x128xf32>
    %c0_97 = arith.constant 0 : index
    %c4096 = arith.constant 4096 : index
    %228 = vector.load %arg2[%c0_97, %c4096] : memref<16x8192xbf16, #tpu.memory_space<vmem>>, vector<16x128xbf16>
    %229 = arith.extf %228 : vector<16x128xbf16> to vector<16x128xf32>
    %c0_98 = arith.constant 0 : index
    %c4096_99 = arith.constant 4096 : index
    %230 = vector.load %arg3[%c0_98, %c4096_99] : memref<1x8192xbf16, #tpu.memory_space<vmem>>, vector<1x128xbf16>
    %231 = arith.extf %230 : vector<1x128xbf16> to vector<1x128xf32>
    %232 = vector.broadcast %231 : vector<1x128xf32> to vector<16x128xf32>
    %233 = arith.mulf %229, %232 : vector<16x128xf32>
    %234 = arith.addf %227, %233 : vector<16x128xf32>
    %c0_100 = arith.constant 0 : index
    %c4224 = arith.constant 4224 : index
    %235 = vector.load %arg2[%c0_100, %c4224] : memref<16x8192xbf16, #tpu.memory_space<vmem>>, vector<16x128xbf16>
    %236 = arith.extf %235 : vector<16x128xbf16> to vector<16x128xf32>
    %c0_101 = arith.constant 0 : index
    %c4224_102 = arith.constant 4224 : index
    %237 = vector.load %arg3[%c0_101, %c4224_102] : memref<1x8192xbf16, #tpu.memory_space<vmem>>, vector<1x128xbf16>
    %238 = arith.extf %237 : vector<1x128xbf16> to vector<1x128xf32>
    %239 = vector.broadcast %238 : vector<1x128xf32> to vector<16x128xf32>
    %240 = arith.mulf %236, %239 : vector<16x128xf32>
    %241 = arith.addf %234, %240 : vector<16x128xf32>
    %c0_103 = arith.constant 0 : index
    %c4352 = arith.constant 4352 : index
    %242 = vector.load %arg2[%c0_103, %c4352] : memref<16x8192xbf16, #tpu.memory_space<vmem>>, vector<16x128xbf16>
    %243 = arith.extf %242 : vector<16x128xbf16> to vector<16x128xf32>
    %c0_104 = arith.constant 0 : index
    %c4352_105 = arith.constant 4352 : index
    %244 = vector.load %arg3[%c0_104, %c4352_105] : memref<1x8192xbf16, #tpu.memory_space<vmem>>, vector<1x128xbf16>
    %245 = arith.extf %244 : vector<1x128xbf16> to vector<1x128xf32>
    %246 = vector.broadcast %245 : vector<1x128xf32> to vector<16x128xf32>
    %247 = arith.mulf %243, %246 : vector<16x128xf32>
    %248 = arith.addf %241, %247 : vector<16x128xf32>
    %c0_106 = arith.constant 0 : index
    %c4480 = arith.constant 4480 : index
    %249 = vector.load %arg2[%c0_106, %c4480] : memref<16x8192xbf16, #tpu.memory_space<vmem>>, vector<16x128xbf16>
    %250 = arith.extf %249 : vector<16x128xbf16> to vector<16x128xf32>
    %c0_107 = arith.constant 0 : index
    %c4480_108 = arith.constant 4480 : index
    %251 = vector.load %arg3[%c0_107, %c4480_108] : memref<1x8192xbf16, #tpu.memory_space<vmem>>, vector<1x128xbf16>
    %252 = arith.extf %251 : vector<1x128xbf16> to vector<1x128xf32>
    %253 = vector.broadcast %252 : vector<1x128xf32> to vector<16x128xf32>
    %254 = arith.mulf %250, %253 : vector<16x128xf32>
    %255 = arith.addf %248, %254 : vector<16x128xf32>
    %c0_109 = arith.constant 0 : index
    %c4608 = arith.constant 4608 : index
    %256 = vector.load %arg2[%c0_109, %c4608] : memref<16x8192xbf16, #tpu.memory_space<vmem>>, vector<16x128xbf16>
    %257 = arith.extf %256 : vector<16x128xbf16> to vector<16x128xf32>
    %c0_110 = arith.constant 0 : index
    %c4608_111 = arith.constant 4608 : index
    %258 = vector.load %arg3[%c0_110, %c4608_111] : memref<1x8192xbf16, #tpu.memory_space<vmem>>, vector<1x128xbf16>
    %259 = arith.extf %258 : vector<1x128xbf16> to vector<1x128xf32>
    %260 = vector.broadcast %259 : vector<1x128xf32> to vector<16x128xf32>
    %261 = arith.mulf %257, %260 : vector<16x128xf32>
    %262 = arith.addf %255, %261 : vector<16x128xf32>
    %c0_112 = arith.constant 0 : index
    %c4736 = arith.constant 4736 : index
    %263 = vector.load %arg2[%c0_112, %c4736] : memref<16x8192xbf16, #tpu.memory_space<vmem>>, vector<16x128xbf16>
    %264 = arith.extf %263 : vector<16x128xbf16> to vector<16x128xf32>
    %c0_113 = arith.constant 0 : index
    %c4736_114 = arith.constant 4736 : index
    %265 = vector.load %arg3[%c0_113, %c4736_114] : memref<1x8192xbf16, #tpu.memory_space<vmem>>, vector<1x128xbf16>
    %266 = arith.extf %265 : vector<1x128xbf16> to vector<1x128xf32>
    %267 = vector.broadcast %266 : vector<1x128xf32> to vector<16x128xf32>
    %268 = arith.mulf %264, %267 : vector<16x128xf32>
    %269 = arith.addf %262, %268 : vector<16x128xf32>
    %c0_115 = arith.constant 0 : index
    %c4864 = arith.constant 4864 : index
    %270 = vector.load %arg2[%c0_115, %c4864] : memref<16x8192xbf16, #tpu.memory_space<vmem>>, vector<16x128xbf16>
    %271 = arith.extf %270 : vector<16x128xbf16> to vector<16x128xf32>
    %c0_116 = arith.constant 0 : index
    %c4864_117 = arith.constant 4864 : index
    %272 = vector.load %arg3[%c0_116, %c4864_117] : memref<1x8192xbf16, #tpu.memory_space<vmem>>, vector<1x128xbf16>
    %273 = arith.extf %272 : vector<1x128xbf16> to vector<1x128xf32>
    %274 = vector.broadcast %273 : vector<1x128xf32> to vector<16x128xf32>
    %275 = arith.mulf %271, %274 : vector<16x128xf32>
    %276 = arith.addf %269, %275 : vector<16x128xf32>
    %c0_118 = arith.constant 0 : index
    %c4992 = arith.constant 4992 : index
    %277 = vector.load %arg2[%c0_118, %c4992] : memref<16x8192xbf16, #tpu.memory_space<vmem>>, vector<16x128xbf16>
    %278 = arith.extf %277 : vector<16x128xbf16> to vector<16x128xf32>
    %c0_119 = arith.constant 0 : index
    %c4992_120 = arith.constant 4992 : index
    %279 = vector.load %arg3[%c0_119, %c4992_120] : memref<1x8192xbf16, #tpu.memory_space<vmem>>, vector<1x128xbf16>
    %280 = arith.extf %279 : vector<1x128xbf16> to vector<1x128xf32>
    %281 = vector.broadcast %280 : vector<1x128xf32> to vector<16x128xf32>
    %282 = arith.mulf %278, %281 : vector<16x128xf32>
    %283 = arith.addf %276, %282 : vector<16x128xf32>
    %c0_121 = arith.constant 0 : index
    %c5120 = arith.constant 5120 : index
    %284 = vector.load %arg2[%c0_121, %c5120] : memref<16x8192xbf16, #tpu.memory_space<vmem>>, vector<16x128xbf16>
    %285 = arith.extf %284 : vector<16x128xbf16> to vector<16x128xf32>
    %c0_122 = arith.constant 0 : index
    %c5120_123 = arith.constant 5120 : index
    %286 = vector.load %arg3[%c0_122, %c5120_123] : memref<1x8192xbf16, #tpu.memory_space<vmem>>, vector<1x128xbf16>
    %287 = arith.extf %286 : vector<1x128xbf16> to vector<1x128xf32>
    %288 = vector.broadcast %287 : vector<1x128xf32> to vector<16x128xf32>
    %289 = arith.mulf %285, %288 : vector<16x128xf32>
    %290 = arith.addf %283, %289 : vector<16x128xf32>
    %c0_124 = arith.constant 0 : index
    %c5248 = arith.constant 5248 : index
    %291 = vector.load %arg2[%c0_124, %c5248] : memref<16x8192xbf16, #tpu.memory_space<vmem>>, vector<16x128xbf16>
    %292 = arith.extf %291 : vector<16x128xbf16> to vector<16x128xf32>
    %c0_125 = arith.constant 0 : index
    %c5248_126 = arith.constant 5248 : index
    %293 = vector.load %arg3[%c0_125, %c5248_126] : memref<1x8192xbf16, #tpu.memory_space<vmem>>, vector<1x128xbf16>
    %294 = arith.extf %293 : vector<1x128xbf16> to vector<1x128xf32>
    %295 = vector.broadcast %294 : vector<1x128xf32> to vector<16x128xf32>
    %296 = arith.mulf %292, %295 : vector<16x128xf32>
    %297 = arith.addf %290, %296 : vector<16x128xf32>
    %c0_127 = arith.constant 0 : index
    %c5376 = arith.constant 5376 : index
    %298 = vector.load %arg2[%c0_127, %c5376] : memref<16x8192xbf16, #tpu.memory_space<vmem>>, vector<16x128xbf16>
    %299 = arith.extf %298 : vector<16x128xbf16> to vector<16x128xf32>
    %c0_128 = arith.constant 0 : index
    %c5376_129 = arith.constant 5376 : index
    %300 = vector.load %arg3[%c0_128, %c5376_129] : memref<1x8192xbf16, #tpu.memory_space<vmem>>, vector<1x128xbf16>
    %301 = arith.extf %300 : vector<1x128xbf16> to vector<1x128xf32>
    %302 = vector.broadcast %301 : vector<1x128xf32> to vector<16x128xf32>
    %303 = arith.mulf %299, %302 : vector<16x128xf32>
    %304 = arith.addf %297, %303 : vector<16x128xf32>
    %c0_130 = arith.constant 0 : index
    %c5504 = arith.constant 5504 : index
    %305 = vector.load %arg2[%c0_130, %c5504] : memref<16x8192xbf16, #tpu.memory_space<vmem>>, vector<16x128xbf16>
    %306 = arith.extf %305 : vector<16x128xbf16> to vector<16x128xf32>
    %c0_131 = arith.constant 0 : index
    %c5504_132 = arith.constant 5504 : index
    %307 = vector.load %arg3[%c0_131, %c5504_132] : memref<1x8192xbf16, #tpu.memory_space<vmem>>, vector<1x128xbf16>
    %308 = arith.extf %307 : vector<1x128xbf16> to vector<1x128xf32>
    %309 = vector.broadcast %308 : vector<1x128xf32> to vector<16x128xf32>
    %310 = arith.mulf %306, %309 : vector<16x128xf32>
    %311 = arith.addf %304, %310 : vector<16x128xf32>
    %c0_133 = arith.constant 0 : index
    %c5632 = arith.constant 5632 : index
    %312 = vector.load %arg2[%c0_133, %c5632] : memref<16x8192xbf16, #tpu.memory_space<vmem>>, vector<16x128xbf16>
    %313 = arith.extf %312 : vector<16x128xbf16> to vector<16x128xf32>
    %c0_134 = arith.constant 0 : index
    %c5632_135 = arith.constant 5632 : index
    %314 = vector.load %arg3[%c0_134, %c5632_135] : memref<1x8192xbf16, #tpu.memory_space<vmem>>, vector<1x128xbf16>
    %315 = arith.extf %314 : vector<1x128xbf16> to vector<1x128xf32>
    %316 = vector.broadcast %315 : vector<1x128xf32> to vector<16x128xf32>
    %317 = arith.mulf %313, %316 : vector<16x128xf32>
    %318 = arith.addf %311, %317 : vector<16x128xf32>
    %c0_136 = arith.constant 0 : index
    %c5760 = arith.constant 5760 : index
    %319 = vector.load %arg2[%c0_136, %c5760] : memref<16x8192xbf16, #tpu.memory_space<vmem>>, vector<16x128xbf16>
    %320 = arith.extf %319 : vector<16x128xbf16> to vector<16x128xf32>
    %c0_137 = arith.constant 0 : index
    %c5760_138 = arith.constant 5760 : index
    %321 = vector.load %arg3[%c0_137, %c5760_138] : memref<1x8192xbf16, #tpu.memory_space<vmem>>, vector<1x128xbf16>
    %322 = arith.extf %321 : vector<1x128xbf16> to vector<1x128xf32>
    %323 = vector.broadcast %322 : vector<1x128xf32> to vector<16x128xf32>
    %324 = arith.mulf %320, %323 : vector<16x128xf32>
    %325 = arith.addf %318, %324 : vector<16x128xf32>
    %c0_139 = arith.constant 0 : index
    %c5888 = arith.constant 5888 : index
    %326 = vector.load %arg2[%c0_139, %c5888] : memref<16x8192xbf16, #tpu.memory_space<vmem>>, vector<16x128xbf16>
    %327 = arith.extf %326 : vector<16x128xbf16> to vector<16x128xf32>
    %c0_140 = arith.constant 0 : index
    %c5888_141 = arith.constant 5888 : index
    %328 = vector.load %arg3[%c0_140, %c5888_141] : memref<1x8192xbf16, #tpu.memory_space<vmem>>, vector<1x128xbf16>
    %329 = arith.extf %328 : vector<1x128xbf16> to vector<1x128xf32>
    %330 = vector.broadcast %329 : vector<1x128xf32> to vector<16x128xf32>
    %331 = arith.mulf %327, %330 : vector<16x128xf32>
    %332 = arith.addf %325, %331 : vector<16x128xf32>
    %c0_142 = arith.constant 0 : index
    %c6016 = arith.constant 6016 : index
    %333 = vector.load %arg2[%c0_142, %c6016] : memref<16x8192xbf16, #tpu.memory_space<vmem>>, vector<16x128xbf16>
    %334 = arith.extf %333 : vector<16x128xbf16> to vector<16x128xf32>
    %c0_143 = arith.constant 0 : index
    %c6016_144 = arith.constant 6016 : index
    %335 = vector.load %arg3[%c0_143, %c6016_144] : memref<1x8192xbf16, #tpu.memory_space<vmem>>, vector<1x128xbf16>
    %336 = arith.extf %335 : vector<1x128xbf16> to vector<1x128xf32>
    %337 = vector.broadcast %336 : vector<1x128xf32> to vector<16x128xf32>
    %338 = arith.mulf %334, %337 : vector<16x128xf32>
    %339 = arith.addf %332, %338 : vector<16x128xf32>
    %c0_145 = arith.constant 0 : index
    %c6144 = arith.constant 6144 : index
    %340 = vector.load %arg2[%c0_145, %c6144] : memref<16x8192xbf16, #tpu.memory_space<vmem>>, vector<16x128xbf16>
    %341 = arith.extf %340 : vector<16x128xbf16> to vector<16x128xf32>
    %c0_146 = arith.constant 0 : index
    %c6144_147 = arith.constant 6144 : index
    %342 = vector.load %arg3[%c0_146, %c6144_147] : memref<1x8192xbf16, #tpu.memory_space<vmem>>, vector<1x128xbf16>
    %343 = arith.extf %342 : vector<1x128xbf16> to vector<1x128xf32>
    %344 = vector.broadcast %343 : vector<1x128xf32> to vector<16x128xf32>
    %345 = arith.mulf %341, %344 : vector<16x128xf32>
    %346 = arith.addf %339, %345 : vector<16x128xf32>
    %c0_148 = arith.constant 0 : index
    %c6272 = arith.constant 6272 : index
    %347 = vector.load %arg2[%c0_148, %c6272] : memref<16x8192xbf16, #tpu.memory_space<vmem>>, vector<16x128xbf16>
    %348 = arith.extf %347 : vector<16x128xbf16> to vector<16x128xf32>
    %c0_149 = arith.constant 0 : index
    %c6272_150 = arith.constant 6272 : index
    %349 = vector.load %arg3[%c0_149, %c6272_150] : memref<1x8192xbf16, #tpu.memory_space<vmem>>, vector<1x128xbf16>
    %350 = arith.extf %349 : vector<1x128xbf16> to vector<1x128xf32>
    %351 = vector.broadcast %350 : vector<1x128xf32> to vector<16x128xf32>
    %352 = arith.mulf %348, %351 : vector<16x128xf32>
    %353 = arith.addf %346, %352 : vector<16x128xf32>
    %c0_151 = arith.constant 0 : index
    %c6400 = arith.constant 6400 : index
    %354 = vector.load %arg2[%c0_151, %c6400] : memref<16x8192xbf16, #tpu.memory_space<vmem>>, vector<16x128xbf16>
    %355 = arith.extf %354 : vector<16x128xbf16> to vector<16x128xf32>
    %c0_152 = arith.constant 0 : index
    %c6400_153 = arith.constant 6400 : index
    %356 = vector.load %arg3[%c0_152, %c6400_153] : memref<1x8192xbf16, #tpu.memory_space<vmem>>, vector<1x128xbf16>
    %357 = arith.extf %356 : vector<1x128xbf16> to vector<1x128xf32>
    %358 = vector.broadcast %357 : vector<1x128xf32> to vector<16x128xf32>
    %359 = arith.mulf %355, %358 : vector<16x128xf32>
    %360 = arith.addf %353, %359 : vector<16x128xf32>
    %c0_154 = arith.constant 0 : index
    %c6528 = arith.constant 6528 : index
    %361 = vector.load %arg2[%c0_154, %c6528] : memref<16x8192xbf16, #tpu.memory_space<vmem>>, vector<16x128xbf16>
    %362 = arith.extf %361 : vector<16x128xbf16> to vector<16x128xf32>
    %c0_155 = arith.constant 0 : index
    %c6528_156 = arith.constant 6528 : index
    %363 = vector.load %arg3[%c0_155, %c6528_156] : memref<1x8192xbf16, #tpu.memory_space<vmem>>, vector<1x128xbf16>
    %364 = arith.extf %363 : vector<1x128xbf16> to vector<1x128xf32>
    %365 = vector.broadcast %364 : vector<1x128xf32> to vector<16x128xf32>
    %366 = arith.mulf %362, %365 : vector<16x128xf32>
    %367 = arith.addf %360, %366 : vector<16x128xf32>
    %c0_157 = arith.constant 0 : index
    %c6656 = arith.constant 6656 : index
    %368 = vector.load %arg2[%c0_157, %c6656] : memref<16x8192xbf16, #tpu.memory_space<vmem>>, vector<16x128xbf16>
    %369 = arith.extf %368 : vector<16x128xbf16> to vector<16x128xf32>
    %c0_158 = arith.constant 0 : index
    %c6656_159 = arith.constant 6656 : index
    %370 = vector.load %arg3[%c0_158, %c6656_159] : memref<1x8192xbf16, #tpu.memory_space<vmem>>, vector<1x128xbf16>
    %371 = arith.extf %370 : vector<1x128xbf16> to vector<1x128xf32>
    %372 = vector.broadcast %371 : vector<1x128xf32> to vector<16x128xf32>
    %373 = arith.mulf %369, %372 : vector<16x128xf32>
    %374 = arith.addf %367, %373 : vector<16x128xf32>
    %c0_160 = arith.constant 0 : index
    %c6784 = arith.constant 6784 : index
    %375 = vector.load %arg2[%c0_160, %c6784] : memref<16x8192xbf16, #tpu.memory_space<vmem>>, vector<16x128xbf16>
    %376 = arith.extf %375 : vector<16x128xbf16> to vector<16x128xf32>
    %c0_161 = arith.constant 0 : index
    %c6784_162 = arith.constant 6784 : index
    %377 = vector.load %arg3[%c0_161, %c6784_162] : memref<1x8192xbf16, #tpu.memory_space<vmem>>, vector<1x128xbf16>
    %378 = arith.extf %377 : vector<1x128xbf16> to vector<1x128xf32>
    %379 = vector.broadcast %378 : vector<1x128xf32> to vector<16x128xf32>
    %380 = arith.mulf %376, %379 : vector<16x128xf32>
    %381 = arith.addf %374, %380 : vector<16x128xf32>
    %c0_163 = arith.constant 0 : index
    %c6912 = arith.constant 6912 : index
    %382 = vector.load %arg2[%c0_163, %c6912] : memref<16x8192xbf16, #tpu.memory_space<vmem>>, vector<16x128xbf16>
    %383 = arith.extf %382 : vector<16x128xbf16> to vector<16x128xf32>
    %c0_164 = arith.constant 0 : index
    %c6912_165 = arith.constant 6912 : index
    %384 = vector.load %arg3[%c0_164, %c6912_165] : memref<1x8192xbf16, #tpu.memory_space<vmem>>, vector<1x128xbf16>
    %385 = arith.extf %384 : vector<1x128xbf16> to vector<1x128xf32>
    %386 = vector.broadcast %385 : vector<1x128xf32> to vector<16x128xf32>
    %387 = arith.mulf %383, %386 : vector<16x128xf32>
    %388 = arith.addf %381, %387 : vector<16x128xf32>
    %c0_166 = arith.constant 0 : index
    %c7040 = arith.constant 7040 : index
    %389 = vector.load %arg2[%c0_166, %c7040] : memref<16x8192xbf16, #tpu.memory_space<vmem>>, vector<16x128xbf16>
    %390 = arith.extf %389 : vector<16x128xbf16> to vector<16x128xf32>
    %c0_167 = arith.constant 0 : index
    %c7040_168 = arith.constant 7040 : index
    %391 = vector.load %arg3[%c0_167, %c7040_168] : memref<1x8192xbf16, #tpu.memory_space<vmem>>, vector<1x128xbf16>
    %392 = arith.extf %391 : vector<1x128xbf16> to vector<1x128xf32>
    %393 = vector.broadcast %392 : vector<1x128xf32> to vector<16x128xf32>
    %394 = arith.mulf %390, %393 : vector<16x128xf32>
    %395 = arith.addf %388, %394 : vector<16x128xf32>
    %c0_169 = arith.constant 0 : index
    %c7168 = arith.constant 7168 : index
    %396 = vector.load %arg2[%c0_169, %c7168] : memref<16x8192xbf16, #tpu.memory_space<vmem>>, vector<16x128xbf16>
    %397 = arith.extf %396 : vector<16x128xbf16> to vector<16x128xf32>
    %c0_170 = arith.constant 0 : index
    %c7168_171 = arith.constant 7168 : index
    %398 = vector.load %arg3[%c0_170, %c7168_171] : memref<1x8192xbf16, #tpu.memory_space<vmem>>, vector<1x128xbf16>
    %399 = arith.extf %398 : vector<1x128xbf16> to vector<1x128xf32>
    %400 = vector.broadcast %399 : vector<1x128xf32> to vector<16x128xf32>
    %401 = arith.mulf %397, %400 : vector<16x128xf32>
    %402 = arith.addf %395, %401 : vector<16x128xf32>
    %c0_172 = arith.constant 0 : index
    %c7296 = arith.constant 7296 : index
    %403 = vector.load %arg2[%c0_172, %c7296] : memref<16x8192xbf16, #tpu.memory_space<vmem>>, vector<16x128xbf16>
    %404 = arith.extf %403 : vector<16x128xbf16> to vector<16x128xf32>
    %c0_173 = arith.constant 0 : index
    %c7296_174 = arith.constant 7296 : index
    %405 = vector.load %arg3[%c0_173, %c7296_174] : memref<1x8192xbf16, #tpu.memory_space<vmem>>, vector<1x128xbf16>
    %406 = arith.extf %405 : vector<1x128xbf16> to vector<1x128xf32>
    %407 = vector.broadcast %406 : vector<1x128xf32> to vector<16x128xf32>
    %408 = arith.mulf %404, %407 : vector<16x128xf32>
    %409 = arith.addf %402, %408 : vector<16x128xf32>
    %c0_175 = arith.constant 0 : index
    %c7424 = arith.constant 7424 : index
    %410 = vector.load %arg2[%c0_175, %c7424] : memref<16x8192xbf16, #tpu.memory_space<vmem>>, vector<16x128xbf16>
    %411 = arith.extf %410 : vector<16x128xbf16> to vector<16x128xf32>
    %c0_176 = arith.constant 0 : index
    %c7424_177 = arith.constant 7424 : index
    %412 = vector.load %arg3[%c0_176, %c7424_177] : memref<1x8192xbf16, #tpu.memory_space<vmem>>, vector<1x128xbf16>
    %413 = arith.extf %412 : vector<1x128xbf16> to vector<1x128xf32>
    %414 = vector.broadcast %413 : vector<1x128xf32> to vector<16x128xf32>
    %415 = arith.mulf %411, %414 : vector<16x128xf32>
    %416 = arith.addf %409, %415 : vector<16x128xf32>
    %c0_178 = arith.constant 0 : index
    %c7552 = arith.constant 7552 : index
    %417 = vector.load %arg2[%c0_178, %c7552] : memref<16x8192xbf16, #tpu.memory_space<vmem>>, vector<16x128xbf16>
    %418 = arith.extf %417 : vector<16x128xbf16> to vector<16x128xf32>
    %c0_179 = arith.constant 0 : index
    %c7552_180 = arith.constant 7552 : index
    %419 = vector.load %arg3[%c0_179, %c7552_180] : memref<1x8192xbf16, #tpu.memory_space<vmem>>, vector<1x128xbf16>
    %420 = arith.extf %419 : vector<1x128xbf16> to vector<1x128xf32>
    %421 = vector.broadcast %420 : vector<1x128xf32> to vector<16x128xf32>
    %422 = arith.mulf %418, %421 : vector<16x128xf32>
    %423 = arith.addf %416, %422 : vector<16x128xf32>
    %c0_181 = arith.constant 0 : index
    %c7680 = arith.constant 7680 : index
    %424 = vector.load %arg2[%c0_181, %c7680] : memref<16x8192xbf16, #tpu.memory_space<vmem>>, vector<16x128xbf16>
    %425 = arith.extf %424 : vector<16x128xbf16> to vector<16x128xf32>
    %c0_182 = arith.constant 0 : index
    %c7680_183 = arith.constant 7680 : index
    %426 = vector.load %arg3[%c0_182, %c7680_183] : memref<1x8192xbf16, #tpu.memory_space<vmem>>, vector<1x128xbf16>
    %427 = arith.extf %426 : vector<1x128xbf16> to vector<1x128xf32>
    %428 = vector.broadcast %427 : vector<1x128xf32> to vector<16x128xf32>
    %429 = arith.mulf %425, %428 : vector<16x128xf32>
    %430 = arith.addf %423, %429 : vector<16x128xf32>
    %c0_184 = arith.constant 0 : index
    %c7808 = arith.constant 7808 : index
    %431 = vector.load %arg2[%c0_184, %c7808] : memref<16x8192xbf16, #tpu.memory_space<vmem>>, vector<16x128xbf16>
    %432 = arith.extf %431 : vector<16x128xbf16> to vector<16x128xf32>
    %c0_185 = arith.constant 0 : index
    %c7808_186 = arith.constant 7808 : index
    %433 = vector.load %arg3[%c0_185, %c7808_186] : memref<1x8192xbf16, #tpu.memory_space<vmem>>, vector<1x128xbf16>
    %434 = arith.extf %433 : vector<1x128xbf16> to vector<1x128xf32>
    %435 = vector.broadcast %434 : vector<1x128xf32> to vector<16x128xf32>
    %436 = arith.mulf %432, %435 : vector<16x128xf32>
    %437 = arith.addf %430, %436 : vector<16x128xf32>
    %c0_187 = arith.constant 0 : index
    %c7936 = arith.constant 7936 : index
    %438 = vector.load %arg2[%c0_187, %c7936] : memref<16x8192xbf16, #tpu.memory_space<vmem>>, vector<16x128xbf16>
    %439 = arith.extf %438 : vector<16x128xbf16> to vector<16x128xf32>
    %c0_188 = arith.constant 0 : index
    %c7936_189 = arith.constant 7936 : index
    %440 = vector.load %arg3[%c0_188, %c7936_189] : memref<1x8192xbf16, #tpu.memory_space<vmem>>, vector<1x128xbf16>
    %441 = arith.extf %440 : vector<1x128xbf16> to vector<1x128xf32>
    %442 = vector.broadcast %441 : vector<1x128xf32> to vector<16x128xf32>
    %443 = arith.mulf %439, %442 : vector<16x128xf32>
    %444 = arith.addf %437, %443 : vector<16x128xf32>
    %c0_190 = arith.constant 0 : index
    %c8064 = arith.constant 8064 : index
    %445 = vector.load %arg2[%c0_190, %c8064] : memref<16x8192xbf16, #tpu.memory_space<vmem>>, vector<16x128xbf16>
    %446 = arith.extf %445 : vector<16x128xbf16> to vector<16x128xf32>
    %c0_191 = arith.constant 0 : index
    %c8064_192 = arith.constant 8064 : index
    %447 = vector.load %arg3[%c0_191, %c8064_192] : memref<1x8192xbf16, #tpu.memory_space<vmem>>, vector<1x128xbf16>
    %448 = arith.extf %447 : vector<1x128xbf16> to vector<1x128xf32>
    %449 = vector.broadcast %448 : vector<1x128xf32> to vector<16x128xf32>
    %450 = arith.mulf %446, %449 : vector<16x128xf32>
    %451 = arith.addf %444, %450 : vector<16x128xf32>
    %c0_193 = arith.constant 0 : index
    %c0_194 = arith.constant 0 : index
    %452 = vector.load %arg6[%c0_193, %c0_194] : memref<16x128xf32, #tpu.memory_space<vmem>>, vector<16x128xf32>
    %453 = arith.addf %452, %451 : vector<16x128xf32>
    %c0_195 = arith.constant 0 : index
    %c0_196 = arith.constant 0 : index
    %454 = vector.load %arg6[%c0_195, %c0_196] : memref<16x128xf32, #tpu.memory_space<vmem>>, vector<16x128xf32>
    tpu.vector_store %arg6[%c0_195, %c0_196], %453 {strides = array<i32>} : memref<16x128xf32, #tpu.memory_space<vmem>>, vector<16x128xf32>,
    %c0_i32_197 = arith.constant 0 : i32
    %455 = arith.cmpi eq, %arg1, %c0_i32_197 : i32
    %456 = arith.extui %455 : i1 to i32
    %c0_i32_198 = arith.constant 0 : i32
    %457 = arith.cmpi ne, %456, %c0_i32_198 : i32
    scf.if %457 {
      %c0_199 = arith.constant 0 : index
      %c0_200 = arith.constant 0 : index
      %458 = vector.load %arg6[%c0_199, %c0_200] : memref<16x128xf32, #tpu.memory_space<vmem>>, vector<16x128xf32>
      %cst_201 = arith.constant dense<0.000000e+00> : vector<16xf32>
      %459 = vector.multi_reduction <add>, %458, %cst_201 [1] : vector<16x128xf32> to vector<16xf32>
      %460 = vector.shape_cast %459 : vector<16xf32> to vector<16x1xf32>
      %c0_202 = arith.constant 0 : index
      %c0_203 = arith.constant 0 : index
      %461 = vector.load %arg4[%c0_202, %c0_203] : memref<1x1xf32, #tpu.memory_space<vmem>>, vector<1x1xf32>
      %462 = vector.broadcast %461 : vector<1x1xf32> to vector<16x1xf32>
      %463 = arith.addf %460, %462 : vector<16x1xf32>
      %464 = vector.shape_cast %463 : vector<16x1xf32> to vector<16x1xf32>
      %465 = vector.broadcast %464 : vector<16x1xf32> to vector<16x128xf32>
      %c0_204 = arith.constant 0 : index
      %c0_205 = arith.constant 0 : index
      %466 = vector.load %arg5[%c0_204, %c0_205] : memref<16x128xf32, #tpu.memory_space<vmem>>, vector<16x128xf32>
      tpu.vector_store %arg5[%c0_204, %c0_205], %465 {strides = array<i32>} : memref<16x128xf32, #tpu.memory_space<vmem>>, vector<16x128xf32>,
    } else {
    }
    return
  }
  func.func @transform_0(%arg0: i32, %arg1: i32) -> (i32, i32) {
    %c0_i32 = arith.constant 0 : i32
    return %arg0, %arg1 : i32, i32
  }
  func.func @transform_1(%arg0: i32, %arg1: i32) -> (i32, i32) {
    %c0_i32 = arith.constant 0 : i32
    %c0_i32_0 = arith.constant 0 : i32
    return %c0_i32, %arg1 : i32, i32
  }
  func.func @transform_2(%arg0: i32, %arg1: i32) -> (i32, i32) {
    %c0_i32 = arith.constant 0 : i32
    %c0_i32_0 = arith.constant 0 : i32
    %c0_i32_1 = arith.constant 0 : i32
    return %c0_i32, %c0_i32_0 : i32, i32
  }
  func.func @transform_3(%arg0: i32, %arg1: i32) -> (i32, i32) {
    %c0_i32 = arith.constant 0 : i32
    %c0_i32_0 = arith.constant 0 : i32
    return %arg0, %c0_i32 : i32, i32
  }
}

</mosaic_0001>

<bundles_post_ra>
// kernel: discriminator_forward.5
= control target key start
LH: loop header
LB: loop body
LE: loop exit
PB: predicated region body
PF: predicated region fallthrough
CT: control target
= control target key end

     0   :  { %s997_s12 = smov 0   ;;  %s999_s13 = smov 0   ;;  %s1137_s0 = inlined_call_operand.vmem [shape: bf16[512,128], index: 0, kind: input, shape index: {}]   ;;  %s1138_s1 = inlined_call_operand.vmem [shape: bf16[128,128], index: 1, kind: input, shape index: {}]   ;;  %s1139_s2 = inlined_call_operand.vmem [shape: f32[1,128], index: 2, kind: input, shape index: {}]   ;;  %s1140_s3 = inlined_call_operand.vmem [shape: bf16[512,128], index: 3, kind: output, shape index: {}]  }
   0x1   :  { %s1001_s14 = smov 0  }
   0x2 LB: > { %s22_s15 = sadd.s32 1, %s971_s13  ;;  %p682_p0 = scmp.ge.s32.totalorder %s975_s14, 1  ;;  %s975_s14 = sphi %s1001_s14, %s13_s14   ;;  %s971_s13 = sphi %s999_s13, %s1142_s13   ;;  %s967_s12 = sphi %s997_s12, %s1141_s12  }
   0x3   : > { %p23_p1 = scmp.ge.s32.totalorder %s22_s15, 2  ;;  %p169_p2 = scmp.lt.s32.totalorder %s975_s14, 3 }
   0x5   : > { %s1144_s15 = smov (%p23_p1, %s22_s15), 0  ;;  %p170_p3 = pnand %p682_p0, %p169_p2 }
   0x6   : > { %s683_s24 = sshll.u32 (!%p170_p3), %s967_s12, 5 }
   0x7   : > { %173 = sbr.rel (%p170_p3) target bundleno = 239 (0xef), region = 32  ;;  %p204_p4 = scmp.lt.s32.totalorder (!%p170_p3), %s683_s24, 63 }
   0xc   : > { %v808_v0 = vld [vmem:[%s1138_s1 + $0x38] sm:$0xff]  ;;  %v807_v1 = vld [vmem:[%s1138_s1 + $0x30] sm:$0xff]  ;;  %v806_v2 = vld [vmem:[%s1138_s1 + $0x28] sm:$0xff]  ;;  %s1146_s24 = smov (!%p204_p4, %s683_s24), 63 }
   0xd   : > { %421 = vmatpush.bf16.msra.mxu0 %v808_v0  ;;  %904 = vmatpush.bf16.msra.mxu1 %v808_v0  ;;  %v805_v3 = vld [vmem:[%s1138_s1 + $0x20] sm:$0xff]  ;;  %v804_v4 = vld [vmem:[%s1138_s1 + $0x18] sm:$0xff]  ;;  %v803_v5 = vld [vmem:[%s1138_s1 + $0x10] sm:$0xff]  ;;  %s684_s4 = sshll.u32 %s1146_s24, 2 }
   0xe   : > { %905 = vmatpush.bf16.msra.mxu2 %v808_v0  ;;  %906 = vmatpush.bf16.msra.mxu3 %v808_v0  ;;  %v802_v6 = vld [vmem:[%s1138_s1 + $0x8] sm:$0xff]  ;;  %v801_v7 = vld [vmem:[%s1138_s1] sm:$0xff]  ;;  %s1050_s9 = scalar_lea.vmem %s1137_s0, %s684_s4  ;;  %s1082_s17 = scalar_lea.vmem %s1140_s3, %s684_s4 }
   0xf   : > { %v785_v8 = vld [vmem:[%s1050_s9] sm:$0xff]  ;;  %v786_v12 = vld [vmem:[%s1050_s9 + $0x8] sm:$0xff]  ;;  %v787_v16 = vld [vmem:[%s1050_s9 + $0x10] sm:$0xff] }
  0x10   : > { %v789_v9 = vld [vmem:[%s1050_s9 + $0x20] sm:$0xff]  ;;  %v790_v13 = vld [vmem:[%s1050_s9 + $0x28] sm:$0xff]  ;;  %v791_v17 = vld [vmem:[%s1050_s9 + $0x30] sm:$0xff] }
  0x11   : > { %422 = vmatpush.bf16.msra.mxu0 %v807_v1  ;;  %907 = vmatpush.bf16.msra.mxu1 %v807_v1  ;;  %v793_v10 = vld [vmem:[%s1050_s9 + $0x40] sm:$0xff]  ;;  %v794_v14 = vld [vmem:[%s1050_s9 + $0x48] sm:$0xff]  ;;  %v795_v18 = vld [vmem:[%s1050_s9 + $0x50] sm:$0xff] }
  0x12   : > { %908 = vmatpush.bf16.msra.mxu2 %v807_v1  ;;  %909 = vmatpush.bf16.msra.mxu3 %v807_v1  ;;  %v797_v11 = vld [vmem:[%s1050_s9 + $0x60] sm:$0xff]  ;;  %v798_v15 = vld [vmem:[%s1050_s9 + $0x68] sm:$0xff]  ;;  %v799_v19 = vld [vmem:[%s1050_s9 + $0x70] sm:$0xff] }
  0x13   : > { %v788_v20 = vld [vmem:[%s1050_s9 + $0x18] sm:$0xff]  ;;  %v1071_v26 = vld [vmem:[%s1139_s2] ss:$0 sm:$0xff] }
  0x14   : > { %v792_v21 = vld [vmem:[%s1050_s9 + $0x38] sm:$0xff] }
  0x15   : > { %423 = vmatpush.bf16.msra.mxu0 %v806_v2  ;;  %910 = vmatpush.bf16.msra.mxu1 %v806_v2  ;;  %v796_v22 = vld [vmem:[%s1050_s9 + $0x58] sm:$0xff] }
  0x16   : > { %911 = vmatpush.bf16.msra.mxu2 %v806_v2  ;;  %912 = vmatpush.bf16.msra.mxu3 %v806_v2  ;;  %v800_v23 = vld [vmem:[%s1050_s9 + $0x78] sm:$0xff] }
  0x19   : > { %424 = vmatpush.bf16.msra.mxu0 %v805_v3  ;;  %913 = vmatpush.bf16.msra.mxu1 %v805_v3 }
  0x1a   : > { %914 = vmatpush.bf16.msra.mxu2 %v805_v3  ;;  %915 = vmatpush.bf16.msra.mxu3 %v805_v3 }
  0x1d   : > { %425 = vmatpush.bf16.msra.mxu0 %v804_v4  ;;  %916 = vmatpush.bf16.msra.mxu1 %v804_v4 }
  0x1e   : > { %917 = vmatpush.bf16.msra.mxu2 %v804_v4  ;;  %918 = vmatpush.bf16.msra.mxu3 %v804_v4 }
  0x21   : > { %426 = vmatpush.bf16.msra.mxu0 %v803_v5  ;;  %919 = vmatpush.bf16.msra.mxu1 %v803_v5 }
  0x22   : > { %920 = vmatpush.bf16.msra.mxu2 %v803_v5  ;;  %921 = vmatpush.bf16.msra.mxu3 %v803_v5 }
  0x25   : > { %427 = vmatpush.bf16.msra.mxu0 %v802_v6  ;;  %922 = vmatpush.bf16.msra.mxu1 %v802_v6 }
  0x26   : > { %923 = vmatpush.bf16.msra.mxu2 %v802_v6  ;;  %924 = vmatpush.bf16.msra.mxu3 %v802_v6 }
  0x29   : > { %428 = vmatpush.bf16.msra.mxu0 %v801_v7  ;;  %925 = vmatpush.bf16.msra.mxu1 %v801_v7 }
  0x2a   : > { %926 = vmatpush.bf16.msra.mxu2 %v801_v7  ;;  %927 = vmatpush.bf16.msra.mxu3 %v801_v7 }
  0x2c   : > { %429 = vmatmul.bf16.vlgmr.msra.gmra.mxu0 %v785_v8  ;;  %449 = vmatmul.bf16.vlgmr.msra.gmra.mxu1 %v789_v9 }
  0x2d   : > { %469 = vmatmul.bf16.vlgmr.msra.gmra.mxu2 %v793_v10  ;;  %489 = vmatmul.bf16.vlgmr.msra.gmra.mxu3 %v797_v11 }
  0x3c   : > { %434 = vmatmul.bf16.gmra.mxu0 %v786_v12  ;;  %454 = vmatmul.bf16.gmra.mxu1 %v790_v13 }
  0x3d   : > { %474 = vmatmul.bf16.gmra.mxu2 %v794_v14  ;;  %494 = vmatmul.bf16.gmra.mxu3 %v798_v15 }
  0x4c   : > { %439 = vmatmul.bf16.gmra.mxu0 %v787_v16  ;;  %459 = vmatmul.bf16.gmra.mxu1 %v791_v17 }
  0x4d   : > { %479 = vmatmul.bf16.gmra.mxu2 %v795_v18  ;;  %499 = vmatmul.bf16.gmra.mxu3 %v799_v19 }
  0x5c   : > { %444 = vmatmul.bf16.gmra.mxu0 %v788_v20  ;;  %464 = vmatmul.bf16.gmra.mxu1 %v792_v21 }
  0x5d   : > { %484 = vmatmul.bf16.gmra.mxu2 %v796_v22  ;;  %504 = vmatmul.bf16.gmra.mxu3 %v800_v23 }
  0xa9   : > { %v430_v24 = vpop.f32.mrf.mxu0  ;;  %v450_v25 = vpop.f32.mrf.mxu1 }
  0xaa   : > { %v431_v31 = vadd.f32 %v1071_v26, %v430_v24  ;;  %v451_v32 = vadd.f32 %v1071_v26, %v450_v25 }
  0xb0   : > { %v470_v27 = vpop.f32.mrf.mxu2  ;;  %v490_v28 = vpop.f32.mrf.mxu3 }
  0xb1   : > { %v432_v29 = vpop.f32.mrf.mxu0  ;;  %v452_v30 = vpop.f32.mrf.mxu1  ;;  %v471_v39 = vadd.f32 %v1071_v26, %v470_v27  ;;  %v491_v40 = vadd.f32 %v1071_v26, %v490_v28 }
  0xb2   : > { %v433_v33 = vadd.f32 %v1071_v26, %v432_v29  ;;  %v453_v34 = vadd.f32 %v1071_v26, %v452_v30 }
  0xb4   : > { %v812_v35 = vpack.c.bf16 %v433_v33, %v431_v31  ;;  %v832_v36 = vpack.c.bf16 %v453_v34, %v451_v32 }
  0xb6   : > { %813 = vst [vmem:[%s1082_s17] sm:$0xff] %v812_v35  }
  0xb7   : > { %892 = vst [vmem:[%s1082_s17 + $0x20] sm:$0xff] %v832_v36  }
  0xb8   : > { %v472_v37 = vpop.f32.mrf.mxu2  ;;  %v492_v38 = vpop.f32.mrf.mxu3 }
  0xb9   : > { %v473_v41 = vadd.f32 %v1071_v26, %v472_v37  ;;  %v493_v42 = vadd.f32 %v1071_v26, %v492_v38  ;;  %v435_v43 = vpop.f32.mrf.mxu0  ;;  %v455_v44 = vpop.f32.mrf.mxu1 }
  0xba   : > { %v436_v51 = vadd.f32 %v1071_v26, %v435_v43  ;;  %v456_v52 = vadd.f32 %v1071_v26, %v455_v44 }
  0xbb   : > { %v852_v45 = vpack.c.bf16 %v473_v41, %v471_v39  ;;  %v872_v46 = vpack.c.bf16 %v493_v42, %v491_v40 }
  0xbd   : > { %896 = vst [vmem:[%s1082_s17 + $0x40] sm:$0xff] %v852_v45  }
  0xbe   : > { %900 = vst [vmem:[%s1082_s17 + $0x60] sm:$0xff] %v872_v46  }
  0xc0   : > { %v475_v47 = vpop.f32.mrf.mxu2  ;;  %v495_v48 = vpop.f32.mrf.mxu3 }
  0xc1   : > { %v437_v49 = vpop.f32.mrf.mxu0  ;;  %v457_v50 = vpop.f32.mrf.mxu1  ;;  %v476_v59 = vadd.f32 %v1071_v26, %v475_v47  ;;  %v496_v60 = vadd.f32 %v1071_v26, %v495_v48 }
  0xc2   : > { %v438_v53 = vadd.f32 %v1071_v26, %v437_v49  ;;  %v458_v54 = vadd.f32 %v1071_v26, %v457_v50 }
  0xc4   : > { %v817_v55 = vpack.c.bf16 %v438_v53, %v436_v51  ;;  %v837_v56 = vpack.c.bf16 %v458_v54, %v456_v52 }
  0xc6   : > { %889 = vst [vmem:[%s1082_s17 + $0x8] sm:$0xff] %v817_v55  }
  0xc7   : > { %893 = vst [vmem:[%s1082_s17 + $0x28] sm:$0xff] %v837_v56  }
  0xc8   : > { %v477_v57 = vpop.f32.mrf.mxu2  ;;  %v497_v58 = vpop.f32.mrf.mxu3 }
  0xc9   : > { %v478_v61 = vadd.f32 %v1071_v26, %v477_v57  ;;  %v498_v62 = vadd.f32 %v1071_v26, %v497_v58  ;;  %v440_v63 = vpop.f32.mrf.mxu0  ;;  %v460_v0 = vpop.f32.mrf.mxu1 }
  0xca   : > { %v441_v7 = vadd.f32 %v1071_v26, %v440_v63  ;;  %v461_v8 = vadd.f32 %v1071_v26, %v460_v0 }
  0xcb   : > { %v857_v1 = vpack.c.bf16 %v478_v61, %v476_v59  ;;  %v877_v2 = vpack.c.bf16 %v498_v62, %v496_v60 }
  0xcd   : > { %897 = vst [vmem:[%s1082_s17 + $0x48] sm:$0xff] %v857_v1  }
  0xce   : > { %901 = vst [vmem:[%s1082_s17 + $0x68] sm:$0xff] %v877_v2  }
  0xd0   : > { %v480_v3 = vpop.f32.mrf.mxu2  ;;  %v500_v4 = vpop.f32.mrf.mxu3 }
  0xd1   : > { %v442_v5 = vpop.f32.mrf.mxu0  ;;  %v462_v6 = vpop.f32.mrf.mxu1  ;;  %v481_v15 = vadd.f32 %v1071_v26, %v480_v3  ;;  %v501_v16 = vadd.f32 %v1071_v26, %v500_v4 }
  0xd2   : > { %v443_v9 = vadd.f32 %v1071_v26, %v442_v5  ;;  %v463_v10 = vadd.f32 %v1071_v26, %v462_v6 }
  0xd4   : > { %v822_v11 = vpack.c.bf16 %v443_v9, %v441_v7  ;;  %v842_v12 = vpack.c.bf16 %v463_v10, %v461_v8 }
  0xd6   : > { %890 = vst [vmem:[%s1082_s17 + $0x10] sm:$0xff] %v822_v11  }
  0xd7   : > { %894 = vst [vmem:[%s1082_s17 + $0x30] sm:$0xff] %v842_v12  }
  0xd8   : > { %v482_v13 = vpop.f32.mrf.mxu2  ;;  %v502_v14 = vpop.f32.mrf.mxu3 }
  0xd9   : > { %v483_v17 = vadd.f32 %v1071_v26, %v482_v13  ;;  %v503_v18 = vadd.f32 %v1071_v26, %v502_v14  ;;  %v445_v19 = vpop.f32.mrf.mxu0  ;;  %v465_v20 = vpop.f32.mrf.mxu1 }
  0xda   : > { %v446_v28 = vadd.f32 %v1071_v26, %v445_v19  ;;  %v466_v29 = vadd.f32 %v1071_v26, %v465_v20 }
  0xdb   : > { %v862_v21 = vpack.c.bf16 %v483_v17, %v481_v15  ;;  %v882_v22 = vpack.c.bf16 %v503_v18, %v501_v16 }
  0xdd   : > { %898 = vst [vmem:[%s1082_s17 + $0x50] sm:$0xff] %v862_v21  }
  0xde   : > { %902 = vst [vmem:[%s1082_s17 + $0x70] sm:$0xff] %v882_v22  }
  0xe0   : > { %v485_v23 = vpop.f32.mrf.mxu2  ;;  %v505_v24 = vpop.f32.mrf.mxu3 }
  0xe1   : > { %v447_v25 = vpop.f32.mrf.mxu0  ;;  %v467_v27 = vpop.f32.mrf.mxu1  ;;  %v486_v36 = vadd.f32 %v1071_v26, %v485_v23  ;;  %v506_v37 = vadd.f32 %v1071_v26, %v505_v24 }
  0xe2   : > { %v448_v30 = vadd.f32 %v1071_v26, %v447_v25  ;;  %v468_v31 = vadd.f32 %v1071_v26, %v467_v27 }
  0xe4   : > { %v827_v32 = vpack.c.bf16 %v448_v30, %v446_v28  ;;  %v847_v33 = vpack.c.bf16 %v468_v31, %v466_v29 }
  0xe6   : > { %891 = vst [vmem:[%s1082_s17 + $0x18] sm:$0xff] %v827_v32  }
  0xe7   : > { %895 = vst [vmem:[%s1082_s17 + $0x38] sm:$0xff] %v847_v33  }
  0xe8   : > { %v487_v34 = vpop.f32.mrf.mxu2  ;;  %v507_v35 = vpop.f32.mrf.mxu3 }
  0xe9   : > { %v488_v38 = vadd.f32 %v1071_v26, %v487_v34  ;;  %v508_v39 = vadd.f32 %v1071_v26, %v507_v35 }
  0xeb   : > { %v867_v40 = vpack.c.bf16 %v488_v38, %v486_v36  ;;  %v887_v41 = vpack.c.bf16 %v508_v39, %v506_v37 }
  0xed   : > { %899 = vst [vmem:[%s1082_s17 + $0x58] sm:$0xff] %v867_v40  }
  0xee   : > { %903 = vst [vmem:[%s1082_s17 + $0x78] sm:$0xff] %v887_v41  }
  0xef PF: > { %s13_s14 = sadd.s32 1, %s975_s14   ;;  %s1141_s12 = smov %s971_s13 }
  0xf0   : > { %p10_p5 = scmp.ge.s32.totalorder %s13_s14, 4   ;;  %s1142_s13 = smov %s1144_s15 }
  0xf2   :  { %12 = sbr.rel (!%p10_p5) target bundleno = 2 (0x2), region = 68 }

// kernel: discriminator_forward.6
= control target key start
LH: loop header
LB: loop body
LE: loop exit
PB: predicated region body
PF: predicated region fallthrough
CT: control target
= control target key end

     0   :  { %s2719_s1 = inlined_call_operand.vmem [shape: bf16[1024,128], index: 1, kind: input, shape index: {}]   ;;  %s2720_s2 = inlined_call_operand.vmem [shape: f32[1,128], index: 2, kind: input, shape index: {}]   ;;  %s2721_s0 = inlined_call_operand.vmem [shape: bf16[128,1024], index: 0, kind: input, shape index: {}]   ;;  %s2722_s3 = inlined_call_operand.vmem [shape: bf16[128,128], index: 3, kind: output, shape index: {}]  }
   0x1   :  { %v1925_v0 = vld [vmem:[%s2719_s1 + $0x38] sm:$0xff]  ;;  %v1924_v4 = vld [vmem:[%s2719_s1 + $0x30] sm:$0xff]  ;;  %v1923_v8 = vld [vmem:[%s2719_s1 + $0x28] sm:$0xff] }
   0x2   :  { %v1933_v1 = vld [vmem:[%s2719_s1 + $0x78] sm:$0xff]  ;;  %914 = vmatpush.bf16.msra.mxu0 %v1925_v0  ;;  %v1932_v5 = vld [vmem:[%s2719_s1 + $0x70] sm:$0xff]  ;;  %v1931_v9 = vld [vmem:[%s2719_s1 + $0x68] sm:$0xff] }
   0x3   :  { %v1941_v2 = vld [vmem:[%s2719_s1 + $0xb8] sm:$0xff]  ;;  %963 = vmatpush.bf16.msra.mxu1 %v1933_v1  ;;  %v1940_v6 = vld [vmem:[%s2719_s1 + $0xb0] sm:$0xff]  ;;  %v1939_v10 = vld [vmem:[%s2719_s1 + $0xa8] sm:$0xff] }
   0x4   :  { %v1949_v3 = vld [vmem:[%s2719_s1 + $0xf8] sm:$0xff]  ;;  %1012 = vmatpush.bf16.msra.mxu2 %v1941_v2  ;;  %v1948_v7 = vld [vmem:[%s2719_s1 + $0xf0] sm:$0xff]  ;;  %v1947_v11 = vld [vmem:[%s2719_s1 + $0xe8] sm:$0xff] }
   0x5   :  { %1061 = vmatpush.bf16.msra.mxu3 %v1949_v3  ;;  %v1922_v12 = vld [vmem:[%s2719_s1 + $0x20] sm:$0xff]  ;;  %v1921_v16 = vld [vmem:[%s2719_s1 + $0x18] sm:$0xff]  ;;  %v1920_v20 = vld [vmem:[%s2719_s1 + $0x10] sm:$0xff] }
   0x6   :  { %915 = vmatpush.bf16.msra.mxu0 %v1924_v4  ;;  %v1930_v13 = vld [vmem:[%s2719_s1 + $0x60] sm:$0xff]  ;;  %v1929_v17 = vld [vmem:[%s2719_s1 + $0x58] sm:$0xff]  ;;  %v1928_v21 = vld [vmem:[%s2719_s1 + $0x50] sm:$0xff] }
   0x7   :  { %964 = vmatpush.bf16.msra.mxu1 %v1932_v5  ;;  %v1938_v14 = vld [vmem:[%s2719_s1 + $0xa0] sm:$0xff]  ;;  %v1937_v18 = vld [vmem:[%s2719_s1 + $0x98] sm:$0xff]  ;;  %v1936_v22 = vld [vmem:[%s2719_s1 + $0x90] sm:$0xff] }
   0x8   :  { %1013 = vmatpush.bf16.msra.mxu2 %v1940_v6  ;;  %v1946_v15 = vld [vmem:[%s2719_s1 + $0xe0] sm:$0xff]  ;;  %v1945_v19 = vld [vmem:[%s2719_s1 + $0xd8] sm:$0xff]  ;;  %v1944_v23 = vld [vmem:[%s2719_s1 + $0xd0] sm:$0xff] }
   0x9   :  { %1062 = vmatpush.bf16.msra.mxu3 %v1948_v7  ;;  %v1919_v24 = vld [vmem:[%s2719_s1 + $0x8] sm:$0xff]  ;;  %v1918_v28 = vld [vmem:[%s2719_s1] sm:$0xff]  ;;  %v1973_v40 = vld [vmem:[%s2719_s1 + $0x1b8] sm:$0xff] }
   0xa   :  { %916 = vmatpush.bf16.msra.mxu0 %v1923_v8  ;;  %v1927_v25 = vld [vmem:[%s2719_s1 + $0x48] sm:$0xff]  ;;  %v1926_v29 = vld [vmem:[%s2719_s1 + $0x40] sm:$0xff]  ;;  %v1957_v41 = vld [vmem:[%s2719_s1 + $0x138] sm:$0xff] }
   0xb   :  { %965 = vmatpush.bf16.msra.mxu1 %v1931_v9  ;;  %v1935_v26 = vld [vmem:[%s2719_s1 + $0x88] sm:$0xff]  ;;  %v1934_v30 = vld [vmem:[%s2719_s1 + $0x80] sm:$0xff]  ;;  %v1981_v46 = vld [vmem:[%s2719_s1 + $0x1f8] sm:$0xff] }
   0xc   :  { %1014 = vmatpush.bf16.msra.mxu2 %v1939_v10  ;;  %v1943_v27 = vld [vmem:[%s2719_s1 + $0xc8] sm:$0xff]  ;;  %v1942_v31 = vld [vmem:[%s2719_s1 + $0xc0] sm:$0xff]  ;;  %v1965_v47 = vld [vmem:[%s2719_s1 + $0x178] sm:$0xff] }
   0xd   :  { %1063 = vmatpush.bf16.msra.mxu3 %v1947_v11  ;;  %v1344_v32 = vld [vmem:[%s2721_s0] sm:$0xf]  ;;  %v1854_v34 = vld [vmem:[%s2721_s0 + $0x4] sm:$0xf]  ;;  %v1352_v36 = vld [vmem:[%s2721_s0 + $0x8] sm:$0xf] }
   0xe   :  { %917 = vmatpush.bf16.msra.mxu0 %v1922_v12  ;;  %v1858_v33 = vld [vmem:[%s2721_s0 + $0x1c] sm:$0xf0]  ;;  %v1346_v35 = vld [vmem:[%s2721_s0 + $0x20] sm:$0xf0]  ;;  %v1859_v37 = vld [vmem:[%s2721_s0 + $0x24] sm:$0xf0] }
   0xf   :  { %966 = vmatpush.bf16.msra.mxu1 %v1930_v13  ;;  %v1855_v38 = vld [vmem:[%s2721_s0 + $0xc] sm:$0xf]  ;;  %v1345_v42 = vor.u32 %v1858_v33, %v1344_v32  ;;  %v1349_v43 = vor.u32 %v1854_v34, %v1346_v35  ;;  %v1353_v44 = vor.u32 %v1859_v37, %v1352_v36  ;;  %v1972_v48 = vld [vmem:[%s2719_s1 + $0x1b0] sm:$0xff]  ;;  %v1376_v56 = vld [vmem:[%s2721_s0 + $0x40] sm:$0xf] }
  0x10   :  { %1015 = vmatpush.bf16.msra.mxu2 %v1938_v14  ;;  %v1354_v39 = vld [vmem:[%s2721_s0 + $0x28] sm:$0xf0]  ;;  %v1956_v49 = vld [vmem:[%s2719_s1 + $0x130] sm:$0xff]  ;;  %v1866_v57 = vld [vmem:[%s2721_s0 + $0x5c] sm:$0xf0] }
  0x11   :  { %1064 = vmatpush.bf16.msra.mxu3 %v1946_v15  ;;  %v1357_v45 = vor.u32 %v1855_v38, %v1354_v39  ;;  %v1980_v50 = vld [vmem:[%s2719_s1 + $0x1f0] sm:$0xff]  ;;  %v1971_v52 = vld [vmem:[%s2719_s1 + $0x1a8] sm:$0xff]  ;;  %v1862_v58 = vld [vmem:[%s2721_s0 + $0x44] sm:$0xf]  ;;  %v1377_v0 = vor.u32 %v1866_v57, %v1376_v56 }
  0x12   :  { %918 = vmatpush.bf16.msra.mxu0 %v1921_v16  ;;  %v1964_v51 = vld [vmem:[%s2719_s1 + $0x170] sm:$0xff]  ;;  %v1955_v53 = vld [vmem:[%s2719_s1 + $0x128] sm:$0xff]  ;;  %v1378_v59 = vld [vmem:[%s2721_s0 + $0x60] sm:$0xf0] }
  0x13   :  { %967 = vmatpush.bf16.msra.mxu1 %v1929_v17  ;;  %v1979_v54 = vld [vmem:[%s2719_s1 + $0x1e8] sm:$0xff]  ;;  %v1381_v1 = vor.u32 %v1862_v58, %v1378_v59  ;;  %v1970_v4 = vld [vmem:[%s2719_s1 + $0x1a0] sm:$0xff]  ;;  %v1968_v36 = vld [vmem:[%s2719_s1 + $0x190] sm:$0xff] }
  0x14   :  { %1016 = vmatpush.bf16.msra.mxu2 %v1937_v18  ;;  %v1963_v55 = vld [vmem:[%s2719_s1 + $0x168] sm:$0xff]  ;;  %v1954_v5 = vld [vmem:[%s2719_s1 + $0x120] sm:$0xff]  ;;  %v1952_v37 = vld [vmem:[%s2719_s1 + $0x110] sm:$0xff] }
  0x15   :  { %1065 = vmatpush.bf16.msra.mxu3 %v1945_v19  ;;  %v1384_v60 = vld [vmem:[%s2721_s0 + $0x48] sm:$0xf]  ;;  %v1863_v62 = vld [vmem:[%s2721_s0 + $0x4c] sm:$0xf]  ;;  %v1978_v6 = vld [vmem:[%s2719_s1 + $0x1e0] sm:$0xff] }
  0x16   :  { %919 = vmatpush.bf16.msra.mxu0 %v1920_v20  ;;  %v1867_v61 = vld [vmem:[%s2721_s0 + $0x64] sm:$0xf0]  ;;  %v1386_v63 = vld [vmem:[%s2721_s0 + $0x68] sm:$0xf0]  ;;  %v1962_v7 = vld [vmem:[%s2719_s1 + $0x160] sm:$0xff] }
  0x17   :  { %968 = vmatpush.bf16.msra.mxu1 %v1928_v21  ;;  %v1385_v2 = vor.u32 %v1867_v61, %v1384_v60  ;;  %v1389_v3 = vor.u32 %v1863_v62, %v1386_v63  ;;  %v1408_v8 = vld [vmem:[%s2721_s0 + $0x80] sm:$0xf]  ;;  %v1870_v10 = vld [vmem:[%s2721_s0 + $0x84] sm:$0xf]  ;;  %v1416_v12 = vld [vmem:[%s2721_s0 + $0x88] sm:$0xf] }
  0x18   :  { %1017 = vmatpush.bf16.msra.mxu2 %v1936_v22  ;;  %v1874_v9 = vld [vmem:[%s2721_s0 + $0x9c] sm:$0xf0]  ;;  %v1410_v11 = vld [vmem:[%s2721_s0 + $0xa0] sm:$0xf0]  ;;  %v1875_v13 = vld [vmem:[%s2721_s0 + $0xa4] sm:$0xf0] }
  0x19   :  { %1066 = vmatpush.bf16.msra.mxu3 %v1944_v23  ;;  %v1871_v14 = vld [vmem:[%s2721_s0 + $0x8c] sm:$0xf]  ;;  %v1409_v16 = vor.u32 %v1874_v9, %v1408_v8  ;;  %v1413_v17 = vor.u32 %v1870_v10, %v1410_v11  ;;  %v1417_v18 = vor.u32 %v1875_v13, %v1416_v12  ;;  %v1969_v20 = vld [vmem:[%s2719_s1 + $0x198] sm:$0xff]  ;;  %v1976_v38 = vld [vmem:[%s2719_s1 + $0x1d0] sm:$0xff] }
  0x1a   :  { %920 = vmatpush.bf16.msra.mxu0 %v1919_v24  ;;  %v1418_v15 = vld [vmem:[%s2721_s0 + $0xa8] sm:$0xf0]  ;;  %v1953_v21 = vld [vmem:[%s2719_s1 + $0x118] sm:$0xff]  ;;  %v1440_v24 = vld [vmem:[%s2721_s0 + $0xc0] sm:$0xf] }
  0x1b   :  { %969 = vmatpush.bf16.msra.mxu1 %v1927_v25  ;;  %v1421_v19 = vor.u32 %v1871_v14, %v1418_v15  ;;  %v1977_v22 = vld [vmem:[%s2719_s1 + $0x1d8] sm:$0xff]  ;;  %v1882_v25 = vld [vmem:[%s2721_s0 + $0xdc] sm:$0xf0]  ;;  %v1960_v39 = vld [vmem:[%s2719_s1 + $0x150] sm:$0xff] }
  0x1c   :  { %1018 = vmatpush.bf16.msra.mxu2 %v1935_v26  ;;  %v1961_v23 = vld [vmem:[%s2719_s1 + $0x158] sm:$0xff]  ;;  %v1878_v26 = vld [vmem:[%s2721_s0 + $0xc4] sm:$0xf]  ;;  %v1441_v32 = vor.u32 %v1882_v25, %v1440_v24  ;;  %v1504_v56 = vld [vmem:[%s2721_s0 + $0x140] sm:$0xf] }
  0x1d   :  { %1067 = vmatpush.bf16.msra.mxu3 %v1943_v27  ;;  %v1442_v27 = vld [vmem:[%s2721_s0 + $0xe0] sm:$0xf0]  ;;  %v1898_v57 = vld [vmem:[%s2721_s0 + $0x15c] sm:$0xf0]  ;;  %v1512_v60 = vld [vmem:[%s2721_s0 + $0x148] sm:$0xf] }
  0x1e   :  { %921 = vmatpush.bf16.msra.mxu0 %v1918_v28  ;;  %v1448_v28 = vld [vmem:[%s2721_s0 + $0xc8] sm:$0xf]  ;;  %v1445_v33 = vor.u32 %v1878_v26, %v1442_v27  ;;  %v1894_v58 = vld [vmem:[%s2721_s0 + $0x144] sm:$0xf]  ;;  %v1895_v62 = vld [vmem:[%s2721_s0 + $0x14c] sm:$0xf] }
  0x1f   :  { %970 = vmatpush.bf16.msra.mxu1 %v1926_v29  ;;  %v1883_v29 = vld [vmem:[%s2721_s0 + $0xe4] sm:$0xf0]  ;;  %v1506_v59 = vld [vmem:[%s2721_s0 + $0x160] sm:$0xf0]  ;;  %v1514_v63 = vld [vmem:[%s2721_s0 + $0x168] sm:$0xf0] }
  0x20   :  { %1019 = vmatpush.bf16.msra.mxu2 %v1934_v30  ;;  %v1879_v30 = vld [vmem:[%s2721_s0 + $0xcc] sm:$0xf]  ;;  %v1449_v34 = vor.u32 %v1883_v29, %v1448_v28  ;;  %v1899_v61 = vld [vmem:[%s2721_s0 + $0x164] sm:$0xf0]  ;;  %v1536_v8 = vld [vmem:[%s2721_s0 + $0x180] sm:$0xf] }
  0x21   :  { %1068 = vmatpush.bf16.msra.mxu3 %v1942_v31  ;;  %922 = vmatmul.bf16.vlgmr.msra.gmra.mxu0 %v1345_v42  ;;  %v1450_v31 = vld [vmem:[%s2721_s0 + $0xe8] sm:$0xf0]  ;;  %v1886_v42 = vld [vmem:[%s2721_s0 + $0x104] sm:$0xf]  ;;  %v1906_v9 = vld [vmem:[%s2721_s0 + $0x19c] sm:$0xf0] }
  0x22   :  { %1110 = vmatpush.bf16.msrb.mxu0 %v1957_v41  ;;  %971 = vmatmul.bf16.vlgmr.msra.gmra.mxu1 %v1349_v43  ;;  %v1453_v35 = vor.u32 %v1879_v30, %v1450_v31  ;;  %v1890_v41 = vld [vmem:[%s2721_s0 + $0x11c] sm:$0xf0]  ;;  %v1474_v43 = vld [vmem:[%s2721_s0 + $0x120] sm:$0xf0]  ;;  %v1544_v12 = vld [vmem:[%s2721_s0 + $0x188] sm:$0xf] }
  0x23   :  { %1020 = vmatmul.bf16.vlgmr.msra.gmra.mxu2 %v1353_v44  ;;  %1159 = vmatpush.bf16.msrb.mxu1 %v1965_v47  ;;  %v1480_v44 = vld [vmem:[%s2721_s0 + $0x108] sm:$0xf]  ;;  %v1482_v47 = vld [vmem:[%s2721_s0 + $0x128] sm:$0xf0]  ;;  %v1902_v10 = vld [vmem:[%s2721_s0 + $0x184] sm:$0xf] }
  0x24   :  { %1208 = vmatpush.bf16.msrb.mxu2 %v1973_v40  ;;  %1069 = vmatmul.bf16.vlgmr.msra.gmra.mxu3 %v1357_v45  ;;  %v1472_v40 = vld [vmem:[%s2721_s0 + $0x100] sm:$0xf]  ;;  %v1891_v45 = vld [vmem:[%s2721_s0 + $0x124] sm:$0xf0]  ;;  %v1538_v11 = vld [vmem:[%s2721_s0 + $0x1a0] sm:$0xf0] }
  0x25   :  { %1257 = vmatpush.bf16.msrb.mxu3 %v1981_v46  ;;  %v1887_v46 = vld [vmem:[%s2721_s0 + $0x10c] sm:$0xf]  ;;  %v1907_v13 = vld [vmem:[%s2721_s0 + $0x1a4] sm:$0xf0] }
  0x26   :  { %1111 = vmatpush.bf16.msrb.mxu0 %v1956_v49  ;;  %v1477_v49 = vor.u32 %v1886_v42, %v1474_v43  ;;  %v1903_v14 = vld [vmem:[%s2721_s0 + $0x18c] sm:$0xf]  ;;  %v1576_v24 = vld [vmem:[%s2721_s0 + $0x1c8] sm:$0xf] }
  0x27   :  { %1160 = vmatpush.bf16.msrb.mxu1 %v1964_v51  ;;  %v1485_v51 = vor.u32 %v1887_v46, %v1482_v47  ;;  %v1546_v15 = vld [vmem:[%s2721_s0 + $0x1a8] sm:$0xf0]  ;;  %v1915_v25 = vld [vmem:[%s2721_s0 + $0x1e4] sm:$0xf0] }
  0x28   :  { %1209 = vmatpush.bf16.msrb.mxu2 %v1972_v48  ;;  %v1473_v48 = vor.u32 %v1890_v41, %v1472_v40  ;;  %v1911_v26 = vld [vmem:[%s2721_s0 + $0x1cc] sm:$0xf]  ;;  %v1577_v30 = vor.u32 %v1915_v25, %v1576_v24  ;;  %v1370_v40 = vld [vmem:[%s2721_s0 + $0x38] sm:$0xf0]  ;;  %v1426_v24 = vld [vmem:[%s2721_s0 + $0xb0] sm:$0xf0] }
  0x29   :  { %1258 = vmatpush.bf16.msrb.mxu3 %v1980_v50  ;;  %v1481_v50 = vor.u32 %v1891_v45, %v1480_v44  ;;  %v1578_v27 = vld [vmem:[%s2721_s0 + $0x1e8] sm:$0xf0]  ;;  %v1432_v25 = vld [vmem:[%s2721_s0 + $0x98] sm:$0xf] }
  0x2a   :  { %1112 = vmatpush.bf16.msrb.mxu0 %v1955_v53  ;;  %v1951_v53 = vld [vmem:[%s2719_s1 + $0x108] sm:$0xff]  ;;  %v1581_v31 = vor.u32 %v1911_v26, %v1578_v27  ;;  %v1877_v26 = vld [vmem:[%s2721_s0 + $0xb4] sm:$0xf0]  ;;  %v1873_v27 = vld [vmem:[%s2721_s0 + $0x9c] sm:$0xf] }
  0x2b   :  { %1161 = vmatpush.bf16.msrb.mxu1 %v1963_v55  ;;  %v1959_v55 = vld [vmem:[%s2719_s1 + $0x148] sm:$0xff] }
  0x2c   :  { %1210 = vmatpush.bf16.msrb.mxu2 %v1971_v52  ;;  %v1967_v52 = vld [vmem:[%s2719_s1 + $0x188] sm:$0xff] }
  0x2d   :  { %1259 = vmatpush.bf16.msrb.mxu3 %v1979_v54  ;;  %v1975_v54 = vld [vmem:[%s2719_s1 + $0x1c8] sm:$0xff] }
  0x2e   :  { %1113 = vmatpush.bf16.msrb.mxu0 %v1954_v5  ;;  %v1950_v5 = vld [vmem:[%s2719_s1 + $0x100] sm:$0xff] }
  0x2f   :  { %1162 = vmatpush.bf16.msrb.mxu1 %v1962_v7  ;;  %v1958_v7 = vld [vmem:[%s2719_s1 + $0x140] sm:$0xff] }
  0x30   :  { %1211 = vmatpush.bf16.msrb.mxu2 %v1970_v4  ;;  %v1966_v4 = vld [vmem:[%s2719_s1 + $0x180] sm:$0xff] }
  0x31   :  { %927 = vmatmul.bf16.gmra.mxu0 %v1377_v0  ;;  %1260 = vmatpush.bf16.msrb.mxu3 %v1978_v6  ;;  %v1505_v0 = vor.u32 %v1898_v57, %v1504_v56  ;;  %v1974_v6 = vld [vmem:[%s2719_s1 + $0x1c0] sm:$0xff]  ;;  %v1392_v57 = vld [vmem:[%s2721_s0 + $0x50] sm:$0xf] }
  0x32   :  { %976 = vmatmul.bf16.gmra.mxu1 %v1381_v1  ;;  %1114 = vmatpush.bf16.msrb.mxu0 %v1953_v21  ;;  %v1509_v1 = vor.u32 %v1894_v58, %v1506_v59  ;;  %v1914_v21 = vld [vmem:[%s2721_s0 + $0x1dc] sm:$0xf0]  ;;  %v1868_v58 = vld [vmem:[%s2721_s0 + $0x6c] sm:$0xf0]  ;;  %v1864_v59 = vld [vmem:[%s2721_s0 + $0x54] sm:$0xf] }
  0x33   :  { %1025 = vmatmul.bf16.gmra.mxu2 %v1385_v2  ;;  %1163 = vmatpush.bf16.msrb.mxu1 %v1961_v23  ;;  %v1513_v2 = vor.u32 %v1899_v61, %v1512_v60  ;;  %v1570_v23 = vld [vmem:[%s2721_s0 + $0x1e0] sm:$0xf0]  ;;  %v1394_v60 = vld [vmem:[%s2721_s0 + $0x70] sm:$0xf0]  ;;  %v1400_v61 = vld [vmem:[%s2721_s0 + $0x58] sm:$0xf] }
  0x34   :  { %1074 = vmatmul.bf16.gmra.mxu3 %v1389_v3  ;;  %1212 = vmatpush.bf16.msrb.mxu2 %v1969_v20  ;;  %v1517_v3 = vor.u32 %v1895_v62, %v1514_v63  ;;  %v1568_v20 = vld [vmem:[%s2721_s0 + $0x1c0] sm:$0xf]  ;;  %v1869_v62 = vld [vmem:[%s2721_s0 + $0x74] sm:$0xf0]  ;;  %v1865_v63 = vld [vmem:[%s2721_s0 + $0x5c] sm:$0xf] }
  0x35   :  { %1261 = vmatpush.bf16.msrb.mxu3 %v1977_v22  ;;  %v1910_v22 = vld [vmem:[%s2721_s0 + $0x1c4] sm:$0xf]  ;;  %v1569_v28 = vor.u32 %v1914_v21, %v1568_v20  ;;  %v1424_v21 = vld [vmem:[%s2721_s0 + $0x90] sm:$0xf] }
  0x36   :  { %1115 = vmatpush.bf16.msrb.mxu0 %v1952_v37  ;;  %v1573_v29 = vor.u32 %v1910_v22, %v1570_v23  ;;  %v1368_v37 = vld [vmem:[%s2721_s0 + $0x18] sm:$0xf]  ;;  %v1876_v22 = vld [vmem:[%s2721_s0 + $0xac] sm:$0xf0]  ;;  %v1872_v23 = vld [vmem:[%s2721_s0 + $0x94] sm:$0xf] }
  0x37   :  { %1164 = vmatpush.bf16.msrb.mxu1 %v1960_v39  ;;  %v1857_v39 = vld [vmem:[%s2721_s0 + $0x1c] sm:$0xf] }
  0x38   :  { %1213 = vmatpush.bf16.msrb.mxu2 %v1968_v36  ;;  %v1362_v36 = vld [vmem:[%s2721_s0 + $0x30] sm:$0xf0]  ;;  %v1373_v46 = vor.u32 %v1857_v39, %v1370_v40 }
  0x39   :  { %1262 = vmatpush.bf16.msrb.mxu3 %v1976_v38  ;;  %v1861_v38 = vld [vmem:[%s2721_s0 + $0x34] sm:$0xf0] }
  0x3a   :  { %1116 = vmatpush.bf16.msrb.mxu0 %v1951_v53  ;;  %v1369_v45 = vor.u32 %v1861_v38, %v1368_v37  ;;  %v1433_v37 = vor.u32 %v1877_v26, %v1432_v25 }
  0x3b   :  { %1165 = vmatpush.bf16.msrb.mxu1 %v1959_v55 }
  0x3c   :  { %1214 = vmatpush.bf16.msrb.mxu2 %v1967_v52 }
  0x3d   :  { %1263 = vmatpush.bf16.msrb.mxu3 %v1975_v54 }
  0x3e   :  { %1117 = vmatpush.bf16.msrb.mxu0 %v1950_v5 }
  0x3f   :  { %1166 = vmatpush.bf16.msrb.mxu1 %v1958_v7 }
  0x40   :  { %1215 = vmatpush.bf16.msrb.mxu2 %v1966_v4  ;;  %v1397_v4 = vor.u32 %v1864_v59, %v1394_v60 }
  0x41   :  { %932 = vmatmul.bf16.gmra.mxu0 %v1409_v16  ;;  %1264 = vmatpush.bf16.msrb.mxu3 %v1974_v6  ;;  %v1537_v16 = vor.u32 %v1906_v9, %v1536_v8  ;;  %v1401_v8 = vor.u32 %v1869_v62, %v1400_v61 }
  0x42   :  { %981 = vmatmul.bf16.gmra.mxu1 %v1413_v17  ;;  %v1541_v17 = vor.u32 %v1902_v10, %v1538_v11 }
  0x43   :  { %1030 = vmatmul.bf16.gmra.mxu2 %v1417_v18  ;;  %v1545_v18 = vor.u32 %v1907_v13, %v1544_v12 }
  0x44   :  { %1079 = vmatmul.bf16.gmra.mxu3 %v1421_v19  ;;  %v1549_v19 = vor.u32 %v1903_v14, %v1546_v15 }
  0x51   :  { %937 = vmatmul.bf16.gmra.mxu0 %v1441_v32  ;;  %v2437_v32 = vld [vmem:[%s2720_s2] ss:$0 sm:$0xff] }
  0x52   :  { %986 = vmatmul.bf16.gmra.mxu1 %v1445_v33  ;;  %v1360_v33 = vld [vmem:[%s2721_s0 + $0x10] sm:$0xf] }
  0x53   :  { %1035 = vmatmul.bf16.gmra.mxu2 %v1449_v34  ;;  %v1860_v34 = vld [vmem:[%s2721_s0 + $0x2c] sm:$0xf0] }
  0x54   :  { %1084 = vmatmul.bf16.gmra.mxu3 %v1453_v35  ;;  %v1856_v35 = vld [vmem:[%s2721_s0 + $0x14] sm:$0xf]  ;;  %v1361_v41 = vor.u32 %v1860_v34, %v1360_v33  ;;  %v1429_v33 = vor.u32 %v1872_v23, %v1426_v24  ;;  %v1889_v23 = vld [vmem:[%s2721_s0 + $0x11c] sm:$0xf] }
  0x55   :  { %v1365_v42 = vor.u32 %v1856_v35, %v1362_v36  ;;  %v1498_v24 = vld [vmem:[%s2721_s0 + $0x138] sm:$0xf0] }
  0x61   :  { %942 = vmatmul.bf16.gmra.mxu0 %v1473_v48 }
  0x62   :  { %991 = vmatmul.bf16.gmra.mxu1 %v1477_v49 }
  0x63   :  { %1040 = vmatmul.bf16.gmra.mxu2 %v1481_v50 }
  0x64   :  { %1089 = vmatmul.bf16.gmra.mxu3 %v1485_v51 }
  0x71   :  { %947 = vmatmul.bf16.gmra.mxu0 %v1505_v0  ;;  %v1402_v0 = vld [vmem:[%s2721_s0 + $0x78] sm:$0xf0] }
  0x72   :  { %996 = vmatmul.bf16.gmra.mxu1 %v1509_v1  ;;  %v1405_v9 = vor.u32 %v1865_v63, %v1402_v0 }
  0x73   :  { %1045 = vmatmul.bf16.gmra.mxu2 %v1513_v2 }
  0x74   :  { %1094 = vmatmul.bf16.gmra.mxu3 %v1517_v3  ;;  %v1393_v3 = vor.u32 %v1868_v58, %v1392_v57  ;;  %v1881_v57 = vld [vmem:[%s2721_s0 + $0xdc] sm:$0xf] }
  0x75   :  { %v1466_v58 = vld [vmem:[%s2721_s0 + $0xf8] sm:$0xf0] }
  0x81   :  { %952 = vmatmul.bf16.gmra.mxu0 %v1537_v16 }
  0x82   :  { %1001 = vmatmul.bf16.gmra.mxu1 %v1541_v17 }
  0x83   :  { %1050 = vmatmul.bf16.gmra.mxu2 %v1545_v18 }
  0x84   :  { %1099 = vmatmul.bf16.gmra.mxu3 %v1549_v19 }
  0x91   :  { %957 = vmatmul.bf16.gmra.mxu0 %v1569_v28  ;;  %v1434_v28 = vld [vmem:[%s2721_s0 + $0xb8] sm:$0xf0] }
  0x92   :  { %1006 = vmatmul.bf16.gmra.mxu1 %v1573_v29  ;;  %v1437_v38 = vor.u32 %v1873_v27, %v1434_v28 }
  0x93   :  { %1055 = vmatmul.bf16.gmra.mxu2 %v1577_v30 }
  0x94   :  { %1104 = vmatmul.bf16.gmra.mxu3 %v1581_v31  ;;  %v1425_v31 = vor.u32 %v1876_v22, %v1424_v21  ;;  %v1496_v21 = vld [vmem:[%s2721_s0 + $0x118] sm:$0xf] }
  0x95   :  { %v1893_v22 = vld [vmem:[%s2721_s0 + $0x134] sm:$0xf0] }
  0x9e   :  { %v923_v43 = vpop.f32.mrf.mxu0 }
  0x9f   :  { %v972_v44 = vpop.f32.mrf.mxu1  ;;  %v924_v47 = vadd.f32 %v2437_v32, %v923_v43 }
  0xa1   :  { %v973_v48 = vadd.f32 %v972_v44, %v924_v47  ;;  %1118 = vmatmul.bf16.vlgmr.msrb.gmra.mxu0 %v1361_v41 }
  0xa2   :  { %1167 = vmatmul.bf16.vlgmr.msrb.gmra.mxu1 %v1365_v42 }
  0xa3   :  { %1216 = vmatmul.bf16.vlgmr.msrb.gmra.mxu2 %v1369_v45 }
  0xa4   :  { %1265 = vmatmul.bf16.vlgmr.msrb.gmra.mxu3 %v1373_v46 }
  0xa6   :  { %v1021_v49 = vpop.f32.mrf.mxu2  ;;  %v925_v52 = vpop.f32.mrf.mxu0 }
  0xa7   :  { %v1070_v50 = vpop.f32.mrf.mxu3  ;;  %v1022_v51 = vadd.f32 %v1021_v49, %v973_v48  ;;  %v974_v53 = vpop.f32.mrf.mxu1  ;;  %v926_v54 = vadd.f32 %v2437_v32, %v925_v52  ;;  %v1880_v52 = vld [vmem:[%s2721_s0 + $0xd4] sm:$0xf] }
  0xa9   :  { %v2465_v55 = vadd.f32 %v1070_v50, %v1022_v51  ;;  %v975_v56 = vadd.f32 %v974_v53, %v926_v54  ;;  %v1456_v50 = vld [vmem:[%s2721_s0 + $0xd0] sm:$0xf]  ;;  %v1458_v53 = vld [vmem:[%s2721_s0 + $0xf0] sm:$0xf0]  ;;  %v1464_v54 = vld [vmem:[%s2721_s0 + $0xd8] sm:$0xf] }
  0xaa   :  { %v1884_v51 = vld [vmem:[%s2721_s0 + $0xec] sm:$0xf0]  ;;  %v1461_v62 = vor.u32 %v1880_v52, %v1458_v53  ;;  %v1528_v52 = vld [vmem:[%s2721_s0 + $0x158] sm:$0xf] }
  0xab   :  { %v1457_v61 = vor.u32 %v1884_v51, %v1456_v50  ;;  %v1896_v50 = vld [vmem:[%s2721_s0 + $0x154] sm:$0xf]  ;;  %v1901_v53 = vld [vmem:[%s2721_s0 + $0x174] sm:$0xf0] }
  0xac   :  { %v1522_v51 = vld [vmem:[%s2721_s0 + $0x170] sm:$0xf0] }
  0xae   :  { %v1023_v1 = vpop.f32.mrf.mxu2  ;;  %v928_v6 = vpop.f32.mrf.mxu0 }
  0xaf   :  { %v1072_v2 = vpop.f32.mrf.mxu3  ;;  %v1024_v5 = vadd.f32 %v1023_v1, %v975_v56  ;;  %v977_v7 = vpop.f32.mrf.mxu1  ;;  %v929_v10 = vadd.f32 %v2437_v32, %v928_v6  ;;  %v1885_v56 = vld [vmem:[%s2721_s0 + $0xf4] sm:$0xf0] }
  0xb1   :  { %v2492_v11 = vadd.f32 %v1072_v2, %v1024_v5  ;;  %v978_v12 = vadd.f32 %v977_v7, %v929_v10  ;;  %1123 = vmatmul.bf16.gmra.mxu0 %v1393_v3  ;;  %v1465_v2 = vor.u32 %v1885_v56, %v1464_v54  ;;  %v1469_v3 = vor.u32 %v1881_v57, %v1466_v58  ;;  %v1897_v54 = vld [vmem:[%s2721_s0 + $0x15c] sm:$0xf] }
  0xb2   :  { %1172 = vmatmul.bf16.gmra.mxu1 %v1397_v4  ;;  %v1530_v56 = vld [vmem:[%s2721_s0 + $0x178] sm:$0xf0] }
  0xb3   :  { %1221 = vmatmul.bf16.gmra.mxu2 %v1401_v8 }
  0xb4   :  { %1270 = vmatmul.bf16.gmra.mxu3 %v1405_v9 }
  0xb6   :  { %v1026_v13 = vpop.f32.mrf.mxu2  ;;  %v930_v16 = vpop.f32.mrf.mxu0 }
  0xb7   :  { %v1075_v14 = vpop.f32.mrf.mxu3  ;;  %v1027_v15 = vadd.f32 %v1026_v13, %v978_v12  ;;  %v979_v17 = vpop.f32.mrf.mxu1  ;;  %v931_v18 = vadd.f32 %v2437_v32, %v930_v16  ;;  %v1488_v16 = vld [vmem:[%s2721_s0 + $0x110] sm:$0xf] }
  0xb9   :  { %v2495_v19 = vadd.f32 %v1075_v14, %v1027_v15  ;;  %v980_v20 = vadd.f32 %v979_v17, %v931_v18  ;;  %v1892_v17 = vld [vmem:[%s2721_s0 + $0x12c] sm:$0xf0]  ;;  %v1888_v18 = vld [vmem:[%s2721_s0 + $0x114] sm:$0xf] }
  0xba   :  { %v1489_v27 = vor.u32 %v1892_v17, %v1488_v16  ;;  %v1552_v16 = vld [vmem:[%s2721_s0 + $0x190] sm:$0xf] }
  0xbb   :  { %v1908_v17 = vld [vmem:[%s2721_s0 + $0x1ac] sm:$0xf0] }
  0xbe   :  { %v1028_v29 = vpop.f32.mrf.mxu2  ;;  %v933_v35 = vpop.f32.mrf.mxu0 }
  0xbf   :  { %v1077_v30 = vpop.f32.mrf.mxu3  ;;  %v1029_v34 = vadd.f32 %v1028_v29, %v980_v20  ;;  %v982_v36 = vpop.f32.mrf.mxu1  ;;  %v934_v39 = vadd.f32 %v2437_v32, %v933_v35  ;;  %v1490_v20 = vld [vmem:[%s2721_s0 + $0x130] sm:$0xf0] }
  0xc0   :  { %v1493_v28 = vor.u32 %v1888_v18, %v1490_v20  ;;  %v1904_v18 = vld [vmem:[%s2721_s0 + $0x194] sm:$0xf] }
  0xc1   :  { %v2522_v40 = vadd.f32 %v1077_v30, %v1029_v34  ;;  %v983_v41 = vadd.f32 %v982_v36, %v934_v39  ;;  %1128 = vmatmul.bf16.gmra.mxu0 %v1425_v31  ;;  %v1501_v34 = vor.u32 %v1889_v23, %v1498_v24  ;;  %v1554_v20 = vld [vmem:[%s2721_s0 + $0x1b0] sm:$0xf0]  ;;  %v1905_v23 = vld [vmem:[%s2721_s0 + $0x19c] sm:$0xf] }
  0xc2   :  { %1177 = vmatmul.bf16.gmra.mxu1 %v1429_v33  ;;  %v1497_v33 = vor.u32 %v1893_v22, %v1496_v21  ;;  %v1560_v21 = vld [vmem:[%s2721_s0 + $0x198] sm:$0xf]  ;;  %v1562_v24 = vld [vmem:[%s2721_s0 + $0x1b8] sm:$0xf0] }
  0xc3   :  { %1226 = vmatmul.bf16.gmra.mxu2 %v1433_v37  ;;  %v1909_v22 = vld [vmem:[%s2721_s0 + $0x1b4] sm:$0xf0] }
  0xc4   :  { %1275 = vmatmul.bf16.gmra.mxu3 %v1437_v38 }
  0xc6   :  { %v1031_v42 = vpop.f32.mrf.mxu2  ;;  %v935_v45 = vpop.f32.mrf.mxu0 }
  0xc7   :  { %v1080_v43 = vpop.f32.mrf.mxu3  ;;  %v1032_v44 = vadd.f32 %v1031_v42, %v983_v41  ;;  %v984_v46 = vpop.f32.mrf.mxu1  ;;  %v936_v47 = vadd.f32 %v2437_v32, %v935_v45 }
  0xc9   :  { %v2525_v48 = vadd.f32 %v1080_v43, %v1032_v44  ;;  %v985_v49 = vadd.f32 %v984_v46, %v936_v47  ;;  %v1520_v47 = vld [vmem:[%s2721_s0 + $0x150] sm:$0xf] }
  0xce   :  { %v1033_v59 = vpop.f32.mrf.mxu2  ;;  %v938_v0 = vpop.f32.mrf.mxu0 }
  0xcf   :  { %v1082_v60 = vpop.f32.mrf.mxu3  ;;  %v1034_v63 = vadd.f32 %v1033_v59, %v985_v49  ;;  %v987_v1 = vpop.f32.mrf.mxu1  ;;  %v939_v4 = vadd.f32 %v2437_v32, %v938_v0  ;;  %v1900_v49 = vld [vmem:[%s2721_s0 + $0x16c] sm:$0xf0]  ;;  %v1529_v0 = vor.u32 %v1901_v53, %v1528_v52  ;;  %v1912_v52 = vld [vmem:[%s2721_s0 + $0x1d4] sm:$0xf] }
  0xd0   :  { %v1521_v59 = vor.u32 %v1900_v49, %v1520_v47  ;;  %v1586_v53 = vld [vmem:[%s2721_s0 + $0x1f0] sm:$0xf0] }
  0xd1   :  { %v2552_v5 = vadd.f32 %v1082_v60, %v1034_v63  ;;  %v988_v6 = vadd.f32 %v987_v1, %v939_v4  ;;  %1133 = vmatmul.bf16.gmra.mxu0 %v1457_v61  ;;  %v1525_v60 = vor.u32 %v1896_v50, %v1522_v51  ;;  %v1533_v1 = vor.u32 %v1897_v54, %v1530_v56  ;;  %v1584_v50 = vld [vmem:[%s2721_s0 + $0x1d0] sm:$0xf]  ;;  %v1592_v54 = vld [vmem:[%s2721_s0 + $0x1d8] sm:$0xf] }
  0xd2   :  { %1182 = vmatmul.bf16.gmra.mxu1 %v1461_v62  ;;  %v1916_v51 = vld [vmem:[%s2721_s0 + $0x1ec] sm:$0xf0]  ;;  %v1917_v56 = vld [vmem:[%s2721_s0 + $0x1f4] sm:$0xf0] }
  0xd3   :  { %1231 = vmatmul.bf16.gmra.mxu2 %v1465_v2 }
  0xd4   :  { %1280 = vmatmul.bf16.gmra.mxu3 %v1469_v3 }
  0xd6   :  { %v1036_v7 = vpop.f32.mrf.mxu2  ;;  %v940_v10 = vpop.f32.mrf.mxu0 }
  0xd7   :  { %v1085_v8 = vpop.f32.mrf.mxu3  ;;  %v1037_v9 = vadd.f32 %v1036_v7, %v988_v6  ;;  %v989_v12 = vpop.f32.mrf.mxu1  ;;  %v941_v13 = vadd.f32 %v2437_v32, %v940_v10 }
  0xd9   :  { %v2555_v14 = vadd.f32 %v1085_v8, %v1037_v9  ;;  %v990_v15 = vadd.f32 %v989_v12, %v941_v13 }
  0xde   :  { %v1038_v25 = vpop.f32.mrf.mxu2  ;;  %v943_v30 = vpop.f32.mrf.mxu0 }
  0xdf   :  { %v1087_v26 = vpop.f32.mrf.mxu3  ;;  %v1039_v29 = vadd.f32 %v1038_v25, %v990_v15  ;;  %v992_v31 = vpop.f32.mrf.mxu1  ;;  %v944_v35 = vadd.f32 %v2437_v32, %v943_v30 }
  0xe1   :  { %v2582_v36 = vadd.f32 %v1087_v26, %v1039_v29  ;;  %v993_v37 = vadd.f32 %v992_v31, %v944_v35  ;;  %1138 = vmatmul.bf16.gmra.mxu0 %v1489_v27  ;;  %v1553_v27 = vor.u32 %v1908_v17, %v1552_v16 }
  0xe2   :  { %1187 = vmatmul.bf16.gmra.mxu1 %v1493_v28  ;;  %v1557_v28 = vor.u32 %v1904_v18, %v1554_v20 }
  0xe3   :  { %1236 = vmatmul.bf16.gmra.mxu2 %v1497_v33  ;;  %v1561_v33 = vor.u32 %v1909_v22, %v1560_v21 }
  0xe4   :  { %1285 = vmatmul.bf16.gmra.mxu3 %v1501_v34  ;;  %v1565_v34 = vor.u32 %v1905_v23, %v1562_v24 }
  0xe6   :  { %v1041_v38 = vpop.f32.mrf.mxu2  ;;  %v945_v42 = vpop.f32.mrf.mxu0 }
  0xe7   :  { %v1090_v39 = vpop.f32.mrf.mxu3  ;;  %v1042_v41 = vadd.f32 %v1041_v38, %v993_v37  ;;  %v994_v43 = vpop.f32.mrf.mxu1  ;;  %v946_v44 = vadd.f32 %v2437_v32, %v945_v42 }
  0xe9   :  { %v2585_v45 = vadd.f32 %v1090_v39, %v1042_v41  ;;  %v995_v46 = vadd.f32 %v994_v43, %v946_v44 }
  0xee   :  { %v1043_v57 = vpop.f32.mrf.mxu2  ;;  %v948_v62 = vpop.f32.mrf.mxu0 }
  0xef   :  { %v1092_v58 = vpop.f32.mrf.mxu3  ;;  %v1044_v61 = vadd.f32 %v1043_v57, %v995_v46  ;;  %v997_v63 = vpop.f32.mrf.mxu1  ;;  %v949_v2 = vadd.f32 %v2437_v32, %v948_v62  ;;  %v1913_v57 = vld [vmem:[%s2721_s0 + $0x1dc] sm:$0xf]  ;;  %v1589_v62 = vor.u32 %v1912_v52, %v1586_v53 }
  0xf1   :  { %v2612_v3 = vadd.f32 %v1092_v58, %v1044_v61  ;;  %v998_v4 = vadd.f32 %v997_v63, %v949_v2  ;;  %1143 = vmatmul.bf16.gmra.mxu0 %v1521_v59  ;;  %v1594_v58 = vld [vmem:[%s2721_s0 + $0x1f8] sm:$0xf0]  ;;  %v1585_v61 = vor.u32 %v1916_v51, %v1584_v50  ;;  %v1593_v2 = vor.u32 %v1917_v56, %v1592_v54 }
  0xf2   :  { %1192 = vmatmul.bf16.gmra.mxu1 %v1525_v60 }
  0xf3   :  { %1241 = vmatmul.bf16.gmra.mxu2 %v1529_v0 }
  0xf4   :  { %1290 = vmatmul.bf16.gmra.mxu3 %v1533_v1 }
  0xf6   :  { %v1046_v6 = vpop.f32.mrf.mxu2  ;;  %v950_v9 = vpop.f32.mrf.mxu0 }
  0xf7   :  { %v1095_v7 = vpop.f32.mrf.mxu3  ;;  %v1047_v8 = vadd.f32 %v1046_v6, %v998_v4  ;;  %v999_v10 = vpop.f32.mrf.mxu1  ;;  %v951_v12 = vadd.f32 %v2437_v32, %v950_v9  ;;  %v1597_v4 = vor.u32 %v1913_v57, %v1594_v58 }
  0xf9   :  { %v2615_v13 = vadd.f32 %v1095_v7, %v1047_v8  ;;  %v1000_v15 = vadd.f32 %v999_v10, %v951_v12 }
  0xfe   :  { %v1048_v25 = vpop.f32.mrf.mxu2  ;;  %v953_v30 = vpop.f32.mrf.mxu0 }
  0xff   :  { %v1097_v26 = vpop.f32.mrf.mxu3  ;;  %v1049_v29 = vadd.f32 %v1048_v25, %v1000_v15  ;;  %v1002_v31 = vpop.f32.mrf.mxu1  ;;  %v954_v35 = vadd.f32 %v2437_v32, %v953_v30 }
 0x101   :  { %v2642_v37 = vadd.f32 %v1097_v26, %v1049_v29  ;;  %v1003_v38 = vadd.f32 %v1002_v31, %v954_v35  ;;  %1148 = vmatmul.bf16.gmra.mxu0 %v1553_v27 }
 0x102   :  { %1197 = vmatmul.bf16.gmra.mxu1 %v1557_v28 }
 0x103   :  { %1246 = vmatmul.bf16.gmra.mxu2 %v1561_v33 }
 0x104   :  { %1295 = vmatmul.bf16.gmra.mxu3 %v1565_v34 }
 0x106   :  { %v1051_v39 = vpop.f32.mrf.mxu2  ;;  %v955_v43 = vpop.f32.mrf.mxu0 }
 0x107   :  { %v1100_v41 = vpop.f32.mrf.mxu3  ;;  %v1052_v42 = vadd.f32 %v1051_v39, %v1003_v38  ;;  %v1004_v44 = vpop.f32.mrf.mxu1  ;;  %v956_v46 = vadd.f32 %v2437_v32, %v955_v43 }
 0x109   :  { %v2645_v47 = vadd.f32 %v1100_v41, %v1052_v42  ;;  %v1005_v49 = vadd.f32 %v1004_v44, %v956_v46 }
 0x10e   :  { %v1053_v59 = vpop.f32.mrf.mxu2  ;;  %v958_v0 = vpop.f32.mrf.mxu0 }
 0x10f   :  { %v1102_v60 = vpop.f32.mrf.mxu3  ;;  %v1054_v63 = vadd.f32 %v1053_v59, %v1005_v49  ;;  %v1007_v1 = vpop.f32.mrf.mxu1  ;;  %v959_v6 = vadd.f32 %v2437_v32, %v958_v0 }
 0x111   :  { %v2672_v7 = vadd.f32 %v1102_v60, %v1054_v63  ;;  %v1008_v8 = vadd.f32 %v1007_v1, %v959_v6  ;;  %1153 = vmatmul.bf16.gmra.mxu0 %v1585_v61 }
 0x112   :  { %1202 = vmatmul.bf16.gmra.mxu1 %v1589_v62 }
 0x113   :  { %1251 = vmatmul.bf16.gmra.mxu2 %v1593_v2 }
 0x114   :  { %1300 = vmatmul.bf16.gmra.mxu3 %v1597_v4 }
 0x116   :  { %v1056_v9 = vpop.f32.mrf.mxu2  ;;  %v960_v15 = vpop.f32.mrf.mxu0 }
 0x117   :  { %v1105_v10 = vpop.f32.mrf.mxu3  ;;  %v1057_v12 = vadd.f32 %v1056_v9, %v1008_v8  ;;  %v1009_v16 = vpop.f32.mrf.mxu1  ;;  %v961_v17 = vadd.f32 %v2437_v32, %v960_v15 }
 0x119   :  { %v2675_v18 = vadd.f32 %v1105_v10, %v1057_v12  ;;  %v1010_v20 = vadd.f32 %v1009_v16, %v961_v17 }
 0x11e   :  { %v1058_v21 = vpop.f32.mrf.mxu2  ;;  %v1119_v24 = vpop.f32.mrf.mxu0 }
 0x11f   :  { %v1107_v22 = vpop.f32.mrf.mxu3  ;;  %v1059_v23 = vadd.f32 %v1058_v21, %v1010_v20  ;;  %v1168_v25 = vpop.f32.mrf.mxu1  ;;  %v1120_v29 = vadd.f32 %v1119_v24, %v2465_v55 }
 0x121   :  { %v2677_v26 = vadd.f32 %v1107_v22, %v1059_v23  ;;  %v1169_v34 = vadd.f32 %v1168_v25, %v1120_v29 }
 0x126   :  { %v1217_v27 = vpop.f32.mrf.mxu2  ;;  %v1121_v30 = vpop.f32.mrf.mxu0 }
 0x127   :  { %v1266_v28 = vpop.f32.mrf.mxu3  ;;  %v1170_v31 = vpop.f32.mrf.mxu1  ;;  %v1122_v33 = vadd.f32 %v1121_v30, %v2492_v11  ;;  %v1218_v32 = vadd.f32 %v1217_v27, %v1169_v34 }
 0x129   :  { %v1171_v35 = vadd.f32 %v1170_v31, %v1122_v33  ;;  %v1267_v44 = vadd.f32 %v1266_v28, %v1218_v32 }
 0x12e   :  { %v1219_v38 = vpop.f32.mrf.mxu2  ;;  %v1124_v42 = vpop.f32.mrf.mxu0 }
 0x12f   :  { %v1268_v39 = vpop.f32.mrf.mxu3  ;;  %v1220_v41 = vadd.f32 %v1219_v38, %v1171_v35  ;;  %v1173_v43 = vpop.f32.mrf.mxu1  ;;  %v1125_v51 = vadd.f32 %v1124_v42, %v2495_v19 }
 0x131   :  { %v1269_v46 = vadd.f32 %v1268_v39, %v1220_v41  ;;  %v1174_v54 = vadd.f32 %v1173_v43, %v1125_v51 }
 0x133   :  { %v1985_v49 = vpack.c.bf16 %v1269_v46, %v1267_v44 }
 0x135   :  { %1986 = vst [vmem:[%s2722_s3] sm:$0xff] %v1985_v49  }
 0x136   :  { %v1222_v55 = vpop.f32.mrf.mxu2  ;;  %v1126_v11 = vpop.f32.mrf.mxu0 }
 0x137   :  { %v1271_v50 = vpop.f32.mrf.mxu3  ;;  %v1175_v52 = vpop.f32.mrf.mxu1  ;;  %v1127_v53 = vadd.f32 %v1126_v11, %v2522_v40  ;;  %v1223_v56 = vadd.f32 %v1222_v55, %v1174_v54 }
 0x139   :  { %v1176_v57 = vadd.f32 %v1175_v52, %v1127_v53  ;;  %v1272_v63 = vadd.f32 %v1271_v50, %v1223_v56 }
 0x13e   :  { %v1224_v58 = vpop.f32.mrf.mxu2  ;;  %v1129_v61 = vpop.f32.mrf.mxu0 }
 0x13f   :  { %v1273_v59 = vpop.f32.mrf.mxu3  ;;  %v1225_v60 = vadd.f32 %v1224_v58, %v1176_v57  ;;  %v1178_v62 = vpop.f32.mrf.mxu1  ;;  %v1130_v4 = vadd.f32 %v1129_v61, %v2525_v48 }
 0x141   :  { %v1274_v0 = vadd.f32 %v1273_v59, %v1225_v60  ;;  %v1179_v9 = vadd.f32 %v1178_v62, %v1130_v4 }
 0x143   :  { %v1990_v1 = vpack.c.bf16 %v1274_v0, %v1272_v63 }
 0x145   :  { %2022 = vst [vmem:[%s2722_s3 + $0x8] sm:$0xff] %v1990_v1  }
 0x146   :  { %v1227_v19 = vpop.f32.mrf.mxu2  ;;  %v1131_v40 = vpop.f32.mrf.mxu0 }
 0x147   :  { %v1276_v2 = vpop.f32.mrf.mxu3  ;;  %v1180_v6 = vpop.f32.mrf.mxu1  ;;  %v1132_v8 = vadd.f32 %v1131_v40, %v2552_v5  ;;  %v1228_v10 = vadd.f32 %v1227_v19, %v1179_v9 }
 0x149   :  { %v1181_v12 = vadd.f32 %v1180_v6, %v1132_v8  ;;  %v1277_v22 = vadd.f32 %v1276_v2, %v1228_v10 }
 0x14e   :  { %v1229_v15 = vpop.f32.mrf.mxu2  ;;  %v1134_v20 = vpop.f32.mrf.mxu0 }
 0x14f   :  { %v1278_v16 = vpop.f32.mrf.mxu3  ;;  %v1230_v17 = vadd.f32 %v1229_v15, %v1181_v12  ;;  %v1183_v21 = vpop.f32.mrf.mxu1  ;;  %v1135_v27 = vadd.f32 %v1134_v20, %v2555_v14 }
 0x151   :  { %v1279_v23 = vadd.f32 %v1278_v16, %v1230_v17  ;;  %v1184_v30 = vadd.f32 %v1183_v21, %v1135_v27 }
 0x153   :  { %v1995_v24 = vpack.c.bf16 %v1279_v23, %v1277_v22 }
 0x155   :  { %2023 = vst [vmem:[%s2722_s3 + $0x10] sm:$0xff] %v1995_v24  }
 0x156   :  { %v1232_v48 = vpop.f32.mrf.mxu2  ;;  %v1136_v5 = vpop.f32.mrf.mxu0 }
 0x157   :  { %v1281_v25 = vpop.f32.mrf.mxu3  ;;  %v1185_v28 = vpop.f32.mrf.mxu1  ;;  %v1137_v29 = vadd.f32 %v1136_v5, %v2582_v36  ;;  %v1233_v31 = vadd.f32 %v1232_v48, %v1184_v30 }
 0x159   :  { %v1186_v33 = vadd.f32 %v1185_v28, %v1137_v29  ;;  %v1282_v41 = vadd.f32 %v1281_v25, %v1233_v31 }
 0x15e   :  { %v1234_v34 = vpop.f32.mrf.mxu2  ;;  %v1139_v38 = vpop.f32.mrf.mxu0 }
 0x15f   :  { %v1283_v32 = vpop.f32.mrf.mxu3  ;;  %v1235_v35 = vadd.f32 %v1234_v34, %v1186_v33  ;;  %v1188_v39 = vpop.f32.mrf.mxu1  ;;  %v1140_v46 = vadd.f32 %v1139_v38, %v2585_v45 }
 0x161   :  { %v1284_v42 = vadd.f32 %v1283_v32, %v1235_v35  ;;  %v1189_v50 = vadd.f32 %v1188_v39, %v1140_v46 }
 0x163   :  { %v2000_v43 = vpack.c.bf16 %v1284_v42, %v1282_v41 }
 0x165   :  { %2024 = vst [vmem:[%s2722_s3 + $0x18] sm:$0xff] %v2000_v43  }
 0x166   :  { %v1237_v14 = vpop.f32.mrf.mxu2  ;;  %v1141_v36 = vpop.f32.mrf.mxu0 }
 0x167   :  { %v1286_v44 = vpop.f32.mrf.mxu3  ;;  %v1190_v49 = vpop.f32.mrf.mxu1  ;;  %v1142_v55 = vadd.f32 %v1141_v36, %v2612_v3  ;;  %v1238_v51 = vadd.f32 %v1237_v14, %v1189_v50 }
 0x169   :  { %v1191_v11 = vadd.f32 %v1190_v49, %v1142_v55  ;;  %v1287_v58 = vadd.f32 %v1286_v44, %v1238_v51 }
 0x16e   :  { %v1239_v52 = vpop.f32.mrf.mxu2  ;;  %v1144_v56 = vpop.f32.mrf.mxu0 }
 0x16f   :  { %v1288_v53 = vpop.f32.mrf.mxu3  ;;  %v1240_v54 = vadd.f32 %v1239_v52, %v1191_v11  ;;  %v1193_v57 = vpop.f32.mrf.mxu1  ;;  %v1145_v62 = vadd.f32 %v1144_v56, %v2615_v13 }
 0x171   :  { %v1289_v59 = vadd.f32 %v1288_v53, %v1240_v54  ;;  %v1194_v1 = vadd.f32 %v1193_v57, %v1145_v62 }
 0x173   :  { %v2005_v60 = vpack.c.bf16 %v1289_v59, %v1287_v58 }
 0x175   :  { %2025 = vst [vmem:[%s2722_s3 + $0x20] sm:$0xff] %v2005_v60  }
 0x176   :  { %v1242_v45 = vpop.f32.mrf.mxu2  ;;  %v1146_v3 = vpop.f32.mrf.mxu0 }
 0x177   :  { %v1291_v61 = vpop.f32.mrf.mxu3  ;;  %v1195_v63 = vpop.f32.mrf.mxu1  ;;  %v1147_v0 = vadd.f32 %v1146_v3, %v2642_v37  ;;  %v1243_v19 = vadd.f32 %v1242_v45, %v1194_v1 }
 0x179   :  { %v1196_v2 = vadd.f32 %v1195_v63, %v1147_v0  ;;  %v1292_v10 = vadd.f32 %v1291_v61, %v1243_v19 }
 0x17e   :  { %v1244_v4 = vpop.f32.mrf.mxu2  ;;  %v1149_v8 = vpop.f32.mrf.mxu0 }
 0x17f   :  { %v1293_v40 = vpop.f32.mrf.mxu3  ;;  %v1245_v6 = vadd.f32 %v1244_v4, %v1196_v2  ;;  %v1198_v9 = vpop.f32.mrf.mxu1  ;;  %v1150_v17 = vadd.f32 %v1149_v8, %v2645_v47 }
 0x181   :  { %v1294_v12 = vadd.f32 %v1293_v40, %v1245_v6  ;;  %v1199_v22 = vadd.f32 %v1198_v9, %v1150_v17 }
 0x183   :  { %v2010_v15 = vpack.c.bf16 %v1294_v12, %v1292_v10 }
 0x185   :  { %2026 = vst [vmem:[%s2722_s3 + $0x28] sm:$0xff] %v2010_v15  }
 0x186   :  { %v1247_v13 = vpop.f32.mrf.mxu2  ;;  %v1151_v37 = vpop.f32.mrf.mxu0 }
 0x187   :  { %v1296_v16 = vpop.f32.mrf.mxu3  ;;  %v1200_v20 = vpop.f32.mrf.mxu1  ;;  %v1152_v21 = vadd.f32 %v1151_v37, %v2672_v7  ;;  %v1248_v23 = vadd.f32 %v1247_v13, %v1199_v22 }
 0x189   :  { %v1201_v24 = vadd.f32 %v1200_v20, %v1152_v21  ;;  %v1297_v28 = vadd.f32 %v1296_v16, %v1248_v23 }
 0x18e   :  { %v1249_v48 = vpop.f32.mrf.mxu2  ;;  %v1154_v5 = vpop.f32.mrf.mxu0 }
 0x18f   :  { %v1298_v25 = vpop.f32.mrf.mxu3  ;;  %v1250_v27 = vadd.f32 %v1249_v48, %v1201_v24  ;;  %v1203_v30 = vpop.f32.mrf.mxu1  ;;  %v1155_v34 = vadd.f32 %v1154_v5, %v2675_v18 }
 0x191   :  { %v1299_v29 = vadd.f32 %v1298_v25, %v1250_v27  ;;  %v1204_v35 = vadd.f32 %v1203_v30, %v1155_v34 }
 0x193   :  { %v2015_v31 = vpack.c.bf16 %v1299_v29, %v1297_v28 }
 0x195   :  { %2027 = vst [vmem:[%s2722_s3 + $0x30] sm:$0xff] %v2015_v31  }
 0x196   :  { %v1252_v47 = vpop.f32.mrf.mxu2  ;;  %v1156_v7 = vpop.f32.mrf.mxu0 }
 0x197   :  { %v1301_v33 = vpop.f32.mrf.mxu3  ;;  %v1157_v32 = vadd.f32 %v1156_v7, %v2677_v26  ;;  %v1205_v38 = vpop.f32.mrf.mxu1  ;;  %v1253_v39 = vadd.f32 %v1252_v47, %v1204_v35 }
 0x199   :  { %v1206_v41 = vadd.f32 %v1205_v38, %v1157_v32  ;;  %v1302_v44 = vadd.f32 %v1301_v33, %v1253_v39 }
 0x19e   :  { %v1254_v42 = vpop.f32.mrf.mxu2 }
 0x19f   :  { %v1255_v43 = vadd.f32 %v1254_v42, %v1206_v41  ;;  %v1303_v14 = vpop.f32.mrf.mxu3 }
 0x1a1   :  { %v1304_v46 = vadd.f32 %v1303_v14, %v1255_v43 }
 0x1a3   :  { %v2020_v36 = vpack.c.bf16 %v1304_v46, %v1302_v44 }
 0x1a5   :  { %2028 = vst [vmem:[%s2722_s3 + $0x38] sm:$0xff] %v2020_v36  }

// kernel: discriminator_forward.7
= control target key start
LH: loop header
LB: loop body
LE: loop exit
PB: predicated region body
PF: predicated region fallthrough
CT: control target
= control target key end

     0   :  { %s4954_s12 = smov 0   ;;  %s4956_s13 = smov 0   ;;  %s5881_s0 = inlined_call_operand.vmem [shape: bf16[32,2048], index: 0, kind: input, shape index: {}]   ;;  %s5882_s1 = inlined_call_operand.vmem [shape: bf16[2048,256], index: 1, kind: input, shape index: {}]   ;;  %s5883_s2 = inlined_call_operand.vmem [shape: f32[1,256], index: 2, kind: input, shape index: {}]   ;;  %s5884_s3 = inlined_call_operand.vmem [shape: bf16[32,256], index: 3, kind: output, shape index: {}]  }
   0x1   :  { %s4958_s14 = smov 0   ;;  %s4960_s15 = smov 0  }
   0x2   :  { %s4962_s16 = smov 0  }
   0x3 LB: > { %s25_s17 = sadd.s32 1, %s4928_s15  ;;  %s4028_s18 = sadd.s32 4294967295, %s4932_s16   ;;  %s4932_s16 = sphi %s4962_s16, %s13_s16   ;;  %s4928_s15 = sphi %s4960_s15, %s5889_s15   ;;  %s4924_s14 = sphi %s4958_s14, %s5888_s14   ;;  %s4920_s13 = sphi %s4956_s13, %s5887_s13   ;;  %s4916_s12 = sphi %s4954_s12, %s5886_s12  }
   0x4   : > { %p27_p0 = scmp.ge.s32.totalorder %s25_s17, 2  ;;  %p65_p1 = scmp.ne.s32.totalorder %s4920_s13, %s4916_s12 }
   0x5   : > { %p66_p2 = scmp.eq.s32.totalorder %s4932_s16, 0  ;;  %p123_p4 = scmp.eq.s32.totalorder %s4028_s18, 1 }
   0x6   : > { %s5891_s17 = smov (%p27_p0, %s25_s17), 0  ;;  %s58_s20 = sadd.s32 1, %s4920_s13 }
   0x7   : > { %p67_p3 = por %p66_p2, %p65_p1  ;;  %s55_s19 = ssub.s32 %s4928_s15, %s5891_s17 }
   0x8   : > { %p56_p5 = scmp.eq.s32.totalorder %s55_s19, 0  ;;  %p4989_p6 = por %p123_p4, %p65_p1 }
   0x9   : > { %p4032_p7 = scmp.ge.s32.totalorder %s4932_s16, 2 }
   0xa   : > { %s4994_s22 = scalar_select %p56_p5, %s4920_s13, %s58_s20  }
   0xb   : > { %155 = sbr.rel (%p4032_p7) target bundleno = 276 (0x114), region = 20 }
  0x10   : > { %158 = sbr.rel (!%p67_p3) target bundleno = 276 (0x114), region = 24  ;;  %s160_s23 = sand.u32 (%p67_p3), 1, %s4920_s13  }
  0x11   : > { %s4034_s24 = sshll.u32 (%p67_p3), %s4928_s15, 2  ;;  %s4033_s25 = sshll.u32 (%p67_p3), %s160_s23, 10 }
  0x12   : > { %s5002_s28 = scalar_lea.vmem (%p67_p3), %s5882_s1, %s4034_s24  ;;  %s5006_s29 = scalar_lea.vmem (%p67_p3), [#allocation2], %s4033_s25 }
  0x13   : > { %v181_v0 = vld [vmem:[%s5002_s28] sm:$0xf] (%p67_p3)  ;;  %v183_v1 = vld [vmem:[%s5002_s28 + $0x8] sm:$0xf] (%p67_p3)  ;;  %v185_v2 = vld [vmem:[%s5002_s28 + $0x10] sm:$0xf] (%p67_p3) }
  0x14   : > { %182 = vst [vmem:[%s5006_s29] sm:$0xf] (%p67_p3), %v181_v0  ;;  %v187_v3 = vld [vmem:[%s5002_s28 + $0x18] sm:$0xf] (%p67_p3)  ;;  %v189_v4 = vld [vmem:[%s5002_s28 + $0x20] sm:$0xf] (%p67_p3) }
  0x15   : > { %184 = vst [vmem:[%s5006_s29 + $0x4] sm:$0xf] %v183_v1  ;;  %v191_v5 = vld [vmem:[%s5002_s28 + $0x28] sm:$0xf]  ;;  %v193_v6 = vld [vmem:[%s5002_s28 + $0x30] sm:$0xf] }
  0x16   : > { %186 = vst [vmem:[%s5006_s29 + $0x8] sm:$0xf] %v185_v2  ;;  %v195_v7 = vld [vmem:[%s5002_s28 + $0x38] sm:$0xf]  ;;  %v197_v8 = vld [vmem:[%s5002_s28 + $0x40] sm:$0xf] }
  0x17   : > { %188 = vst [vmem:[%s5006_s29 + $0xc] sm:$0xf] %v187_v3  ;;  %v199_v9 = vld [vmem:[%s5002_s28 + $0x48] sm:$0xf]  ;;  %v201_v10 = vld [vmem:[%s5002_s28 + $0x50] sm:$0xf] }
  0x18   : > { %190 = vst [vmem:[%s5006_s29 + $0x10] sm:$0xf] %v189_v4  ;;  %v203_v11 = vld [vmem:[%s5002_s28 + $0x58] sm:$0xf]  ;;  %v205_v12 = vld [vmem:[%s5002_s28 + $0x60] sm:$0xf] }
  0x19   : > { %192 = vst [vmem:[%s5006_s29 + $0x14] sm:$0xf] %v191_v5  ;;  %v207_v13 = vld [vmem:[%s5002_s28 + $0x68] sm:$0xf]  ;;  %v209_v14 = vld [vmem:[%s5002_s28 + $0x70] sm:$0xf] }
  0x1a   : > { %194 = vst [vmem:[%s5006_s29 + $0x18] sm:$0xf] %v193_v6  ;;  %v211_v15 = vld [vmem:[%s5002_s28 + $0x78] sm:$0xf]  ;;  %v213_v16 = vld [vmem:[%s5002_s28 + $0x80] sm:$0xf] }
  0x1b   : > { %196 = vst [vmem:[%s5006_s29 + $0x1c] sm:$0xf] %v195_v7  ;;  %v215_v17 = vld [vmem:[%s5002_s28 + $0x88] sm:$0xf]  ;;  %v217_v18 = vld [vmem:[%s5002_s28 + $0x90] sm:$0xf] }
  0x1c   : > { %198 = vst [vmem:[%s5006_s29 + $0x20] sm:$0xf] %v197_v8  ;;  %v219_v19 = vld [vmem:[%s5002_s28 + $0x98] sm:$0xf]  ;;  %v221_v20 = vld [vmem:[%s5002_s28 + $0xa0] sm:$0xf] }
  0x1d   : > { %200 = vst [vmem:[%s5006_s29 + $0x24] sm:$0xf] %v199_v9  ;;  %v223_v21 = vld [vmem:[%s5002_s28 + $0xa8] sm:$0xf]  ;;  %v225_v22 = vld [vmem:[%s5002_s28 + $0xb0] sm:$0xf] }
  0x1e   : > { %202 = vst [vmem:[%s5006_s29 + $0x28] sm:$0xf] %v201_v10  ;;  %v227_v23 = vld [vmem:[%s5002_s28 + $0xb8] sm:$0xf]  ;;  %v229_v24 = vld [vmem:[%s5002_s28 + $0xc0] sm:$0xf] }
  0x1f   : > { %204 = vst [vmem:[%s5006_s29 + $0x2c] sm:$0xf] %v203_v11  ;;  %v231_v25 = vld [vmem:[%s5002_s28 + $0xc8] sm:$0xf]  ;;  %v233_v26 = vld [vmem:[%s5002_s28 + $0xd0] sm:$0xf] }
  0x20   : > { %206 = vst [vmem:[%s5006_s29 + $0x30] sm:$0xf] %v205_v12  ;;  %v235_v27 = vld [vmem:[%s5002_s28 + $0xd8] sm:$0xf]  ;;  %v237_v28 = vld [vmem:[%s5002_s28 + $0xe0] sm:$0xf] }
  0x21   : > { %208 = vst [vmem:[%s5006_s29 + $0x34] sm:$0xf] %v207_v13  ;;  %v239_v29 = vld [vmem:[%s5002_s28 + $0xe8] sm:$0xf]  ;;  %v241_v30 = vld [vmem:[%s5002_s28 + $0xf0] sm:$0xf] }
  0x22   : > { %210 = vst [vmem:[%s5006_s29 + $0x38] sm:$0xf] %v209_v14  ;;  %v243_v31 = vld [vmem:[%s5002_s28 + $0xf8] sm:$0xf]  ;;  %v245_v32 = vld [vmem:[%s5002_s28 + $0x100] sm:$0xf] }
  0x23   : > { %212 = vst [vmem:[%s5006_s29 + $0x3c] sm:$0xf] %v211_v15  ;;  %v247_v33 = vld [vmem:[%s5002_s28 + $0x108] sm:$0xf]  ;;  %v249_v34 = vld [vmem:[%s5002_s28 + $0x110] sm:$0xf] }
  0x24   : > { %214 = vst [vmem:[%s5006_s29 + $0x40] sm:$0xf] %v213_v16  ;;  %v251_v35 = vld [vmem:[%s5002_s28 + $0x118] sm:$0xf]  ;;  %v253_v36 = vld [vmem:[%s5002_s28 + $0x120] sm:$0xf] }
  0x25   : > { %216 = vst [vmem:[%s5006_s29 + $0x44] sm:$0xf] %v215_v17  ;;  %v255_v37 = vld [vmem:[%s5002_s28 + $0x128] sm:$0xf]  ;;  %v257_v38 = vld [vmem:[%s5002_s28 + $0x130] sm:$0xf] }
  0x26   : > { %218 = vst [vmem:[%s5006_s29 + $0x48] sm:$0xf] %v217_v18  ;;  %v259_v39 = vld [vmem:[%s5002_s28 + $0x138] sm:$0xf]  ;;  %v261_v40 = vld [vmem:[%s5002_s28 + $0x140] sm:$0xf] }
  0x27   : > { %220 = vst [vmem:[%s5006_s29 + $0x4c] sm:$0xf] %v219_v19  ;;  %v263_v41 = vld [vmem:[%s5002_s28 + $0x148] sm:$0xf]  ;;  %v265_v42 = vld [vmem:[%s5002_s28 + $0x150] sm:$0xf] }
  0x28   : > { %222 = vst [vmem:[%s5006_s29 + $0x50] sm:$0xf] %v221_v20  ;;  %v267_v43 = vld [vmem:[%s5002_s28 + $0x158] sm:$0xf]  ;;  %v269_v44 = vld [vmem:[%s5002_s28 + $0x160] sm:$0xf] }
  0x29   : > { %224 = vst [vmem:[%s5006_s29 + $0x54] sm:$0xf] %v223_v21  ;;  %v271_v45 = vld [vmem:[%s5002_s28 + $0x168] sm:$0xf]  ;;  %v273_v46 = vld [vmem:[%s5002_s28 + $0x170] sm:$0xf] }
  0x2a   : > { %226 = vst [vmem:[%s5006_s29 + $0x58] sm:$0xf] %v225_v22  ;;  %v275_v47 = vld [vmem:[%s5002_s28 + $0x178] sm:$0xf]  ;;  %v277_v48 = vld [vmem:[%s5002_s28 + $0x180] sm:$0xf] }
  0x2b   : > { %228 = vst [vmem:[%s5006_s29 + $0x5c] sm:$0xf] %v227_v23  ;;  %v279_v49 = vld [vmem:[%s5002_s28 + $0x188] sm:$0xf]  ;;  %v281_v50 = vld [vmem:[%s5002_s28 + $0x190] sm:$0xf] }
  0x2c   : > { %230 = vst [vmem:[%s5006_s29 + $0x60] sm:$0xf] %v229_v24  ;;  %v283_v51 = vld [vmem:[%s5002_s28 + $0x198] sm:$0xf]  ;;  %v285_v52 = vld [vmem:[%s5002_s28 + $0x1a0] sm:$0xf] }
  0x2d   : > { %232 = vst [vmem:[%s5006_s29 + $0x64] sm:$0xf] %v231_v25  ;;  %v287_v53 = vld [vmem:[%s5002_s28 + $0x1a8] sm:$0xf]  ;;  %v289_v54 = vld [vmem:[%s5002_s28 + $0x1b0] sm:$0xf] }
  0x2e   : > { %234 = vst [vmem:[%s5006_s29 + $0x68] sm:$0xf] %v233_v26  ;;  %v291_v55 = vld [vmem:[%s5002_s28 + $0x1b8] sm:$0xf]  ;;  %v293_v56 = vld [vmem:[%s5002_s28 + $0x1c0] sm:$0xf] }
  0x2f   : > { %236 = vst [vmem:[%s5006_s29 + $0x6c] sm:$0xf] %v235_v27  ;;  %v295_v57 = vld [vmem:[%s5002_s28 + $0x1c8] sm:$0xf]  ;;  %v297_v58 = vld [vmem:[%s5002_s28 + $0x1d0] sm:$0xf] }
  0x30   : > { %238 = vst [vmem:[%s5006_s29 + $0x70] sm:$0xf] %v237_v28  ;;  %v299_v59 = vld [vmem:[%s5002_s28 + $0x1d8] sm:$0xf]  ;;  %v301_v60 = vld [vmem:[%s5002_s28 + $0x1e0] sm:$0xf] }
  0x31   : > { %240 = vst [vmem:[%s5006_s29 + $0x74] sm:$0xf] %v239_v29  ;;  %v303_v61 = vld [vmem:[%s5002_s28 + $0x1e8] sm:$0xf]  ;;  %v305_v62 = vld [vmem:[%s5002_s28 + $0x1f0] sm:$0xf] }
  0x32   : > { %242 = vst [vmem:[%s5006_s29 + $0x78] sm:$0xf] %v241_v30  ;;  %v307_v63 = vld [vmem:[%s5002_s28 + $0x1f8] sm:$0xf]  ;;  %v309_v0 = vld [vmem:[%s5002_s28 + $0x200] sm:$0xf] }
  0x33   : > { %244 = vst [vmem:[%s5006_s29 + $0x7c] sm:$0xf] %v243_v31  ;;  %v311_v1 = vld [vmem:[%s5002_s28 + $0x208] sm:$0xf]  ;;  %v313_v2 = vld [vmem:[%s5002_s28 + $0x210] sm:$0xf] }
  0x34   : > { %246 = vst [vmem:[%s5006_s29 + $0x80] sm:$0xf] %v245_v32  ;;  %v315_v3 = vld [vmem:[%s5002_s28 + $0x218] sm:$0xf]  ;;  %v317_v4 = vld [vmem:[%s5002_s28 + $0x220] sm:$0xf] }
  0x35   : > { %248 = vst [vmem:[%s5006_s29 + $0x84] sm:$0xf] %v247_v33  ;;  %v319_v5 = vld [vmem:[%s5002_s28 + $0x228] sm:$0xf]  ;;  %v321_v6 = vld [vmem:[%s5002_s28 + $0x230] sm:$0xf] }
  0x36   : > { %250 = vst [vmem:[%s5006_s29 + $0x88] sm:$0xf] %v249_v34  ;;  %v323_v7 = vld [vmem:[%s5002_s28 + $0x238] sm:$0xf]  ;;  %v325_v8 = vld [vmem:[%s5002_s28 + $0x240] sm:$0xf] }
  0x37   : > { %252 = vst [vmem:[%s5006_s29 + $0x8c] sm:$0xf] %v251_v35  ;;  %v327_v9 = vld [vmem:[%s5002_s28 + $0x248] sm:$0xf]  ;;  %v329_v10 = vld [vmem:[%s5002_s28 + $0x250] sm:$0xf] }
  0x38   : > { %254 = vst [vmem:[%s5006_s29 + $0x90] sm:$0xf] %v253_v36  ;;  %v331_v11 = vld [vmem:[%s5002_s28 + $0x258] sm:$0xf]  ;;  %v333_v12 = vld [vmem:[%s5002_s28 + $0x260] sm:$0xf] }
  0x39   : > { %256 = vst [vmem:[%s5006_s29 + $0x94] sm:$0xf] %v255_v37  ;;  %v335_v13 = vld [vmem:[%s5002_s28 + $0x268] sm:$0xf]  ;;  %v337_v14 = vld [vmem:[%s5002_s28 + $0x270] sm:$0xf] }
  0x3a   : > { %258 = vst [vmem:[%s5006_s29 + $0x98] sm:$0xf] %v257_v38  ;;  %v339_v15 = vld [vmem:[%s5002_s28 + $0x278] sm:$0xf]  ;;  %v341_v16 = vld [vmem:[%s5002_s28 + $0x280] sm:$0xf] }
  0x3b   : > { %260 = vst [vmem:[%s5006_s29 + $0x9c] sm:$0xf] %v259_v39  ;;  %v343_v17 = vld [vmem:[%s5002_s28 + $0x288] sm:$0xf]  ;;  %v345_v18 = vld [vmem:[%s5002_s28 + $0x290] sm:$0xf] }
  0x3c   : > { %262 = vst [vmem:[%s5006_s29 + $0xa0] sm:$0xf] %v261_v40  ;;  %v347_v19 = vld [vmem:[%s5002_s28 + $0x298] sm:$0xf]  ;;  %v349_v20 = vld [vmem:[%s5002_s28 + $0x2a0] sm:$0xf] }
  0x3d   : > { %264 = vst [vmem:[%s5006_s29 + $0xa4] sm:$0xf] %v263_v41  ;;  %v351_v21 = vld [vmem:[%s5002_s28 + $0x2a8] sm:$0xf]  ;;  %v353_v22 = vld [vmem:[%s5002_s28 + $0x2b0] sm:$0xf] }
  0x3e   : > { %266 = vst [vmem:[%s5006_s29 + $0xa8] sm:$0xf] %v265_v42  ;;  %v355_v23 = vld [vmem:[%s5002_s28 + $0x2b8] sm:$0xf]  ;;  %v357_v24 = vld [vmem:[%s5002_s28 + $0x2c0] sm:$0xf] }
  0x3f   : > { %268 = vst [vmem:[%s5006_s29 + $0xac] sm:$0xf] %v267_v43  ;;  %v359_v25 = vld [vmem:[%s5002_s28 + $0x2c8] sm:$0xf]  ;;  %v361_v26 = vld [vmem:[%s5002_s28 + $0x2d0] sm:$0xf] }
  0x40   : > { %270 = vst [vmem:[%s5006_s29 + $0xb0] sm:$0xf] %v269_v44  ;;  %v363_v27 = vld [vmem:[%s5002_s28 + $0x2d8] sm:$0xf]  ;;  %v365_v28 = vld [vmem:[%s5002_s28 + $0x2e0] sm:$0xf] }
  0x41   : > { %272 = vst [vmem:[%s5006_s29 + $0xb4] sm:$0xf] %v271_v45  ;;  %v367_v29 = vld [vmem:[%s5002_s28 + $0x2e8] sm:$0xf]  ;;  %v369_v30 = vld [vmem:[%s5002_s28 + $0x2f0] sm:$0xf] }
  0x42   : > { %274 = vst [vmem:[%s5006_s29 + $0xb8] sm:$0xf] %v273_v46  ;;  %v371_v31 = vld [vmem:[%s5002_s28 + $0x2f8] sm:$0xf]  ;;  %v373_v32 = vld [vmem:[%s5002_s28 + $0x300] sm:$0xf] }
  0x43   : > { %276 = vst [vmem:[%s5006_s29 + $0xbc] sm:$0xf] %v275_v47  ;;  %v375_v33 = vld [vmem:[%s5002_s28 + $0x308] sm:$0xf]  ;;  %v377_v34 = vld [vmem:[%s5002_s28 + $0x310] sm:$0xf] }
  0x44   : > { %278 = vst [vmem:[%s5006_s29 + $0xc0] sm:$0xf] %v277_v48  ;;  %v379_v35 = vld [vmem:[%s5002_s28 + $0x318] sm:$0xf]  ;;  %v381_v36 = vld [vmem:[%s5002_s28 + $0x320] sm:$0xf] }
  0x45   : > { %280 = vst [vmem:[%s5006_s29 + $0xc4] sm:$0xf] %v279_v49  ;;  %v383_v37 = vld [vmem:[%s5002_s28 + $0x328] sm:$0xf]  ;;  %v385_v38 = vld [vmem:[%s5002_s28 + $0x330] sm:$0xf] }
  0x46   : > { %282 = vst [vmem:[%s5006_s29 + $0xc8] sm:$0xf] %v281_v50  ;;  %v387_v39 = vld [vmem:[%s5002_s28 + $0x338] sm:$0xf]  ;;  %v389_v40 = vld [vmem:[%s5002_s28 + $0x340] sm:$0xf] }
  0x47   : > { %284 = vst [vmem:[%s5006_s29 + $0xcc] sm:$0xf] %v283_v51  ;;  %v391_v41 = vld [vmem:[%s5002_s28 + $0x348] sm:$0xf]  ;;  %v393_v42 = vld [vmem:[%s5002_s28 + $0x350] sm:$0xf] }
  0x48   : > { %286 = vst [vmem:[%s5006_s29 + $0xd0] sm:$0xf] %v285_v52  ;;  %v395_v43 = vld [vmem:[%s5002_s28 + $0x358] sm:$0xf]  ;;  %v397_v44 = vld [vmem:[%s5002_s28 + $0x360] sm:$0xf] }
  0x49   : > { %288 = vst [vmem:[%s5006_s29 + $0xd4] sm:$0xf] %v287_v53  ;;  %v399_v45 = vld [vmem:[%s5002_s28 + $0x368] sm:$0xf]  ;;  %v401_v46 = vld [vmem:[%s5002_s28 + $0x370] sm:$0xf] }
  0x4a   : > { %290 = vst [vmem:[%s5006_s29 + $0xd8] sm:$0xf] %v289_v54  ;;  %v403_v47 = vld [vmem:[%s5002_s28 + $0x378] sm:$0xf]  ;;  %v405_v48 = vld [vmem:[%s5002_s28 + $0x380] sm:$0xf] }
  0x4b   : > { %292 = vst [vmem:[%s5006_s29 + $0xdc] sm:$0xf] %v291_v55  ;;  %v407_v49 = vld [vmem:[%s5002_s28 + $0x388] sm:$0xf]  ;;  %v409_v50 = vld [vmem:[%s5002_s28 + $0x390] sm:$0xf] }
  0x4c   : > { %294 = vst [vmem:[%s5006_s29 + $0xe0] sm:$0xf] %v293_v56  ;;  %v411_v51 = vld [vmem:[%s5002_s28 + $0x398] sm:$0xf]  ;;  %v413_v52 = vld [vmem:[%s5002_s28 + $0x3a0] sm:$0xf] }
  0x4d   : > { %296 = vst [vmem:[%s5006_s29 + $0xe4] sm:$0xf] %v295_v57  ;;  %v415_v53 = vld [vmem:[%s5002_s28 + $0x3a8] sm:$0xf]  ;;  %v417_v54 = vld [vmem:[%s5002_s28 + $0x3b0] sm:$0xf] }
  0x4e   : > { %298 = vst [vmem:[%s5006_s29 + $0xe8] sm:$0xf] %v297_v58  ;;  %v419_v55 = vld [vmem:[%s5002_s28 + $0x3b8] sm:$0xf]  ;;  %v421_v56 = vld [vmem:[%s5002_s28 + $0x3c0] sm:$0xf] }
  0x4f   : > { %300 = vst [vmem:[%s5006_s29 + $0xec] sm:$0xf] %v299_v59  ;;  %v423_v57 = vld [vmem:[%s5002_s28 + $0x3c8] sm:$0xf]  ;;  %v425_v58 = vld [vmem:[%s5002_s28 + $0x3d0] sm:$0xf] }
  0x50   : > { %302 = vst [vmem:[%s5006_s29 + $0xf0] sm:$0xf] %v301_v60  ;;  %v427_v59 = vld [vmem:[%s5002_s28 + $0x3d8] sm:$0xf]  ;;  %v429_v60 = vld [vmem:[%s5002_s28 + $0x3e0] sm:$0xf] }
  0x51   : > { %304 = vst [vmem:[%s5006_s29 + $0xf4] sm:$0xf] %v303_v61  ;;  %v431_v61 = vld [vmem:[%s5002_s28 + $0x3e8] sm:$0xf] }
  0x52   : > { %306 = vst [vmem:[%s5006_s29 + $0xf8] sm:$0xf] %v305_v62  ;;  %v433_v62 = vld [vmem:[%s5002_s28 + $0x3f0] sm:$0xf] }
  0x53   : > { %308 = vst [vmem:[%s5006_s29 + $0xfc] sm:$0xf] %v307_v63  ;;  %v435_v63 = vld [vmem:[%s5002_s28 + $0x3f8] sm:$0xf] }
  0x54   : > { %310 = vst [vmem:[%s5006_s29 + $0x100] sm:$0xf] %v309_v0  ;;  %v437_v0 = vld [vmem:[%s5002_s28 + $0x400] sm:$0xf] }
  0x55   : > { %312 = vst [vmem:[%s5006_s29 + $0x104] sm:$0xf] %v311_v1  ;;  %v439_v1 = vld [vmem:[%s5002_s28 + $0x408] sm:$0xf] }
  0x56   : > { %314 = vst [vmem:[%s5006_s29 + $0x108] sm:$0xf] %v313_v2  ;;  %v441_v2 = vld [vmem:[%s5002_s28 + $0x410] sm:$0xf] }
  0x57   : > { %316 = vst [vmem:[%s5006_s29 + $0x10c] sm:$0xf] %v315_v3  ;;  %v443_v3 = vld [vmem:[%s5002_s28 + $0x418] sm:$0xf] }
  0x58   : > { %318 = vst [vmem:[%s5006_s29 + $0x110] sm:$0xf] %v317_v4  ;;  %v445_v4 = vld [vmem:[%s5002_s28 + $0x420] sm:$0xf] }
  0x59   : > { %320 = vst [vmem:[%s5006_s29 + $0x114] sm:$0xf] %v319_v5  ;;  %v447_v5 = vld [vmem:[%s5002_s28 + $0x428] sm:$0xf] }
  0x5a   : > { %322 = vst [vmem:[%s5006_s29 + $0x118] sm:$0xf] %v321_v6  ;;  %v449_v6 = vld [vmem:[%s5002_s28 + $0x430] sm:$0xf] }
  0x5b   : > { %324 = vst [vmem:[%s5006_s29 + $0x11c] sm:$0xf] %v323_v7  ;;  %v451_v7 = vld [vmem:[%s5002_s28 + $0x438] sm:$0xf] }
  0x5c   : > { %326 = vst [vmem:[%s5006_s29 + $0x120] sm:$0xf] %v325_v8  ;;  %v453_v8 = vld [vmem:[%s5002_s28 + $0x440] sm:$0xf] }
  0x5d   : > { %328 = vst [vmem:[%s5006_s29 + $0x124] sm:$0xf] %v327_v9  ;;  %v455_v9 = vld [vmem:[%s5002_s28 + $0x448] sm:$0xf] }
  0x5e   : > { %330 = vst [vmem:[%s5006_s29 + $0x128] sm:$0xf] %v329_v10  ;;  %v457_v10 = vld [vmem:[%s5002_s28 + $0x450] sm:$0xf] }
  0x5f   : > { %332 = vst [vmem:[%s5006_s29 + $0x12c] sm:$0xf] %v331_v11  ;;  %v459_v11 = vld [vmem:[%s5002_s28 + $0x458] sm:$0xf] }
  0x60   : > { %334 = vst [vmem:[%s5006_s29 + $0x130] sm:$0xf] %v333_v12  ;;  %v461_v12 = vld [vmem:[%s5002_s28 + $0x460] sm:$0xf] }
  0x61   : > { %336 = vst [vmem:[%s5006_s29 + $0x134] sm:$0xf] %v335_v13  ;;  %v463_v13 = vld [vmem:[%s5002_s28 + $0x468] sm:$0xf] }
  0x62   : > { %338 = vst [vmem:[%s5006_s29 + $0x138] sm:$0xf] %v337_v14  ;;  %v465_v14 = vld [vmem:[%s5002_s28 + $0x470] sm:$0xf] }
  0x63   : > { %340 = vst [vmem:[%s5006_s29 + $0x13c] sm:$0xf] %v339_v15  ;;  %v467_v15 = vld [vmem:[%s5002_s28 + $0x478] sm:$0xf] }
  0x64   : > { %342 = vst [vmem:[%s5006_s29 + $0x140] sm:$0xf] %v341_v16  ;;  %v469_v16 = vld [vmem:[%s5002_s28 + $0x480] sm:$0xf] }
  0x65   : > { %344 = vst [vmem:[%s5006_s29 + $0x144] sm:$0xf] %v343_v17  ;;  %v471_v17 = vld [vmem:[%s5002_s28 + $0x488] sm:$0xf] }
  0x66   : > { %346 = vst [vmem:[%s5006_s29 + $0x148] sm:$0xf] %v345_v18  ;;  %v473_v18 = vld [vmem:[%s5002_s28 + $0x490] sm:$0xf] }
  0x67   : > { %348 = vst [vmem:[%s5006_s29 + $0x14c] sm:$0xf] %v347_v19  ;;  %v475_v19 = vld [vmem:[%s5002_s28 + $0x498] sm:$0xf] }
  0x68   : > { %350 = vst [vmem:[%s5006_s29 + $0x150] sm:$0xf] %v349_v20  ;;  %v477_v20 = vld [vmem:[%s5002_s28 + $0x4a0] sm:$0xf] }
  0x69   : > { %352 = vst [vmem:[%s5006_s29 + $0x154] sm:$0xf] %v351_v21  ;;  %v479_v21 = vld [vmem:[%s5002_s28 + $0x4a8] sm:$0xf] }
  0x6a   : > { %354 = vst [vmem:[%s5006_s29 + $0x158] sm:$0xf] %v353_v22  ;;  %v481_v22 = vld [vmem:[%s5002_s28 + $0x4b0] sm:$0xf] }
  0x6b   : > { %356 = vst [vmem:[%s5006_s29 + $0x15c] sm:$0xf] %v355_v23  ;;  %v483_v23 = vld [vmem:[%s5002_s28 + $0x4b8] sm:$0xf] }
  0x6c   : > { %358 = vst [vmem:[%s5006_s29 + $0x160] sm:$0xf] %v357_v24  ;;  %v485_v24 = vld [vmem:[%s5002_s28 + $0x4c0] sm:$0xf] }
  0x6d   : > { %360 = vst [vmem:[%s5006_s29 + $0x164] sm:$0xf] %v359_v25  ;;  %v487_v25 = vld [vmem:[%s5002_s28 + $0x4c8] sm:$0xf] }
  0x6e   : > { %362 = vst [vmem:[%s5006_s29 + $0x168] sm:$0xf] %v361_v26  ;;  %v489_v26 = vld [vmem:[%s5002_s28 + $0x4d0] sm:$0xf] }
  0x6f   : > { %364 = vst [vmem:[%s5006_s29 + $0x16c] sm:$0xf] %v363_v27  ;;  %v491_v27 = vld [vmem:[%s5002_s28 + $0x4d8] sm:$0xf] }
  0x70   : > { %366 = vst [vmem:[%s5006_s29 + $0x170] sm:$0xf] %v365_v28  ;;  %v493_v28 = vld [vmem:[%s5002_s28 + $0x4e0] sm:$0xf] }
  0x71   : > { %368 = vst [vmem:[%s5006_s29 + $0x174] sm:$0xf] %v367_v29  ;;  %v495_v29 = vld [vmem:[%s5002_s28 + $0x4e8] sm:$0xf] }
  0x72   : > { %370 = vst [vmem:[%s5006_s29 + $0x178] sm:$0xf] %v369_v30  ;;  %v497_v30 = vld [vmem:[%s5002_s28 + $0x4f0] sm:$0xf] }
  0x73   : > { %372 = vst [vmem:[%s5006_s29 + $0x17c] sm:$0xf] %v371_v31  ;;  %v499_v31 = vld [vmem:[%s5002_s28 + $0x4f8] sm:$0xf] }
  0x74   : > { %374 = vst [vmem:[%s5006_s29 + $0x180] sm:$0xf] %v373_v32  ;;  %v501_v32 = vld [vmem:[%s5002_s28 + $0x500] sm:$0xf] }
  0x75   : > { %376 = vst [vmem:[%s5006_s29 + $0x184] sm:$0xf] %v375_v33  ;;  %v503_v33 = vld [vmem:[%s5002_s28 + $0x508] sm:$0xf] }
  0x76   : > { %378 = vst [vmem:[%s5006_s29 + $0x188] sm:$0xf] %v377_v34  ;;  %v505_v34 = vld [vmem:[%s5002_s28 + $0x510] sm:$0xf] }
  0x77   : > { %380 = vst [vmem:[%s5006_s29 + $0x18c] sm:$0xf] %v379_v35  ;;  %v507_v35 = vld [vmem:[%s5002_s28 + $0x518] sm:$0xf] }
  0x78   : > { %382 = vst [vmem:[%s5006_s29 + $0x190] sm:$0xf] %v381_v36  ;;  %v509_v36 = vld [vmem:[%s5002_s28 + $0x520] sm:$0xf] }
  0x79   : > { %384 = vst [vmem:[%s5006_s29 + $0x194] sm:$0xf] %v383_v37  ;;  %v511_v37 = vld [vmem:[%s5002_s28 + $0x528] sm:$0xf] }
  0x7a   : > { %386 = vst [vmem:[%s5006_s29 + $0x198] sm:$0xf] %v385_v38  ;;  %v513_v38 = vld [vmem:[%s5002_s28 + $0x530] sm:$0xf] }
  0x7b   : > { %388 = vst [vmem:[%s5006_s29 + $0x19c] sm:$0xf] %v387_v39  ;;  %v515_v39 = vld [vmem:[%s5002_s28 + $0x538] sm:$0xf] }
  0x7c   : > { %390 = vst [vmem:[%s5006_s29 + $0x1a0] sm:$0xf] %v389_v40  ;;  %v517_v40 = vld [vmem:[%s5002_s28 + $0x540] sm:$0xf] }
  0x7d   : > { %392 = vst [vmem:[%s5006_s29 + $0x1a4] sm:$0xf] %v391_v41  ;;  %v519_v41 = vld [vmem:[%s5002_s28 + $0x548] sm:$0xf] }
  0x7e   : > { %394 = vst [vmem:[%s5006_s29 + $0x1a8] sm:$0xf] %v393_v42  ;;  %v521_v42 = vld [vmem:[%s5002_s28 + $0x550] sm:$0xf] }
  0x7f   : > { %396 = vst [vmem:[%s5006_s29 + $0x1ac] sm:$0xf] %v395_v43  ;;  %v523_v43 = vld [vmem:[%s5002_s28 + $0x558] sm:$0xf] }
  0x80   : > { %398 = vst [vmem:[%s5006_s29 + $0x1b0] sm:$0xf] %v397_v44  ;;  %v525_v44 = vld [vmem:[%s5002_s28 + $0x560] sm:$0xf] }
  0x81   : > { %400 = vst [vmem:[%s5006_s29 + $0x1b4] sm:$0xf] %v399_v45  ;;  %v527_v45 = vld [vmem:[%s5002_s28 + $0x568] sm:$0xf] }
  0x82   : > { %402 = vst [vmem:[%s5006_s29 + $0x1b8] sm:$0xf] %v401_v46  ;;  %v529_v46 = vld [vmem:[%s5002_s28 + $0x570] sm:$0xf] }
  0x83   : > { %404 = vst [vmem:[%s5006_s29 + $0x1bc] sm:$0xf] %v403_v47  ;;  %v531_v47 = vld [vmem:[%s5002_s28 + $0x578] sm:$0xf] }
  0x84   : > { %406 = vst [vmem:[%s5006_s29 + $0x1c0] sm:$0xf] %v405_v48  ;;  %v533_v48 = vld [vmem:[%s5002_s28 + $0x580] sm:$0xf] }
  0x85   : > { %408 = vst [vmem:[%s5006_s29 + $0x1c4] sm:$0xf] %v407_v49  ;;  %v535_v49 = vld [vmem:[%s5002_s28 + $0x588] sm:$0xf] }
  0x86   : > { %410 = vst [vmem:[%s5006_s29 + $0x1c8] sm:$0xf] %v409_v50  ;;  %v537_v50 = vld [vmem:[%s5002_s28 + $0x590] sm:$0xf] }
  0x87   : > { %412 = vst [vmem:[%s5006_s29 + $0x1cc] sm:$0xf] %v411_v51  ;;  %v539_v51 = vld [vmem:[%s5002_s28 + $0x598] sm:$0xf] }
  0x88   : > { %414 = vst [vmem:[%s5006_s29 + $0x1d0] sm:$0xf] %v413_v52  ;;  %v541_v52 = vld [vmem:[%s5002_s28 + $0x5a0] sm:$0xf] }
  0x89   : > { %416 = vst [vmem:[%s5006_s29 + $0x1d4] sm:$0xf] %v415_v53  ;;  %v543_v53 = vld [vmem:[%s5002_s28 + $0x5a8] sm:$0xf] }
  0x8a   : > { %418 = vst [vmem:[%s5006_s29 + $0x1d8] sm:$0xf] %v417_v54  ;;  %v545_v54 = vld [vmem:[%s5002_s28 + $0x5b0] sm:$0xf] }
  0x8b   : > { %420 = vst [vmem:[%s5006_s29 + $0x1dc] sm:$0xf] %v419_v55  ;;  %v547_v55 = vld [vmem:[%s5002_s28 + $0x5b8] sm:$0xf] }
  0x8c   : > { %422 = vst [vmem:[%s5006_s29 + $0x1e0] sm:$0xf] %v421_v56  ;;  %v549_v56 = vld [vmem:[%s5002_s28 + $0x5c0] sm:$0xf] }
  0x8d   : > { %424 = vst [vmem:[%s5006_s29 + $0x1e4] sm:$0xf] %v423_v57  ;;  %v551_v57 = vld [vmem:[%s5002_s28 + $0x5c8] sm:$0xf] }
  0x8e   : > { %426 = vst [vmem:[%s5006_s29 + $0x1e8] sm:$0xf] %v425_v58  ;;  %v553_v58 = vld [vmem:[%s5002_s28 + $0x5d0] sm:$0xf] }
  0x8f   : > { %428 = vst [vmem:[%s5006_s29 + $0x1ec] sm:$0xf] %v427_v59  ;;  %v555_v59 = vld [vmem:[%s5002_s28 + $0x5d8] sm:$0xf] }
  0x90   : > { %430 = vst [vmem:[%s5006_s29 + $0x1f0] sm:$0xf] %v429_v60  ;;  %v557_v60 = vld [vmem:[%s5002_s28 + $0x5e0] sm:$0xf] }
  0x91   : > { %432 = vst [vmem:[%s5006_s29 + $0x1f4] sm:$0xf] %v431_v61  ;;  %v559_v61 = vld [vmem:[%s5002_s28 + $0x5e8] sm:$0xf] }
  0x92   : > { %434 = vst [vmem:[%s5006_s29 + $0x1f8] sm:$0xf] %v433_v62  ;;  %v561_v62 = vld [vmem:[%s5002_s28 + $0x5f0] sm:$0xf] }
  0x93   : > { %436 = vst [vmem:[%s5006_s29 + $0x1fc] sm:$0xf] %v435_v63  ;;  %v563_v63 = vld [vmem:[%s5002_s28 + $0x5f8] sm:$0xf] }
  0x94   : > { %438 = vst [vmem:[%s5006_s29 + $0x200] sm:$0xf] %v437_v0  ;;  %v565_v0 = vld [vmem:[%s5002_s28 + $0x600] sm:$0xf] }
  0x95   : > { %440 = vst [vmem:[%s5006_s29 + $0x204] sm:$0xf] %v439_v1  ;;  %v567_v1 = vld [vmem:[%s5002_s28 + $0x608] sm:$0xf] }
  0x96   : > { %442 = vst [vmem:[%s5006_s29 + $0x208] sm:$0xf] %v441_v2  ;;  %v569_v2 = vld [vmem:[%s5002_s28 + $0x610] sm:$0xf] }
  0x97   : > { %444 = vst [vmem:[%s5006_s29 + $0x20c] sm:$0xf] %v443_v3  ;;  %v571_v3 = vld [vmem:[%s5002_s28 + $0x618] sm:$0xf] }
  0x98   : > { %446 = vst [vmem:[%s5006_s29 + $0x210] sm:$0xf] %v445_v4  ;;  %v573_v4 = vld [vmem:[%s5002_s28 + $0x620] sm:$0xf] }
  0x99   : > { %448 = vst [vmem:[%s5006_s29 + $0x214] sm:$0xf] %v447_v5  ;;  %v575_v5 = vld [vmem:[%s5002_s28 + $0x628] sm:$0xf] }
  0x9a   : > { %450 = vst [vmem:[%s5006_s29 + $0x218] sm:$0xf] %v449_v6  ;;  %v577_v6 = vld [vmem:[%s5002_s28 + $0x630] sm:$0xf] }
  0x9b   : > { %452 = vst [vmem:[%s5006_s29 + $0x21c] sm:$0xf] %v451_v7  ;;  %v579_v7 = vld [vmem:[%s5002_s28 + $0x638] sm:$0xf] }
  0x9c   : > { %454 = vst [vmem:[%s5006_s29 + $0x220] sm:$0xf] %v453_v8  ;;  %v581_v8 = vld [vmem:[%s5002_s28 + $0x640] sm:$0xf] }
  0x9d   : > { %456 = vst [vmem:[%s5006_s29 + $0x224] sm:$0xf] %v455_v9  ;;  %v583_v9 = vld [vmem:[%s5002_s28 + $0x648] sm:$0xf] }
  0x9e   : > { %458 = vst [vmem:[%s5006_s29 + $0x228] sm:$0xf] %v457_v10  ;;  %v585_v10 = vld [vmem:[%s5002_s28 + $0x650] sm:$0xf] }
  0x9f   : > { %460 = vst [vmem:[%s5006_s29 + $0x22c] sm:$0xf] %v459_v11  ;;  %v587_v11 = vld [vmem:[%s5002_s28 + $0x658] sm:$0xf] }
  0xa0   : > { %462 = vst [vmem:[%s5006_s29 + $0x230] sm:$0xf] %v461_v12  ;;  %v589_v12 = vld [vmem:[%s5002_s28 + $0x660] sm:$0xf] }
  0xa1   : > { %464 = vst [vmem:[%s5006_s29 + $0x234] sm:$0xf] %v463_v13  ;;  %v591_v13 = vld [vmem:[%s5002_s28 + $0x668] sm:$0xf] }
  0xa2   : > { %466 = vst [vmem:[%s5006_s29 + $0x238] sm:$0xf] %v465_v14  ;;  %v593_v14 = vld [vmem:[%s5002_s28 + $0x670] sm:$0xf] }
  0xa3   : > { %468 = vst [vmem:[%s5006_s29 + $0x23c] sm:$0xf] %v467_v15  ;;  %v595_v15 = vld [vmem:[%s5002_s28 + $0x678] sm:$0xf] }
  0xa4   : > { %470 = vst [vmem:[%s5006_s29 + $0x240] sm:$0xf] %v469_v16  ;;  %v597_v16 = vld [vmem:[%s5002_s28 + $0x680] sm:$0xf] }
  0xa5   : > { %472 = vst [vmem:[%s5006_s29 + $0x244] sm:$0xf] %v471_v17  ;;  %v599_v17 = vld [vmem:[%s5002_s28 + $0x688] sm:$0xf] }
  0xa6   : > { %474 = vst [vmem:[%s5006_s29 + $0x248] sm:$0xf] %v473_v18  ;;  %v601_v18 = vld [vmem:[%s5002_s28 + $0x690] sm:$0xf] }
  0xa7   : > { %476 = vst [vmem:[%s5006_s29 + $0x24c] sm:$0xf] %v475_v19  ;;  %v603_v19 = vld [vmem:[%s5002_s28 + $0x698] sm:$0xf] }
  0xa8   : > { %478 = vst [vmem:[%s5006_s29 + $0x250] sm:$0xf] %v477_v20  ;;  %v605_v20 = vld [vmem:[%s5002_s28 + $0x6a0] sm:$0xf] }
  0xa9   : > { %480 = vst [vmem:[%s5006_s29 + $0x254] sm:$0xf] %v479_v21  ;;  %v607_v21 = vld [vmem:[%s5002_s28 + $0x6a8] sm:$0xf] }
  0xaa   : > { %482 = vst [vmem:[%s5006_s29 + $0x258] sm:$0xf] %v481_v22  ;;  %v609_v22 = vld [vmem:[%s5002_s28 + $0x6b0] sm:$0xf] }
  0xab   : > { %484 = vst [vmem:[%s5006_s29 + $0x25c] sm:$0xf] %v483_v23  ;;  %v611_v23 = vld [vmem:[%s5002_s28 + $0x6b8] sm:$0xf] }
  0xac   : > { %486 = vst [vmem:[%s5006_s29 + $0x260] sm:$0xf] %v485_v24  ;;  %v613_v24 = vld [vmem:[%s5002_s28 + $0x6c0] sm:$0xf] }
  0xad   : > { %488 = vst [vmem:[%s5006_s29 + $0x264] sm:$0xf] %v487_v25  ;;  %v615_v25 = vld [vmem:[%s5002_s28 + $0x6c8] sm:$0xf] }
  0xae   : > { %490 = vst [vmem:[%s5006_s29 + $0x268] sm:$0xf] %v489_v26  ;;  %v617_v26 = vld [vmem:[%s5002_s28 + $0x6d0] sm:$0xf] }
  0xaf   : > { %492 = vst [vmem:[%s5006_s29 + $0x26c] sm:$0xf] %v491_v27  ;;  %v619_v27 = vld [vmem:[%s5002_s28 + $0x6d8] sm:$0xf] }
  0xb0   : > { %494 = vst [vmem:[%s5006_s29 + $0x270] sm:$0xf] %v493_v28  ;;  %v621_v28 = vld [vmem:[%s5002_s28 + $0x6e0] sm:$0xf] }
  0xb1   : > { %496 = vst [vmem:[%s5006_s29 + $0x274] sm:$0xf] %v495_v29  ;;  %v623_v29 = vld [vmem:[%s5002_s28 + $0x6e8] sm:$0xf] }
  0xb2   : > { %498 = vst [vmem:[%s5006_s29 + $0x278] sm:$0xf] %v497_v30  ;;  %v625_v30 = vld [vmem:[%s5002_s28 + $0x6f0] sm:$0xf] }
  0xb3   : > { %500 = vst [vmem:[%s5006_s29 + $0x27c] sm:$0xf] %v499_v31  ;;  %v627_v31 = vld [vmem:[%s5002_s28 + $0x6f8] sm:$0xf] }
  0xb4   : > { %502 = vst [vmem:[%s5006_s29 + $0x280] sm:$0xf] %v501_v32  ;;  %v629_v32 = vld [vmem:[%s5002_s28 + $0x700] sm:$0xf] }
  0xb5   : > { %504 = vst [vmem:[%s5006_s29 + $0x284] sm:$0xf] %v503_v33  ;;  %v631_v33 = vld [vmem:[%s5002_s28 + $0x708] sm:$0xf] }
  0xb6   : > { %506 = vst [vmem:[%s5006_s29 + $0x288] sm:$0xf] %v505_v34  ;;  %v633_v34 = vld [vmem:[%s5002_s28 + $0x710] sm:$0xf] }
  0xb7   : > { %508 = vst [vmem:[%s5006_s29 + $0x28c] sm:$0xf] %v507_v35  ;;  %v635_v35 = vld [vmem:[%s5002_s28 + $0x718] sm:$0xf] }
  0xb8   : > { %510 = vst [vmem:[%s5006_s29 + $0x290] sm:$0xf] %v509_v36  ;;  %v637_v36 = vld [vmem:[%s5002_s28 + $0x720] sm:$0xf] }
  0xb9   : > { %512 = vst [vmem:[%s5006_s29 + $0x294] sm:$0xf] %v511_v37  ;;  %v639_v37 = vld [vmem:[%s5002_s28 + $0x728] sm:$0xf] }
  0xba   : > { %514 = vst [vmem:[%s5006_s29 + $0x298] sm:$0xf] %v513_v38  ;;  %v641_v38 = vld [vmem:[%s5002_s28 + $0x730] sm:$0xf] }
  0xbb   : > { %516 = vst [vmem:[%s5006_s29 + $0x29c] sm:$0xf] %v515_v39  ;;  %v643_v39 = vld [vmem:[%s5002_s28 + $0x738] sm:$0xf] }
  0xbc   : > { %518 = vst [vmem:[%s5006_s29 + $0x2a0] sm:$0xf] %v517_v40  ;;  %v645_v40 = vld [vmem:[%s5002_s28 + $0x740] sm:$0xf] }
  0xbd   : > { %520 = vst [vmem:[%s5006_s29 + $0x2a4] sm:$0xf] %v519_v41  ;;  %v647_v41 = vld [vmem:[%s5002_s28 + $0x748] sm:$0xf] }
  0xbe   : > { %522 = vst [vmem:[%s5006_s29 + $0x2a8] sm:$0xf] %v521_v42  ;;  %v649_v42 = vld [vmem:[%s5002_s28 + $0x750] sm:$0xf] }
  0xbf   : > { %524 = vst [vmem:[%s5006_s29 + $0x2ac] sm:$0xf] %v523_v43  ;;  %v651_v43 = vld [vmem:[%s5002_s28 + $0x758] sm:$0xf] }
  0xc0   : > { %526 = vst [vmem:[%s5006_s29 + $0x2b0] sm:$0xf] %v525_v44  ;;  %v653_v44 = vld [vmem:[%s5002_s28 + $0x760] sm:$0xf] }
  0xc1   : > { %528 = vst [vmem:[%s5006_s29 + $0x2b4] sm:$0xf] %v527_v45  ;;  %v655_v45 = vld [vmem:[%s5002_s28 + $0x768] sm:$0xf] }
  0xc2   : > { %530 = vst [vmem:[%s5006_s29 + $0x2b8] sm:$0xf] %v529_v46  ;;  %v657_v46 = vld [vmem:[%s5002_s28 + $0x770] sm:$0xf] }
  0xc3   : > { %532 = vst [vmem:[%s5006_s29 + $0x2bc] sm:$0xf] %v531_v47  ;;  %v659_v47 = vld [vmem:[%s5002_s28 + $0x778] sm:$0xf] }
  0xc4   : > { %534 = vst [vmem:[%s5006_s29 + $0x2c0] sm:$0xf] %v533_v48  ;;  %v661_v48 = vld [vmem:[%s5002_s28 + $0x780] sm:$0xf] }
  0xc5   : > { %536 = vst [vmem:[%s5006_s29 + $0x2c4] sm:$0xf] %v535_v49  ;;  %v663_v49 = vld [vmem:[%s5002_s28 + $0x788] sm:$0xf] }
  0xc6   : > { %538 = vst [vmem:[%s5006_s29 + $0x2c8] sm:$0xf] %v537_v50  ;;  %v665_v50 = vld [vmem:[%s5002_s28 + $0x790] sm:$0xf] }
  0xc7   : > { %540 = vst [vmem:[%s5006_s29 + $0x2cc] sm:$0xf] %v539_v51  ;;  %v667_v51 = vld [vmem:[%s5002_s28 + $0x798] sm:$0xf] }
  0xc8   : > { %542 = vst [vmem:[%s5006_s29 + $0x2d0] sm:$0xf] %v541_v52  ;;  %v669_v52 = vld [vmem:[%s5002_s28 + $0x7a0] sm:$0xf] }
  0xc9   : > { %544 = vst [vmem:[%s5006_s29 + $0x2d4] sm:$0xf] %v543_v53  ;;  %v671_v53 = vld [vmem:[%s5002_s28 + $0x7a8] sm:$0xf] }
  0xca   : > { %546 = vst [vmem:[%s5006_s29 + $0x2d8] sm:$0xf] %v545_v54  ;;  %v673_v54 = vld [vmem:[%s5002_s28 + $0x7b0] sm:$0xf] }
  0xcb   : > { %548 = vst [vmem:[%s5006_s29 + $0x2dc] sm:$0xf] %v547_v55  ;;  %v675_v55 = vld [vmem:[%s5002_s28 + $0x7b8] sm:$0xf] }
  0xcc   : > { %550 = vst [vmem:[%s5006_s29 + $0x2e0] sm:$0xf] %v549_v56  ;;  %v677_v56 = vld [vmem:[%s5002_s28 + $0x7c0] sm:$0xf] }
  0xcd   : > { %552 = vst [vmem:[%s5006_s29 + $0x2e4] sm:$0xf] %v551_v57  ;;  %v679_v57 = vld [vmem:[%s5002_s28 + $0x7c8] sm:$0xf] }
  0xce   : > { %554 = vst [vmem:[%s5006_s29 + $0x2e8] sm:$0xf] %v553_v58  ;;  %v681_v58 = vld [vmem:[%s5002_s28 + $0x7d0] sm:$0xf] }
  0xcf   : > { %556 = vst [vmem:[%s5006_s29 + $0x2ec] sm:$0xf] %v555_v59  ;;  %v683_v59 = vld [vmem:[%s5002_s28 + $0x7d8] sm:$0xf] }
  0xd0   : > { %558 = vst [vmem:[%s5006_s29 + $0x2f0] sm:$0xf] %v557_v60  ;;  %v685_v60 = vld [vmem:[%s5002_s28 + $0x7e0] sm:$0xf] }
  0xd1   : > { %560 = vst [vmem:[%s5006_s29 + $0x2f4] sm:$0xf] %v559_v61  ;;  %v687_v61 = vld [vmem:[%s5002_s28 + $0x7e8] sm:$0xf] }
  0xd2   : > { %562 = vst [vmem:[%s5006_s29 + $0x2f8] sm:$0xf] %v561_v62  ;;  %v689_v62 = vld [vmem:[%s5002_s28 + $0x7f0] sm:$0xf] }
  0xd3   : > { %564 = vst [vmem:[%s5006_s29 + $0x2fc] sm:$0xf] %v563_v63  ;;  %v691_v63 = vld [vmem:[%s5002_s28 + $0x7f8] sm:$0xf] }
  0xd4   : > { %566 = vst [vmem:[%s5006_s29 + $0x300] sm:$0xf] %v565_v0 }
  0xd5   : > { %568 = vst [vmem:[%s5006_s29 + $0x304] sm:$0xf] %v567_v1 }
  0xd6   : > { %570 = vst [vmem:[%s5006_s29 + $0x308] sm:$0xf] %v569_v2 }
  0xd7   : > { %572 = vst [vmem:[%s5006_s29 + $0x30c] sm:$0xf] %v571_v3 }
  0xd8   : > { %574 = vst [vmem:[%s5006_s29 + $0x310] sm:$0xf] %v573_v4 }
  0xd9   : > { %576 = vst [vmem:[%s5006_s29 + $0x314] sm:$0xf] %v575_v5 }
  0xda   : > { %578 = vst [vmem:[%s5006_s29 + $0x318] sm:$0xf] %v577_v6 }
  0xdb   : > { %580 = vst [vmem:[%s5006_s29 + $0x31c] sm:$0xf] %v579_v7 }
  0xdc   : > { %582 = vst [vmem:[%s5006_s29 + $0x320] sm:$0xf] %v581_v8 }
  0xdd   : > { %584 = vst [vmem:[%s5006_s29 + $0x324] sm:$0xf] %v583_v9 }
  0xde   : > { %586 = vst [vmem:[%s5006_s29 + $0x328] sm:$0xf] %v585_v10 }
  0xdf   : > { %588 = vst [vmem:[%s5006_s29 + $0x32c] sm:$0xf] %v587_v11 }
  0xe0   : > { %590 = vst [vmem:[%s5006_s29 + $0x330] sm:$0xf] %v589_v12 }
  0xe1   : > { %592 = vst [vmem:[%s5006_s29 + $0x334] sm:$0xf] %v591_v13 }
  0xe2   : > { %594 = vst [vmem:[%s5006_s29 + $0x338] sm:$0xf] %v593_v14 }
  0xe3   : > { %596 = vst [vmem:[%s5006_s29 + $0x33c] sm:$0xf] %v595_v15 }
  0xe4   : > { %598 = vst [vmem:[%s5006_s29 + $0x340] sm:$0xf] %v597_v16 }
  0xe5   : > { %600 = vst [vmem:[%s5006_s29 + $0x344] sm:$0xf] %v599_v17 }
  0xe6   : > { %602 = vst [vmem:[%s5006_s29 + $0x348] sm:$0xf] %v601_v18 }
  0xe7   : > { %604 = vst [vmem:[%s5006_s29 + $0x34c] sm:$0xf] %v603_v19 }
  0xe8   : > { %606 = vst [vmem:[%s5006_s29 + $0x350] sm:$0xf] %v605_v20 }
  0xe9   : > { %608 = vst [vmem:[%s5006_s29 + $0x354] sm:$0xf] %v607_v21 }
  0xea   : > { %610 = vst [vmem:[%s5006_s29 + $0x358] sm:$0xf] %v609_v22 }
  0xeb   : > { %612 = vst [vmem:[%s5006_s29 + $0x35c] sm:$0xf] %v611_v23 }
  0xec   : > { %614 = vst [vmem:[%s5006_s29 + $0x360] sm:$0xf] %v613_v24 }
  0xed   : > { %616 = vst [vmem:[%s5006_s29 + $0x364] sm:$0xf] %v615_v25 }
  0xee   : > { %618 = vst [vmem:[%s5006_s29 + $0x368] sm:$0xf] %v617_v26 }
  0xef   : > { %620 = vst [vmem:[%s5006_s29 + $0x36c] sm:$0xf] %v619_v27 }
  0xf0   : > { %622 = vst [vmem:[%s5006_s29 + $0x370] sm:$0xf] %v621_v28 }
  0xf1   : > { %624 = vst [vmem:[%s5006_s29 + $0x374] sm:$0xf] %v623_v29 }
  0xf2   : > { %626 = vst [vmem:[%s5006_s29 + $0x378] sm:$0xf] %v625_v30 }
  0xf3   : > { %628 = vst [vmem:[%s5006_s29 + $0x37c] sm:$0xf] %v627_v31 }
  0xf4   : > { %630 = vst [vmem:[%s5006_s29 + $0x380] sm:$0xf] %v629_v32 }
  0xf5   : > { %632 = vst [vmem:[%s5006_s29 + $0x384] sm:$0xf] %v631_v33 }
  0xf6   : > { %634 = vst [vmem:[%s5006_s29 + $0x388] sm:$0xf] %v633_v34 }
  0xf7   : > { %636 = vst [vmem:[%s5006_s29 + $0x38c] sm:$0xf] %v635_v35 }
  0xf8   : > { %638 = vst [vmem:[%s5006_s29 + $0x390] sm:$0xf] %v637_v36 }
  0xf9   : > { %640 = vst [vmem:[%s5006_s29 + $0x394] sm:$0xf] %v639_v37 }
  0xfa   : > { %642 = vst [vmem:[%s5006_s29 + $0x398] sm:$0xf] %v641_v38 }
  0xfb   : > { %644 = vst [vmem:[%s5006_s29 + $0x39c] sm:$0xf] %v643_v39 }
  0xfc   : > { %646 = vst [vmem:[%s5006_s29 + $0x3a0] sm:$0xf] %v645_v40 }
  0xfd   : > { %648 = vst [vmem:[%s5006_s29 + $0x3a4] sm:$0xf] %v647_v41 }
  0xfe   : > { %650 = vst [vmem:[%s5006_s29 + $0x3a8] sm:$0xf] %v649_v42 }
  0xff   : > { %652 = vst [vmem:[%s5006_s29 + $0x3ac] sm:$0xf] %v651_v43 }
 0x100   : > { %654 = vst [vmem:[%s5006_s29 + $0x3b0] sm:$0xf] %v653_v44 }
 0x101   : > { %656 = vst [vmem:[%s5006_s29 + $0x3b4] sm:$0xf] %v655_v45 }
 0x102   : > { %658 = vst [vmem:[%s5006_s29 + $0x3b8] sm:$0xf] %v657_v46 }
 0x103   : > { %660 = vst [vmem:[%s5006_s29 + $0x3bc] sm:$0xf] %v659_v47 }
 0x104   : > { %662 = vst [vmem:[%s5006_s29 + $0x3c0] sm:$0xf] %v661_v48 }
 0x105   : > { %664 = vst [vmem:[%s5006_s29 + $0x3c4] sm:$0xf] %v663_v49 }
 0x106   : > { %666 = vst [vmem:[%s5006_s29 + $0x3c8] sm:$0xf] %v665_v50 }
 0x107   : > { %668 = vst [vmem:[%s5006_s29 + $0x3cc] sm:$0xf] %v667_v51 }
 0x108   : > { %670 = vst [vmem:[%s5006_s29 + $0x3d0] sm:$0xf] %v669_v52 }
 0x109   : > { %672 = vst [vmem:[%s5006_s29 + $0x3d4] sm:$0xf] %v671_v53 }
 0x10a   : > { %674 = vst [vmem:[%s5006_s29 + $0x3d8] sm:$0xf] %v673_v54 }
 0x10b   : > { %676 = vst [vmem:[%s5006_s29 + $0x3dc] sm:$0xf] %v675_v55 }
 0x10c   : > { %678 = vst [vmem:[%s5006_s29 + $0x3e0] sm:$0xf] %v677_v56 }
 0x10d   : > { %680 = vst [vmem:[%s5006_s29 + $0x3e4] sm:$0xf] %v679_v57 }
 0x10e   : > { %682 = vst [vmem:[%s5006_s29 + $0x3e8] sm:$0xf] %v681_v58 }
 0x10f   : > { %684 = vst [vmem:[%s5006_s29 + $0x3ec] sm:$0xf] %v683_v59 }
 0x110   : > { %686 = vst [vmem:[%s5006_s29 + $0x3f0] sm:$0xf] %v685_v60 }
 0x111   : > { %688 = vst [vmem:[%s5006_s29 + $0x3f4] sm:$0xf] %v687_v61 }
 0x112   : > { %690 = vst [vmem:[%s5006_s29 + $0x3f8] sm:$0xf] %v689_v62 }
 0x113   : > { %692 = vst [vmem:[%s5006_s29 + $0x3fc] sm:$0xf] %v691_v63 }
 0x114 PF: > { %p4035_p8 = scmp.ge.s32.totalorder %s4932_s16, 1  ;;  %p2283_p9 = scmp.lt.s32.totalorder %s4932_s16, 3 }
 0x116   : > { %p2284_p10 = pnand %p4035_p8, %p2283_p9 }
 0x117   : > { %s2290_s30 = sand.u32 (!%p2284_p10), 1, %s4916_s12   ;;  %p2328_p11 = scmp.lt.s32.totalorder (!%p2284_p10), %s4924_s14, 1 }
 0x118   : > { %2287 = sbr.rel (%p2284_p10) target bundleno = 587 (0x24b), region = 80  ;;  %s4036_s4 = sshll.u32 (!%p2284_p10), %s2290_s30, 10 }
 0x119   : > { %s5523_s5 = scalar_lea.vmem (!%p2284_p10), [#allocation2], %s4036_s4 }
 0x11d   : > { %v4721_v0 = vld [vmem:[%s5523_s5 + $0x38] sm:$0xff]  ;;  %v4720_v4 = vld [vmem:[%s5523_s5 + $0x30] sm:$0xff]  ;;  %v4719_v8 = vld [vmem:[%s5523_s5 + $0x28] sm:$0xff]  ;;  %s5553_s6 = scalar_select %p2328_p11, %s4924_s14, 1 }
 0x11e   : > { %v4729_v1 = vld [vmem:[%s5523_s5 + $0x78] sm:$0xff]  ;;  %3552 = vmatpush.bf16.msra.mxu0 %v4721_v0  ;;  %v4728_v5 = vld [vmem:[%s5523_s5 + $0x70] sm:$0xff]  ;;  %v4727_v9 = vld [vmem:[%s5523_s5 + $0x68] sm:$0xff]  ;;  %s4679_s12 = sshll.u32 (%p4989_p6), %s4924_s14, 2 }
 0x11f   : > { %v4737_v2 = vld [vmem:[%s5523_s5 + $0xb8] sm:$0xff]  ;;  %3571 = vmatpush.bf16.msra.mxu1 %v4729_v1  ;;  %v4736_v6 = vld [vmem:[%s5523_s5 + $0xb0] sm:$0xff]  ;;  %v4735_v10 = vld [vmem:[%s5523_s5 + $0xa8] sm:$0xff]  ;;  %s2330_s19 = scalar_lea.vmem %s5883_s2, %s5553_s6  ;;  %s4037_s6 = sshll.u32 %s2290_s30, 4 }
 0x120   : > { %v4745_v3 = vld [vmem:[%s5523_s5 + $0xf8] sm:$0xff]  ;;  %3590 = vmatpush.bf16.msra.mxu2 %v4737_v2  ;;  %v4744_v7 = vld [vmem:[%s5523_s5 + $0xf0] sm:$0xff]  ;;  %v4743_v11 = vld [vmem:[%s5523_s5 + $0xe8] sm:$0xff]  ;;  %s3875_s27 = scalar_lea.vmem (%p4989_p6), %s5884_s3, %s4679_s12 }
 0x121   : > { %3609 = vmatpush.bf16.msra.mxu3 %v4745_v3  ;;  %v4718_v12 = vld [vmem:[%s5523_s5 + $0x20] sm:$0xff]  ;;  %v4717_v16 = vld [vmem:[%s5523_s5 + $0x18] sm:$0xff]  ;;  %v4716_v20 = vld [vmem:[%s5523_s5 + $0x10] sm:$0xff] }
 0x122   : > { %3553 = vmatpush.bf16.msra.mxu0 %v4720_v4  ;;  %v4726_v13 = vld [vmem:[%s5523_s5 + $0x60] sm:$0xff]  ;;  %v4725_v17 = vld [vmem:[%s5523_s5 + $0x58] sm:$0xff]  ;;  %v4724_v21 = vld [vmem:[%s5523_s5 + $0x50] sm:$0xff] }
 0x123   : > { %3572 = vmatpush.bf16.msra.mxu1 %v4728_v5  ;;  %v4734_v14 = vld [vmem:[%s5523_s5 + $0xa0] sm:$0xff]  ;;  %v4733_v18 = vld [vmem:[%s5523_s5 + $0x98] sm:$0xff]  ;;  %v4732_v22 = vld [vmem:[%s5523_s5 + $0x90] sm:$0xff] }
 0x124   : > { %3591 = vmatpush.bf16.msra.mxu2 %v4736_v6  ;;  %v4742_v15 = vld [vmem:[%s5523_s5 + $0xe0] sm:$0xff]  ;;  %v4741_v19 = vld [vmem:[%s5523_s5 + $0xd8] sm:$0xff]  ;;  %v4740_v23 = vld [vmem:[%s5523_s5 + $0xd0] sm:$0xff] }
 0x125   : > { %3610 = vmatpush.bf16.msra.mxu3 %v4744_v7  ;;  %v4715_v24 = vld [vmem:[%s5523_s5 + $0x8] sm:$0xff]  ;;  %v4714_v28 = vld [vmem:[%s5523_s5] sm:$0xff]  ;;  %v4769_v40 = vld [vmem:[%s5523_s5 + $0x1b8] sm:$0xff] }
 0x126   : > { %3554 = vmatpush.bf16.msra.mxu0 %v4719_v8  ;;  %v4723_v25 = vld [vmem:[%s5523_s5 + $0x48] sm:$0xff]  ;;  %v4722_v29 = vld [vmem:[%s5523_s5 + $0x40] sm:$0xff]  ;;  %v4753_v41 = vld [vmem:[%s5523_s5 + $0x138] sm:$0xff] }
 0x127   : > { %3573 = vmatpush.bf16.msra.mxu1 %v4727_v9  ;;  %v4731_v26 = vld [vmem:[%s5523_s5 + $0x88] sm:$0xff]  ;;  %v4040_v30 = vld [vmem:[%s5881_s0] sm:$0xf]  ;;  %v4682_v34 = vld [vmem:[%s5881_s0 + $0x4] sm:$0xf] }
 0x128   : > { %3592 = vmatpush.bf16.msra.mxu2 %v4735_v10  ;;  %v4739_v27 = vld [vmem:[%s5523_s5 + $0xc8] sm:$0xff]  ;;  %v4690_v31 = vld [vmem:[%s5881_s0 + $0x3c] sm:$0xf0]  ;;  %v4042_v35 = vld [vmem:[%s5881_s0 + $0x40] sm:$0xf0] }
 0x129   : > { %3611 = vmatpush.bf16.msra.mxu3 %v4743_v11  ;;  %v4730_v32 = vld [vmem:[%s5523_s5 + $0x80] sm:$0xff]  ;;  %v4048_v36 = vld [vmem:[%s5881_s0 + $0x8] sm:$0xf]  ;;  %v4683_v38 = vld [vmem:[%s5881_s0 + $0xc] sm:$0xf]  ;;  %v4041_v42 = vor.u32 %v4690_v31, %v4040_v30  ;;  %v4045_v43 = vor.u32 %v4682_v34, %v4042_v35 }
 0x12a   : > { %3555 = vmatpush.bf16.msra.mxu0 %v4718_v12  ;;  %v4738_v33 = vld [vmem:[%s5523_s5 + $0xc0] sm:$0xff]  ;;  %v4691_v37 = vld [vmem:[%s5881_s0 + $0x44] sm:$0xf0]  ;;  %v4050_v39 = vld [vmem:[%s5881_s0 + $0x48] sm:$0xf0] }
 0x12b   : > { %3574 = vmatpush.bf16.msra.mxu1 %v4726_v13  ;;  %v4049_v44 = vor.u32 %v4691_v37, %v4048_v36  ;;  %v4053_v45 = vor.u32 %v4683_v38, %v4050_v39  ;;  %v4761_v46 = vld [vmem:[%s5523_s5 + $0x178] sm:$0xff]  ;;  %v4768_v48 = vld [vmem:[%s5523_s5 + $0x1b0] sm:$0xff]  ;;  %v4767_v52 = vld [vmem:[%s5523_s5 + $0x1a8] sm:$0xff] }
 0x12c   : > { %3593 = vmatpush.bf16.msra.mxu2 %v4734_v14  ;;  %v4777_v47 = vld [vmem:[%s5523_s5 + $0x1f8] sm:$0xff]  ;;  %v4752_v49 = vld [vmem:[%s5523_s5 + $0x130] sm:$0xff]  ;;  %v4751_v53 = vld [vmem:[%s5523_s5 + $0x128] sm:$0xff] }
 0x12d   : > { %3612 = vmatpush.bf16.msra.mxu3 %v4742_v15  ;;  %v4760_v50 = vld [vmem:[%s5523_s5 + $0x170] sm:$0xff]  ;;  %v4759_v54 = vld [vmem:[%s5523_s5 + $0x168] sm:$0xff]  ;;  %v4766_v56 = vld [vmem:[%s5523_s5 + $0x1a0] sm:$0xff] }
 0x12e   : > { %3556 = vmatpush.bf16.msra.mxu0 %v4717_v16  ;;  %v4776_v51 = vld [vmem:[%s5523_s5 + $0x1f0] sm:$0xff]  ;;  %v4775_v55 = vld [vmem:[%s5523_s5 + $0x1e8] sm:$0xff]  ;;  %v4750_v57 = vld [vmem:[%s5523_s5 + $0x120] sm:$0xff] }
 0x12f   : > { %3575 = vmatpush.bf16.msra.mxu1 %v4725_v17  ;;  %v4758_v58 = vld [vmem:[%s5523_s5 + $0x160] sm:$0xff]  ;;  %v4112_v0 = vld [vmem:[%s5881_s0 + $0x88] sm:$0xf]  ;;  %v4699_v2 = vld [vmem:[%s5881_s0 + $0x8c] sm:$0xf] }
 0x130   : > { %3594 = vmatpush.bf16.msra.mxu2 %v4733_v18  ;;  %v4774_v59 = vld [vmem:[%s5523_s5 + $0x1e0] sm:$0xff]  ;;  %v4707_v1 = vld [vmem:[%s5881_s0 + $0xc4] sm:$0xf0]  ;;  %v4114_v3 = vld [vmem:[%s5881_s0 + $0xc8] sm:$0xf0] }
 0x131   : > { %3613 = vmatpush.bf16.msra.mxu3 %v4741_v19  ;;  %v4104_v60 = vld [vmem:[%s5881_s0 + $0x80] sm:$0xf]  ;;  %v4698_v62 = vld [vmem:[%s5881_s0 + $0x84] sm:$0xf]  ;;  %v4765_v4 = vld [vmem:[%s5523_s5 + $0x198] sm:$0xff]  ;;  %v4113_v8 = vor.u32 %v4707_v1, %v4112_v0  ;;  %v4117_v9 = vor.u32 %v4699_v2, %v4114_v3 }
 0x132   : > { %3557 = vmatpush.bf16.msra.mxu0 %v4716_v20  ;;  %v4706_v61 = vld [vmem:[%s5881_s0 + $0xbc] sm:$0xf0]  ;;  %v4106_v63 = vld [vmem:[%s5881_s0 + $0xc0] sm:$0xf0]  ;;  %v4749_v5 = vld [vmem:[%s5523_s5 + $0x118] sm:$0xff] }
 0x133   : > { %3576 = vmatpush.bf16.msra.mxu1 %v4724_v21  ;;  %v4105_v6 = vor.u32 %v4706_v61, %v4104_v60  ;;  %v4109_v7 = vor.u32 %v4698_v62, %v4106_v63  ;;  %v4757_v10 = vld [vmem:[%s5523_s5 + $0x158] sm:$0xff]  ;;  %v4764_v12 = vld [vmem:[%s5523_s5 + $0x190] sm:$0xff]  ;;  %v4763_v16 = vld [vmem:[%s5523_s5 + $0x188] sm:$0xff] }
 0x134   : > { %3595 = vmatpush.bf16.msra.mxu2 %v4732_v22  ;;  %v4773_v11 = vld [vmem:[%s5523_s5 + $0x1d8] sm:$0xff]  ;;  %v4748_v13 = vld [vmem:[%s5523_s5 + $0x110] sm:$0xff]  ;;  %v4747_v17 = vld [vmem:[%s5523_s5 + $0x108] sm:$0xff] }
 0x135   : > { %3614 = vmatpush.bf16.msra.mxu3 %v4740_v23  ;;  %v4756_v14 = vld [vmem:[%s5523_s5 + $0x150] sm:$0xff]  ;;  %v4755_v18 = vld [vmem:[%s5523_s5 + $0x148] sm:$0xff]  ;;  %v4762_v20 = vld [vmem:[%s5523_s5 + $0x180] sm:$0xff] }
 0x136   : > { %3558 = vmatpush.bf16.msra.mxu0 %v4715_v24  ;;  %v4772_v15 = vld [vmem:[%s5523_s5 + $0x1d0] sm:$0xff]  ;;  %v4771_v19 = vld [vmem:[%s5523_s5 + $0x1c8] sm:$0xff]  ;;  %v4746_v21 = vld [vmem:[%s5523_s5 + $0x100] sm:$0xff] }
 0x137   : > { %3577 = vmatpush.bf16.msra.mxu1 %v4723_v25  ;;  %v4754_v22 = vld [vmem:[%s5523_s5 + $0x140] sm:$0xff]  ;;  %v4056_v24 = vld [vmem:[%s5881_s0 + $0x10] sm:$0xf]  ;;  %v4801_v25 = vld [vmem:[%s5523_s5 + $0x2b8] sm:$0xff] }
 0x138   : > { %3596 = vmatpush.bf16.msra.mxu2 %v4731_v26  ;;  %v4770_v23 = vld [vmem:[%s5523_s5 + $0x1c0] sm:$0xff]  ;;  %v4785_v26 = vld [vmem:[%s5523_s5 + $0x238] sm:$0xff]  ;;  %v4800_v37 = vld [vmem:[%s5523_s5 + $0x2b0] sm:$0xff] }
 0x139   : > { %3615 = vmatpush.bf16.msra.mxu3 %v4739_v27  ;;  %v4692_v27 = vld [vmem:[%s5881_s0 + $0x4c] sm:$0xf0]  ;;  %v4064_v30 = vld [vmem:[%s5881_s0 + $0x18] sm:$0xf]  ;;  %v4130_v61 = vld [vmem:[%s5881_s0 + $0xd8] sm:$0xf0] }
 0x13a   : > { %3559 = vmatpush.bf16.msra.mxu0 %v4714_v28  ;;  %v4684_v28 = vld [vmem:[%s5881_s0 + $0x14] sm:$0xf]  ;;  %v4693_v31 = vld [vmem:[%s5881_s0 + $0x54] sm:$0xf0]  ;;  %v4057_v36 = vor.u32 %v4692_v27, %v4056_v24  ;;  %v4074_v24 = vld [vmem:[%s5881_s0 + $0x60] sm:$0xf0] }
 0x13b   : > { %3578 = vmatpush.bf16.msra.mxu1 %v4722_v29  ;;  %v4058_v29 = vld [vmem:[%s5881_s0 + $0x50] sm:$0xf0]  ;;  %v4793_v34 = vld [vmem:[%s5523_s5 + $0x278] sm:$0xff]  ;;  %v4065_v39 = vor.u32 %v4693_v31, %v4064_v30  ;;  %v4687_v27 = vld [vmem:[%s5881_s0 + $0x2c] sm:$0xf] }
 0x13c   : > { %3597 = vmatpush.bf16.msra.mxu2 %v4730_v32  ;;  %v4685_v32 = vld [vmem:[%s5881_s0 + $0x1c] sm:$0xf]  ;;  %v4061_v38 = vor.u32 %v4684_v28, %v4058_v29  ;;  %v4796_v1 = vld [vmem:[%s5523_s5 + $0x290] sm:$0xff]  ;;  %v4082_v28 = vld [vmem:[%s5881_s0 + $0x68] sm:$0xf0] }
 0x13d   : > { %3616 = vmatpush.bf16.msra.mxu3 %v4738_v33  ;;  %3560 = vmatmul.bf16.vlgmr.msra.gmra.mxu0 %v4041_v42  ;;  %v4066_v33 = vld [vmem:[%s5881_s0 + $0x58] sm:$0xf0]  ;;  %v4792_v42 = vld [vmem:[%s5523_s5 + $0x270] sm:$0xff] }
 0x13e   : > { %3628 = vmatpush.bf16.msrb.mxu0 %v4753_v41  ;;  %3579 = vmatmul.bf16.vlgmr.msra.gmra.mxu1 %v4045_v43  ;;  %v4809_v35 = vld [vmem:[%s5523_s5 + $0x2f8] sm:$0xff]  ;;  %v4784_v41 = vld [vmem:[%s5523_s5 + $0x230] sm:$0xff] }
 0x13f   : > { %3598 = vmatmul.bf16.vlgmr.msra.gmra.mxu2 %v4049_v44  ;;  %3647 = vmatpush.bf16.msrb.mxu1 %v4761_v46  ;;  %v4808_v43 = vld [vmem:[%s5523_s5 + $0x2f0] sm:$0xff]  ;;  %v4799_v44 = vld [vmem:[%s5523_s5 + $0x2a8] sm:$0xff]  ;;  %v4781_v60 = vld [vmem:[%s5523_s5 + $0x218] sm:$0xff] }
 0x140   : > { %3666 = vmatpush.bf16.msrb.mxu2 %v4769_v40  ;;  %3617 = vmatmul.bf16.vlgmr.msra.gmra.mxu3 %v4053_v45  ;;  %v4069_v40 = vor.u32 %v4685_v32, %v4066_v33  ;;  %v4783_v45 = vld [vmem:[%s5523_s5 + $0x228] sm:$0xff]  ;;  %v4789_v62 = vld [vmem:[%s5523_s5 + $0x258] sm:$0xff]  ;;  %v4824_v30 = vld [vmem:[%s5523_s5 + $0x370] sm:$0xff]  ;;  %v4085_v33 = vor.u32 %v4687_v27, %v4082_v28 }
 0x141   : > { %3685 = vmatpush.bf16.msrb.mxu3 %v4777_v47  ;;  %v4791_v46 = vld [vmem:[%s5523_s5 + $0x268] sm:$0xff]  ;;  %v4805_v63 = vld [vmem:[%s5523_s5 + $0x2d8] sm:$0xff] }
 0x142   : > { %3629 = vmatpush.bf16.msrb.mxu0 %v4752_v49  ;;  %v4807_v47 = vld [vmem:[%s5523_s5 + $0x2e8] sm:$0xff]  ;;  %v4782_v49 = vld [vmem:[%s5523_s5 + $0x220] sm:$0xff]  ;;  %v4162_v27 = vld [vmem:[%s5881_s0 + $0xf8] sm:$0xf0] }
 0x143   : > { %3648 = vmatpush.bf16.msrb.mxu1 %v4760_v50  ;;  %v4790_v50 = vld [vmem:[%s5523_s5 + $0x260] sm:$0xff] }
 0x144   : > { %3667 = vmatpush.bf16.msrb.mxu2 %v4768_v48  ;;  %v4798_v48 = vld [vmem:[%s5523_s5 + $0x2a0] sm:$0xff] }
 0x145   : > { %3686 = vmatpush.bf16.msrb.mxu3 %v4776_v51  ;;  %v4806_v51 = vld [vmem:[%s5523_s5 + $0x2e0] sm:$0xff] }
 0x146   : > { %3630 = vmatpush.bf16.msrb.mxu0 %v4751_v53  ;;  %v4708_v53 = vld [vmem:[%s5881_s0 + $0xcc] sm:$0xf0] }
 0x147   : > { %3649 = vmatpush.bf16.msrb.mxu1 %v4759_v54  ;;  %v4797_v54 = vld [vmem:[%s5523_s5 + $0x298] sm:$0xff] }
 0x148   : > { %3668 = vmatpush.bf16.msrb.mxu2 %v4767_v52  ;;  %v4120_v52 = vld [vmem:[%s5881_s0 + $0x90] sm:$0xf] }
 0x149   : > { %3687 = vmatpush.bf16.msrb.mxu3 %v4775_v55  ;;  %v4700_v55 = vld [vmem:[%s5881_s0 + $0x94] sm:$0xf]  ;;  %v4121_v0 = vor.u32 %v4708_v53, %v4120_v52  ;;  %v4703_v52 = vld [vmem:[%s5881_s0 + $0xac] sm:$0xf]  ;;  %v4813_v53 = vld [vmem:[%s5523_s5 + $0x318] sm:$0xff] }
 0x14a   : > { %3631 = vmatpush.bf16.msrb.mxu0 %v4750_v57  ;;  %v4128_v57 = vld [vmem:[%s5881_s0 + $0x98] sm:$0xf] }
 0x14b   : > { %3650 = vmatpush.bf16.msrb.mxu1 %v4758_v58  ;;  %v4709_v58 = vld [vmem:[%s5881_s0 + $0xd4] sm:$0xf0] }
 0x14c   : > { %3669 = vmatpush.bf16.msrb.mxu2 %v4766_v56  ;;  %v4122_v56 = vld [vmem:[%s5881_s0 + $0xd0] sm:$0xf0]  ;;  %v4129_v3 = vor.u32 %v4709_v58, %v4128_v57 }
 0x14d   : > { %3688 = vmatpush.bf16.msrb.mxu3 %v4774_v59  ;;  %3565 = vmatmul.bf16.gmra.mxu0 %v4105_v6  ;;  %v4701_v59 = vld [vmem:[%s5881_s0 + $0x9c] sm:$0xf]  ;;  %v4125_v2 = vor.u32 %v4700_v55, %v4122_v56  ;;  %v4788_v6 = vld [vmem:[%s5523_s5 + $0x250] sm:$0xff] }
 0x14e   : > { %3632 = vmatpush.bf16.msrb.mxu0 %v4749_v5  ;;  %3584 = vmatmul.bf16.gmra.mxu1 %v4109_v7  ;;  %v4780_v5 = vld [vmem:[%s5523_s5 + $0x210] sm:$0xff]  ;;  %v4837_v55 = vld [vmem:[%s5523_s5 + $0x3d8] sm:$0xff] }
 0x14f   : > { %3603 = vmatmul.bf16.gmra.mxu2 %v4113_v8  ;;  %3651 = vmatpush.bf16.msrb.mxu1 %v4757_v10  ;;  %v4804_v7 = vld [vmem:[%s5523_s5 + $0x2d0] sm:$0xff]  ;;  %v4795_v8 = vld [vmem:[%s5523_s5 + $0x288] sm:$0xff] }
 0x150   : > { %3670 = vmatpush.bf16.msrb.mxu2 %v4765_v4  ;;  %3622 = vmatmul.bf16.gmra.mxu3 %v4117_v9  ;;  %v4133_v4 = vor.u32 %v4701_v59, %v4130_v61  ;;  %v4779_v9 = vld [vmem:[%s5523_s5 + $0x208] sm:$0xff]  ;;  %v4828_v56 = vld [vmem:[%s5523_s5 + $0x390] sm:$0xff] }
 0x151   : > { %3689 = vmatpush.bf16.msrb.mxu3 %v4773_v11  ;;  %v4787_v10 = vld [vmem:[%s5523_s5 + $0x248] sm:$0xff]  ;;  %v4820_v58 = vld [vmem:[%s5523_s5 + $0x350] sm:$0xff] }
 0x152   : > { %3633 = vmatpush.bf16.msrb.mxu0 %v4748_v13  ;;  %v4803_v11 = vld [vmem:[%s5523_s5 + $0x2c8] sm:$0xff]  ;;  %v4833_v13 = vld [vmem:[%s5523_s5 + $0x3b8] sm:$0xff] }
 0x153   : > { %3652 = vmatpush.bf16.msrb.mxu1 %v4756_v14  ;;  %v4778_v14 = vld [vmem:[%s5523_s5 + $0x200] sm:$0xff] }
 0x154   : > { %3671 = vmatpush.bf16.msrb.mxu2 %v4764_v12  ;;  %v4794_v12 = vld [vmem:[%s5523_s5 + $0x280] sm:$0xff] }
 0x155   : > { %3690 = vmatpush.bf16.msrb.mxu3 %v4772_v15  ;;  %v4786_v15 = vld [vmem:[%s5523_s5 + $0x240] sm:$0xff] }
 0x156   : > { %3634 = vmatpush.bf16.msrb.mxu0 %v4747_v17  ;;  %v4072_v17 = vld [vmem:[%s5881_s0 + $0x20] sm:$0xf] }
 0x157   : > { %3653 = vmatpush.bf16.msrb.mxu1 %v4755_v18  ;;  %v4694_v18 = vld [vmem:[%s5881_s0 + $0x5c] sm:$0xf0] }
 0x158   : > { %3672 = vmatpush.bf16.msrb.mxu2 %v4763_v16  ;;  %v4802_v16 = vld [vmem:[%s5523_s5 + $0x2c0] sm:$0xff]  ;;  %v4073_v29 = vor.u32 %v4694_v18, %v4072_v17 }
 0x159   : > { %3691 = vmatpush.bf16.msrb.mxu3 %v4771_v19  ;;  %v4817_v19 = vld [vmem:[%s5523_s5 + $0x338] sm:$0xff] }
 0x15a   : > { %3635 = vmatpush.bf16.msrb.mxu0 %v4746_v21  ;;  %v4686_v21 = vld [vmem:[%s5881_s0 + $0x24] sm:$0xf] }
 0x15b   : > { %3654 = vmatpush.bf16.msrb.mxu1 %v4754_v22  ;;  %v4841_v22 = vld [vmem:[%s5523_s5 + $0x3f8] sm:$0xff]  ;;  %v4077_v31 = vor.u32 %v4686_v21, %v4074_v24  ;;  %v4712_v21 = vld [vmem:[%s5881_s0 + $0xec] sm:$0xf0] }
 0x15c   : > { %3673 = vmatpush.bf16.msrb.mxu2 %v4762_v20  ;;  %v4825_v20 = vld [vmem:[%s5523_s5 + $0x378] sm:$0xff] }
 0x15d   : > { %3692 = vmatpush.bf16.msrb.mxu3 %v4770_v23  ;;  %3636 = vmatmul.bf16.vlgmr.msrb.gmra.mxu0 %v4057_v36  ;;  %v4832_v23 = vld [vmem:[%s5523_s5 + $0x3b0] sm:$0xff]  ;;  %v4831_v36 = vld [vmem:[%s5523_s5 + $0x3a8] sm:$0xff]  ;;  %v4160_v24 = vld [vmem:[%s5881_s0 + $0xb8] sm:$0xf] }
 0x15e   : > { %3704 = vmatpush.bf16.msra.mxu0 %v4785_v26  ;;  %3655 = vmatmul.bf16.vlgmr.msrb.gmra.mxu1 %v4061_v38  ;;  %v4695_v26 = vld [vmem:[%s5881_s0 + $0x64] sm:$0xf0] }
 0x15f   : > { %3723 = vmatpush.bf16.msra.mxu1 %v4793_v34  ;;  %3674 = vmatmul.bf16.vlgmr.msrb.gmra.mxu2 %v4065_v39  ;;  %v4816_v34 = vld [vmem:[%s5523_s5 + $0x330] sm:$0xff]  ;;  %v4815_v38 = vld [vmem:[%s5523_s5 + $0x328] sm:$0xff] }
 0x160   : > { %3742 = vmatpush.bf16.msra.mxu2 %v4801_v25  ;;  %3693 = vmatmul.bf16.vlgmr.msrb.gmra.mxu3 %v4069_v40  ;;  %v4080_v25 = vld [vmem:[%s5881_s0 + $0x28] sm:$0xf]  ;;  %v4830_v40 = vld [vmem:[%s5523_s5 + $0x3a0] sm:$0xff] }
 0x161   : > { %3761 = vmatpush.bf16.msra.mxu3 %v4809_v35  ;;  %v4081_v32 = vor.u32 %v4695_v26, %v4080_v25  ;;  %v4840_v35 = vld [vmem:[%s5523_s5 + $0x3f0] sm:$0xff]  ;;  %v4839_v39 = vld [vmem:[%s5523_s5 + $0x3e8] sm:$0xff]  ;;  %v4713_v25 = vld [vmem:[%s5881_s0 + $0xf4] sm:$0xf0] }
 0x162   : > { %3705 = vmatpush.bf16.msra.mxu0 %v4784_v41  ;;  %v4822_v41 = vld [vmem:[%s5523_s5 + $0x360] sm:$0xff]  ;;  %v4705_v26 = vld [vmem:[%s5881_s0 + $0xbc] sm:$0xf] }
 0x163   : > { %3724 = vmatpush.bf16.msra.mxu1 %v4792_v42  ;;  %v4814_v42 = vld [vmem:[%s5523_s5 + $0x320] sm:$0xff] }
 0x164   : > { %3743 = vmatpush.bf16.msra.mxu2 %v4800_v37  ;;  %v4823_v37 = vld [vmem:[%s5523_s5 + $0x368] sm:$0xff] }
 0x165   : > { %3762 = vmatpush.bf16.msra.mxu3 %v4808_v43  ;;  %v4838_v43 = vld [vmem:[%s5523_s5 + $0x3e0] sm:$0xff] }
 0x166   : > { %3706 = vmatpush.bf16.msra.mxu0 %v4783_v45  ;;  %v4136_v45 = vld [vmem:[%s5881_s0 + $0xa0] sm:$0xf] }
 0x167   : > { %3725 = vmatpush.bf16.msra.mxu1 %v4791_v46  ;;  %v4710_v46 = vld [vmem:[%s5881_s0 + $0xdc] sm:$0xf0] }
 0x168   : > { %3744 = vmatpush.bf16.msra.mxu2 %v4799_v44  ;;  %v4829_v44 = vld [vmem:[%s5523_s5 + $0x398] sm:$0xff]  ;;  %v4137_v57 = vor.u32 %v4710_v46, %v4136_v45 }
 0x169   : > { %3763 = vmatpush.bf16.msra.mxu3 %v4807_v47  ;;  %v4821_v47 = vld [vmem:[%s5523_s5 + $0x358] sm:$0xff] }
 0x16a   : > { %3707 = vmatpush.bf16.msra.mxu0 %v4782_v49  ;;  %v4138_v49 = vld [vmem:[%s5881_s0 + $0xe0] sm:$0xf0] }
 0x16b   : > { %3726 = vmatpush.bf16.msra.mxu1 %v4790_v50  ;;  %v4144_v50 = vld [vmem:[%s5881_s0 + $0xa8] sm:$0xf] }
 0x16c   : > { %3745 = vmatpush.bf16.msra.mxu2 %v4798_v48  ;;  %v4702_v48 = vld [vmem:[%s5881_s0 + $0xa4] sm:$0xf] }
 0x16d   : > { %3764 = vmatpush.bf16.msra.mxu3 %v4806_v51  ;;  %3641 = vmatmul.bf16.gmra.mxu0 %v4121_v0  ;;  %v4711_v51 = vld [vmem:[%s5881_s0 + $0xe4] sm:$0xf0]  ;;  %v4141_v59 = vor.u32 %v4702_v48, %v4138_v49 }
 0x16e   : > { %3708 = vmatpush.bf16.msra.mxu0 %v4781_v60  ;;  %3660 = vmatmul.bf16.gmra.mxu1 %v4125_v2  ;;  %v4145_v60 = vor.u32 %v4711_v51, %v4144_v50  ;;  %v4827_v0 = vld [vmem:[%s5523_s5 + $0x388] sm:$0xff] }
 0x16f   : > { %3727 = vmatpush.bf16.msra.mxu1 %v4789_v62  ;;  %3679 = vmatmul.bf16.gmra.mxu2 %v4129_v3  ;;  %v4812_v62 = vld [vmem:[%s5523_s5 + $0x310] sm:$0xff]  ;;  %v4811_v2 = vld [vmem:[%s5523_s5 + $0x308] sm:$0xff] }
 0x170   : > { %3746 = vmatpush.bf16.msra.mxu2 %v4797_v54  ;;  %3698 = vmatmul.bf16.gmra.mxu3 %v4133_v4  ;;  %v4146_v54 = vld [vmem:[%s5881_s0 + $0xe8] sm:$0xf0]  ;;  %v4826_v4 = vld [vmem:[%s5523_s5 + $0x380] sm:$0xff] }
 0x171   : > { %3765 = vmatpush.bf16.msra.mxu3 %v4805_v63  ;;  %v4149_v61 = vor.u32 %v4703_v52, %v4146_v54  ;;  %v4836_v63 = vld [vmem:[%s5523_s5 + $0x3d0] sm:$0xff]  ;;  %v4835_v3 = vld [vmem:[%s5523_s5 + $0x3c8] sm:$0xff] }
 0x172   : > { %3709 = vmatpush.bf16.msra.mxu0 %v4780_v5  ;;  %v4818_v5 = vld [vmem:[%s5523_s5 + $0x340] sm:$0xff] }
 0x173   : > { %3728 = vmatpush.bf16.msra.mxu1 %v4788_v6  ;;  %v4810_v6 = vld [vmem:[%s5523_s5 + $0x300] sm:$0xff] }
 0x174   : > { %3747 = vmatpush.bf16.msra.mxu2 %v4796_v1  ;;  %v4819_v1 = vld [vmem:[%s5523_s5 + $0x348] sm:$0xff] }
 0x175   : > { %3766 = vmatpush.bf16.msra.mxu3 %v4804_v7  ;;  %v4834_v7 = vld [vmem:[%s5523_s5 + $0x3c0] sm:$0xff] }
 0x176   : > { %3710 = vmatpush.bf16.msra.mxu0 %v4779_v9  ;;  %v4696_v9 = vld [vmem:[%s5881_s0 + $0x6c] sm:$0xf0] }
 0x177   : > { %3729 = vmatpush.bf16.msra.mxu1 %v4787_v10  ;;  %v4688_v10 = vld [vmem:[%s5881_s0 + $0x34] sm:$0xf] }
 0x178   : > { %3748 = vmatpush.bf16.msra.mxu2 %v4795_v8  ;;  %v4088_v8 = vld [vmem:[%s5881_s0 + $0x30] sm:$0xf] }
 0x179   : > { %3767 = vmatpush.bf16.msra.mxu3 %v4803_v11  ;;  %v4090_v11 = vld [vmem:[%s5881_s0 + $0x70] sm:$0xf0] }
 0x17a   : > { %3711 = vmatpush.bf16.msra.mxu0 %v4778_v14  ;;  %v4689_v14 = vld [vmem:[%s5881_s0 + $0x3c] sm:$0xf]  ;;  %v4093_v17 = vor.u32 %v4688_v10, %v4090_v11 }
 0x17b   : > { %3730 = vmatpush.bf16.msra.mxu1 %v4786_v15  ;;  %v4098_v15 = vld [vmem:[%s5881_s0 + $0x78] sm:$0xf0] }
 0x17c   : > { %3749 = vmatpush.bf16.msra.mxu2 %v4794_v12  ;;  %v4096_v12 = vld [vmem:[%s5881_s0 + $0x38] sm:$0xf] }
 0x17d   : > { %3768 = vmatpush.bf16.msra.mxu3 %v4802_v16  ;;  %3712 = vmatmul.bf16.vlgmr.msra.gmra.mxu0 %v4073_v29  ;;  %v4089_v16 = vor.u32 %v4696_v9, %v4088_v8 }
 0x17e   : > { %3780 = vmatpush.bf16.msrb.mxu0 %v4817_v19  ;;  %3731 = vmatmul.bf16.vlgmr.msra.gmra.mxu1 %v4077_v31  ;;  %v4101_v19 = vor.u32 %v4689_v14, %v4098_v15  ;;  %v4165_v31 = vor.u32 %v4705_v26, %v4162_v27 }
 0x17f   : > { %3799 = vmatpush.bf16.msrb.mxu1 %v4825_v20  ;;  %3750 = vmatmul.bf16.vlgmr.msra.gmra.mxu2 %v4081_v32  ;;  %v4152_v20 = vld [vmem:[%s5881_s0 + $0xb0] sm:$0xf]  ;;  %v4893_v32 = vld [vmem:[%s2330_s19] ss:$0 sm:$0xff]  ;;  %s2320_s19 = scalar_lea.vmem [#allocation3], %s4037_s6 }
 0x180   : > { %3818 = vmatpush.bf16.msrb.mxu2 %v4833_v13  ;;  %3769 = vmatmul.bf16.vlgmr.msra.gmra.mxu3 %v4085_v33  ;;  %v4697_v13 = vld [vmem:[%s5881_s0 + $0x74] sm:$0xf0]  ;;  %v4153_v28 = vor.u32 %v4712_v21, %v4152_v20 }
 0x181   : > { %3837 = vmatpush.bf16.msrb.mxu3 %v4841_v22  ;;  %v4097_v18 = vor.u32 %v4697_v13, %v4096_v12  ;;  %v4704_v22 = vld [vmem:[%s5881_s0 + $0xb4] sm:$0xf] }
 0x182   : > { %3781 = vmatpush.bf16.msrb.mxu0 %v4816_v34 }
 0x183   : > { %3800 = vmatpush.bf16.msrb.mxu1 %v4824_v30  ;;  %v4161_v30 = vor.u32 %v4713_v25, %v4160_v24 }
 0x184   : > { %3819 = vmatpush.bf16.msrb.mxu2 %v4832_v23  ;;  %v4154_v23 = vld [vmem:[%s5881_s0 + $0xf0] sm:$0xf0] }
 0x185   : > { %3838 = vmatpush.bf16.msrb.mxu3 %v4840_v35  ;;  %v4157_v29 = vor.u32 %v4704_v22, %v4154_v23 }
 0x186   : > { %3782 = vmatpush.bf16.msrb.mxu0 %v4815_v38 }
 0x187   : > { %3801 = vmatpush.bf16.msrb.mxu1 %v4823_v37 }
 0x188   : > { %3820 = vmatpush.bf16.msrb.mxu2 %v4831_v36 }
 0x189   : > { %3839 = vmatpush.bf16.msrb.mxu3 %v4839_v39 }
 0x18a   : > { %3783 = vmatpush.bf16.msrb.mxu0 %v4814_v42 }
 0x18b   : > { %3802 = vmatpush.bf16.msrb.mxu1 %v4822_v41 }
 0x18c   : > { %3821 = vmatpush.bf16.msrb.mxu2 %v4830_v40 }
 0x18d   : > { %3840 = vmatpush.bf16.msrb.mxu3 %v4838_v43  ;;  %3717 = vmatmul.bf16.gmra.mxu0 %v4137_v57 }
 0x18e   : > { %3784 = vmatpush.bf16.msrb.mxu0 %v4813_v53  ;;  %3736 = vmatmul.bf16.gmra.mxu1 %v4141_v59 }
 0x18f   : > { %3803 = vmatpush.bf16.msrb.mxu1 %v4821_v47  ;;  %3755 = vmatmul.bf16.gmra.mxu2 %v4145_v60 }
 0x190   : > { %3822 = vmatpush.bf16.msrb.mxu2 %v4829_v44  ;;  %3774 = vmatmul.bf16.gmra.mxu3 %v4149_v61 }
 0x191   : > { %3841 = vmatpush.bf16.msrb.mxu3 %v4837_v55 }
 0x192   : > { %3785 = vmatpush.bf16.msrb.mxu0 %v4812_v62 }
 0x193   : > { %3804 = vmatpush.bf16.msrb.mxu1 %v4820_v58 }
 0x194   : > { %3823 = vmatpush.bf16.msrb.mxu2 %v4828_v56 }
 0x195   : > { %3842 = vmatpush.bf16.msrb.mxu3 %v4836_v63 }
 0x196   : > { %3786 = vmatpush.bf16.msrb.mxu0 %v4811_v2 }
 0x197   : > { %3805 = vmatpush.bf16.msrb.mxu1 %v4819_v1 }
 0x198   : > { %3824 = vmatpush.bf16.msrb.mxu2 %v4827_v0 }
 0x199   : > { %3843 = vmatpush.bf16.msrb.mxu3 %v4835_v3 }
 0x19a   : > { %3787 = vmatpush.bf16.msrb.mxu0 %v4810_v6 }
 0x19b   : > { %3806 = vmatpush.bf16.msrb.mxu1 %v4818_v5 }
 0x19c   : > { %3825 = vmatpush.bf16.msrb.mxu2 %v4826_v4 }
 0x19d   : > { %3844 = vmatpush.bf16.msrb.mxu3 %v4834_v7  ;;  %3788 = vmatmul.bf16.vlgmr.msrb.gmra.mxu0 %v4089_v16 }
 0x19e   : > { %3807 = vmatmul.bf16.vlgmr.msrb.gmra.mxu1 %v4093_v17 }
 0x19f   : > { %3826 = vmatmul.bf16.vlgmr.msrb.gmra.mxu2 %v4097_v18 }
 0x1a0   : > { %3845 = vmatmul.bf16.vlgmr.msrb.gmra.mxu3 %v4101_v19 }
 0x1ad   : > { %3793 = vmatmul.bf16.gmra.mxu0 %v4153_v28 }
 0x1ae   : > { %3812 = vmatmul.bf16.gmra.mxu1 %v4157_v29 }
 0x1af   : > { %3831 = vmatmul.bf16.gmra.mxu2 %v4161_v30 }
 0x1b0   : > { %3850 = vmatmul.bf16.gmra.mxu3 %v4165_v31 }
 0x1ba   : > { %v3561_v33 = vpop.f32.mrf.mxu0 }
 0x1bb   : > { %v3580_v34 = vpop.f32.mrf.mxu1  ;;  %v3562_v35 = vadd.f32 %v4893_v32, %v3561_v33 }
 0x1bd   : > { %v3581_v36 = vadd.f32 %v3580_v34, %v3562_v35 }
 0x1c2   : > { %v3599_v37 = vpop.f32.mrf.mxu2  ;;  %v3563_v40 = vpop.f32.mrf.mxu0 }
 0x1c3   : > { %v3618_v38 = vpop.f32.mrf.mxu3  ;;  %v3600_v39 = vadd.f32 %v3599_v37, %v3581_v36  ;;  %v3582_v41 = vpop.f32.mrf.mxu1  ;;  %v3564_v42 = vadd.f32 %v4893_v32, %v3563_v40 }
 0x1c5   : > { %v3619_v43 = vadd.f32 %v3618_v38, %v3600_v39  ;;  %v3583_v44 = vadd.f32 %v3582_v41, %v3564_v42 }
 0x1ca   : > { %v3601_v45 = vpop.f32.mrf.mxu2  ;;  %v3566_v48 = vpop.f32.mrf.mxu0 }
 0x1cb   : > { %v3620_v46 = vpop.f32.mrf.mxu3  ;;  %v3602_v47 = vadd.f32 %v3601_v45, %v3583_v44  ;;  %v3585_v49 = vpop.f32.mrf.mxu1  ;;  %v3567_v50 = vadd.f32 %v4893_v32, %v3566_v48 }
 0x1cd   : > { %v3621_v51 = vadd.f32 %v3620_v46, %v3602_v47  ;;  %v3586_v52 = vadd.f32 %v3585_v49, %v3567_v50 }
 0x1d2   : > { %v3604_v53 = vpop.f32.mrf.mxu2  ;;  %v3568_v56 = vpop.f32.mrf.mxu0 }
 0x1d3   : > { %v3623_v54 = vpop.f32.mrf.mxu3  ;;  %v3605_v55 = vadd.f32 %v3604_v53, %v3586_v52  ;;  %v3587_v57 = vpop.f32.mrf.mxu1  ;;  %v3569_v58 = vadd.f32 %v4893_v32, %v3568_v56 }
 0x1d5   : > { %v3624_v59 = vadd.f32 %v3623_v54, %v3605_v55  ;;  %v3588_v60 = vadd.f32 %v3587_v57, %v3569_v58 }
 0x1da   : > { %v3606_v61 = vpop.f32.mrf.mxu2  ;;  %v3637_v0 = vpop.f32.mrf.mxu0 }
 0x1db   : > { %v3625_v62 = vpop.f32.mrf.mxu3  ;;  %v3607_v63 = vadd.f32 %v3606_v61, %v3588_v60  ;;  %v3656_v1 = vpop.f32.mrf.mxu1  ;;  %v3638_v24 = vadd.f32 %v3637_v0, %v3619_v43 }
 0x1dd   : > { %v3626_v2 = vadd.f32 %v3625_v62, %v3607_v63  ;;  %v3657_v29 = vadd.f32 %v3656_v1, %v3638_v24 }
 0x1e2   : > { %v3675_v3 = vpop.f32.mrf.mxu2  ;;  %v3639_v5 = vpop.f32.mrf.mxu0 }
 0x1e3   : > { %v3694_v4 = vpop.f32.mrf.mxu3  ;;  %v3658_v6 = vpop.f32.mrf.mxu1  ;;  %v3640_v28 = vadd.f32 %v3639_v5, %v3621_v51  ;;  %v3676_v30 = vadd.f32 %v3675_v3, %v3657_v29 }
 0x1e5   : > { %v3659_v31 = vadd.f32 %v3658_v6, %v3640_v28  ;;  %v3695_v37 = vadd.f32 %v3694_v4, %v3676_v30 }
 0x1ea   : > { %v3677_v7 = vpop.f32.mrf.mxu2  ;;  %v3642_v9 = vpop.f32.mrf.mxu0 }
 0x1eb   : > { %v3696_v8 = vpop.f32.mrf.mxu3  ;;  %v3661_v10 = vpop.f32.mrf.mxu1  ;;  %v3678_v33 = vadd.f32 %v3677_v7, %v3659_v31  ;;  %v3643_v42 = vadd.f32 %v3642_v9, %v3624_v59 }
 0x1ed   : > { %v3697_v38 = vadd.f32 %v3696_v8, %v3678_v33  ;;  %v3662_v50 = vadd.f32 %v3661_v10, %v3643_v42 }
 0x1f2   : > { %v3680_v11 = vpop.f32.mrf.mxu2  ;;  %v3644_v13 = vpop.f32.mrf.mxu0 }
 0x1f3   : > { %v3699_v12 = vpop.f32.mrf.mxu3  ;;  %v3663_v14 = vpop.f32.mrf.mxu1  ;;  %v3645_v47 = vadd.f32 %v3644_v13, %v3626_v2  ;;  %v3681_v52 = vadd.f32 %v3680_v11, %v3662_v50 }
 0x1f5   : > { %v3664_v53 = vadd.f32 %v3663_v14, %v3645_v47  ;;  %v3700_v62 = vadd.f32 %v3699_v12, %v3681_v52 }
 0x1fa   : > { %v3682_v15 = vpop.f32.mrf.mxu2  ;;  %v3713_v17 = vpop.f32.mrf.mxu0 }
 0x1fb   : > { %v3701_v16 = vpop.f32.mrf.mxu3  ;;  %v3732_v18 = vpop.f32.mrf.mxu1  ;;  %v3714_v39 = vadd.f32 %v3713_v17, %v3695_v37  ;;  %v3683_v56 = vadd.f32 %v3682_v15, %v3664_v53 }
 0x1fd   : > { %v3733_v44 = vadd.f32 %v3732_v18, %v3714_v39  ;;  %v3702_v0 = vadd.f32 %v3701_v16, %v3683_v56 }
 0x202   : > { %v3751_v19 = vpop.f32.mrf.mxu2  ;;  %v3715_v21 = vpop.f32.mrf.mxu0 }
 0x203   : > { %v3770_v20 = vpop.f32.mrf.mxu3  ;;  %v3734_v22 = vpop.f32.mrf.mxu1  ;;  %v3716_v40 = vadd.f32 %v3715_v21, %v3697_v38  ;;  %v3752_v48 = vadd.f32 %v3751_v19, %v3733_v44 }
 0x205   : > { %v3735_v49 = vadd.f32 %v3734_v22, %v3716_v40  ;;  %v3771_v54 = vadd.f32 %v3770_v20, %v3752_v48 }
 0x20a   : > { %v3753_v23 = vpop.f32.mrf.mxu2  ;;  %v3718_v26 = vpop.f32.mrf.mxu0 }
 0x20b   : > { %v3772_v25 = vpop.f32.mrf.mxu3  ;;  %v3737_v27 = vpop.f32.mrf.mxu1  ;;  %v3754_v51 = vadd.f32 %v3753_v23, %v3735_v49  ;;  %v3719_v1 = vadd.f32 %v3718_v26, %v3700_v62 }
 0x20d   : > { %v3773_v57 = vadd.f32 %v3772_v25, %v3754_v51  ;;  %v3738_v7 = vadd.f32 %v3737_v27, %v3719_v1 }
 0x212   : > { %v3756_v32 = vpop.f32.mrf.mxu2  ;;  %v3720_v35 = vpop.f32.mrf.mxu0 }
 0x213   : > { %v3775_v34 = vpop.f32.mrf.mxu3  ;;  %v3739_v36 = vpop.f32.mrf.mxu1  ;;  %v3721_v3 = vadd.f32 %v3720_v35, %v3702_v0  ;;  %v3757_v11 = vadd.f32 %v3756_v32, %v3738_v7 }
 0x215   : > { %v3740_v13 = vadd.f32 %v3739_v36, %v3721_v3  ;;  %v3776_v16 = vadd.f32 %v3775_v34, %v3757_v11 }
 0x21a   : > { %v3758_v41 = vpop.f32.mrf.mxu2  ;;  %v3789_v45 = vpop.f32.mrf.mxu0 }
 0x21b   : > { %v3777_v43 = vpop.f32.mrf.mxu3  ;;  %v3808_v46 = vpop.f32.mrf.mxu1  ;;  %v3790_v58 = vadd.f32 %v3789_v45, %v3771_v54  ;;  %v3759_v12 = vadd.f32 %v3758_v41, %v3740_v13 }
 0x21d   : > { %v3809_v2 = vadd.f32 %v3808_v46, %v3790_v58  ;;  %v3778_v20 = vadd.f32 %v3777_v43, %v3759_v12 }
 0x222   : > { %v3827_v55 = vpop.f32.mrf.mxu2  ;;  %v3791_v61 = vpop.f32.mrf.mxu0 }
 0x223   : > { %v3846_v60 = vpop.f32.mrf.mxu3  ;;  %v3810_v59 = vpop.f32.mrf.mxu1  ;;  %v3792_v63 = vadd.f32 %v3791_v61, %v3773_v57  ;;  %v3828_v4 = vadd.f32 %v3827_v55, %v3809_v2 }
 0x225   : > { %v3811_v5 = vadd.f32 %v3810_v59, %v3792_v63  ;;  %v3847_v14 = vadd.f32 %v3846_v60, %v3828_v4 }
 0x22a   : > { %v3829_v6 = vpop.f32.mrf.mxu2  ;;  %v3794_v10 = vpop.f32.mrf.mxu0 }
 0x22b   : > { %v3830_v8 = vadd.f32 %v3829_v6, %v3811_v5  ;;  %v3848_v9 = vpop.f32.mrf.mxu3  ;;  %v3813_v17 = vpop.f32.mrf.mxu1  ;;  %v3795_v21 = vadd.f32 %v3794_v10, %v3776_v16 }
 0x22d   : > { %v3849_v15 = vadd.f32 %v3848_v9, %v3830_v8  ;;  %v3814_v25 = vadd.f32 %v3813_v17, %v3795_v21 }
 0x22f   : > { %v4845_v18 = vpack.c.bf16 %v3849_v15, %v3847_v14 }
 0x231   : > { %4846 = vst [vmem:[%s2320_s19] sm:$0xff] %v4845_v18  }
 0x232   : > { %v3832_v19 = vpop.f32.mrf.mxu2  ;;  %v3796_v23 = vpop.f32.mrf.mxu0 }
 0x233   : > { %v3851_v22 = vpop.f32.mrf.mxu3  ;;  %v3797_v24 = vadd.f32 %v3796_v23, %v3778_v20  ;;  %v3815_v26 = vpop.f32.mrf.mxu1  ;;  %v3833_v27 = vadd.f32 %v3832_v19, %v3814_v25 }
 0x235   : > { %v3816_v28 = vadd.f32 %v3815_v26, %v3797_v24  ;;  %v3852_v32 = vadd.f32 %v3851_v22, %v3833_v27 }
 0x238   : > { %v3892_v34 = vld [vmem:[%s2320_s19] sm:$0xf] (%p4989_p6)  ;;  %v3894_v36 = vld [vmem:[%s2320_s19 + $0x4] sm:$0xf] (%p4989_p6) }
 0x239   : > { %3893 = vst [vmem:[%s3875_s27] sm:$0xf] (%p4989_p6), %v3892_v34 }
 0x23a   : > { %v3834_v29 = vpop.f32.mrf.mxu2  ;;  %3895 = vst [vmem:[%s3875_s27 + $0x8] sm:$0xf] (%p4989_p6), %v3894_v36 }
 0x23b   : > { %v3835_v30 = vadd.f32 %v3834_v29, %v3816_v28  ;;  %v3853_v31 = vpop.f32.mrf.mxu3 }
 0x23d   : > { %v3854_v33 = vadd.f32 %v3853_v31, %v3835_v30  ;;  %3870 = sbr.rel (!%p4989_p6) target bundleno = 587 (0x24b), region = 88 }
 0x23f   : > { %v4850_v35 = vpack.c.bf16 %v3854_v33, %v3852_v32 }
 0x241   : > { %4852 = vst [vmem:[%s2320_s19 + $0x8] sm:$0xff] %v4850_v35  }
 0x248   : > { %v3896_v37 = vld [vmem:[%s2320_s19 + $0x8] sm:$0xf]  ;;  %v3898_v38 = vld [vmem:[%s2320_s19 + $0xc] sm:$0xf] }
 0x249   : > { %3897 = vst [vmem:[%s3875_s27 + $0x10] sm:$0xf] %v3896_v37 }
 0x24a   : > { %3899 = vst [vmem:[%s3875_s27 + $0x18] sm:$0xf] %v3898_v38 }
 0x24b PF: > { %s13_s16 = sadd.s32 1, %s4932_s16   ;;  %s5886_s12 = smov %s4920_s13 }
 0x24c   : > { %p10_p12 = scmp.ge.s32.totalorder %s13_s16, 4   ;;  %s5887_s13 = smov %s4994_s22 }
 0x24d   : > { %s5888_s14 = smov %s4928_s15  ;;  %s5889_s15 = smov %s5891_s17 }
 0x24e   :  { %12 = sbr.rel (!%p10_p12) target bundleno = 3 (0x3), region = 170 }

// kernel: discriminator_forward.8
= control target key start
LH: loop header
LB: loop body
LE: loop exit
PB: predicated region body
PF: predicated region fallthrough
CT: control target
= control target key end

     0   :  { %s9322_s12 = smov 0   ;;  %s9324_s13 = smov 0   ;;  %s11114_s0 = inlined_call_operand.vmem [shape: bf16[32,4096], index: 0, kind: input, shape index: {}]   ;;  %s11115_s1 = inlined_call_operand.vmem [shape: bf16[4096,512], index: 1, kind: input, shape index: {}]   ;;  %s11116_s2 = inlined_call_operand.vmem [shape: f32[1,512], index: 2, kind: input, shape index: {}]   ;;  %s11117_s3 = inlined_call_operand.vmem [shape: bf16[32,512], index: 3, kind: output, shape index: {}]  }
   0x1   :  { %s9326_s14 = smov 0   ;;  %s9328_s15 = smov 0  }
   0x2   :  { %s9330_s16 = smov 0  }
   0x3 LB: > { %s25_s17 = sadd.s32 1, %s9296_s15  ;;  %s7596_s18 = sadd.s32 4294967295, %s9300_s16   ;;  %s9300_s16 = sphi %s9330_s16, %s13_s16   ;;  %s9296_s15 = sphi %s9328_s15, %s11122_s15   ;;  %s9292_s14 = sphi %s9326_s14, %s11121_s14   ;;  %s9288_s13 = sphi %s9324_s13, %s11120_s13   ;;  %s9284_s12 = sphi %s9322_s12, %s11119_s12  }
   0x4   : > { %p27_p0 = scmp.ge.s32.totalorder %s25_s17, 4  ;;  %p65_p1 = scmp.ne.s32.totalorder %s9288_s13, %s9284_s12 }
   0x5   : > { %p66_p2 = scmp.eq.s32.totalorder %s9300_s16, 0  ;;  %p123_p4 = scmp.eq.s32.totalorder %s7596_s18, 3 }
   0x6   : > { %s11124_s17 = smov (%p27_p0, %s25_s17), 0  ;;  %s58_s20 = sadd.s32 1, %s9288_s13 }
   0x7   : > { %p67_p3 = por %p66_p2, %p65_p1  ;;  %s55_s19 = ssub.s32 %s9296_s15, %s11124_s17 }
   0x8   : > { %p56_p5 = scmp.eq.s32.totalorder %s55_s19, 0  ;;  %p9357_p6 = por %p123_p4, %p65_p1 }
   0x9   : > { %p7600_p7 = scmp.ge.s32.totalorder %s9300_s16, 4 }
   0xa   : > { %s9362_s22 = scalar_select %p56_p5, %s9288_s13, %s58_s20  }
   0xb   : > { %155 = sbr.rel (%p7600_p7) target bundleno = 532 (0x214), region = 20 }
  0x10   : > { %158 = sbr.rel (!%p67_p3) target bundleno = 532 (0x214), region = 24  ;;  %s160_s23 = sand.u32 (%p67_p3), 1, %s9288_s13  }
  0x11   : > { %s7602_s24 = sshll.u32 (%p67_p3), %s9296_s15, 2  ;;  %s7601_s25 = sshll.u32 (%p67_p3), %s160_s23, 11 }
  0x12   : > { %s9370_s28 = scalar_lea.vmem (%p67_p3), %s11115_s1, %s7602_s24  ;;  %s9374_s29 = scalar_lea.vmem (%p67_p3), [#allocation2], %s7601_s25 }
  0x13   : > { %v181_v0 = vld [vmem:[%s9370_s28] sm:$0xf] (%p67_p3)  ;;  %v183_v1 = vld [vmem:[%s9370_s28 + $0x10] sm:$0xf] (%p67_p3) }
  0x14   : > { %182 = vst [vmem:[%s9374_s29] sm:$0xf] (%p67_p3), %v181_v0  ;;  %v185_v2 = vld [vmem:[%s9370_s28 + $0x20] sm:$0xf] (%p67_p3)  ;;  %v187_v3 = vld [vmem:[%s9370_s28 + $0x30] sm:$0xf] (%p67_p3) }
  0x15   : > { %184 = vst [vmem:[%s9374_s29 + $0x4] sm:$0xf] %v183_v1  ;;  %v189_v4 = vld [vmem:[%s9370_s28 + $0x40] sm:$0xf]  ;;  %v191_v5 = vld [vmem:[%s9370_s28 + $0x50] sm:$0xf] }
  0x16   : > { %186 = vst [vmem:[%s9374_s29 + $0x8] sm:$0xf] %v185_v2  ;;  %v193_v6 = vld [vmem:[%s9370_s28 + $0x60] sm:$0xf]  ;;  %v195_v7 = vld [vmem:[%s9370_s28 + $0x70] sm:$0xf] }
  0x17   : > { %188 = vst [vmem:[%s9374_s29 + $0xc] sm:$0xf] %v187_v3  ;;  %v197_v8 = vld [vmem:[%s9370_s28 + $0x80] sm:$0xf]  ;;  %v199_v9 = vld [vmem:[%s9370_s28 + $0x90] sm:$0xf] }
  0x18   : > { %190 = vst [vmem:[%s9374_s29 + $0x10] sm:$0xf] %v189_v4  ;;  %v201_v10 = vld [vmem:[%s9370_s28 + $0xa0] sm:$0xf]  ;;  %v203_v11 = vld [vmem:[%s9370_s28 + $0xb0] sm:$0xf] }
  0x19   : > { %192 = vst [vmem:[%s9374_s29 + $0x14] sm:$0xf] %v191_v5  ;;  %v205_v12 = vld [vmem:[%s9370_s28 + $0xc0] sm:$0xf]  ;;  %v207_v13 = vld [vmem:[%s9370_s28 + $0xd0] sm:$0xf] }
  0x1a   : > { %194 = vst [vmem:[%s9374_s29 + $0x18] sm:$0xf] %v193_v6  ;;  %v209_v14 = vld [vmem:[%s9370_s28 + $0xe0] sm:$0xf]  ;;  %v211_v15 = vld [vmem:[%s9370_s28 + $0xf0] sm:$0xf] }
  0x1b   : > { %196 = vst [vmem:[%s9374_s29 + $0x1c] sm:$0xf] %v195_v7  ;;  %v213_v16 = vld [vmem:[%s9370_s28 + $0x100] sm:$0xf]  ;;  %v215_v17 = vld [vmem:[%s9370_s28 + $0x110] sm:$0xf] }
  0x1c   : > { %198 = vst [vmem:[%s9374_s29 + $0x20] sm:$0xf] %v197_v8  ;;  %v217_v18 = vld [vmem:[%s9370_s28 + $0x120] sm:$0xf]  ;;  %v219_v19 = vld [vmem:[%s9370_s28 + $0x130] sm:$0xf] }
  0x1d   : > { %200 = vst [vmem:[%s9374_s29 + $0x24] sm:$0xf] %v199_v9  ;;  %v221_v20 = vld [vmem:[%s9370_s28 + $0x140] sm:$0xf]  ;;  %v223_v21 = vld [vmem:[%s9370_s28 + $0x150] sm:$0xf] }
  0x1e   : > { %202 = vst [vmem:[%s9374_s29 + $0x28] sm:$0xf] %v201_v10  ;;  %v225_v22 = vld [vmem:[%s9370_s28 + $0x160] sm:$0xf]  ;;  %v227_v23 = vld [vmem:[%s9370_s28 + $0x170] sm:$0xf] }
  0x1f   : > { %204 = vst [vmem:[%s9374_s29 + $0x2c] sm:$0xf] %v203_v11  ;;  %v229_v24 = vld [vmem:[%s9370_s28 + $0x180] sm:$0xf]  ;;  %v231_v25 = vld [vmem:[%s9370_s28 + $0x190] sm:$0xf] }
  0x20   : > { %206 = vst [vmem:[%s9374_s29 + $0x30] sm:$0xf] %v205_v12  ;;  %v233_v26 = vld [vmem:[%s9370_s28 + $0x1a0] sm:$0xf]  ;;  %v235_v27 = vld [vmem:[%s9370_s28 + $0x1b0] sm:$0xf] }
  0x21   : > { %208 = vst [vmem:[%s9374_s29 + $0x34] sm:$0xf] %v207_v13  ;;  %v237_v28 = vld [vmem:[%s9370_s28 + $0x1c0] sm:$0xf]  ;;  %v239_v29 = vld [vmem:[%s9370_s28 + $0x1d0] sm:$0xf] }
  0x22   : > { %210 = vst [vmem:[%s9374_s29 + $0x38] sm:$0xf] %v209_v14  ;;  %v241_v30 = vld [vmem:[%s9370_s28 + $0x1e0] sm:$0xf]  ;;  %v243_v31 = vld [vmem:[%s9370_s28 + $0x1f0] sm:$0xf] }
  0x23   : > { %212 = vst [vmem:[%s9374_s29 + $0x3c] sm:$0xf] %v211_v15  ;;  %v245_v32 = vld [vmem:[%s9370_s28 + $0x200] sm:$0xf]  ;;  %v247_v33 = vld [vmem:[%s9370_s28 + $0x210] sm:$0xf] }
  0x24   : > { %214 = vst [vmem:[%s9374_s29 + $0x40] sm:$0xf] %v213_v16  ;;  %v249_v34 = vld [vmem:[%s9370_s28 + $0x220] sm:$0xf]  ;;  %v251_v35 = vld [vmem:[%s9370_s28 + $0x230] sm:$0xf] }
  0x25   : > { %216 = vst [vmem:[%s9374_s29 + $0x44] sm:$0xf] %v215_v17  ;;  %v253_v36 = vld [vmem:[%s9370_s28 + $0x240] sm:$0xf]  ;;  %v255_v37 = vld [vmem:[%s9370_s28 + $0x250] sm:$0xf] }
  0x26   : > { %218 = vst [vmem:[%s9374_s29 + $0x48] sm:$0xf] %v217_v18  ;;  %v257_v38 = vld [vmem:[%s9370_s28 + $0x260] sm:$0xf]  ;;  %v259_v39 = vld [vmem:[%s9370_s28 + $0x270] sm:$0xf] }
  0x27   : > { %220 = vst [vmem:[%s9374_s29 + $0x4c] sm:$0xf] %v219_v19  ;;  %v261_v40 = vld [vmem:[%s9370_s28 + $0x280] sm:$0xf]  ;;  %v263_v41 = vld [vmem:[%s9370_s28 + $0x290] sm:$0xf] }
  0x28   : > { %222 = vst [vmem:[%s9374_s29 + $0x50] sm:$0xf] %v221_v20  ;;  %v265_v42 = vld [vmem:[%s9370_s28 + $0x2a0] sm:$0xf]  ;;  %v267_v43 = vld [vmem:[%s9370_s28 + $0x2b0] sm:$0xf] }
  0x29   : > { %224 = vst [vmem:[%s9374_s29 + $0x54] sm:$0xf] %v223_v21  ;;  %v269_v44 = vld [vmem:[%s9370_s28 + $0x2c0] sm:$0xf]  ;;  %v271_v45 = vld [vmem:[%s9370_s28 + $0x2d0] sm:$0xf] }
  0x2a   : > { %226 = vst [vmem:[%s9374_s29 + $0x58] sm:$0xf] %v225_v22  ;;  %v273_v46 = vld [vmem:[%s9370_s28 + $0x2e0] sm:$0xf]  ;;  %v275_v47 = vld [vmem:[%s9370_s28 + $0x2f0] sm:$0xf] }
  0x2b   : > { %228 = vst [vmem:[%s9374_s29 + $0x5c] sm:$0xf] %v227_v23  ;;  %v277_v48 = vld [vmem:[%s9370_s28 + $0x300] sm:$0xf]  ;;  %v279_v49 = vld [vmem:[%s9370_s28 + $0x310] sm:$0xf] }
  0x2c   : > { %230 = vst [vmem:[%s9374_s29 + $0x60] sm:$0xf] %v229_v24  ;;  %v281_v50 = vld [vmem:[%s9370_s28 + $0x320] sm:$0xf]  ;;  %v283_v51 = vld [vmem:[%s9370_s28 + $0x330] sm:$0xf] }
  0x2d   : > { %232 = vst [vmem:[%s9374_s29 + $0x64] sm:$0xf] %v231_v25  ;;  %v285_v52 = vld [vmem:[%s9370_s28 + $0x340] sm:$0xf]  ;;  %v287_v53 = vld [vmem:[%s9370_s28 + $0x350] sm:$0xf] }
  0x2e   : > { %234 = vst [vmem:[%s9374_s29 + $0x68] sm:$0xf] %v233_v26  ;;  %v289_v54 = vld [vmem:[%s9370_s28 + $0x360] sm:$0xf]  ;;  %v291_v55 = vld [vmem:[%s9370_s28 + $0x370] sm:$0xf] }
  0x2f   : > { %236 = vst [vmem:[%s9374_s29 + $0x6c] sm:$0xf] %v235_v27  ;;  %v293_v56 = vld [vmem:[%s9370_s28 + $0x380] sm:$0xf]  ;;  %v295_v57 = vld [vmem:[%s9370_s28 + $0x390] sm:$0xf] }
  0x30   : > { %238 = vst [vmem:[%s9374_s29 + $0x70] sm:$0xf] %v237_v28  ;;  %v297_v58 = vld [vmem:[%s9370_s28 + $0x3a0] sm:$0xf]  ;;  %v299_v59 = vld [vmem:[%s9370_s28 + $0x3b0] sm:$0xf] }
  0x31   : > { %240 = vst [vmem:[%s9374_s29 + $0x74] sm:$0xf] %v239_v29  ;;  %v301_v60 = vld [vmem:[%s9370_s28 + $0x3c0] sm:$0xf]  ;;  %v303_v61 = vld [vmem:[%s9370_s28 + $0x3d0] sm:$0xf] }
  0x32   : > { %242 = vst [vmem:[%s9374_s29 + $0x78] sm:$0xf] %v241_v30  ;;  %v305_v62 = vld [vmem:[%s9370_s28 + $0x3e0] sm:$0xf]  ;;  %v307_v63 = vld [vmem:[%s9370_s28 + $0x3f0] sm:$0xf] }
  0x33   : > { %244 = vst [vmem:[%s9374_s29 + $0x7c] sm:$0xf] %v243_v31  ;;  %v309_v0 = vld [vmem:[%s9370_s28 + $0x400] sm:$0xf]  ;;  %v311_v1 = vld [vmem:[%s9370_s28 + $0x410] sm:$0xf] }
  0x34   : > { %246 = vst [vmem:[%s9374_s29 + $0x80] sm:$0xf] %v245_v32  ;;  %v313_v2 = vld [vmem:[%s9370_s28 + $0x420] sm:$0xf]  ;;  %v315_v3 = vld [vmem:[%s9370_s28 + $0x430] sm:$0xf] }
  0x35   : > { %248 = vst [vmem:[%s9374_s29 + $0x84] sm:$0xf] %v247_v33  ;;  %v317_v4 = vld [vmem:[%s9370_s28 + $0x440] sm:$0xf]  ;;  %v319_v5 = vld [vmem:[%s9370_s28 + $0x450] sm:$0xf] }
  0x36   : > { %250 = vst [vmem:[%s9374_s29 + $0x88] sm:$0xf] %v249_v34  ;;  %v321_v6 = vld [vmem:[%s9370_s28 + $0x460] sm:$0xf]  ;;  %v323_v7 = vld [vmem:[%s9370_s28 + $0x470] sm:$0xf] }
  0x37   : > { %252 = vst [vmem:[%s9374_s29 + $0x8c] sm:$0xf] %v251_v35  ;;  %v325_v8 = vld [vmem:[%s9370_s28 + $0x480] sm:$0xf]  ;;  %v327_v9 = vld [vmem:[%s9370_s28 + $0x490] sm:$0xf] }
  0x38   : > { %254 = vst [vmem:[%s9374_s29 + $0x90] sm:$0xf] %v253_v36  ;;  %v329_v10 = vld [vmem:[%s9370_s28 + $0x4a0] sm:$0xf]  ;;  %v331_v11 = vld [vmem:[%s9370_s28 + $0x4b0] sm:$0xf] }
  0x39   : > { %256 = vst [vmem:[%s9374_s29 + $0x94] sm:$0xf] %v255_v37  ;;  %v333_v12 = vld [vmem:[%s9370_s28 + $0x4c0] sm:$0xf]  ;;  %v335_v13 = vld [vmem:[%s9370_s28 + $0x4d0] sm:$0xf] }
  0x3a   : > { %258 = vst [vmem:[%s9374_s29 + $0x98] sm:$0xf] %v257_v38  ;;  %v337_v14 = vld [vmem:[%s9370_s28 + $0x4e0] sm:$0xf]  ;;  %v339_v15 = vld [vmem:[%s9370_s28 + $0x4f0] sm:$0xf] }
  0x3b   : > { %260 = vst [vmem:[%s9374_s29 + $0x9c] sm:$0xf] %v259_v39  ;;  %v341_v16 = vld [vmem:[%s9370_s28 + $0x500] sm:$0xf]  ;;  %v343_v17 = vld [vmem:[%s9370_s28 + $0x510] sm:$0xf] }
  0x3c   : > { %262 = vst [vmem:[%s9374_s29 + $0xa0] sm:$0xf] %v261_v40  ;;  %v345_v18 = vld [vmem:[%s9370_s28 + $0x520] sm:$0xf]  ;;  %v347_v19 = vld [vmem:[%s9370_s28 + $0x530] sm:$0xf] }
  0x3d   : > { %264 = vst [vmem:[%s9374_s29 + $0xa4] sm:$0xf] %v263_v41  ;;  %v349_v20 = vld [vmem:[%s9370_s28 + $0x540] sm:$0xf]  ;;  %v351_v21 = vld [vmem:[%s9370_s28 + $0x550] sm:$0xf] }
  0x3e   : > { %266 = vst [vmem:[%s9374_s29 + $0xa8] sm:$0xf] %v265_v42  ;;  %v353_v22 = vld [vmem:[%s9370_s28 + $0x560] sm:$0xf]  ;;  %v355_v23 = vld [vmem:[%s9370_s28 + $0x570] sm:$0xf] }
  0x3f   : > { %268 = vst [vmem:[%s9374_s29 + $0xac] sm:$0xf] %v267_v43  ;;  %v357_v24 = vld [vmem:[%s9370_s28 + $0x580] sm:$0xf]  ;;  %v359_v25 = vld [vmem:[%s9370_s28 + $0x590] sm:$0xf] }
  0x40   : > { %270 = vst [vmem:[%s9374_s29 + $0xb0] sm:$0xf] %v269_v44  ;;  %v361_v26 = vld [vmem:[%s9370_s28 + $0x5a0] sm:$0xf]  ;;  %v363_v27 = vld [vmem:[%s9370_s28 + $0x5b0] sm:$0xf] }
  0x41   : > { %272 = vst [vmem:[%s9374_s29 + $0xb4] sm:$0xf] %v271_v45  ;;  %v365_v28 = vld [vmem:[%s9370_s28 + $0x5c0] sm:$0xf]  ;;  %v367_v29 = vld [vmem:[%s9370_s28 + $0x5d0] sm:$0xf] }
  0x42   : > { %274 = vst [vmem:[%s9374_s29 + $0xb8] sm:$0xf] %v273_v46  ;;  %v369_v30 = vld [vmem:[%s9370_s28 + $0x5e0] sm:$0xf]  ;;  %v371_v31 = vld [vmem:[%s9370_s28 + $0x5f0] sm:$0xf] }
  0x43   : > { %276 = vst [vmem:[%s9374_s29 + $0xbc] sm:$0xf] %v275_v47  ;;  %v373_v32 = vld [vmem:[%s9370_s28 + $0x600] sm:$0xf]  ;;  %v375_v33 = vld [vmem:[%s9370_s28 + $0x610] sm:$0xf] }
  0x44   : > { %278 = vst [vmem:[%s9374_s29 + $0xc0] sm:$0xf] %v277_v48  ;;  %v377_v34 = vld [vmem:[%s9370_s28 + $0x620] sm:$0xf]  ;;  %v379_v35 = vld [vmem:[%s9370_s28 + $0x630] sm:$0xf] }
  0x45   : > { %280 = vst [vmem:[%s9374_s29 + $0xc4] sm:$0xf] %v279_v49  ;;  %v381_v36 = vld [vmem:[%s9370_s28 + $0x640] sm:$0xf]  ;;  %v383_v37 = vld [vmem:[%s9370_s28 + $0x650] sm:$0xf] }
  0x46   : > { %282 = vst [vmem:[%s9374_s29 + $0xc8] sm:$0xf] %v281_v50  ;;  %v385_v38 = vld [vmem:[%s9370_s28 + $0x660] sm:$0xf]  ;;  %v387_v39 = vld [vmem:[%s9370_s28 + $0x670] sm:$0xf] }
  0x47   : > { %284 = vst [vmem:[%s9374_s29 + $0xcc] sm:$0xf] %v283_v51  ;;  %v389_v40 = vld [vmem:[%s9370_s28 + $0x680] sm:$0xf]  ;;  %v391_v41 = vld [vmem:[%s9370_s28 + $0x690] sm:$0xf] }
  0x48   : > { %286 = vst [vmem:[%s9374_s29 + $0xd0] sm:$0xf] %v285_v52  ;;  %v393_v42 = vld [vmem:[%s9370_s28 + $0x6a0] sm:$0xf]  ;;  %v395_v43 = vld [vmem:[%s9370_s28 + $0x6b0] sm:$0xf] }
  0x49   : > { %288 = vst [vmem:[%s9374_s29 + $0xd4] sm:$0xf] %v287_v53  ;;  %v397_v44 = vld [vmem:[%s9370_s28 + $0x6c0] sm:$0xf]  ;;  %v399_v45 = vld [vmem:[%s9370_s28 + $0x6d0] sm:$0xf] }
  0x4a   : > { %290 = vst [vmem:[%s9374_s29 + $0xd8] sm:$0xf] %v289_v54  ;;  %v401_v46 = vld [vmem:[%s9370_s28 + $0x6e0] sm:$0xf]  ;;  %v403_v47 = vld [vmem:[%s9370_s28 + $0x6f0] sm:$0xf] }
  0x4b   : > { %292 = vst [vmem:[%s9374_s29 + $0xdc] sm:$0xf] %v291_v55  ;;  %v405_v48 = vld [vmem:[%s9370_s28 + $0x700] sm:$0xf]  ;;  %v407_v49 = vld [vmem:[%s9370_s28 + $0x710] sm:$0xf] }
  0x4c   : > { %294 = vst [vmem:[%s9374_s29 + $0xe0] sm:$0xf] %v293_v56  ;;  %v409_v50 = vld [vmem:[%s9370_s28 + $0x720] sm:$0xf]  ;;  %v411_v51 = vld [vmem:[%s9370_s28 + $0x730] sm:$0xf] }
  0x4d   : > { %296 = vst [vmem:[%s9374_s29 + $0xe4] sm:$0xf] %v295_v57  ;;  %v413_v52 = vld [vmem:[%s9370_s28 + $0x740] sm:$0xf]  ;;  %v415_v53 = vld [vmem:[%s9370_s28 + $0x750] sm:$0xf] }
  0x4e   : > { %298 = vst [vmem:[%s9374_s29 + $0xe8] sm:$0xf] %v297_v58  ;;  %v417_v54 = vld [vmem:[%s9370_s28 + $0x760] sm:$0xf]  ;;  %v419_v55 = vld [vmem:[%s9370_s28 + $0x770] sm:$0xf] }
  0x4f   : > { %300 = vst [vmem:[%s9374_s29 + $0xec] sm:$0xf] %v299_v59  ;;  %v421_v56 = vld [vmem:[%s9370_s28 + $0x780] sm:$0xf]  ;;  %v423_v57 = vld [vmem:[%s9370_s28 + $0x790] sm:$0xf] }
  0x50   : > { %302 = vst [vmem:[%s9374_s29 + $0xf0] sm:$0xf] %v301_v60  ;;  %v425_v58 = vld [vmem:[%s9370_s28 + $0x7a0] sm:$0xf]  ;;  %v427_v59 = vld [vmem:[%s9370_s28 + $0x7b0] sm:$0xf] }
  0x51   : > { %304 = vst [vmem:[%s9374_s29 + $0xf4] sm:$0xf] %v303_v61  ;;  %v429_v60 = vld [vmem:[%s9370_s28 + $0x7c0] sm:$0xf]  ;;  %v431_v61 = vld [vmem:[%s9370_s28 + $0x7d0] sm:$0xf] }
  0x52   : > { %306 = vst [vmem:[%s9374_s29 + $0xf8] sm:$0xf] %v305_v62  ;;  %v433_v62 = vld [vmem:[%s9370_s28 + $0x7e0] sm:$0xf] }
  0x53   : > { %308 = vst [vmem:[%s9374_s29 + $0xfc] sm:$0xf] %v307_v63  ;;  %v435_v63 = vld [vmem:[%s9370_s28 + $0x7f0] sm:$0xf] }
  0x54   : > { %310 = vst [vmem:[%s9374_s29 + $0x100] sm:$0xf] %v309_v0  ;;  %v437_v0 = vld [vmem:[%s9370_s28 + $0x800] sm:$0xf] }
  0x55   : > { %312 = vst [vmem:[%s9374_s29 + $0x104] sm:$0xf] %v311_v1  ;;  %v439_v1 = vld [vmem:[%s9370_s28 + $0x810] sm:$0xf] }
  0x56   : > { %314 = vst [vmem:[%s9374_s29 + $0x108] sm:$0xf] %v313_v2  ;;  %v441_v2 = vld [vmem:[%s9370_s28 + $0x820] sm:$0xf] }
  0x57   : > { %316 = vst [vmem:[%s9374_s29 + $0x10c] sm:$0xf] %v315_v3  ;;  %v443_v3 = vld [vmem:[%s9370_s28 + $0x830] sm:$0xf] }
  0x58   : > { %318 = vst [vmem:[%s9374_s29 + $0x110] sm:$0xf] %v317_v4  ;;  %v445_v4 = vld [vmem:[%s9370_s28 + $0x840] sm:$0xf] }
  0x59   : > { %320 = vst [vmem:[%s9374_s29 + $0x114] sm:$0xf] %v319_v5  ;;  %v447_v5 = vld [vmem:[%s9370_s28 + $0x850] sm:$0xf] }
  0x5a   : > { %322 = vst [vmem:[%s9374_s29 + $0x118] sm:$0xf] %v321_v6  ;;  %v449_v6 = vld [vmem:[%s9370_s28 + $0x860] sm:$0xf] }
  0x5b   : > { %324 = vst [vmem:[%s9374_s29 + $0x11c] sm:$0xf] %v323_v7  ;;  %v451_v7 = vld [vmem:[%s9370_s28 + $0x870] sm:$0xf] }
  0x5c   : > { %326 = vst [vmem:[%s9374_s29 + $0x120] sm:$0xf] %v325_v8  ;;  %v453_v8 = vld [vmem:[%s9370_s28 + $0x880] sm:$0xf] }
  0x5d   : > { %328 = vst [vmem:[%s9374_s29 + $0x124] sm:$0xf] %v327_v9  ;;  %v455_v9 = vld [vmem:[%s9370_s28 + $0x890] sm:$0xf] }
  0x5e   : > { %330 = vst [vmem:[%s9374_s29 + $0x128] sm:$0xf] %v329_v10  ;;  %v457_v10 = vld [vmem:[%s9370_s28 + $0x8a0] sm:$0xf] }
  0x5f   : > { %332 = vst [vmem:[%s9374_s29 + $0x12c] sm:$0xf] %v331_v11  ;;  %v459_v11 = vld [vmem:[%s9370_s28 + $0x8b0] sm:$0xf] }
  0x60   : > { %334 = vst [vmem:[%s9374_s29 + $0x130] sm:$0xf] %v333_v12  ;;  %v461_v12 = vld [vmem:[%s9370_s28 + $0x8c0] sm:$0xf] }
  0x61   : > { %336 = vst [vmem:[%s9374_s29 + $0x134] sm:$0xf] %v335_v13  ;;  %v463_v13 = vld [vmem:[%s9370_s28 + $0x8d0] sm:$0xf] }
  0x62   : > { %338 = vst [vmem:[%s9374_s29 + $0x138] sm:$0xf] %v337_v14  ;;  %v465_v14 = vld [vmem:[%s9370_s28 + $0x8e0] sm:$0xf] }
  0x63   : > { %340 = vst [vmem:[%s9374_s29 + $0x13c] sm:$0xf] %v339_v15  ;;  %v467_v15 = vld [vmem:[%s9370_s28 + $0x8f0] sm:$0xf] }
  0x64   : > { %342 = vst [vmem:[%s9374_s29 + $0x140] sm:$0xf] %v341_v16  ;;  %v469_v16 = vld [vmem:[%s9370_s28 + $0x900] sm:$0xf] }
  0x65   : > { %344 = vst [vmem:[%s9374_s29 + $0x144] sm:$0xf] %v343_v17  ;;  %v471_v17 = vld [vmem:[%s9370_s28 + $0x910] sm:$0xf] }
  0x66   : > { %346 = vst [vmem:[%s9374_s29 + $0x148] sm:$0xf] %v345_v18  ;;  %v473_v18 = vld [vmem:[%s9370_s28 + $0x920] sm:$0xf] }
  0x67   : > { %348 = vst [vmem:[%s9374_s29 + $0x14c] sm:$0xf] %v347_v19  ;;  %v475_v19 = vld [vmem:[%s9370_s28 + $0x930] sm:$0xf] }
  0x68   : > { %350 = vst [vmem:[%s9374_s29 + $0x150] sm:$0xf] %v349_v20  ;;  %v477_v20 = vld [vmem:[%s9370_s28 + $0x940] sm:$0xf] }
  0x69   : > { %352 = vst [vmem:[%s9374_s29 + $0x154] sm:$0xf] %v351_v21  ;;  %v479_v21 = vld [vmem:[%s9370_s28 + $0x950] sm:$0xf] }
  0x6a   : > { %354 = vst [vmem:[%s9374_s29 + $0x158] sm:$0xf] %v353_v22  ;;  %v481_v22 = vld [vmem:[%s9370_s28 + $0x960] sm:$0xf] }
  0x6b   : > { %356 = vst [vmem:[%s9374_s29 + $0x15c] sm:$0xf] %v355_v23  ;;  %v483_v23 = vld [vmem:[%s9370_s28 + $0x970] sm:$0xf] }
  0x6c   : > { %358 = vst [vmem:[%s9374_s29 + $0x160] sm:$0xf] %v357_v24  ;;  %v485_v24 = vld [vmem:[%s9370_s28 + $0x980] sm:$0xf] }
  0x6d   : > { %360 = vst [vmem:[%s9374_s29 + $0x164] sm:$0xf] %v359_v25  ;;  %v487_v25 = vld [vmem:[%s9370_s28 + $0x990] sm:$0xf] }
  0x6e   : > { %362 = vst [vmem:[%s9374_s29 + $0x168] sm:$0xf] %v361_v26  ;;  %v489_v26 = vld [vmem:[%s9370_s28 + $0x9a0] sm:$0xf] }
  0x6f   : > { %364 = vst [vmem:[%s9374_s29 + $0x16c] sm:$0xf] %v363_v27  ;;  %v491_v27 = vld [vmem:[%s9370_s28 + $0x9b0] sm:$0xf] }
  0x70   : > { %366 = vst [vmem:[%s9374_s29 + $0x170] sm:$0xf] %v365_v28  ;;  %v493_v28 = vld [vmem:[%s9370_s28 + $0x9c0] sm:$0xf] }
  0x71   : > { %368 = vst [vmem:[%s9374_s29 + $0x174] sm:$0xf] %v367_v29  ;;  %v495_v29 = vld [vmem:[%s9370_s28 + $0x9d0] sm:$0xf] }
  0x72   : > { %370 = vst [vmem:[%s9374_s29 + $0x178] sm:$0xf] %v369_v30  ;;  %v497_v30 = vld [vmem:[%s9370_s28 + $0x9e0] sm:$0xf] }
  0x73   : > { %372 = vst [vmem:[%s9374_s29 + $0x17c] sm:$0xf] %v371_v31  ;;  %v499_v31 = vld [vmem:[%s9370_s28 + $0x9f0] sm:$0xf] }
  0x74   : > { %374 = vst [vmem:[%s9374_s29 + $0x180] sm:$0xf] %v373_v32  ;;  %v501_v32 = vld [vmem:[%s9370_s28 + $0xa00] sm:$0xf] }
  0x75   : > { %376 = vst [vmem:[%s9374_s29 + $0x184] sm:$0xf] %v375_v33  ;;  %v503_v33 = vld [vmem:[%s9370_s28 + $0xa10] sm:$0xf] }
  0x76   : > { %378 = vst [vmem:[%s9374_s29 + $0x188] sm:$0xf] %v377_v34  ;;  %v505_v34 = vld [vmem:[%s9370_s28 + $0xa20] sm:$0xf] }
  0x77   : > { %380 = vst [vmem:[%s9374_s29 + $0x18c] sm:$0xf] %v379_v35  ;;  %v507_v35 = vld [vmem:[%s9370_s28 + $0xa30] sm:$0xf] }
  0x78   : > { %382 = vst [vmem:[%s9374_s29 + $0x190] sm:$0xf] %v381_v36  ;;  %v509_v36 = vld [vmem:[%s9370_s28 + $0xa40] sm:$0xf] }
  0x79   : > { %384 = vst [vmem:[%s9374_s29 + $0x194] sm:$0xf] %v383_v37  ;;  %v511_v37 = vld [vmem:[%s9370_s28 + $0xa50] sm:$0xf] }
  0x7a   : > { %386 = vst [vmem:[%s9374_s29 + $0x198] sm:$0xf] %v385_v38  ;;  %v513_v38 = vld [vmem:[%s9370_s28 + $0xa60] sm:$0xf] }
  0x7b   : > { %388 = vst [vmem:[%s9374_s29 + $0x19c] sm:$0xf] %v387_v39  ;;  %v515_v39 = vld [vmem:[%s9370_s28 + $0xa70] sm:$0xf] }
  0x7c   : > { %390 = vst [vmem:[%s9374_s29 + $0x1a0] sm:$0xf] %v389_v40  ;;  %v517_v40 = vld [vmem:[%s9370_s28 + $0xa80] sm:$0xf] }
  0x7d   : > { %392 = vst [vmem:[%s9374_s29 + $0x1a4] sm:$0xf] %v391_v41  ;;  %v519_v41 = vld [vmem:[%s9370_s28 + $0xa90] sm:$0xf] }
  0x7e   : > { %394 = vst [vmem:[%s9374_s29 + $0x1a8] sm:$0xf] %v393_v42  ;;  %v521_v42 = vld [vmem:[%s9370_s28 + $0xaa0] sm:$0xf] }
  0x7f   : > { %396 = vst [vmem:[%s9374_s29 + $0x1ac] sm:$0xf] %v395_v43  ;;  %v523_v43 = vld [vmem:[%s9370_s28 + $0xab0] sm:$0xf] }
  0x80   : > { %398 = vst [vmem:[%s9374_s29 + $0x1b0] sm:$0xf] %v397_v44  ;;  %v525_v44 = vld [vmem:[%s9370_s28 + $0xac0] sm:$0xf] }
  0x81   : > { %400 = vst [vmem:[%s9374_s29 + $0x1b4] sm:$0xf] %v399_v45  ;;  %v527_v45 = vld [vmem:[%s9370_s28 + $0xad0] sm:$0xf] }
  0x82   : > { %402 = vst [vmem:[%s9374_s29 + $0x1b8] sm:$0xf] %v401_v46  ;;  %v529_v46 = vld [vmem:[%s9370_s28 + $0xae0] sm:$0xf] }
  0x83   : > { %404 = vst [vmem:[%s9374_s29 + $0x1bc] sm:$0xf] %v403_v47  ;;  %v531_v47 = vld [vmem:[%s9370_s28 + $0xaf0] sm:$0xf] }
  0x84   : > { %406 = vst [vmem:[%s9374_s29 + $0x1c0] sm:$0xf] %v405_v48  ;;  %v533_v48 = vld [vmem:[%s9370_s28 + $0xb00] sm:$0xf] }
  0x85   : > { %408 = vst [vmem:[%s9374_s29 + $0x1c4] sm:$0xf] %v407_v49  ;;  %v535_v49 = vld [vmem:[%s9370_s28 + $0xb10] sm:$0xf] }
  0x86   : > { %410 = vst [vmem:[%s9374_s29 + $0x1c8] sm:$0xf] %v409_v50  ;;  %v537_v50 = vld [vmem:[%s9370_s28 + $0xb20] sm:$0xf] }
  0x87   : > { %412 = vst [vmem:[%s9374_s29 + $0x1cc] sm:$0xf] %v411_v51  ;;  %v539_v51 = vld [vmem:[%s9370_s28 + $0xb30] sm:$0xf] }
  0x88   : > { %414 = vst [vmem:[%s9374_s29 + $0x1d0] sm:$0xf] %v413_v52  ;;  %v541_v52 = vld [vmem:[%s9370_s28 + $0xb40] sm:$0xf] }
  0x89   : > { %416 = vst [vmem:[%s9374_s29 + $0x1d4] sm:$0xf] %v415_v53  ;;  %v543_v53 = vld [vmem:[%s9370_s28 + $0xb50] sm:$0xf] }
  0x8a   : > { %418 = vst [vmem:[%s9374_s29 + $0x1d8] sm:$0xf] %v417_v54  ;;  %v545_v54 = vld [vmem:[%s9370_s28 + $0xb60] sm:$0xf] }
  0x8b   : > { %420 = vst [vmem:[%s9374_s29 + $0x1dc] sm:$0xf] %v419_v55  ;;  %v547_v55 = vld [vmem:[%s9370_s28 + $0xb70] sm:$0xf] }
  0x8c   : > { %422 = vst [vmem:[%s9374_s29 + $0x1e0] sm:$0xf] %v421_v56  ;;  %v549_v56 = vld [vmem:[%s9370_s28 + $0xb80] sm:$0xf] }
  0x8d   : > { %424 = vst [vmem:[%s9374_s29 + $0x1e4] sm:$0xf] %v423_v57  ;;  %v551_v57 = vld [vmem:[%s9370_s28 + $0xb90] sm:$0xf] }
  0x8e   : > { %426 = vst [vmem:[%s9374_s29 + $0x1e8] sm:$0xf] %v425_v58  ;;  %v553_v58 = vld [vmem:[%s9370_s28 + $0xba0] sm:$0xf] }
  0x8f   : > { %428 = vst [vmem:[%s9374_s29 + $0x1ec] sm:$0xf] %v427_v59  ;;  %v555_v59 = vld [vmem:[%s9370_s28 + $0xbb0] sm:$0xf] }
  0x90   : > { %430 = vst [vmem:[%s9374_s29 + $0x1f0] sm:$0xf] %v429_v60  ;;  %v557_v60 = vld [vmem:[%s9370_s28 + $0xbc0] sm:$0xf] }
  0x91   : > { %432 = vst [vmem:[%s9374_s29 + $0x1f4] sm:$0xf] %v431_v61  ;;  %v559_v61 = vld [vmem:[%s9370_s28 + $0xbd0] sm:$0xf] }
  0x92   : > { %434 = vst [vmem:[%s9374_s29 + $0x1f8] sm:$0xf] %v433_v62  ;;  %v561_v62 = vld [vmem:[%s9370_s28 + $0xbe0] sm:$0xf] }
  0x93   : > { %436 = vst [vmem:[%s9374_s29 + $0x1fc] sm:$0xf] %v435_v63  ;;  %v563_v63 = vld [vmem:[%s9370_s28 + $0xbf0] sm:$0xf] }
  0x94   : > { %438 = vst [vmem:[%s9374_s29 + $0x200] sm:$0xf] %v437_v0  ;;  %v565_v0 = vld [vmem:[%s9370_s28 + $0xc00] sm:$0xf] }
  0x95   : > { %440 = vst [vmem:[%s9374_s29 + $0x204] sm:$0xf] %v439_v1  ;;  %v567_v1 = vld [vmem:[%s9370_s28 + $0xc10] sm:$0xf] }
  0x96   : > { %442 = vst [vmem:[%s9374_s29 + $0x208] sm:$0xf] %v441_v2  ;;  %v569_v2 = vld [vmem:[%s9370_s28 + $0xc20] sm:$0xf] }
  0x97   : > { %444 = vst [vmem:[%s9374_s29 + $0x20c] sm:$0xf] %v443_v3  ;;  %v571_v3 = vld [vmem:[%s9370_s28 + $0xc30] sm:$0xf] }
  0x98   : > { %446 = vst [vmem:[%s9374_s29 + $0x210] sm:$0xf] %v445_v4  ;;  %v573_v4 = vld [vmem:[%s9370_s28 + $0xc40] sm:$0xf] }
  0x99   : > { %448 = vst [vmem:[%s9374_s29 + $0x214] sm:$0xf] %v447_v5  ;;  %v575_v5 = vld [vmem:[%s9370_s28 + $0xc50] sm:$0xf] }
  0x9a   : > { %450 = vst [vmem:[%s9374_s29 + $0x218] sm:$0xf] %v449_v6  ;;  %v577_v6 = vld [vmem:[%s9370_s28 + $0xc60] sm:$0xf] }
  0x9b   : > { %452 = vst [vmem:[%s9374_s29 + $0x21c] sm:$0xf] %v451_v7  ;;  %v579_v7 = vld [vmem:[%s9370_s28 + $0xc70] sm:$0xf] }
  0x9c   : > { %454 = vst [vmem:[%s9374_s29 + $0x220] sm:$0xf] %v453_v8  ;;  %v581_v8 = vld [vmem:[%s9370_s28 + $0xc80] sm:$0xf] }
  0x9d   : > { %456 = vst [vmem:[%s9374_s29 + $0x224] sm:$0xf] %v455_v9  ;;  %v583_v9 = vld [vmem:[%s9370_s28 + $0xc90] sm:$0xf] }
  0x9e   : > { %458 = vst [vmem:[%s9374_s29 + $0x228] sm:$0xf] %v457_v10  ;;  %v585_v10 = vld [vmem:[%s9370_s28 + $0xca0] sm:$0xf] }
  0x9f   : > { %460 = vst [vmem:[%s9374_s29 + $0x22c] sm:$0xf] %v459_v11  ;;  %v587_v11 = vld [vmem:[%s9370_s28 + $0xcb0] sm:$0xf] }
  0xa0   : > { %462 = vst [vmem:[%s9374_s29 + $0x230] sm:$0xf] %v461_v12  ;;  %v589_v12 = vld [vmem:[%s9370_s28 + $0xcc0] sm:$0xf] }
  0xa1   : > { %464 = vst [vmem:[%s9374_s29 + $0x234] sm:$0xf] %v463_v13  ;;  %v591_v13 = vld [vmem:[%s9370_s28 + $0xcd0] sm:$0xf] }
  0xa2   : > { %466 = vst [vmem:[%s9374_s29 + $0x238] sm:$0xf] %v465_v14  ;;  %v593_v14 = vld [vmem:[%s9370_s28 + $0xce0] sm:$0xf] }
  0xa3   : > { %468 = vst [vmem:[%s9374_s29 + $0x23c] sm:$0xf] %v467_v15  ;;  %v595_v15 = vld [vmem:[%s9370_s28 + $0xcf0] sm:$0xf] }
  0xa4   : > { %470 = vst [vmem:[%s9374_s29 + $0x240] sm:$0xf] %v469_v16  ;;  %v597_v16 = vld [vmem:[%s9370_s28 + $0xd00] sm:$0xf] }
  0xa5   : > { %472 = vst [vmem:[%s9374_s29 + $0x244] sm:$0xf] %v471_v17  ;;  %v599_v17 = vld [vmem:[%s9370_s28 + $0xd10] sm:$0xf] }
  0xa6   : > { %474 = vst [vmem:[%s9374_s29 + $0x248] sm:$0xf] %v473_v18  ;;  %v601_v18 = vld [vmem:[%s9370_s28 + $0xd20] sm:$0xf] }
  0xa7   : > { %476 = vst [vmem:[%s9374_s29 + $0x24c] sm:$0xf] %v475_v19  ;;  %v603_v19 = vld [vmem:[%s9370_s28 + $0xd30] sm:$0xf] }
  0xa8   : > { %478 = vst [vmem:[%s9374_s29 + $0x250] sm:$0xf] %v477_v20  ;;  %v605_v20 = vld [vmem:[%s9370_s28 + $0xd40] sm:$0xf] }
  0xa9   : > { %480 = vst [vmem:[%s9374_s29 + $0x254] sm:$0xf] %v479_v21  ;;  %v607_v21 = vld [vmem:[%s9370_s28 + $0xd50] sm:$0xf] }
  0xaa   : > { %482 = vst [vmem:[%s9374_s29 + $0x258] sm:$0xf] %v481_v22  ;;  %v609_v22 = vld [vmem:[%s9370_s28 + $0xd60] sm:$0xf] }
  0xab   : > { %484 = vst [vmem:[%s9374_s29 + $0x25c] sm:$0xf] %v483_v23  ;;  %v611_v23 = vld [vmem:[%s9370_s28 + $0xd70] sm:$0xf] }
  0xac   : > { %486 = vst [vmem:[%s9374_s29 + $0x260] sm:$0xf] %v485_v24  ;;  %v613_v24 = vld [vmem:[%s9370_s28 + $0xd80] sm:$0xf] }
  0xad   : > { %488 = vst [vmem:[%s9374_s29 + $0x264] sm:$0xf] %v487_v25  ;;  %v615_v25 = vld [vmem:[%s9370_s28 + $0xd90] sm:$0xf] }
  0xae   : > { %490 = vst [vmem:[%s9374_s29 + $0x268] sm:$0xf] %v489_v26  ;;  %v617_v26 = vld [vmem:[%s9370_s28 + $0xda0] sm:$0xf] }
  0xaf   : > { %492 = vst [vmem:[%s9374_s29 + $0x26c] sm:$0xf] %v491_v27  ;;  %v619_v27 = vld [vmem:[%s9370_s28 + $0xdb0] sm:$0xf] }
  0xb0   : > { %494 = vst [vmem:[%s9374_s29 + $0x270] sm:$0xf] %v493_v28  ;;  %v621_v28 = vld [vmem:[%s9370_s28 + $0xdc0] sm:$0xf] }
  0xb1   : > { %496 = vst [vmem:[%s9374_s29 + $0x274] sm:$0xf] %v495_v29  ;;  %v623_v29 = vld [vmem:[%s9370_s28 + $0xdd0] sm:$0xf] }
  0xb2   : > { %498 = vst [vmem:[%s9374_s29 + $0x278] sm:$0xf] %v497_v30  ;;  %v625_v30 = vld [vmem:[%s9370_s28 + $0xde0] sm:$0xf] }
  0xb3   : > { %500 = vst [vmem:[%s9374_s29 + $0x27c] sm:$0xf] %v499_v31  ;;  %v627_v31 = vld [vmem:[%s9370_s28 + $0xdf0] sm:$0xf] }
  0xb4   : > { %502 = vst [vmem:[%s9374_s29 + $0x280] sm:$0xf] %v501_v32  ;;  %v629_v32 = vld [vmem:[%s9370_s28 + $0xe00] sm:$0xf] }
  0xb5   : > { %504 = vst [vmem:[%s9374_s29 + $0x284] sm:$0xf] %v503_v33  ;;  %v631_v33 = vld [vmem:[%s9370_s28 + $0xe10] sm:$0xf] }
  0xb6   : > { %506 = vst [vmem:[%s9374_s29 + $0x288] sm:$0xf] %v505_v34  ;;  %v633_v34 = vld [vmem:[%s9370_s28 + $0xe20] sm:$0xf] }
  0xb7   : > { %508 = vst [vmem:[%s9374_s29 + $0x28c] sm:$0xf] %v507_v35  ;;  %v635_v35 = vld [vmem:[%s9370_s28 + $0xe30] sm:$0xf] }
  0xb8   : > { %510 = vst [vmem:[%s9374_s29 + $0x290] sm:$0xf] %v509_v36  ;;  %v637_v36 = vld [vmem:[%s9370_s28 + $0xe40] sm:$0xf] }
  0xb9   : > { %512 = vst [vmem:[%s9374_s29 + $0x294] sm:$0xf] %v511_v37  ;;  %v639_v37 = vld [vmem:[%s9370_s28 + $0xe50] sm:$0xf] }
  0xba   : > { %514 = vst [vmem:[%s9374_s29 + $0x298] sm:$0xf] %v513_v38  ;;  %v641_v38 = vld [vmem:[%s9370_s28 + $0xe60] sm:$0xf] }
  0xbb   : > { %516 = vst [vmem:[%s9374_s29 + $0x29c] sm:$0xf] %v515_v39  ;;  %v643_v39 = vld [vmem:[%s9370_s28 + $0xe70] sm:$0xf] }
  0xbc   : > { %518 = vst [vmem:[%s9374_s29 + $0x2a0] sm:$0xf] %v517_v40  ;;  %v645_v40 = vld [vmem:[%s9370_s28 + $0xe80] sm:$0xf] }
  0xbd   : > { %520 = vst [vmem:[%s9374_s29 + $0x2a4] sm:$0xf] %v519_v41  ;;  %v647_v41 = vld [vmem:[%s9370_s28 + $0xe90] sm:$0xf] }
  0xbe   : > { %522 = vst [vmem:[%s9374_s29 + $0x2a8] sm:$0xf] %v521_v42  ;;  %v649_v42 = vld [vmem:[%s9370_s28 + $0xea0] sm:$0xf] }
  0xbf   : > { %524 = vst [vmem:[%s9374_s29 + $0x2ac] sm:$0xf] %v523_v43  ;;  %v651_v43 = vld [vmem:[%s9370_s28 + $0xeb0] sm:$0xf] }
  0xc0   : > { %526 = vst [vmem:[%s9374_s29 + $0x2b0] sm:$0xf] %v525_v44  ;;  %v653_v44 = vld [vmem:[%s9370_s28 + $0xec0] sm:$0xf] }
  0xc1   : > { %528 = vst [vmem:[%s9374_s29 + $0x2b4] sm:$0xf] %v527_v45  ;;  %v655_v45 = vld [vmem:[%s9370_s28 + $0xed0] sm:$0xf] }
  0xc2   : > { %530 = vst [vmem:[%s9374_s29 + $0x2b8] sm:$0xf] %v529_v46  ;;  %v657_v46 = vld [vmem:[%s9370_s28 + $0xee0] sm:$0xf] }
  0xc3   : > { %532 = vst [vmem:[%s9374_s29 + $0x2bc] sm:$0xf] %v531_v47  ;;  %v659_v47 = vld [vmem:[%s9370_s28 + $0xef0] sm:$0xf] }
  0xc4   : > { %534 = vst [vmem:[%s9374_s29 + $0x2c0] sm:$0xf] %v533_v48  ;;  %v661_v48 = vld [vmem:[%s9370_s28 + $0xf00] sm:$0xf] }
  0xc5   : > { %536 = vst [vmem:[%s9374_s29 + $0x2c4] sm:$0xf] %v535_v49  ;;  %v663_v49 = vld [vmem:[%s9370_s28 + $0xf10] sm:$0xf] }
  0xc6   : > { %538 = vst [vmem:[%s9374_s29 + $0x2c8] sm:$0xf] %v537_v50  ;;  %v665_v50 = vld [vmem:[%s9370_s28 + $0xf20] sm:$0xf] }
  0xc7   : > { %540 = vst [vmem:[%s9374_s29 + $0x2cc] sm:$0xf] %v539_v51  ;;  %v667_v51 = vld [vmem:[%s9370_s28 + $0xf30] sm:$0xf] }
  0xc8   : > { %542 = vst [vmem:[%s9374_s29 + $0x2d0] sm:$0xf] %v541_v52  ;;  %v669_v52 = vld [vmem:[%s9370_s28 + $0xf40] sm:$0xf] }
  0xc9   : > { %544 = vst [vmem:[%s9374_s29 + $0x2d4] sm:$0xf] %v543_v53  ;;  %v671_v53 = vld [vmem:[%s9370_s28 + $0xf50] sm:$0xf] }
  0xca   : > { %546 = vst [vmem:[%s9374_s29 + $0x2d8] sm:$0xf] %v545_v54  ;;  %v673_v54 = vld [vmem:[%s9370_s28 + $0xf60] sm:$0xf] }
  0xcb   : > { %548 = vst [vmem:[%s9374_s29 + $0x2dc] sm:$0xf] %v547_v55  ;;  %v675_v55 = vld [vmem:[%s9370_s28 + $0xf70] sm:$0xf] }
  0xcc   : > { %550 = vst [vmem:[%s9374_s29 + $0x2e0] sm:$0xf] %v549_v56  ;;  %v677_v56 = vld [vmem:[%s9370_s28 + $0xf80] sm:$0xf] }
  0xcd   : > { %552 = vst [vmem:[%s9374_s29 + $0x2e4] sm:$0xf] %v551_v57  ;;  %v679_v57 = vld [vmem:[%s9370_s28 + $0xf90] sm:$0xf] }
  0xce   : > { %554 = vst [vmem:[%s9374_s29 + $0x2e8] sm:$0xf] %v553_v58  ;;  %v681_v58 = vld [vmem:[%s9370_s28 + $0xfa0] sm:$0xf] }
  0xcf   : > { %556 = vst [vmem:[%s9374_s29 + $0x2ec] sm:$0xf] %v555_v59  ;;  %v683_v59 = vld [vmem:[%s9370_s28 + $0xfb0] sm:$0xf] }
  0xd0   : > { %558 = vst [vmem:[%s9374_s29 + $0x2f0] sm:$0xf] %v557_v60  ;;  %v685_v60 = vld [vmem:[%s9370_s28 + $0xfc0] sm:$0xf] }
  0xd1   : > { %560 = vst [vmem:[%s9374_s29 + $0x2f4] sm:$0xf] %v559_v61  ;;  %v687_v61 = vld [vmem:[%s9370_s28 + $0xfd0] sm:$0xf] }
  0xd2   : > { %562 = vst [vmem:[%s9374_s29 + $0x2f8] sm:$0xf] %v561_v62  ;;  %v689_v62 = vld [vmem:[%s9370_s28 + $0xfe0] sm:$0xf] }
  0xd3   : > { %564 = vst [vmem:[%s9374_s29 + $0x2fc] sm:$0xf] %v563_v63  ;;  %v691_v63 = vld [vmem:[%s9370_s28 + $0xff0] sm:$0xf] }
  0xd4   : > { %566 = vst [vmem:[%s9374_s29 + $0x300] sm:$0xf] %v565_v0  ;;  %v693_v0 = vld [vmem:[%s9370_s28 + $0x1000] sm:$0xf] }
  0xd5   : > { %568 = vst [vmem:[%s9374_s29 + $0x304] sm:$0xf] %v567_v1  ;;  %v695_v1 = vld [vmem:[%s9370_s28 + $0x1010] sm:$0xf] }
  0xd6   : > { %570 = vst [vmem:[%s9374_s29 + $0x308] sm:$0xf] %v569_v2  ;;  %v697_v2 = vld [vmem:[%s9370_s28 + $0x1020] sm:$0xf] }
  0xd7   : > { %572 = vst [vmem:[%s9374_s29 + $0x30c] sm:$0xf] %v571_v3  ;;  %v699_v3 = vld [vmem:[%s9370_s28 + $0x1030] sm:$0xf] }
  0xd8   : > { %574 = vst [vmem:[%s9374_s29 + $0x310] sm:$0xf] %v573_v4  ;;  %v701_v4 = vld [vmem:[%s9370_s28 + $0x1040] sm:$0xf] }
  0xd9   : > { %576 = vst [vmem:[%s9374_s29 + $0x314] sm:$0xf] %v575_v5  ;;  %v703_v5 = vld [vmem:[%s9370_s28 + $0x1050] sm:$0xf] }
  0xda   : > { %578 = vst [vmem:[%s9374_s29 + $0x318] sm:$0xf] %v577_v6  ;;  %v705_v6 = vld [vmem:[%s9370_s28 + $0x1060] sm:$0xf] }
  0xdb   : > { %580 = vst [vmem:[%s9374_s29 + $0x31c] sm:$0xf] %v579_v7  ;;  %v707_v7 = vld [vmem:[%s9370_s28 + $0x1070] sm:$0xf] }
  0xdc   : > { %582 = vst [vmem:[%s9374_s29 + $0x320] sm:$0xf] %v581_v8  ;;  %v709_v8 = vld [vmem:[%s9370_s28 + $0x1080] sm:$0xf] }
  0xdd   : > { %584 = vst [vmem:[%s9374_s29 + $0x324] sm:$0xf] %v583_v9  ;;  %v711_v9 = vld [vmem:[%s9370_s28 + $0x1090] sm:$0xf] }
  0xde   : > { %586 = vst [vmem:[%s9374_s29 + $0x328] sm:$0xf] %v585_v10  ;;  %v713_v10 = vld [vmem:[%s9370_s28 + $0x10a0] sm:$0xf] }
  0xdf   : > { %588 = vst [vmem:[%s9374_s29 + $0x32c] sm:$0xf] %v587_v11  ;;  %v715_v11 = vld [vmem:[%s9370_s28 + $0x10b0] sm:$0xf] }
  0xe0   : > { %590 = vst [vmem:[%s9374_s29 + $0x330] sm:$0xf] %v589_v12  ;;  %v717_v12 = vld [vmem:[%s9370_s28 + $0x10c0] sm:$0xf] }
  0xe1   : > { %592 = vst [vmem:[%s9374_s29 + $0x334] sm:$0xf] %v591_v13  ;;  %v719_v13 = vld [vmem:[%s9370_s28 + $0x10d0] sm:$0xf] }
  0xe2   : > { %594 = vst [vmem:[%s9374_s29 + $0x338] sm:$0xf] %v593_v14  ;;  %v721_v14 = vld [vmem:[%s9370_s28 + $0x10e0] sm:$0xf] }
  0xe3   : > { %596 = vst [vmem:[%s9374_s29 + $0x33c] sm:$0xf] %v595_v15  ;;  %v723_v15 = vld [vmem:[%s9370_s28 + $0x10f0] sm:$0xf] }
  0xe4   : > { %598 = vst [vmem:[%s9374_s29 + $0x340] sm:$0xf] %v597_v16  ;;  %v725_v16 = vld [vmem:[%s9370_s28 + $0x1100] sm:$0xf] }
  0xe5   : > { %600 = vst [vmem:[%s9374_s29 + $0x344] sm:$0xf] %v599_v17  ;;  %v727_v17 = vld [vmem:[%s9370_s28 + $0x1110] sm:$0xf] }
  0xe6   : > { %602 = vst [vmem:[%s9374_s29 + $0x348] sm:$0xf] %v601_v18  ;;  %v729_v18 = vld [vmem:[%s9370_s28 + $0x1120] sm:$0xf] }
  0xe7   : > { %604 = vst [vmem:[%s9374_s29 + $0x34c] sm:$0xf] %v603_v19  ;;  %v731_v19 = vld [vmem:[%s9370_s28 + $0x1130] sm:$0xf] }
  0xe8   : > { %606 = vst [vmem:[%s9374_s29 + $0x350] sm:$0xf] %v605_v20  ;;  %v733_v20 = vld [vmem:[%s9370_s28 + $0x1140] sm:$0xf] }
  0xe9   : > { %608 = vst [vmem:[%s9374_s29 + $0x354] sm:$0xf] %v607_v21  ;;  %v735_v21 = vld [vmem:[%s9370_s28 + $0x1150] sm:$0xf] }
  0xea   : > { %610 = vst [vmem:[%s9374_s29 + $0x358] sm:$0xf] %v609_v22  ;;  %v737_v22 = vld [vmem:[%s9370_s28 + $0x1160] sm:$0xf] }
  0xeb   : > { %612 = vst [vmem:[%s9374_s29 + $0x35c] sm:$0xf] %v611_v23  ;;  %v739_v23 = vld [vmem:[%s9370_s28 + $0x1170] sm:$0xf] }
  0xec   : > { %614 = vst [vmem:[%s9374_s29 + $0x360] sm:$0xf] %v613_v24  ;;  %v741_v24 = vld [vmem:[%s9370_s28 + $0x1180] sm:$0xf] }
  0xed   : > { %616 = vst [vmem:[%s9374_s29 + $0x364] sm:$0xf] %v615_v25  ;;  %v743_v25 = vld [vmem:[%s9370_s28 + $0x1190] sm:$0xf] }
  0xee   : > { %618 = vst [vmem:[%s9374_s29 + $0x368] sm:$0xf] %v617_v26  ;;  %v745_v26 = vld [vmem:[%s9370_s28 + $0x11a0] sm:$0xf] }
  0xef   : > { %620 = vst [vmem:[%s9374_s29 + $0x36c] sm:$0xf] %v619_v27  ;;  %v747_v27 = vld [vmem:[%s9370_s28 + $0x11b0] sm:$0xf] }
  0xf0   : > { %622 = vst [vmem:[%s9374_s29 + $0x370] sm:$0xf] %v621_v28  ;;  %v749_v28 = vld [vmem:[%s9370_s28 + $0x11c0] sm:$0xf] }
  0xf1   : > { %624 = vst [vmem:[%s9374_s29 + $0x374] sm:$0xf] %v623_v29  ;;  %v751_v29 = vld [vmem:[%s9370_s28 + $0x11d0] sm:$0xf] }
  0xf2   : > { %626 = vst [vmem:[%s9374_s29 + $0x378] sm:$0xf] %v625_v30  ;;  %v753_v30 = vld [vmem:[%s9370_s28 + $0x11e0] sm:$0xf] }
  0xf3   : > { %628 = vst [vmem:[%s9374_s29 + $0x37c] sm:$0xf] %v627_v31  ;;  %v755_v31 = vld [vmem:[%s9370_s28 + $0x11f0] sm:$0xf] }
  0xf4   : > { %630 = vst [vmem:[%s9374_s29 + $0x380] sm:$0xf] %v629_v32  ;;  %v757_v32 = vld [vmem:[%s9370_s28 + $0x1200] sm:$0xf] }
  0xf5   : > { %632 = vst [vmem:[%s9374_s29 + $0x384] sm:$0xf] %v631_v33  ;;  %v759_v33 = vld [vmem:[%s9370_s28 + $0x1210] sm:$0xf] }
  0xf6   : > { %634 = vst [vmem:[%s9374_s29 + $0x388] sm:$0xf] %v633_v34  ;;  %v761_v34 = vld [vmem:[%s9370_s28 + $0x1220] sm:$0xf] }
  0xf7   : > { %636 = vst [vmem:[%s9374_s29 + $0x38c] sm:$0xf] %v635_v35  ;;  %v763_v35 = vld [vmem:[%s9370_s28 + $0x1230] sm:$0xf] }
  0xf8   : > { %638 = vst [vmem:[%s9374_s29 + $0x390] sm:$0xf] %v637_v36  ;;  %v765_v36 = vld [vmem:[%s9370_s28 + $0x1240] sm:$0xf] }
  0xf9   : > { %640 = vst [vmem:[%s9374_s29 + $0x394] sm:$0xf] %v639_v37  ;;  %v767_v37 = vld [vmem:[%s9370_s28 + $0x1250] sm:$0xf] }
  0xfa   : > { %642 = vst [vmem:[%s9374_s29 + $0x398] sm:$0xf] %v641_v38  ;;  %v769_v38 = vld [vmem:[%s9370_s28 + $0x1260] sm:$0xf] }
  0xfb   : > { %644 = vst [vmem:[%s9374_s29 + $0x39c] sm:$0xf] %v643_v39  ;;  %v771_v39 = vld [vmem:[%s9370_s28 + $0x1270] sm:$0xf] }
  0xfc   : > { %646 = vst [vmem:[%s9374_s29 + $0x3a0] sm:$0xf] %v645_v40  ;;  %v773_v40 = vld [vmem:[%s9370_s28 + $0x1280] sm:$0xf] }
  0xfd   : > { %648 = vst [vmem:[%s9374_s29 + $0x3a4] sm:$0xf] %v647_v41  ;;  %v775_v41 = vld [vmem:[%s9370_s28 + $0x1290] sm:$0xf] }
  0xfe   : > { %650 = vst [vmem:[%s9374_s29 + $0x3a8] sm:$0xf] %v649_v42  ;;  %v777_v42 = vld [vmem:[%s9370_s28 + $0x12a0] sm:$0xf] }
  0xff   : > { %652 = vst [vmem:[%s9374_s29 + $0x3ac] sm:$0xf] %v651_v43  ;;  %v779_v43 = vld [vmem:[%s9370_s28 + $0x12b0] sm:$0xf] }
 0x100   : > { %654 = vst [vmem:[%s9374_s29 + $0x3b0] sm:$0xf] %v653_v44  ;;  %v781_v44 = vld [vmem:[%s9370_s28 + $0x12c0] sm:$0xf] }
 0x101   : > { %656 = vst [vmem:[%s9374_s29 + $0x3b4] sm:$0xf] %v655_v45  ;;  %v783_v45 = vld [vmem:[%s9370_s28 + $0x12d0] sm:$0xf] }
 0x102   : > { %658 = vst [vmem:[%s9374_s29 + $0x3b8] sm:$0xf] %v657_v46  ;;  %v785_v46 = vld [vmem:[%s9370_s28 + $0x12e0] sm:$0xf] }
 0x103   : > { %660 = vst [vmem:[%s9374_s29 + $0x3bc] sm:$0xf] %v659_v47  ;;  %v787_v47 = vld [vmem:[%s9370_s28 + $0x12f0] sm:$0xf] }
 0x104   : > { %662 = vst [vmem:[%s9374_s29 + $0x3c0] sm:$0xf] %v661_v48  ;;  %v789_v48 = vld [vmem:[%s9370_s28 + $0x1300] sm:$0xf] }
 0x105   : > { %664 = vst [vmem:[%s9374_s29 + $0x3c4] sm:$0xf] %v663_v49  ;;  %v791_v49 = vld [vmem:[%s9370_s28 + $0x1310] sm:$0xf] }
 0x106   : > { %666 = vst [vmem:[%s9374_s29 + $0x3c8] sm:$0xf] %v665_v50  ;;  %v793_v50 = vld [vmem:[%s9370_s28 + $0x1320] sm:$0xf] }
 0x107   : > { %668 = vst [vmem:[%s9374_s29 + $0x3cc] sm:$0xf] %v667_v51  ;;  %v795_v51 = vld [vmem:[%s9370_s28 + $0x1330] sm:$0xf] }
 0x108   : > { %670 = vst [vmem:[%s9374_s29 + $0x3d0] sm:$0xf] %v669_v52  ;;  %v797_v52 = vld [vmem:[%s9370_s28 + $0x1340] sm:$0xf] }
 0x109   : > { %672 = vst [vmem:[%s9374_s29 + $0x3d4] sm:$0xf] %v671_v53  ;;  %v799_v53 = vld [vmem:[%s9370_s28 + $0x1350] sm:$0xf] }
 0x10a   : > { %674 = vst [vmem:[%s9374_s29 + $0x3d8] sm:$0xf] %v673_v54  ;;  %v801_v54 = vld [vmem:[%s9370_s28 + $0x1360] sm:$0xf] }
 0x10b   : > { %676 = vst [vmem:[%s9374_s29 + $0x3dc] sm:$0xf] %v675_v55  ;;  %v803_v55 = vld [vmem:[%s9370_s28 + $0x1370] sm:$0xf] }
 0x10c   : > { %678 = vst [vmem:[%s9374_s29 + $0x3e0] sm:$0xf] %v677_v56  ;;  %v805_v56 = vld [vmem:[%s9370_s28 + $0x1380] sm:$0xf] }
 0x10d   : > { %680 = vst [vmem:[%s9374_s29 + $0x3e4] sm:$0xf] %v679_v57  ;;  %v807_v57 = vld [vmem:[%s9370_s28 + $0x1390] sm:$0xf] }
 0x10e   : > { %682 = vst [vmem:[%s9374_s29 + $0x3e8] sm:$0xf] %v681_v58  ;;  %v809_v58 = vld [vmem:[%s9370_s28 + $0x13a0] sm:$0xf] }
 0x10f   : > { %684 = vst [vmem:[%s9374_s29 + $0x3ec] sm:$0xf] %v683_v59  ;;  %v811_v59 = vld [vmem:[%s9370_s28 + $0x13b0] sm:$0xf] }
 0x110   : > { %686 = vst [vmem:[%s9374_s29 + $0x3f0] sm:$0xf] %v685_v60  ;;  %v813_v60 = vld [vmem:[%s9370_s28 + $0x13c0] sm:$0xf] }
 0x111   : > { %688 = vst [vmem:[%s9374_s29 + $0x3f4] sm:$0xf] %v687_v61  ;;  %v815_v61 = vld [vmem:[%s9370_s28 + $0x13d0] sm:$0xf] }
 0x112   : > { %690 = vst [vmem:[%s9374_s29 + $0x3f8] sm:$0xf] %v689_v62  ;;  %v817_v62 = vld [vmem:[%s9370_s28 + $0x13e0] sm:$0xf] }
 0x113   : > { %692 = vst [vmem:[%s9374_s29 + $0x3fc] sm:$0xf] %v691_v63  ;;  %v819_v63 = vld [vmem:[%s9370_s28 + $0x13f0] sm:$0xf] }
 0x114   : > { %694 = vst [vmem:[%s9374_s29 + $0x400] sm:$0xf] %v693_v0  ;;  %v821_v0 = vld [vmem:[%s9370_s28 + $0x1400] sm:$0xf] }
 0x115   : > { %696 = vst [vmem:[%s9374_s29 + $0x404] sm:$0xf] %v695_v1  ;;  %v823_v1 = vld [vmem:[%s9370_s28 + $0x1410] sm:$0xf] }
 0x116   : > { %698 = vst [vmem:[%s9374_s29 + $0x408] sm:$0xf] %v697_v2  ;;  %v825_v2 = vld [vmem:[%s9370_s28 + $0x1420] sm:$0xf] }
 0x117   : > { %700 = vst [vmem:[%s9374_s29 + $0x40c] sm:$0xf] %v699_v3  ;;  %v827_v3 = vld [vmem:[%s9370_s28 + $0x1430] sm:$0xf] }
 0x118   : > { %702 = vst [vmem:[%s9374_s29 + $0x410] sm:$0xf] %v701_v4  ;;  %v829_v4 = vld [vmem:[%s9370_s28 + $0x1440] sm:$0xf] }
 0x119   : > { %704 = vst [vmem:[%s9374_s29 + $0x414] sm:$0xf] %v703_v5  ;;  %v831_v5 = vld [vmem:[%s9370_s28 + $0x1450] sm:$0xf] }
 0x11a   : > { %706 = vst [vmem:[%s9374_s29 + $0x418] sm:$0xf] %v705_v6  ;;  %v833_v6 = vld [vmem:[%s9370_s28 + $0x1460] sm:$0xf] }
 0x11b   : > { %708 = vst [vmem:[%s9374_s29 + $0x41c] sm:$0xf] %v707_v7  ;;  %v835_v7 = vld [vmem:[%s9370_s28 + $0x1470] sm:$0xf] }
 0x11c   : > { %710 = vst [vmem:[%s9374_s29 + $0x420] sm:$0xf] %v709_v8  ;;  %v837_v8 = vld [vmem:[%s9370_s28 + $0x1480] sm:$0xf] }
 0x11d   : > { %712 = vst [vmem:[%s9374_s29 + $0x424] sm:$0xf] %v711_v9  ;;  %v839_v9 = vld [vmem:[%s9370_s28 + $0x1490] sm:$0xf] }
 0x11e   : > { %714 = vst [vmem:[%s9374_s29 + $0x428] sm:$0xf] %v713_v10  ;;  %v841_v10 = vld [vmem:[%s9370_s28 + $0x14a0] sm:$0xf] }
 0x11f   : > { %716 = vst [vmem:[%s9374_s29 + $0x42c] sm:$0xf] %v715_v11  ;;  %v843_v11 = vld [vmem:[%s9370_s28 + $0x14b0] sm:$0xf] }
 0x120   : > { %718 = vst [vmem:[%s9374_s29 + $0x430] sm:$0xf] %v717_v12  ;;  %v845_v12 = vld [vmem:[%s9370_s28 + $0x14c0] sm:$0xf] }
 0x121   : > { %720 = vst [vmem:[%s9374_s29 + $0x434] sm:$0xf] %v719_v13  ;;  %v847_v13 = vld [vmem:[%s9370_s28 + $0x14d0] sm:$0xf] }
 0x122   : > { %722 = vst [vmem:[%s9374_s29 + $0x438] sm:$0xf] %v721_v14  ;;  %v849_v14 = vld [vmem:[%s9370_s28 + $0x14e0] sm:$0xf] }
 0x123   : > { %724 = vst [vmem:[%s9374_s29 + $0x43c] sm:$0xf] %v723_v15  ;;  %v851_v15 = vld [vmem:[%s9370_s28 + $0x14f0] sm:$0xf] }
 0x124   : > { %726 = vst [vmem:[%s9374_s29 + $0x440] sm:$0xf] %v725_v16  ;;  %v853_v16 = vld [vmem:[%s9370_s28 + $0x1500] sm:$0xf] }
 0x125   : > { %728 = vst [vmem:[%s9374_s29 + $0x444] sm:$0xf] %v727_v17  ;;  %v855_v17 = vld [vmem:[%s9370_s28 + $0x1510] sm:$0xf] }
 0x126   : > { %730 = vst [vmem:[%s9374_s29 + $0x448] sm:$0xf] %v729_v18  ;;  %v857_v18 = vld [vmem:[%s9370_s28 + $0x1520] sm:$0xf] }
 0x127   : > { %732 = vst [vmem:[%s9374_s29 + $0x44c] sm:$0xf] %v731_v19  ;;  %v859_v19 = vld [vmem:[%s9370_s28 + $0x1530] sm:$0xf] }
 0x128   : > { %734 = vst [vmem:[%s9374_s29 + $0x450] sm:$0xf] %v733_v20  ;;  %v861_v20 = vld [vmem:[%s9370_s28 + $0x1540] sm:$0xf] }
 0x129   : > { %736 = vst [vmem:[%s9374_s29 + $0x454] sm:$0xf] %v735_v21  ;;  %v863_v21 = vld [vmem:[%s9370_s28 + $0x1550] sm:$0xf] }
 0x12a   : > { %738 = vst [vmem:[%s9374_s29 + $0x458] sm:$0xf] %v737_v22  ;;  %v865_v22 = vld [vmem:[%s9370_s28 + $0x1560] sm:$0xf] }
 0x12b   : > { %740 = vst [vmem:[%s9374_s29 + $0x45c] sm:$0xf] %v739_v23  ;;  %v867_v23 = vld [vmem:[%s9370_s28 + $0x1570] sm:$0xf] }
 0x12c   : > { %742 = vst [vmem:[%s9374_s29 + $0x460] sm:$0xf] %v741_v24  ;;  %v869_v24 = vld [vmem:[%s9370_s28 + $0x1580] sm:$0xf] }
 0x12d   : > { %744 = vst [vmem:[%s9374_s29 + $0x464] sm:$0xf] %v743_v25  ;;  %v871_v25 = vld [vmem:[%s9370_s28 + $0x1590] sm:$0xf] }
 0x12e   : > { %746 = vst [vmem:[%s9374_s29 + $0x468] sm:$0xf] %v745_v26  ;;  %v873_v26 = vld [vmem:[%s9370_s28 + $0x15a0] sm:$0xf] }
 0x12f   : > { %748 = vst [vmem:[%s9374_s29 + $0x46c] sm:$0xf] %v747_v27  ;;  %v875_v27 = vld [vmem:[%s9370_s28 + $0x15b0] sm:$0xf] }
 0x130   : > { %750 = vst [vmem:[%s9374_s29 + $0x470] sm:$0xf] %v749_v28  ;;  %v877_v28 = vld [vmem:[%s9370_s28 + $0x15c0] sm:$0xf] }
 0x131   : > { %752 = vst [vmem:[%s9374_s29 + $0x474] sm:$0xf] %v751_v29  ;;  %v879_v29 = vld [vmem:[%s9370_s28 + $0x15d0] sm:$0xf] }
 0x132   : > { %754 = vst [vmem:[%s9374_s29 + $0x478] sm:$0xf] %v753_v30  ;;  %v881_v30 = vld [vmem:[%s9370_s28 + $0x15e0] sm:$0xf] }
 0x133   : > { %756 = vst [vmem:[%s9374_s29 + $0x47c] sm:$0xf] %v755_v31  ;;  %v883_v31 = vld [vmem:[%s9370_s28 + $0x15f0] sm:$0xf] }
 0x134   : > { %758 = vst [vmem:[%s9374_s29 + $0x480] sm:$0xf] %v757_v32  ;;  %v885_v32 = vld [vmem:[%s9370_s28 + $0x1600] sm:$0xf] }
 0x135   : > { %760 = vst [vmem:[%s9374_s29 + $0x484] sm:$0xf] %v759_v33  ;;  %v887_v33 = vld [vmem:[%s9370_s28 + $0x1610] sm:$0xf] }
 0x136   : > { %762 = vst [vmem:[%s9374_s29 + $0x488] sm:$0xf] %v761_v34  ;;  %v889_v34 = vld [vmem:[%s9370_s28 + $0x1620] sm:$0xf] }
 0x137   : > { %764 = vst [vmem:[%s9374_s29 + $0x48c] sm:$0xf] %v763_v35  ;;  %v891_v35 = vld [vmem:[%s9370_s28 + $0x1630] sm:$0xf] }
 0x138   : > { %766 = vst [vmem:[%s9374_s29 + $0x490] sm:$0xf] %v765_v36  ;;  %v893_v36 = vld [vmem:[%s9370_s28 + $0x1640] sm:$0xf] }
 0x139   : > { %768 = vst [vmem:[%s9374_s29 + $0x494] sm:$0xf] %v767_v37  ;;  %v895_v37 = vld [vmem:[%s9370_s28 + $0x1650] sm:$0xf] }
 0x13a   : > { %770 = vst [vmem:[%s9374_s29 + $0x498] sm:$0xf] %v769_v38  ;;  %v897_v38 = vld [vmem:[%s9370_s28 + $0x1660] sm:$0xf] }
 0x13b   : > { %772 = vst [vmem:[%s9374_s29 + $0x49c] sm:$0xf] %v771_v39  ;;  %v899_v39 = vld [vmem:[%s9370_s28 + $0x1670] sm:$0xf] }
 0x13c   : > { %774 = vst [vmem:[%s9374_s29 + $0x4a0] sm:$0xf] %v773_v40  ;;  %v901_v40 = vld [vmem:[%s9370_s28 + $0x1680] sm:$0xf] }
 0x13d   : > { %776 = vst [vmem:[%s9374_s29 + $0x4a4] sm:$0xf] %v775_v41  ;;  %v903_v41 = vld [vmem:[%s9370_s28 + $0x1690] sm:$0xf] }
 0x13e   : > { %778 = vst [vmem:[%s9374_s29 + $0x4a8] sm:$0xf] %v777_v42  ;;  %v905_v42 = vld [vmem:[%s9370_s28 + $0x16a0] sm:$0xf] }
 0x13f   : > { %780 = vst [vmem:[%s9374_s29 + $0x4ac] sm:$0xf] %v779_v43  ;;  %v907_v43 = vld [vmem:[%s9370_s28 + $0x16b0] sm:$0xf] }
 0x140   : > { %782 = vst [vmem:[%s9374_s29 + $0x4b0] sm:$0xf] %v781_v44  ;;  %v909_v44 = vld [vmem:[%s9370_s28 + $0x16c0] sm:$0xf] }
 0x141   : > { %784 = vst [vmem:[%s9374_s29 + $0x4b4] sm:$0xf] %v783_v45  ;;  %v911_v45 = vld [vmem:[%s9370_s28 + $0x16d0] sm:$0xf] }
 0x142   : > { %786 = vst [vmem:[%s9374_s29 + $0x4b8] sm:$0xf] %v785_v46  ;;  %v913_v46 = vld [vmem:[%s9370_s28 + $0x16e0] sm:$0xf] }
 0x143   : > { %788 = vst [vmem:[%s9374_s29 + $0x4bc] sm:$0xf] %v787_v47  ;;  %v915_v47 = vld [vmem:[%s9370_s28 + $0x16f0] sm:$0xf] }
 0x144   : > { %790 = vst [vmem:[%s9374_s29 + $0x4c0] sm:$0xf] %v789_v48  ;;  %v917_v48 = vld [vmem:[%s9370_s28 + $0x1700] sm:$0xf] }
 0x145   : > { %792 = vst [vmem:[%s9374_s29 + $0x4c4] sm:$0xf] %v791_v49  ;;  %v919_v49 = vld [vmem:[%s9370_s28 + $0x1710] sm:$0xf] }
 0x146   : > { %794 = vst [vmem:[%s9374_s29 + $0x4c8] sm:$0xf] %v793_v50  ;;  %v921_v50 = vld [vmem:[%s9370_s28 + $0x1720] sm:$0xf] }
 0x147   : > { %796 = vst [vmem:[%s9374_s29 + $0x4cc] sm:$0xf] %v795_v51  ;;  %v923_v51 = vld [vmem:[%s9370_s28 + $0x1730] sm:$0xf] }
 0x148   : > { %798 = vst [vmem:[%s9374_s29 + $0x4d0] sm:$0xf] %v797_v52  ;;  %v925_v52 = vld [vmem:[%s9370_s28 + $0x1740] sm:$0xf] }
 0x149   : > { %800 = vst [vmem:[%s9374_s29 + $0x4d4] sm:$0xf] %v799_v53  ;;  %v927_v53 = vld [vmem:[%s9370_s28 + $0x1750] sm:$0xf] }
 0x14a   : > { %802 = vst [vmem:[%s9374_s29 + $0x4d8] sm:$0xf] %v801_v54  ;;  %v929_v54 = vld [vmem:[%s9370_s28 + $0x1760] sm:$0xf] }
 0x14b   : > { %804 = vst [vmem:[%s9374_s29 + $0x4dc] sm:$0xf] %v803_v55  ;;  %v931_v55 = vld [vmem:[%s9370_s28 + $0x1770] sm:$0xf] }
 0x14c   : > { %806 = vst [vmem:[%s9374_s29 + $0x4e0] sm:$0xf] %v805_v56  ;;  %v933_v56 = vld [vmem:[%s9370_s28 + $0x1780] sm:$0xf] }
 0x14d   : > { %808 = vst [vmem:[%s9374_s29 + $0x4e4] sm:$0xf] %v807_v57  ;;  %v935_v57 = vld [vmem:[%s9370_s28 + $0x1790] sm:$0xf] }
 0x14e   : > { %810 = vst [vmem:[%s9374_s29 + $0x4e8] sm:$0xf] %v809_v58  ;;  %v937_v58 = vld [vmem:[%s9370_s28 + $0x17a0] sm:$0xf] }
 0x14f   : > { %812 = vst [vmem:[%s9374_s29 + $0x4ec] sm:$0xf] %v811_v59  ;;  %v939_v59 = vld [vmem:[%s9370_s28 + $0x17b0] sm:$0xf] }
 0x150   : > { %814 = vst [vmem:[%s9374_s29 + $0x4f0] sm:$0xf] %v813_v60  ;;  %v941_v60 = vld [vmem:[%s9370_s28 + $0x17c0] sm:$0xf] }
 0x151   : > { %816 = vst [vmem:[%s9374_s29 + $0x4f4] sm:$0xf] %v815_v61  ;;  %v943_v61 = vld [vmem:[%s9370_s28 + $0x17d0] sm:$0xf] }
 0x152   : > { %818 = vst [vmem:[%s9374_s29 + $0x4f8] sm:$0xf] %v817_v62  ;;  %v945_v62 = vld [vmem:[%s9370_s28 + $0x17e0] sm:$0xf] }
 0x153   : > { %820 = vst [vmem:[%s9374_s29 + $0x4fc] sm:$0xf] %v819_v63  ;;  %v947_v63 = vld [vmem:[%s9370_s28 + $0x17f0] sm:$0xf] }
 0x154   : > { %822 = vst [vmem:[%s9374_s29 + $0x500] sm:$0xf] %v821_v0  ;;  %v949_v0 = vld [vmem:[%s9370_s28 + $0x1800] sm:$0xf] }
 0x155   : > { %824 = vst [vmem:[%s9374_s29 + $0x504] sm:$0xf] %v823_v1  ;;  %v951_v1 = vld [vmem:[%s9370_s28 + $0x1810] sm:$0xf] }
 0x156   : > { %826 = vst [vmem:[%s9374_s29 + $0x508] sm:$0xf] %v825_v2  ;;  %v953_v2 = vld [vmem:[%s9370_s28 + $0x1820] sm:$0xf] }
 0x157   : > { %828 = vst [vmem:[%s9374_s29 + $0x50c] sm:$0xf] %v827_v3  ;;  %v955_v3 = vld [vmem:[%s9370_s28 + $0x1830] sm:$0xf] }
 0x158   : > { %830 = vst [vmem:[%s9374_s29 + $0x510] sm:$0xf] %v829_v4  ;;  %v957_v4 = vld [vmem:[%s9370_s28 + $0x1840] sm:$0xf] }
 0x159   : > { %832 = vst [vmem:[%s9374_s29 + $0x514] sm:$0xf] %v831_v5  ;;  %v959_v5 = vld [vmem:[%s9370_s28 + $0x1850] sm:$0xf] }
 0x15a   : > { %834 = vst [vmem:[%s9374_s29 + $0x518] sm:$0xf] %v833_v6  ;;  %v961_v6 = vld [vmem:[%s9370_s28 + $0x1860] sm:$0xf] }
 0x15b   : > { %836 = vst [vmem:[%s9374_s29 + $0x51c] sm:$0xf] %v835_v7  ;;  %v963_v7 = vld [vmem:[%s9370_s28 + $0x1870] sm:$0xf] }
 0x15c   : > { %838 = vst [vmem:[%s9374_s29 + $0x520] sm:$0xf] %v837_v8  ;;  %v965_v8 = vld [vmem:[%s9370_s28 + $0x1880] sm:$0xf] }
 0x15d   : > { %840 = vst [vmem:[%s9374_s29 + $0x524] sm:$0xf] %v839_v9  ;;  %v967_v9 = vld [vmem:[%s9370_s28 + $0x1890] sm:$0xf] }
 0x15e   : > { %842 = vst [vmem:[%s9374_s29 + $0x528] sm:$0xf] %v841_v10  ;;  %v969_v10 = vld [vmem:[%s9370_s28 + $0x18a0] sm:$0xf] }
 0x15f   : > { %844 = vst [vmem:[%s9374_s29 + $0x52c] sm:$0xf] %v843_v11  ;;  %v971_v11 = vld [vmem:[%s9370_s28 + $0x18b0] sm:$0xf] }
 0x160   : > { %846 = vst [vmem:[%s9374_s29 + $0x530] sm:$0xf] %v845_v12  ;;  %v973_v12 = vld [vmem:[%s9370_s28 + $0x18c0] sm:$0xf] }
 0x161   : > { %848 = vst [vmem:[%s9374_s29 + $0x534] sm:$0xf] %v847_v13  ;;  %v975_v13 = vld [vmem:[%s9370_s28 + $0x18d0] sm:$0xf] }
 0x162   : > { %850 = vst [vmem:[%s9374_s29 + $0x538] sm:$0xf] %v849_v14  ;;  %v977_v14 = vld [vmem:[%s9370_s28 + $0x18e0] sm:$0xf] }
 0x163   : > { %852 = vst [vmem:[%s9374_s29 + $0x53c] sm:$0xf] %v851_v15  ;;  %v979_v15 = vld [vmem:[%s9370_s28 + $0x18f0] sm:$0xf] }
 0x164   : > { %854 = vst [vmem:[%s9374_s29 + $0x540] sm:$0xf] %v853_v16  ;;  %v981_v16 = vld [vmem:[%s9370_s28 + $0x1900] sm:$0xf] }
 0x165   : > { %856 = vst [vmem:[%s9374_s29 + $0x544] sm:$0xf] %v855_v17  ;;  %v983_v17 = vld [vmem:[%s9370_s28 + $0x1910] sm:$0xf] }
 0x166   : > { %858 = vst [vmem:[%s9374_s29 + $0x548] sm:$0xf] %v857_v18  ;;  %v985_v18 = vld [vmem:[%s9370_s28 + $0x1920] sm:$0xf] }
 0x167   : > { %860 = vst [vmem:[%s9374_s29 + $0x54c] sm:$0xf] %v859_v19  ;;  %v987_v19 = vld [vmem:[%s9370_s28 + $0x1930] sm:$0xf] }
 0x168   : > { %862 = vst [vmem:[%s9374_s29 + $0x550] sm:$0xf] %v861_v20  ;;  %v989_v20 = vld [vmem:[%s9370_s28 + $0x1940] sm:$0xf] }
 0x169   : > { %864 = vst [vmem:[%s9374_s29 + $0x554] sm:$0xf] %v863_v21  ;;  %v991_v21 = vld [vmem:[%s9370_s28 + $0x1950] sm:$0xf] }
 0x16a   : > { %866 = vst [vmem:[%s9374_s29 + $0x558] sm:$0xf] %v865_v22  ;;  %v993_v22 = vld [vmem:[%s9370_s28 + $0x1960] sm:$0xf] }
 0x16b   : > { %868 = vst [vmem:[%s9374_s29 + $0x55c] sm:$0xf] %v867_v23  ;;  %v995_v23 = vld [vmem:[%s9370_s28 + $0x1970] sm:$0xf] }
 0x16c   : > { %870 = vst [vmem:[%s9374_s29 + $0x560] sm:$0xf] %v869_v24  ;;  %v997_v24 = vld [vmem:[%s9370_s28 + $0x1980] sm:$0xf] }
 0x16d   : > { %872 = vst [vmem:[%s9374_s29 + $0x564] sm:$0xf] %v871_v25  ;;  %v999_v25 = vld [vmem:[%s9370_s28 + $0x1990] sm:$0xf] }
 0x16e   : > { %874 = vst [vmem:[%s9374_s29 + $0x568] sm:$0xf] %v873_v26  ;;  %v1001_v26 = vld [vmem:[%s9370_s28 + $0x19a0] sm:$0xf] }
 0x16f   : > { %876 = vst [vmem:[%s9374_s29 + $0x56c] sm:$0xf] %v875_v27  ;;  %v1003_v27 = vld [vmem:[%s9370_s28 + $0x19b0] sm:$0xf] }
 0x170   : > { %878 = vst [vmem:[%s9374_s29 + $0x570] sm:$0xf] %v877_v28  ;;  %v1005_v28 = vld [vmem:[%s9370_s28 + $0x19c0] sm:$0xf] }
 0x171   : > { %880 = vst [vmem:[%s9374_s29 + $0x574] sm:$0xf] %v879_v29  ;;  %v1007_v29 = vld [vmem:[%s9370_s28 + $0x19d0] sm:$0xf] }
 0x172   : > { %882 = vst [vmem:[%s9374_s29 + $0x578] sm:$0xf] %v881_v30  ;;  %v1009_v30 = vld [vmem:[%s9370_s28 + $0x19e0] sm:$0xf] }
 0x173   : > { %884 = vst [vmem:[%s9374_s29 + $0x57c] sm:$0xf] %v883_v31  ;;  %v1011_v31 = vld [vmem:[%s9370_s28 + $0x19f0] sm:$0xf] }
 0x174   : > { %886 = vst [vmem:[%s9374_s29 + $0x580] sm:$0xf] %v885_v32  ;;  %v1013_v32 = vld [vmem:[%s9370_s28 + $0x1a00] sm:$0xf] }
 0x175   : > { %888 = vst [vmem:[%s9374_s29 + $0x584] sm:$0xf] %v887_v33  ;;  %v1015_v33 = vld [vmem:[%s9370_s28 + $0x1a10] sm:$0xf] }
 0x176   : > { %890 = vst [vmem:[%s9374_s29 + $0x588] sm:$0xf] %v889_v34  ;;  %v1017_v34 = vld [vmem:[%s9370_s28 + $0x1a20] sm:$0xf] }
 0x177   : > { %892 = vst [vmem:[%s9374_s29 + $0x58c] sm:$0xf] %v891_v35  ;;  %v1019_v35 = vld [vmem:[%s9370_s28 + $0x1a30] sm:$0xf] }
 0x178   : > { %894 = vst [vmem:[%s9374_s29 + $0x590] sm:$0xf] %v893_v36  ;;  %v1021_v36 = vld [vmem:[%s9370_s28 + $0x1a40] sm:$0xf] }
 0x179   : > { %896 = vst [vmem:[%s9374_s29 + $0x594] sm:$0xf] %v895_v37  ;;  %v1023_v37 = vld [vmem:[%s9370_s28 + $0x1a50] sm:$0xf] }
 0x17a   : > { %898 = vst [vmem:[%s9374_s29 + $0x598] sm:$0xf] %v897_v38  ;;  %v1025_v38 = vld [vmem:[%s9370_s28 + $0x1a60] sm:$0xf] }
 0x17b   : > { %900 = vst [vmem:[%s9374_s29 + $0x59c] sm:$0xf] %v899_v39  ;;  %v1027_v39 = vld [vmem:[%s9370_s28 + $0x1a70] sm:$0xf] }
 0x17c   : > { %902 = vst [vmem:[%s9374_s29 + $0x5a0] sm:$0xf] %v901_v40  ;;  %v1029_v40 = vld [vmem:[%s9370_s28 + $0x1a80] sm:$0xf] }
 0x17d   : > { %904 = vst [vmem:[%s9374_s29 + $0x5a4] sm:$0xf] %v903_v41  ;;  %v1031_v41 = vld [vmem:[%s9370_s28 + $0x1a90] sm:$0xf] }
 0x17e   : > { %906 = vst [vmem:[%s9374_s29 + $0x5a8] sm:$0xf] %v905_v42  ;;  %v1033_v42 = vld [vmem:[%s9370_s28 + $0x1aa0] sm:$0xf] }
 0x17f   : > { %908 = vst [vmem:[%s9374_s29 + $0x5ac] sm:$0xf] %v907_v43  ;;  %v1035_v43 = vld [vmem:[%s9370_s28 + $0x1ab0] sm:$0xf] }
 0x180   : > { %910 = vst [vmem:[%s9374_s29 + $0x5b0] sm:$0xf] %v909_v44  ;;  %v1037_v44 = vld [vmem:[%s9370_s28 + $0x1ac0] sm:$0xf] }
 0x181   : > { %912 = vst [vmem:[%s9374_s29 + $0x5b4] sm:$0xf] %v911_v45  ;;  %v1039_v45 = vld [vmem:[%s9370_s28 + $0x1ad0] sm:$0xf] }
 0x182   : > { %914 = vst [vmem:[%s9374_s29 + $0x5b8] sm:$0xf] %v913_v46  ;;  %v1041_v46 = vld [vmem:[%s9370_s28 + $0x1ae0] sm:$0xf] }
 0x183   : > { %916 = vst [vmem:[%s9374_s29 + $0x5bc] sm:$0xf] %v915_v47  ;;  %v1043_v47 = vld [vmem:[%s9370_s28 + $0x1af0] sm:$0xf] }
 0x184   : > { %918 = vst [vmem:[%s9374_s29 + $0x5c0] sm:$0xf] %v917_v48  ;;  %v1045_v48 = vld [vmem:[%s9370_s28 + $0x1b00] sm:$0xf] }
 0x185   : > { %920 = vst [vmem:[%s9374_s29 + $0x5c4] sm:$0xf] %v919_v49  ;;  %v1047_v49 = vld [vmem:[%s9370_s28 + $0x1b10] sm:$0xf] }
 0x186   : > { %922 = vst [vmem:[%s9374_s29 + $0x5c8] sm:$0xf] %v921_v50  ;;  %v1049_v50 = vld [vmem:[%s9370_s28 + $0x1b20] sm:$0xf] }
 0x187   : > { %924 = vst [vmem:[%s9374_s29 + $0x5cc] sm:$0xf] %v923_v51  ;;  %v1051_v51 = vld [vmem:[%s9370_s28 + $0x1b30] sm:$0xf] }
 0x188   : > { %926 = vst [vmem:[%s9374_s29 + $0x5d0] sm:$0xf] %v925_v52  ;;  %v1053_v52 = vld [vmem:[%s9370_s28 + $0x1b40] sm:$0xf] }
 0x189   : > { %928 = vst [vmem:[%s9374_s29 + $0x5d4] sm:$0xf] %v927_v53  ;;  %v1055_v53 = vld [vmem:[%s9370_s28 + $0x1b50] sm:$0xf] }
 0x18a   : > { %930 = vst [vmem:[%s9374_s29 + $0x5d8] sm:$0xf] %v929_v54  ;;  %v1057_v54 = vld [vmem:[%s9370_s28 + $0x1b60] sm:$0xf] }
 0x18b   : > { %932 = vst [vmem:[%s9374_s29 + $0x5dc] sm:$0xf] %v931_v55  ;;  %v1059_v55 = vld [vmem:[%s9370_s28 + $0x1b70] sm:$0xf] }
 0x18c   : > { %934 = vst [vmem:[%s9374_s29 + $0x5e0] sm:$0xf] %v933_v56  ;;  %v1061_v56 = vld [vmem:[%s9370_s28 + $0x1b80] sm:$0xf] }
 0x18d   : > { %936 = vst [vmem:[%s9374_s29 + $0x5e4] sm:$0xf] %v935_v57  ;;  %v1063_v57 = vld [vmem:[%s9370_s28 + $0x1b90] sm:$0xf] }
 0x18e   : > { %938 = vst [vmem:[%s9374_s29 + $0x5e8] sm:$0xf] %v937_v58  ;;  %v1065_v58 = vld [vmem:[%s9370_s28 + $0x1ba0] sm:$0xf] }
 0x18f   : > { %940 = vst [vmem:[%s9374_s29 + $0x5ec] sm:$0xf] %v939_v59  ;;  %v1067_v59 = vld [vmem:[%s9370_s28 + $0x1bb0] sm:$0xf] }
 0x190   : > { %942 = vst [vmem:[%s9374_s29 + $0x5f0] sm:$0xf] %v941_v60  ;;  %v1069_v60 = vld [vmem:[%s9370_s28 + $0x1bc0] sm:$0xf] }
 0x191   : > { %944 = vst [vmem:[%s9374_s29 + $0x5f4] sm:$0xf] %v943_v61  ;;  %v1071_v61 = vld [vmem:[%s9370_s28 + $0x1bd0] sm:$0xf] }
 0x192   : > { %946 = vst [vmem:[%s9374_s29 + $0x5f8] sm:$0xf] %v945_v62  ;;  %v1073_v62 = vld [vmem:[%s9370_s28 + $0x1be0] sm:$0xf] }
 0x193   : > { %948 = vst [vmem:[%s9374_s29 + $0x5fc] sm:$0xf] %v947_v63  ;;  %v1075_v63 = vld [vmem:[%s9370_s28 + $0x1bf0] sm:$0xf] }
 0x194   : > { %950 = vst [vmem:[%s9374_s29 + $0x600] sm:$0xf] %v949_v0  ;;  %v1077_v0 = vld [vmem:[%s9370_s28 + $0x1c00] sm:$0xf] }
 0x195   : > { %952 = vst [vmem:[%s9374_s29 + $0x604] sm:$0xf] %v951_v1  ;;  %v1079_v1 = vld [vmem:[%s9370_s28 + $0x1c10] sm:$0xf] }
 0x196   : > { %954 = vst [vmem:[%s9374_s29 + $0x608] sm:$0xf] %v953_v2  ;;  %v1081_v2 = vld [vmem:[%s9370_s28 + $0x1c20] sm:$0xf] }
 0x197   : > { %956 = vst [vmem:[%s9374_s29 + $0x60c] sm:$0xf] %v955_v3  ;;  %v1083_v3 = vld [vmem:[%s9370_s28 + $0x1c30] sm:$0xf] }
 0x198   : > { %958 = vst [vmem:[%s9374_s29 + $0x610] sm:$0xf] %v957_v4  ;;  %v1085_v4 = vld [vmem:[%s9370_s28 + $0x1c40] sm:$0xf] }
 0x199   : > { %960 = vst [vmem:[%s9374_s29 + $0x614] sm:$0xf] %v959_v5  ;;  %v1087_v5 = vld [vmem:[%s9370_s28 + $0x1c50] sm:$0xf] }
 0x19a   : > { %962 = vst [vmem:[%s9374_s29 + $0x618] sm:$0xf] %v961_v6  ;;  %v1089_v6 = vld [vmem:[%s9370_s28 + $0x1c60] sm:$0xf] }
 0x19b   : > { %964 = vst [vmem:[%s9374_s29 + $0x61c] sm:$0xf] %v963_v7  ;;  %v1091_v7 = vld [vmem:[%s9370_s28 + $0x1c70] sm:$0xf] }
 0x19c   : > { %966 = vst [vmem:[%s9374_s29 + $0x620] sm:$0xf] %v965_v8  ;;  %v1093_v8 = vld [vmem:[%s9370_s28 + $0x1c80] sm:$0xf] }
 0x19d   : > { %968 = vst [vmem:[%s9374_s29 + $0x624] sm:$0xf] %v967_v9  ;;  %v1095_v9 = vld [vmem:[%s9370_s28 + $0x1c90] sm:$0xf] }
 0x19e   : > { %970 = vst [vmem:[%s9374_s29 + $0x628] sm:$0xf] %v969_v10  ;;  %v1097_v10 = vld [vmem:[%s9370_s28 + $0x1ca0] sm:$0xf] }
 0x19f   : > { %972 = vst [vmem:[%s9374_s29 + $0x62c] sm:$0xf] %v971_v11  ;;  %v1099_v11 = vld [vmem:[%s9370_s28 + $0x1cb0] sm:$0xf] }
 0x1a0   : > { %974 = vst [vmem:[%s9374_s29 + $0x630] sm:$0xf] %v973_v12  ;;  %v1101_v12 = vld [vmem:[%s9370_s28 + $0x1cc0] sm:$0xf] }
 0x1a1   : > { %976 = vst [vmem:[%s9374_s29 + $0x634] sm:$0xf] %v975_v13  ;;  %v1103_v13 = vld [vmem:[%s9370_s28 + $0x1cd0] sm:$0xf] }
 0x1a2   : > { %978 = vst [vmem:[%s9374_s29 + $0x638] sm:$0xf] %v977_v14  ;;  %v1105_v14 = vld [vmem:[%s9370_s28 + $0x1ce0] sm:$0xf] }
 0x1a3   : > { %980 = vst [vmem:[%s9374_s29 + $0x63c] sm:$0xf] %v979_v15  ;;  %v1107_v15 = vld [vmem:[%s9370_s28 + $0x1cf0] sm:$0xf] }
 0x1a4   : > { %982 = vst [vmem:[%s9374_s29 + $0x640] sm:$0xf] %v981_v16  ;;  %v1109_v16 = vld [vmem:[%s9370_s28 + $0x1d00] sm:$0xf] }
 0x1a5   : > { %984 = vst [vmem:[%s9374_s29 + $0x644] sm:$0xf] %v983_v17  ;;  %v1111_v17 = vld [vmem:[%s9370_s28 + $0x1d10] sm:$0xf] }
 0x1a6   : > { %986 = vst [vmem:[%s9374_s29 + $0x648] sm:$0xf] %v985_v18  ;;  %v1113_v18 = vld [vmem:[%s9370_s28 + $0x1d20] sm:$0xf] }
 0x1a7   : > { %988 = vst [vmem:[%s9374_s29 + $0x64c] sm:$0xf] %v987_v19  ;;  %v1115_v19 = vld [vmem:[%s9370_s28 + $0x1d30] sm:$0xf] }
 0x1a8   : > { %990 = vst [vmem:[%s9374_s29 + $0x650] sm:$0xf] %v989_v20  ;;  %v1117_v20 = vld [vmem:[%s9370_s28 + $0x1d40] sm:$0xf] }
 0x1a9   : > { %992 = vst [vmem:[%s9374_s29 + $0x654] sm:$0xf] %v991_v21  ;;  %v1119_v21 = vld [vmem:[%s9370_s28 + $0x1d50] sm:$0xf] }
 0x1aa   : > { %994 = vst [vmem:[%s9374_s29 + $0x658] sm:$0xf] %v993_v22  ;;  %v1121_v22 = vld [vmem:[%s9370_s28 + $0x1d60] sm:$0xf] }
 0x1ab   : > { %996 = vst [vmem:[%s9374_s29 + $0x65c] sm:$0xf] %v995_v23  ;;  %v1123_v23 = vld [vmem:[%s9370_s28 + $0x1d70] sm:$0xf] }
 0x1ac   : > { %998 = vst [vmem:[%s9374_s29 + $0x660] sm:$0xf] %v997_v24  ;;  %v1125_v24 = vld [vmem:[%s9370_s28 + $0x1d80] sm:$0xf] }
 0x1ad   : > { %1000 = vst [vmem:[%s9374_s29 + $0x664] sm:$0xf] %v999_v25  ;;  %v1127_v25 = vld [vmem:[%s9370_s28 + $0x1d90] sm:$0xf] }
 0x1ae   : > { %1002 = vst [vmem:[%s9374_s29 + $0x668] sm:$0xf] %v1001_v26  ;;  %v1129_v26 = vld [vmem:[%s9370_s28 + $0x1da0] sm:$0xf] }
 0x1af   : > { %1004 = vst [vmem:[%s9374_s29 + $0x66c] sm:$0xf] %v1003_v27  ;;  %v1131_v27 = vld [vmem:[%s9370_s28 + $0x1db0] sm:$0xf] }
 0x1b0   : > { %1006 = vst [vmem:[%s9374_s29 + $0x670] sm:$0xf] %v1005_v28  ;;  %v1133_v28 = vld [vmem:[%s9370_s28 + $0x1dc0] sm:$0xf] }
 0x1b1   : > { %1008 = vst [vmem:[%s9374_s29 + $0x674] sm:$0xf] %v1007_v29  ;;  %v1135_v29 = vld [vmem:[%s9370_s28 + $0x1dd0] sm:$0xf] }
 0x1b2   : > { %1010 = vst [vmem:[%s9374_s29 + $0x678] sm:$0xf] %v1009_v30  ;;  %v1137_v30 = vld [vmem:[%s9370_s28 + $0x1de0] sm:$0xf] }
 0x1b3   : > { %1012 = vst [vmem:[%s9374_s29 + $0x67c] sm:$0xf] %v1011_v31  ;;  %v1139_v31 = vld [vmem:[%s9370_s28 + $0x1df0] sm:$0xf] }
 0x1b4   : > { %1014 = vst [vmem:[%s9374_s29 + $0x680] sm:$0xf] %v1013_v32  ;;  %v1141_v32 = vld [vmem:[%s9370_s28 + $0x1e00] sm:$0xf] }
 0x1b5   : > { %1016 = vst [vmem:[%s9374_s29 + $0x684] sm:$0xf] %v1015_v33  ;;  %v1143_v33 = vld [vmem:[%s9370_s28 + $0x1e10] sm:$0xf] }
 0x1b6   : > { %1018 = vst [vmem:[%s9374_s29 + $0x688] sm:$0xf] %v1017_v34  ;;  %v1145_v34 = vld [vmem:[%s9370_s28 + $0x1e20] sm:$0xf] }
 0x1b7   : > { %1020 = vst [vmem:[%s9374_s29 + $0x68c] sm:$0xf] %v1019_v35  ;;  %v1147_v35 = vld [vmem:[%s9370_s28 + $0x1e30] sm:$0xf] }
 0x1b8   : > { %1022 = vst [vmem:[%s9374_s29 + $0x690] sm:$0xf] %v1021_v36  ;;  %v1149_v36 = vld [vmem:[%s9370_s28 + $0x1e40] sm:$0xf] }
 0x1b9   : > { %1024 = vst [vmem:[%s9374_s29 + $0x694] sm:$0xf] %v1023_v37  ;;  %v1151_v37 = vld [vmem:[%s9370_s28 + $0x1e50] sm:$0xf] }
 0x1ba   : > { %1026 = vst [vmem:[%s9374_s29 + $0x698] sm:$0xf] %v1025_v38  ;;  %v1153_v38 = vld [vmem:[%s9370_s28 + $0x1e60] sm:$0xf] }
 0x1bb   : > { %1028 = vst [vmem:[%s9374_s29 + $0x69c] sm:$0xf] %v1027_v39  ;;  %v1155_v39 = vld [vmem:[%s9370_s28 + $0x1e70] sm:$0xf] }
 0x1bc   : > { %1030 = vst [vmem:[%s9374_s29 + $0x6a0] sm:$0xf] %v1029_v40  ;;  %v1157_v40 = vld [vmem:[%s9370_s28 + $0x1e80] sm:$0xf] }
 0x1bd   : > { %1032 = vst [vmem:[%s9374_s29 + $0x6a4] sm:$0xf] %v1031_v41  ;;  %v1159_v41 = vld [vmem:[%s9370_s28 + $0x1e90] sm:$0xf] }
 0x1be   : > { %1034 = vst [vmem:[%s9374_s29 + $0x6a8] sm:$0xf] %v1033_v42  ;;  %v1161_v42 = vld [vmem:[%s9370_s28 + $0x1ea0] sm:$0xf] }
 0x1bf   : > { %1036 = vst [vmem:[%s9374_s29 + $0x6ac] sm:$0xf] %v1035_v43  ;;  %v1163_v43 = vld [vmem:[%s9370_s28 + $0x1eb0] sm:$0xf] }
 0x1c0   : > { %1038 = vst [vmem:[%s9374_s29 + $0x6b0] sm:$0xf] %v1037_v44  ;;  %v1165_v44 = vld [vmem:[%s9370_s28 + $0x1ec0] sm:$0xf] }
 0x1c1   : > { %1040 = vst [vmem:[%s9374_s29 + $0x6b4] sm:$0xf] %v1039_v45  ;;  %v1167_v45 = vld [vmem:[%s9370_s28 + $0x1ed0] sm:$0xf] }
 0x1c2   : > { %1042 = vst [vmem:[%s9374_s29 + $0x6b8] sm:$0xf] %v1041_v46  ;;  %v1169_v46 = vld [vmem:[%s9370_s28 + $0x1ee0] sm:$0xf] }
 0x1c3   : > { %1044 = vst [vmem:[%s9374_s29 + $0x6bc] sm:$0xf] %v1043_v47  ;;  %v1171_v47 = vld [vmem:[%s9370_s28 + $0x1ef0] sm:$0xf] }
 0x1c4   : > { %1046 = vst [vmem:[%s9374_s29 + $0x6c0] sm:$0xf] %v1045_v48  ;;  %v1173_v48 = vld [vmem:[%s9370_s28 + $0x1f00] sm:$0xf] }
 0x1c5   : > { %1048 = vst [vmem:[%s9374_s29 + $0x6c4] sm:$0xf] %v1047_v49  ;;  %v1175_v49 = vld [vmem:[%s9370_s28 + $0x1f10] sm:$0xf] }
 0x1c6   : > { %1050 = vst [vmem:[%s9374_s29 + $0x6c8] sm:$0xf] %v1049_v50  ;;  %v1177_v50 = vld [vmem:[%s9370_s28 + $0x1f20] sm:$0xf] }
 0x1c7   : > { %1052 = vst [vmem:[%s9374_s29 + $0x6cc] sm:$0xf] %v1051_v51  ;;  %v1179_v51 = vld [vmem:[%s9370_s28 + $0x1f30] sm:$0xf] }
 0x1c8   : > { %1054 = vst [vmem:[%s9374_s29 + $0x6d0] sm:$0xf] %v1053_v52  ;;  %v1181_v52 = vld [vmem:[%s9370_s28 + $0x1f40] sm:$0xf] }
 0x1c9   : > { %1056 = vst [vmem:[%s9374_s29 + $0x6d4] sm:$0xf] %v1055_v53  ;;  %v1183_v53 = vld [vmem:[%s9370_s28 + $0x1f50] sm:$0xf] }
 0x1ca   : > { %1058 = vst [vmem:[%s9374_s29 + $0x6d8] sm:$0xf] %v1057_v54  ;;  %v1185_v54 = vld [vmem:[%s9370_s28 + $0x1f60] sm:$0xf] }
 0x1cb   : > { %1060 = vst [vmem:[%s9374_s29 + $0x6dc] sm:$0xf] %v1059_v55  ;;  %v1187_v55 = vld [vmem:[%s9370_s28 + $0x1f70] sm:$0xf] }
 0x1cc   : > { %1062 = vst [vmem:[%s9374_s29 + $0x6e0] sm:$0xf] %v1061_v56  ;;  %v1189_v56 = vld [vmem:[%s9370_s28 + $0x1f80] sm:$0xf] }
 0x1cd   : > { %1064 = vst [vmem:[%s9374_s29 + $0x6e4] sm:$0xf] %v1063_v57  ;;  %v1191_v57 = vld [vmem:[%s9370_s28 + $0x1f90] sm:$0xf] }
 0x1ce   : > { %1066 = vst [vmem:[%s9374_s29 + $0x6e8] sm:$0xf] %v1065_v58  ;;  %v1193_v58 = vld [vmem:[%s9370_s28 + $0x1fa0] sm:$0xf] }
 0x1cf   : > { %1068 = vst [vmem:[%s9374_s29 + $0x6ec] sm:$0xf] %v1067_v59  ;;  %v1195_v59 = vld [vmem:[%s9370_s28 + $0x1fb0] sm:$0xf] }
 0x1d0   : > { %1070 = vst [vmem:[%s9374_s29 + $0x6f0] sm:$0xf] %v1069_v60  ;;  %v1197_v60 = vld [vmem:[%s9370_s28 + $0x1fc0] sm:$0xf] }
 0x1d1   : > { %1072 = vst [vmem:[%s9374_s29 + $0x6f4] sm:$0xf] %v1071_v61  ;;  %v1199_v61 = vld [vmem:[%s9370_s28 + $0x1fd0] sm:$0xf] }
 0x1d2   : > { %1074 = vst [vmem:[%s9374_s29 + $0x6f8] sm:$0xf] %v1073_v62  ;;  %v1201_v62 = vld [vmem:[%s9370_s28 + $0x1fe0] sm:$0xf] }
 0x1d3   : > { %1076 = vst [vmem:[%s9374_s29 + $0x6fc] sm:$0xf] %v1075_v63  ;;  %v1203_v63 = vld [vmem:[%s9370_s28 + $0x1ff0] sm:$0xf] }
 0x1d4   : > { %1078 = vst [vmem:[%s9374_s29 + $0x700] sm:$0xf] %v1077_v0 }
 0x1d5   : > { %1080 = vst [vmem:[%s9374_s29 + $0x704] sm:$0xf] %v1079_v1 }
 0x1d6   : > { %1082 = vst [vmem:[%s9374_s29 + $0x708] sm:$0xf] %v1081_v2 }
 0x1d7   : > { %1084 = vst [vmem:[%s9374_s29 + $0x70c] sm:$0xf] %v1083_v3 }
 0x1d8   : > { %1086 = vst [vmem:[%s9374_s29 + $0x710] sm:$0xf] %v1085_v4 }
 0x1d9   : > { %1088 = vst [vmem:[%s9374_s29 + $0x714] sm:$0xf] %v1087_v5 }
 0x1da   : > { %1090 = vst [vmem:[%s9374_s29 + $0x718] sm:$0xf] %v1089_v6 }
 0x1db   : > { %1092 = vst [vmem:[%s9374_s29 + $0x71c] sm:$0xf] %v1091_v7 }
 0x1dc   : > { %1094 = vst [vmem:[%s9374_s29 + $0x720] sm:$0xf] %v1093_v8 }
 0x1dd   : > { %1096 = vst [vmem:[%s9374_s29 + $0x724] sm:$0xf] %v1095_v9 }
 0x1de   : > { %1098 = vst [vmem:[%s9374_s29 + $0x728] sm:$0xf] %v1097_v10 }
 0x1df   : > { %1100 = vst [vmem:[%s9374_s29 + $0x72c] sm:$0xf] %v1099_v11 }
 0x1e0   : > { %1102 = vst [vmem:[%s9374_s29 + $0x730] sm:$0xf] %v1101_v12 }
 0x1e1   : > { %1104 = vst [vmem:[%s9374_s29 + $0x734] sm:$0xf] %v1103_v13 }
 0x1e2   : > { %1106 = vst [vmem:[%s9374_s29 + $0x738] sm:$0xf] %v1105_v14 }
 0x1e3   : > { %1108 = vst [vmem:[%s9374_s29 + $0x73c] sm:$0xf] %v1107_v15 }
 0x1e4   : > { %1110 = vst [vmem:[%s9374_s29 + $0x740] sm:$0xf] %v1109_v16 }
 0x1e5   : > { %1112 = vst [vmem:[%s9374_s29 + $0x744] sm:$0xf] %v1111_v17 }
 0x1e6   : > { %1114 = vst [vmem:[%s9374_s29 + $0x748] sm:$0xf] %v1113_v18 }
 0x1e7   : > { %1116 = vst [vmem:[%s9374_s29 + $0x74c] sm:$0xf] %v1115_v19 }
 0x1e8   : > { %1118 = vst [vmem:[%s9374_s29 + $0x750] sm:$0xf] %v1117_v20 }
 0x1e9   : > { %1120 = vst [vmem:[%s9374_s29 + $0x754] sm:$0xf] %v1119_v21 }
 0x1ea   : > { %1122 = vst [vmem:[%s9374_s29 + $0x758] sm:$0xf] %v1121_v22 }
 0x1eb   : > { %1124 = vst [vmem:[%s9374_s29 + $0x75c] sm:$0xf] %v1123_v23 }
 0x1ec   : > { %1126 = vst [vmem:[%s9374_s29 + $0x760] sm:$0xf] %v1125_v24 }
 0x1ed   : > { %1128 = vst [vmem:[%s9374_s29 + $0x764] sm:$0xf] %v1127_v25 }
 0x1ee   : > { %1130 = vst [vmem:[%s9374_s29 + $0x768] sm:$0xf] %v1129_v26 }
 0x1ef   : > { %1132 = vst [vmem:[%s9374_s29 + $0x76c] sm:$0xf] %v1131_v27 }
 0x1f0   : > { %1134 = vst [vmem:[%s9374_s29 + $0x770] sm:$0xf] %v1133_v28 }
 0x1f1   : > { %1136 = vst [vmem:[%s9374_s29 + $0x774] sm:$0xf] %v1135_v29 }
 0x1f2   : > { %1138 = vst [vmem:[%s9374_s29 + $0x778] sm:$0xf] %v1137_v30 }
 0x1f3   : > { %1140 = vst [vmem:[%s9374_s29 + $0x77c] sm:$0xf] %v1139_v31 }
 0x1f4   : > { %1142 = vst [vmem:[%s9374_s29 + $0x780] sm:$0xf] %v1141_v32 }
 0x1f5   : > { %1144 = vst [vmem:[%s9374_s29 + $0x784] sm:$0xf] %v1143_v33 }
 0x1f6   : > { %1146 = vst [vmem:[%s9374_s29 + $0x788] sm:$0xf] %v1145_v34 }
 0x1f7   : > { %1148 = vst [vmem:[%s9374_s29 + $0x78c] sm:$0xf] %v1147_v35 }
 0x1f8   : > { %1150 = vst [vmem:[%s9374_s29 + $0x790] sm:$0xf] %v1149_v36 }
 0x1f9   : > { %1152 = vst [vmem:[%s9374_s29 + $0x794] sm:$0xf] %v1151_v37 }
 0x1fa   : > { %1154 = vst [vmem:[%s9374_s29 + $0x798] sm:$0xf] %v1153_v38 }
 0x1fb   : > { %1156 = vst [vmem:[%s9374_s29 + $0x79c] sm:$0xf] %v1155_v39 }
 0x1fc   : > { %1158 = vst [vmem:[%s9374_s29 + $0x7a0] sm:$0xf] %v1157_v40 }
 0x1fd   : > { %1160 = vst [vmem:[%s9374_s29 + $0x7a4] sm:$0xf] %v1159_v41 }
 0x1fe   : > { %1162 = vst [vmem:[%s9374_s29 + $0x7a8] sm:$0xf] %v1161_v42 }
 0x1ff   : > { %1164 = vst [vmem:[%s9374_s29 + $0x7ac] sm:$0xf] %v1163_v43 }
 0x200   : > { %1166 = vst [vmem:[%s9374_s29 + $0x7b0] sm:$0xf] %v1165_v44 }
 0x201   : > { %1168 = vst [vmem:[%s9374_s29 + $0x7b4] sm:$0xf] %v1167_v45 }
 0x202   : > { %1170 = vst [vmem:[%s9374_s29 + $0x7b8] sm:$0xf] %v1169_v46 }
 0x203   : > { %1172 = vst [vmem:[%s9374_s29 + $0x7bc] sm:$0xf] %v1171_v47 }
 0x204   : > { %1174 = vst [vmem:[%s9374_s29 + $0x7c0] sm:$0xf] %v1173_v48 }
 0x205   : > { %1176 = vst [vmem:[%s9374_s29 + $0x7c4] sm:$0xf] %v1175_v49 }
 0x206   : > { %1178 = vst [vmem:[%s9374_s29 + $0x7c8] sm:$0xf] %v1177_v50 }
 0x207   : > { %1180 = vst [vmem:[%s9374_s29 + $0x7cc] sm:$0xf] %v1179_v51 }
 0x208   : > { %1182 = vst [vmem:[%s9374_s29 + $0x7d0] sm:$0xf] %v1181_v52 }
 0x209   : > { %1184 = vst [vmem:[%s9374_s29 + $0x7d4] sm:$0xf] %v1183_v53 }
 0x20a   : > { %1186 = vst [vmem:[%s9374_s29 + $0x7d8] sm:$0xf] %v1185_v54 }
 0x20b   : > { %1188 = vst [vmem:[%s9374_s29 + $0x7dc] sm:$0xf] %v1187_v55 }
 0x20c   : > { %1190 = vst [vmem:[%s9374_s29 + $0x7e0] sm:$0xf] %v1189_v56 }
 0x20d   : > { %1192 = vst [vmem:[%s9374_s29 + $0x7e4] sm:$0xf] %v1191_v57 }
 0x20e   : > { %1194 = vst [vmem:[%s9374_s29 + $0x7e8] sm:$0xf] %v1193_v58 }
 0x20f   : > { %1196 = vst [vmem:[%s9374_s29 + $0x7ec] sm:$0xf] %v1195_v59 }
 0x210   : > { %1198 = vst [vmem:[%s9374_s29 + $0x7f0] sm:$0xf] %v1197_v60 }
 0x211   : > { %1200 = vst [vmem:[%s9374_s29 + $0x7f4] sm:$0xf] %v1199_v61 }
 0x212   : > { %1202 = vst [vmem:[%s9374_s29 + $0x7f8] sm:$0xf] %v1201_v62 }
 0x213   : > { %1204 = vst [vmem:[%s9374_s29 + $0x7fc] sm:$0xf] %v1203_v63 }
 0x214 PF: > { %p7603_p8 = scmp.ge.s32.totalorder %s9300_s16, 1  ;;  %p4331_p9 = scmp.lt.s32.totalorder %s9300_s16, 5 }
 0x216   : > { %p4332_p10 = pnand %p7603_p8, %p4331_p9 }
 0x217   : > { %s4338_s30 = sand.u32 (!%p4332_p10), 1, %s9284_s12   ;;  %p4376_p11 = scmp.lt.s32.totalorder (!%p4332_p10), %s9292_s14, 3 }
 0x218   : > { %4335 = sbr.rel (%p4332_p10) target bundleno = 971 (0x3cb), region = 80  ;;  %s7604_s4 = sshll.u32 (!%p4332_p10), %s4338_s30, 11 }
 0x219   : > { %s10403_s5 = scalar_lea.vmem (!%p4332_p10), [#allocation2], %s7604_s4  ;;  %s7605_s11 = sshll.u32 (!%p4332_p10), %s4338_s30, 4 }
 0x21d   : > { %v8961_v0 = vld [vmem:[%s10403_s5 + $0x38] sm:$0xff]  ;;  %v8960_v4 = vld [vmem:[%s10403_s5 + $0x30] sm:$0xff]  ;;  %v8959_v8 = vld [vmem:[%s10403_s5 + $0x28] sm:$0xff]  ;;  %s10445_s10 = scalar_select %p4376_p11, %s9292_s14, 3 }
 0x21e   : > { %v8969_v1 = vld [vmem:[%s10403_s5 + $0x78] sm:$0xff]  ;;  %6816 = vmatpush.bf16.msra.mxu0 %v8961_v0  ;;  %v8968_v5 = vld [vmem:[%s10403_s5 + $0x70] sm:$0xff]  ;;  %v8967_v9 = vld [vmem:[%s10403_s5 + $0x68] sm:$0xff]  ;;  %s8887_s12 = sshll.u32 (%p9357_p6), %s9292_s14, 2 }
 0x21f   : > { %v8977_v2 = vld [vmem:[%s10403_s5 + $0xb8] sm:$0xff]  ;;  %6835 = vmatpush.bf16.msra.mxu1 %v8969_v1  ;;  %v8976_v6 = vld [vmem:[%s10403_s5 + $0xb0] sm:$0xff]  ;;  %v8975_v10 = vld [vmem:[%s10403_s5 + $0xa8] sm:$0xff]  ;;  %s4378_s8 = scalar_lea.vmem %s11116_s2, %s10445_s10  ;;  %s4368_s10 = scalar_lea.vmem [#allocation3], %s7605_s11 }
 0x220   : > { %v8985_v3 = vld [vmem:[%s10403_s5 + $0xf8] sm:$0xff]  ;;  %6854 = vmatpush.bf16.msra.mxu2 %v8977_v2  ;;  %v8984_v7 = vld [vmem:[%s10403_s5 + $0xf0] sm:$0xff]  ;;  %v8983_v11 = vld [vmem:[%s10403_s5 + $0xe8] sm:$0xff]  ;;  %s7443_s18 = scalar_lea.vmem (%p9357_p6), %s11117_s3, %s8887_s12 }
 0x221   : > { %6873 = vmatpush.bf16.msra.mxu3 %v8985_v3  ;;  %v8958_v12 = vld [vmem:[%s10403_s5 + $0x20] sm:$0xff]  ;;  %v8957_v16 = vld [vmem:[%s10403_s5 + $0x18] sm:$0xff]  ;;  %v8956_v20 = vld [vmem:[%s10403_s5 + $0x10] sm:$0xff] }
 0x222   : > { %6817 = vmatpush.bf16.msra.mxu0 %v8960_v4  ;;  %v8966_v13 = vld [vmem:[%s10403_s5 + $0x60] sm:$0xff]  ;;  %v8965_v17 = vld [vmem:[%s10403_s5 + $0x58] sm:$0xff]  ;;  %v8964_v21 = vld [vmem:[%s10403_s5 + $0x50] sm:$0xff] }
 0x223   : > { %6836 = vmatpush.bf16.msra.mxu1 %v8968_v5  ;;  %v8974_v14 = vld [vmem:[%s10403_s5 + $0xa0] sm:$0xff]  ;;  %v8973_v18 = vld [vmem:[%s10403_s5 + $0x98] sm:$0xff]  ;;  %v8972_v22 = vld [vmem:[%s10403_s5 + $0x90] sm:$0xff] }
 0x224   : > { %6855 = vmatpush.bf16.msra.mxu2 %v8976_v6  ;;  %v8982_v15 = vld [vmem:[%s10403_s5 + $0xe0] sm:$0xff]  ;;  %v8981_v19 = vld [vmem:[%s10403_s5 + $0xd8] sm:$0xff]  ;;  %v8980_v23 = vld [vmem:[%s10403_s5 + $0xd0] sm:$0xff] }
 0x225   : > { %6874 = vmatpush.bf16.msra.mxu3 %v8984_v7  ;;  %v8955_v24 = vld [vmem:[%s10403_s5 + $0x8] sm:$0xff]  ;;  %v8954_v28 = vld [vmem:[%s10403_s5] sm:$0xff]  ;;  %v9009_v40 = vld [vmem:[%s10403_s5 + $0x1b8] sm:$0xff] }
 0x226   : > { %6818 = vmatpush.bf16.msra.mxu0 %v8959_v8  ;;  %v8963_v25 = vld [vmem:[%s10403_s5 + $0x48] sm:$0xff]  ;;  %v7608_v29 = vld [vmem:[%s11114_s0] sm:$0xf]  ;;  %v8890_v34 = vld [vmem:[%s11114_s0 + $0x4] sm:$0xf] }
 0x227   : > { %6837 = vmatpush.bf16.msra.mxu1 %v8967_v9  ;;  %v8971_v26 = vld [vmem:[%s10403_s5 + $0x88] sm:$0xff]  ;;  %v8906_v30 = vld [vmem:[%s11114_s0 + $0x7c] sm:$0xf0]  ;;  %v7610_v35 = vld [vmem:[%s11114_s0 + $0x80] sm:$0xf0] }
 0x228   : > { %6856 = vmatpush.bf16.msra.mxu2 %v8975_v10  ;;  %v8979_v27 = vld [vmem:[%s10403_s5 + $0xc8] sm:$0xff]  ;;  %v8962_v31 = vld [vmem:[%s10403_s5 + $0x40] sm:$0xff]  ;;  %v8993_v41 = vld [vmem:[%s10403_s5 + $0x138] sm:$0xff]  ;;  %v7609_v42 = vor.u32 %v8906_v30, %v7608_v29  ;;  %v7613_v43 = vor.u32 %v8890_v34, %v7610_v35 }
 0x229   : > { %6875 = vmatpush.bf16.msra.mxu3 %v8983_v11  ;;  %v8970_v32 = vld [vmem:[%s10403_s5 + $0x80] sm:$0xff]  ;;  %v7616_v36 = vld [vmem:[%s11114_s0 + $0x8] sm:$0xf]  ;;  %v8891_v38 = vld [vmem:[%s11114_s0 + $0xc] sm:$0xf] }
 0x22a   : > { %6819 = vmatpush.bf16.msra.mxu0 %v8958_v12  ;;  %v8978_v33 = vld [vmem:[%s10403_s5 + $0xc0] sm:$0xff]  ;;  %v8907_v37 = vld [vmem:[%s11114_s0 + $0x84] sm:$0xf0]  ;;  %v7618_v39 = vld [vmem:[%s11114_s0 + $0x88] sm:$0xf0] }
 0x22b   : > { %6838 = vmatpush.bf16.msra.mxu1 %v8966_v13  ;;  %v7617_v44 = vor.u32 %v8907_v37, %v7616_v36  ;;  %v7621_v45 = vor.u32 %v8891_v38, %v7618_v39  ;;  %v9001_v46 = vld [vmem:[%s10403_s5 + $0x178] sm:$0xff]  ;;  %v9008_v48 = vld [vmem:[%s10403_s5 + $0x1b0] sm:$0xff]  ;;  %v9007_v52 = vld [vmem:[%s10403_s5 + $0x1a8] sm:$0xff] }
 0x22c   : > { %6857 = vmatpush.bf16.msra.mxu2 %v8974_v14  ;;  %v9017_v47 = vld [vmem:[%s10403_s5 + $0x1f8] sm:$0xff]  ;;  %v8992_v49 = vld [vmem:[%s10403_s5 + $0x130] sm:$0xff]  ;;  %v8991_v53 = vld [vmem:[%s10403_s5 + $0x128] sm:$0xff] }
 0x22d   : > { %6876 = vmatpush.bf16.msra.mxu3 %v8982_v15  ;;  %v9000_v50 = vld [vmem:[%s10403_s5 + $0x170] sm:$0xff]  ;;  %v8999_v54 = vld [vmem:[%s10403_s5 + $0x168] sm:$0xff]  ;;  %v9006_v56 = vld [vmem:[%s10403_s5 + $0x1a0] sm:$0xff] }
 0x22e   : > { %6820 = vmatpush.bf16.msra.mxu0 %v8957_v16  ;;  %v9016_v51 = vld [vmem:[%s10403_s5 + $0x1f0] sm:$0xff]  ;;  %v9015_v55 = vld [vmem:[%s10403_s5 + $0x1e8] sm:$0xff]  ;;  %v8990_v57 = vld [vmem:[%s10403_s5 + $0x120] sm:$0xff] }
 0x22f   : > { %6839 = vmatpush.bf16.msra.mxu1 %v8965_v17  ;;  %v8998_v58 = vld [vmem:[%s10403_s5 + $0x160] sm:$0xff]  ;;  %v7744_v0 = vld [vmem:[%s11114_s0 + $0x108] sm:$0xf]  ;;  %v8923_v2 = vld [vmem:[%s11114_s0 + $0x10c] sm:$0xf] }
 0x230   : > { %6858 = vmatpush.bf16.msra.mxu2 %v8973_v18  ;;  %v9014_v59 = vld [vmem:[%s10403_s5 + $0x1e0] sm:$0xff]  ;;  %v8939_v1 = vld [vmem:[%s11114_s0 + $0x184] sm:$0xf0]  ;;  %v7746_v3 = vld [vmem:[%s11114_s0 + $0x188] sm:$0xf0] }
 0x231   : > { %6877 = vmatpush.bf16.msra.mxu3 %v8981_v19  ;;  %v7736_v60 = vld [vmem:[%s11114_s0 + $0x100] sm:$0xf]  ;;  %v8922_v62 = vld [vmem:[%s11114_s0 + $0x104] sm:$0xf]  ;;  %v9005_v4 = vld [vmem:[%s10403_s5 + $0x198] sm:$0xff]  ;;  %v7745_v8 = vor.u32 %v8939_v1, %v7744_v0  ;;  %v7749_v9 = vor.u32 %v8923_v2, %v7746_v3 }
 0x232   : > { %6821 = vmatpush.bf16.msra.mxu0 %v8956_v20  ;;  %v8938_v61 = vld [vmem:[%s11114_s0 + $0x17c] sm:$0xf0]  ;;  %v7738_v63 = vld [vmem:[%s11114_s0 + $0x180] sm:$0xf0]  ;;  %v8989_v5 = vld [vmem:[%s10403_s5 + $0x118] sm:$0xff] }
 0x233   : > { %6840 = vmatpush.bf16.msra.mxu1 %v8964_v21  ;;  %v7737_v6 = vor.u32 %v8938_v61, %v7736_v60  ;;  %v7741_v7 = vor.u32 %v8922_v62, %v7738_v63  ;;  %v8997_v10 = vld [vmem:[%s10403_s5 + $0x158] sm:$0xff]  ;;  %v9004_v12 = vld [vmem:[%s10403_s5 + $0x190] sm:$0xff]  ;;  %v9003_v16 = vld [vmem:[%s10403_s5 + $0x188] sm:$0xff] }
 0x234   : > { %6859 = vmatpush.bf16.msra.mxu2 %v8972_v22  ;;  %v9013_v11 = vld [vmem:[%s10403_s5 + $0x1d8] sm:$0xff]  ;;  %v8988_v13 = vld [vmem:[%s10403_s5 + $0x110] sm:$0xff]  ;;  %v8987_v17 = vld [vmem:[%s10403_s5 + $0x108] sm:$0xff] }
 0x235   : > { %6878 = vmatpush.bf16.msra.mxu3 %v8980_v23  ;;  %v8996_v14 = vld [vmem:[%s10403_s5 + $0x150] sm:$0xff]  ;;  %v8995_v18 = vld [vmem:[%s10403_s5 + $0x148] sm:$0xff]  ;;  %v9002_v20 = vld [vmem:[%s10403_s5 + $0x180] sm:$0xff] }
 0x236   : > { %6822 = vmatpush.bf16.msra.mxu0 %v8955_v24  ;;  %v9012_v15 = vld [vmem:[%s10403_s5 + $0x1d0] sm:$0xff]  ;;  %v9011_v19 = vld [vmem:[%s10403_s5 + $0x1c8] sm:$0xff]  ;;  %v8986_v21 = vld [vmem:[%s10403_s5 + $0x100] sm:$0xff] }
 0x237   : > { %6841 = vmatpush.bf16.msra.mxu1 %v8963_v25  ;;  %v8994_v22 = vld [vmem:[%s10403_s5 + $0x140] sm:$0xff]  ;;  %v7624_v24 = vld [vmem:[%s11114_s0 + $0x10] sm:$0xf]  ;;  %v9041_v25 = vld [vmem:[%s10403_s5 + $0x2b8] sm:$0xff] }
 0x238   : > { %6860 = vmatpush.bf16.msra.mxu2 %v8971_v26  ;;  %v9010_v23 = vld [vmem:[%s10403_s5 + $0x1c0] sm:$0xff]  ;;  %v9025_v26 = vld [vmem:[%s10403_s5 + $0x238] sm:$0xff]  ;;  %v7626_v29 = vld [vmem:[%s11114_s0 + $0x90] sm:$0xf0] }
 0x239   : > { %6879 = vmatpush.bf16.msra.mxu3 %v8979_v27  ;;  %v8908_v27 = vld [vmem:[%s11114_s0 + $0x8c] sm:$0xf0]  ;;  %v7632_v30 = vld [vmem:[%s11114_s0 + $0x18] sm:$0xf]  ;;  %v7762_v61 = vld [vmem:[%s11114_s0 + $0x198] sm:$0xf0] }
 0x23a   : > { %6823 = vmatpush.bf16.msra.mxu0 %v8954_v28  ;;  %v8892_v28 = vld [vmem:[%s11114_s0 + $0x14] sm:$0xf]  ;;  %v9033_v34 = vld [vmem:[%s10403_s5 + $0x278] sm:$0xff]  ;;  %v7625_v36 = vor.u32 %v8908_v27, %v7624_v24  ;;  %v7642_v24 = vld [vmem:[%s11114_s0 + $0xa0] sm:$0xf0] }
 0x23b   : > { %6842 = vmatpush.bf16.msra.mxu1 %v8962_v31  ;;  %v8909_v31 = vld [vmem:[%s11114_s0 + $0x94] sm:$0xf0]  ;;  %v9040_v37 = vld [vmem:[%s10403_s5 + $0x2b0] sm:$0xff]  ;;  %v7629_v38 = vor.u32 %v8892_v28, %v7626_v29  ;;  %v8895_v27 = vld [vmem:[%s11114_s0 + $0x2c] sm:$0xf] }
 0x23c   : > { %6861 = vmatpush.bf16.msra.mxu2 %v8970_v32  ;;  %v8893_v32 = vld [vmem:[%s11114_s0 + $0x1c] sm:$0xf]  ;;  %v7633_v39 = vor.u32 %v8909_v31, %v7632_v30  ;;  %v9036_v1 = vld [vmem:[%s10403_s5 + $0x290] sm:$0xff]  ;;  %v7650_v28 = vld [vmem:[%s11114_s0 + $0xa8] sm:$0xf0] }
 0x23d   : > { %6880 = vmatpush.bf16.msra.mxu3 %v8978_v33  ;;  %6824 = vmatmul.bf16.vlgmr.msra.gmra.mxu0 %v7609_v42  ;;  %v7634_v33 = vld [vmem:[%s11114_s0 + $0x98] sm:$0xf0]  ;;  %v9032_v42 = vld [vmem:[%s10403_s5 + $0x270] sm:$0xff] }
 0x23e   : > { %6892 = vmatpush.bf16.msrb.mxu0 %v8993_v41  ;;  %6843 = vmatmul.bf16.vlgmr.msra.gmra.mxu1 %v7613_v43  ;;  %v9049_v35 = vld [vmem:[%s10403_s5 + $0x2f8] sm:$0xff]  ;;  %v9024_v41 = vld [vmem:[%s10403_s5 + $0x230] sm:$0xff] }
 0x23f   : > { %6862 = vmatmul.bf16.vlgmr.msra.gmra.mxu2 %v7617_v44  ;;  %6911 = vmatpush.bf16.msrb.mxu1 %v9001_v46  ;;  %v9048_v43 = vld [vmem:[%s10403_s5 + $0x2f0] sm:$0xff]  ;;  %v9039_v44 = vld [vmem:[%s10403_s5 + $0x2a8] sm:$0xff]  ;;  %v9021_v60 = vld [vmem:[%s10403_s5 + $0x218] sm:$0xff] }
 0x240   : > { %6930 = vmatpush.bf16.msrb.mxu2 %v9009_v40  ;;  %6881 = vmatmul.bf16.vlgmr.msra.gmra.mxu3 %v7621_v45  ;;  %v7637_v40 = vor.u32 %v8893_v32, %v7634_v33  ;;  %v9023_v45 = vld [vmem:[%s10403_s5 + $0x228] sm:$0xff]  ;;  %v9029_v62 = vld [vmem:[%s10403_s5 + $0x258] sm:$0xff]  ;;  %v9064_v30 = vld [vmem:[%s10403_s5 + $0x370] sm:$0xff]  ;;  %v7653_v33 = vor.u32 %v8895_v27, %v7650_v28 }
 0x241   : > { %6949 = vmatpush.bf16.msrb.mxu3 %v9017_v47  ;;  %v9031_v46 = vld [vmem:[%s10403_s5 + $0x268] sm:$0xff]  ;;  %v9045_v63 = vld [vmem:[%s10403_s5 + $0x2d8] sm:$0xff] }
 0x242   : > { %6893 = vmatpush.bf16.msrb.mxu0 %v8992_v49  ;;  %v9047_v47 = vld [vmem:[%s10403_s5 + $0x2e8] sm:$0xff]  ;;  %v9022_v49 = vld [vmem:[%s10403_s5 + $0x220] sm:$0xff] }
 0x243   : > { %6912 = vmatpush.bf16.msrb.mxu1 %v9000_v50  ;;  %v9030_v50 = vld [vmem:[%s10403_s5 + $0x260] sm:$0xff]  ;;  %v9103_v28 = vld [vmem:[%s10403_s5 + $0x4a8] sm:$0xff] }
 0x244   : > { %6931 = vmatpush.bf16.msrb.mxu2 %v9008_v48  ;;  %v9038_v48 = vld [vmem:[%s10403_s5 + $0x2a0] sm:$0xff] }
 0x245   : > { %6950 = vmatpush.bf16.msrb.mxu3 %v9016_v51  ;;  %v9046_v51 = vld [vmem:[%s10403_s5 + $0x2e0] sm:$0xff] }
 0x246   : > { %6894 = vmatpush.bf16.msrb.mxu0 %v8991_v53  ;;  %v8940_v53 = vld [vmem:[%s11114_s0 + $0x18c] sm:$0xf0] }
 0x247   : > { %6913 = vmatpush.bf16.msrb.mxu1 %v8999_v54  ;;  %v9037_v54 = vld [vmem:[%s10403_s5 + $0x298] sm:$0xff] }
 0x248   : > { %6932 = vmatpush.bf16.msrb.mxu2 %v9007_v52  ;;  %v7752_v52 = vld [vmem:[%s11114_s0 + $0x110] sm:$0xf] }
 0x249   : > { %6951 = vmatpush.bf16.msrb.mxu3 %v9015_v55  ;;  %v8924_v55 = vld [vmem:[%s11114_s0 + $0x114] sm:$0xf]  ;;  %v7753_v0 = vor.u32 %v8940_v53, %v7752_v52  ;;  %v8927_v52 = vld [vmem:[%s11114_s0 + $0x12c] sm:$0xf]  ;;  %v9053_v53 = vld [vmem:[%s10403_s5 + $0x318] sm:$0xff] }
 0x24a   : > { %6895 = vmatpush.bf16.msrb.mxu0 %v8990_v57  ;;  %v7760_v57 = vld [vmem:[%s11114_s0 + $0x118] sm:$0xf] }
 0x24b   : > { %6914 = vmatpush.bf16.msrb.mxu1 %v8998_v58  ;;  %v8941_v58 = vld [vmem:[%s11114_s0 + $0x194] sm:$0xf0] }
 0x24c   : > { %6933 = vmatpush.bf16.msrb.mxu2 %v9006_v56  ;;  %v7754_v56 = vld [vmem:[%s11114_s0 + $0x190] sm:$0xf0]  ;;  %v7761_v3 = vor.u32 %v8941_v58, %v7760_v57 }
 0x24d   : > { %6952 = vmatpush.bf16.msrb.mxu3 %v9014_v59  ;;  %6829 = vmatmul.bf16.gmra.mxu0 %v7737_v6  ;;  %v8925_v59 = vld [vmem:[%s11114_s0 + $0x11c] sm:$0xf]  ;;  %v7757_v2 = vor.u32 %v8924_v55, %v7754_v56  ;;  %v9028_v6 = vld [vmem:[%s10403_s5 + $0x250] sm:$0xff] }
 0x24e   : > { %6896 = vmatpush.bf16.msrb.mxu0 %v8989_v5  ;;  %6848 = vmatmul.bf16.gmra.mxu1 %v7741_v7  ;;  %v9020_v5 = vld [vmem:[%s10403_s5 + $0x210] sm:$0xff]  ;;  %v9077_v55 = vld [vmem:[%s10403_s5 + $0x3d8] sm:$0xff] }
 0x24f   : > { %6867 = vmatmul.bf16.gmra.mxu2 %v7745_v8  ;;  %6915 = vmatpush.bf16.msrb.mxu1 %v8997_v10  ;;  %v9044_v7 = vld [vmem:[%s10403_s5 + $0x2d0] sm:$0xff]  ;;  %v9035_v8 = vld [vmem:[%s10403_s5 + $0x288] sm:$0xff] }
 0x250   : > { %6934 = vmatpush.bf16.msrb.mxu2 %v9005_v4  ;;  %6886 = vmatmul.bf16.gmra.mxu3 %v7749_v9  ;;  %v7765_v4 = vor.u32 %v8925_v59, %v7762_v61  ;;  %v9019_v9 = vld [vmem:[%s10403_s5 + $0x208] sm:$0xff]  ;;  %v9068_v56 = vld [vmem:[%s10403_s5 + $0x390] sm:$0xff] }
 0x251   : > { %6953 = vmatpush.bf16.msrb.mxu3 %v9013_v11  ;;  %v9027_v10 = vld [vmem:[%s10403_s5 + $0x248] sm:$0xff]  ;;  %v9060_v58 = vld [vmem:[%s10403_s5 + $0x350] sm:$0xff] }
 0x252   : > { %6897 = vmatpush.bf16.msrb.mxu0 %v8988_v13  ;;  %v9043_v11 = vld [vmem:[%s10403_s5 + $0x2c8] sm:$0xff]  ;;  %v9073_v13 = vld [vmem:[%s10403_s5 + $0x3b8] sm:$0xff] }
 0x253   : > { %6916 = vmatpush.bf16.msrb.mxu1 %v8996_v14  ;;  %v9018_v14 = vld [vmem:[%s10403_s5 + $0x200] sm:$0xff] }
 0x254   : > { %6935 = vmatpush.bf16.msrb.mxu2 %v9004_v12  ;;  %v9034_v12 = vld [vmem:[%s10403_s5 + $0x280] sm:$0xff] }
 0x255   : > { %6954 = vmatpush.bf16.msrb.mxu3 %v9012_v15  ;;  %v9026_v15 = vld [vmem:[%s10403_s5 + $0x240] sm:$0xff] }
 0x256   : > { %6898 = vmatpush.bf16.msrb.mxu0 %v8987_v17  ;;  %v7640_v17 = vld [vmem:[%s11114_s0 + $0x20] sm:$0xf] }
 0x257   : > { %6917 = vmatpush.bf16.msrb.mxu1 %v8995_v18  ;;  %v8910_v18 = vld [vmem:[%s11114_s0 + $0x9c] sm:$0xf0] }
 0x258   : > { %6936 = vmatpush.bf16.msrb.mxu2 %v9003_v16  ;;  %v9042_v16 = vld [vmem:[%s10403_s5 + $0x2c0] sm:$0xff]  ;;  %v7641_v29 = vor.u32 %v8910_v18, %v7640_v17  ;;  %v7658_v17 = vld [vmem:[%s11114_s0 + $0xb0] sm:$0xf0]  ;;  %v7664_v18 = vld [vmem:[%s11114_s0 + $0x38] sm:$0xf] }
 0x259   : > { %6955 = vmatpush.bf16.msrb.mxu3 %v9011_v19  ;;  %v9057_v19 = vld [vmem:[%s10403_s5 + $0x338] sm:$0xff] }
 0x25a   : > { %6899 = vmatpush.bf16.msrb.mxu0 %v8986_v21  ;;  %v8894_v21 = vld [vmem:[%s11114_s0 + $0x24] sm:$0xf] }
 0x25b   : > { %6918 = vmatpush.bf16.msrb.mxu1 %v8994_v22  ;;  %v9081_v22 = vld [vmem:[%s10403_s5 + $0x3f8] sm:$0xff]  ;;  %v7645_v31 = vor.u32 %v8894_v21, %v7642_v24  ;;  %v9112_v24 = vld [vmem:[%s10403_s5 + $0x4f0] sm:$0xff] }
 0x25c   : > { %6937 = vmatpush.bf16.msrb.mxu2 %v9002_v20  ;;  %v9065_v20 = vld [vmem:[%s10403_s5 + $0x378] sm:$0xff] }
 0x25d   : > { %6956 = vmatpush.bf16.msrb.mxu3 %v9010_v23  ;;  %6900 = vmatmul.bf16.vlgmr.msrb.gmra.mxu0 %v7625_v36  ;;  %v9072_v23 = vld [vmem:[%s10403_s5 + $0x3b0] sm:$0xff]  ;;  %v9071_v36 = vld [vmem:[%s10403_s5 + $0x3a8] sm:$0xff]  ;;  %v7666_v21 = vld [vmem:[%s11114_s0 + $0xb8] sm:$0xf0] }
 0x25e   : > { %6968 = vmatpush.bf16.msra.mxu0 %v9025_v26  ;;  %6919 = vmatmul.bf16.vlgmr.msrb.gmra.mxu1 %v7629_v38  ;;  %v8911_v26 = vld [vmem:[%s11114_s0 + $0xa4] sm:$0xf0] }
 0x25f   : > { %6987 = vmatpush.bf16.msra.mxu1 %v9033_v34  ;;  %6938 = vmatmul.bf16.vlgmr.msrb.gmra.mxu2 %v7633_v39  ;;  %v9056_v34 = vld [vmem:[%s10403_s5 + $0x330] sm:$0xff]  ;;  %v9055_v38 = vld [vmem:[%s10403_s5 + $0x328] sm:$0xff] }
 0x260   : > { %7006 = vmatpush.bf16.msra.mxu2 %v9041_v25  ;;  %6957 = vmatmul.bf16.vlgmr.msrb.gmra.mxu3 %v7637_v40  ;;  %v7648_v25 = vld [vmem:[%s11114_s0 + $0x28] sm:$0xf]  ;;  %v9070_v40 = vld [vmem:[%s10403_s5 + $0x3a0] sm:$0xff] }
 0x261   : > { %7025 = vmatpush.bf16.msra.mxu3 %v9049_v35  ;;  %v7649_v32 = vor.u32 %v8911_v26, %v7648_v25  ;;  %v9080_v35 = vld [vmem:[%s10403_s5 + $0x3f0] sm:$0xff]  ;;  %v9079_v39 = vld [vmem:[%s10403_s5 + $0x3e8] sm:$0xff] }
 0x262   : > { %6969 = vmatpush.bf16.msra.mxu0 %v9024_v41  ;;  %v9062_v41 = vld [vmem:[%s10403_s5 + $0x360] sm:$0xff] }
 0x263   : > { %6988 = vmatpush.bf16.msra.mxu1 %v9032_v42  ;;  %v9054_v42 = vld [vmem:[%s10403_s5 + $0x320] sm:$0xff] }
 0x264   : > { %7007 = vmatpush.bf16.msra.mxu2 %v9040_v37  ;;  %v9063_v37 = vld [vmem:[%s10403_s5 + $0x368] sm:$0xff] }
 0x265   : > { %7026 = vmatpush.bf16.msra.mxu3 %v9048_v43  ;;  %v9078_v43 = vld [vmem:[%s10403_s5 + $0x3e0] sm:$0xff] }
 0x266   : > { %6970 = vmatpush.bf16.msra.mxu0 %v9023_v45  ;;  %v7768_v45 = vld [vmem:[%s11114_s0 + $0x120] sm:$0xf] }
 0x267   : > { %6989 = vmatpush.bf16.msra.mxu1 %v9031_v46  ;;  %v8942_v46 = vld [vmem:[%s11114_s0 + $0x19c] sm:$0xf0] }
 0x268   : > { %7008 = vmatpush.bf16.msra.mxu2 %v9039_v44  ;;  %v9069_v44 = vld [vmem:[%s10403_s5 + $0x398] sm:$0xff]  ;;  %v7769_v57 = vor.u32 %v8942_v46, %v7768_v45 }
 0x269   : > { %7027 = vmatpush.bf16.msra.mxu3 %v9047_v47  ;;  %v9061_v47 = vld [vmem:[%s10403_s5 + $0x358] sm:$0xff] }
 0x26a   : > { %6971 = vmatpush.bf16.msra.mxu0 %v9022_v49  ;;  %v7770_v49 = vld [vmem:[%s11114_s0 + $0x1a0] sm:$0xf0]  ;;  %v8945_v45 = vld [vmem:[%s11114_s0 + $0x1b4] sm:$0xf0]  ;;  %v8929_v46 = vld [vmem:[%s11114_s0 + $0x13c] sm:$0xf] }
 0x26b   : > { %6990 = vmatpush.bf16.msra.mxu1 %v9030_v50  ;;  %v7776_v50 = vld [vmem:[%s11114_s0 + $0x128] sm:$0xf] }
 0x26c   : > { %7009 = vmatpush.bf16.msra.mxu2 %v9038_v48  ;;  %v8926_v48 = vld [vmem:[%s11114_s0 + $0x124] sm:$0xf] }
 0x26d   : > { %7028 = vmatpush.bf16.msra.mxu3 %v9046_v51  ;;  %6905 = vmatmul.bf16.gmra.mxu0 %v7753_v0  ;;  %v8943_v51 = vld [vmem:[%s11114_s0 + $0x1a4] sm:$0xf0]  ;;  %v7773_v59 = vor.u32 %v8926_v48, %v7770_v49  ;;  %v7794_v48 = vld [vmem:[%s11114_s0 + $0x1b8] sm:$0xf0]  ;;  %v9084_v49 = vld [vmem:[%s10403_s5 + $0x410] sm:$0xff] }
 0x26e   : > { %6972 = vmatpush.bf16.msra.mxu0 %v9021_v60  ;;  %6924 = vmatmul.bf16.gmra.mxu1 %v7757_v2  ;;  %v7777_v60 = vor.u32 %v8943_v51, %v7776_v50  ;;  %v9067_v0 = vld [vmem:[%s10403_s5 + $0x388] sm:$0xff]  ;;  %v9092_v50 = vld [vmem:[%s10403_s5 + $0x450] sm:$0xff] }
 0x26f   : > { %6991 = vmatpush.bf16.msra.mxu1 %v9029_v62  ;;  %6943 = vmatmul.bf16.gmra.mxu2 %v7761_v3  ;;  %v9052_v62 = vld [vmem:[%s10403_s5 + $0x310] sm:$0xff]  ;;  %v9051_v2 = vld [vmem:[%s10403_s5 + $0x308] sm:$0xff] }
 0x270   : > { %7010 = vmatpush.bf16.msra.mxu2 %v9037_v54  ;;  %6962 = vmatmul.bf16.gmra.mxu3 %v7765_v4  ;;  %v7778_v54 = vld [vmem:[%s11114_s0 + $0x1a8] sm:$0xf0]  ;;  %v9066_v4 = vld [vmem:[%s10403_s5 + $0x380] sm:$0xff] }
 0x271   : > { %7029 = vmatpush.bf16.msra.mxu3 %v9045_v63  ;;  %v7781_v61 = vor.u32 %v8927_v52, %v7778_v54  ;;  %v9076_v63 = vld [vmem:[%s10403_s5 + $0x3d0] sm:$0xff]  ;;  %v9075_v3 = vld [vmem:[%s10403_s5 + $0x3c8] sm:$0xff] }
 0x272   : > { %6973 = vmatpush.bf16.msra.mxu0 %v9020_v5  ;;  %v9058_v5 = vld [vmem:[%s10403_s5 + $0x340] sm:$0xff]  ;;  %v9108_v52 = vld [vmem:[%s10403_s5 + $0x4d0] sm:$0xff] }
 0x273   : > { %6992 = vmatpush.bf16.msra.mxu1 %v9028_v6  ;;  %v9105_v6 = vld [vmem:[%s10403_s5 + $0x4b8] sm:$0xff] }
 0x274   : > { %7011 = vmatpush.bf16.msra.mxu2 %v9036_v1  ;;  %v9059_v1 = vld [vmem:[%s10403_s5 + $0x348] sm:$0xff] }
 0x275   : > { %7030 = vmatpush.bf16.msra.mxu3 %v9044_v7  ;;  %v9097_v7 = vld [vmem:[%s10403_s5 + $0x478] sm:$0xff] }
 0x276   : > { %6974 = vmatpush.bf16.msra.mxu0 %v9019_v9  ;;  %v9074_v9 = vld [vmem:[%s10403_s5 + $0x3c0] sm:$0xff] }
 0x277   : > { %6993 = vmatpush.bf16.msra.mxu1 %v9027_v10  ;;  %v9089_v10 = vld [vmem:[%s10403_s5 + $0x438] sm:$0xff] }
 0x278   : > { %7012 = vmatpush.bf16.msra.mxu2 %v9035_v8  ;;  %v9050_v8 = vld [vmem:[%s10403_s5 + $0x300] sm:$0xff] }
 0x279   : > { %7031 = vmatpush.bf16.msra.mxu3 %v9043_v11  ;;  %v7656_v11 = vld [vmem:[%s11114_s0 + $0x30] sm:$0xf] }
 0x27a   : > { %6975 = vmatpush.bf16.msra.mxu0 %v9018_v14  ;;  %v8912_v14 = vld [vmem:[%s11114_s0 + $0xac] sm:$0xf0] }
 0x27b   : > { %6994 = vmatpush.bf16.msra.mxu1 %v9026_v15  ;;  %v8896_v15 = vld [vmem:[%s11114_s0 + $0x34] sm:$0xf] }
 0x27c   : > { %7013 = vmatpush.bf16.msra.mxu2 %v9034_v12  ;;  %v9113_v12 = vld [vmem:[%s10403_s5 + $0x4f8] sm:$0xff]  ;;  %v7661_v25 = vor.u32 %v8896_v15, %v7658_v17  ;;  %v8899_v15 = vld [vmem:[%s11114_s0 + $0x4c] sm:$0xf] }
 0x27d   : > { %7032 = vmatpush.bf16.msra.mxu3 %v9042_v16  ;;  %6976 = vmatmul.bf16.vlgmr.msra.gmra.mxu0 %v7641_v29  ;;  %v9096_v16 = vld [vmem:[%s10403_s5 + $0x470] sm:$0xff]  ;;  %v9087_v29 = vld [vmem:[%s10403_s5 + $0x428] sm:$0xff] }
 0x27e   : > { %7044 = vmatpush.bf16.msrb.mxu0 %v9057_v19  ;;  %6995 = vmatmul.bf16.vlgmr.msra.gmra.mxu1 %v7645_v31  ;;  %v8913_v19 = vld [vmem:[%s11114_s0 + $0xb4] sm:$0xf0]  ;;  %v9111_v31 = vld [vmem:[%s10403_s5 + $0x4e8] sm:$0xff] }
 0x27f   : > { %7063 = vmatpush.bf16.msrb.mxu1 %v9065_v20  ;;  %7014 = vmatmul.bf16.vlgmr.msra.gmra.mxu2 %v7649_v32  ;;  %v8897_v20 = vld [vmem:[%s11114_s0 + $0x3c] sm:$0xf]  ;;  %v7665_v26 = vor.u32 %v8913_v19, %v7664_v18  ;;  %v9102_v32 = vld [vmem:[%s10403_s5 + $0x4a0] sm:$0xff]  ;;  %v9135_v18 = vld [vmem:[%s10403_s5 + $0x5a8] sm:$0xff] }
 0x280   : > { %7082 = vmatpush.bf16.msrb.mxu2 %v9073_v13  ;;  %7033 = vmatmul.bf16.vlgmr.msra.gmra.mxu3 %v7653_v33  ;;  %v9104_v13 = vld [vmem:[%s10403_s5 + $0x4b0] sm:$0xff]  ;;  %v7669_v27 = vor.u32 %v8897_v20, %v7666_v21  ;;  %v9086_v33 = vld [vmem:[%s10403_s5 + $0x420] sm:$0xff] }
 0x281   : > { %7101 = vmatpush.bf16.msrb.mxu3 %v9081_v22  ;;  %v9088_v22 = vld [vmem:[%s10403_s5 + $0x430] sm:$0xff] }
 0x282   : > { %7045 = vmatpush.bf16.msrb.mxu0 %v9056_v34  ;;  %v9094_v34 = vld [vmem:[%s10403_s5 + $0x460] sm:$0xff] }
 0x283   : > { %7064 = vmatpush.bf16.msrb.mxu1 %v9064_v30  ;;  %v9095_v30 = vld [vmem:[%s10403_s5 + $0x468] sm:$0xff] }
 0x284   : > { %7083 = vmatpush.bf16.msrb.mxu2 %v9072_v23  ;;  %v7657_v23 = vor.u32 %v8912_v14, %v7656_v11  ;;  %v9128_v11 = vld [vmem:[%s10403_s5 + $0x570] sm:$0xff] }
 0x285   : > { %7102 = vmatpush.bf16.msrb.mxu3 %v9080_v35  ;;  %v9110_v35 = vld [vmem:[%s10403_s5 + $0x4e0] sm:$0xff]  ;;  %v9144_v14 = vld [vmem:[%s10403_s5 + $0x5f0] sm:$0xff] }
 0x286   : > { %7046 = vmatpush.bf16.msrb.mxu0 %v9055_v38  ;;  %v9093_v38 = vld [vmem:[%s10403_s5 + $0x458] sm:$0xff] }
 0x287   : > { %7065 = vmatpush.bf16.msrb.mxu1 %v9063_v37  ;;  %v9085_v37 = vld [vmem:[%s10403_s5 + $0x418] sm:$0xff] }
 0x288   : > { %7084 = vmatpush.bf16.msrb.mxu2 %v9071_v36  ;;  %v9101_v36 = vld [vmem:[%s10403_s5 + $0x498] sm:$0xff] }
 0x289   : > { %7103 = vmatpush.bf16.msrb.mxu3 %v9079_v39  ;;  %v7784_v39 = vld [vmem:[%s11114_s0 + $0x130] sm:$0xf] }
 0x28a   : > { %7047 = vmatpush.bf16.msrb.mxu0 %v9054_v42  ;;  %v8928_v42 = vld [vmem:[%s11114_s0 + $0x134] sm:$0xf] }
 0x28b   : > { %7066 = vmatpush.bf16.msrb.mxu1 %v9062_v41  ;;  %v9109_v41 = vld [vmem:[%s10403_s5 + $0x4d8] sm:$0xff] }
 0x28c   : > { %7085 = vmatpush.bf16.msrb.mxu2 %v9070_v40  ;;  %v8944_v40 = vld [vmem:[%s11114_s0 + $0x1ac] sm:$0xf0] }
 0x28d   : > { %7104 = vmatpush.bf16.msrb.mxu3 %v9078_v43  ;;  %6981 = vmatmul.bf16.gmra.mxu0 %v7769_v57  ;;  %v7786_v43 = vld [vmem:[%s11114_s0 + $0x1b0] sm:$0xf0]  ;;  %v7785_v51 = vor.u32 %v8944_v40, %v7784_v39  ;;  %v9083_v57 = vld [vmem:[%s10403_s5 + $0x408] sm:$0xff]  ;;  %v9117_v40 = vld [vmem:[%s10403_s5 + $0x518] sm:$0xff] }
 0x28e   : > { %7048 = vmatpush.bf16.msrb.mxu0 %v9053_v53  ;;  %7000 = vmatmul.bf16.gmra.mxu1 %v7773_v59  ;;  %v7789_v53 = vor.u32 %v8928_v42, %v7786_v43  ;;  %v9107_v59 = vld [vmem:[%s10403_s5 + $0x4c8] sm:$0xff]  ;;  %v9125_v42 = vld [vmem:[%s10403_s5 + $0x558] sm:$0xff] }
 0x28f   : > { %7067 = vmatpush.bf16.msrb.mxu1 %v9061_v47  ;;  %7019 = vmatmul.bf16.gmra.mxu2 %v7777_v60  ;;  %v9100_v47 = vld [vmem:[%s10403_s5 + $0x490] sm:$0xff]  ;;  %v9098_v60 = vld [vmem:[%s10403_s5 + $0x480] sm:$0xff]  ;;  %v9141_v43 = vld [vmem:[%s10403_s5 + $0x5d8] sm:$0xff] }
 0x290   : > { %7086 = vmatpush.bf16.msrb.mxu2 %v9069_v44  ;;  %7038 = vmatmul.bf16.gmra.mxu3 %v7781_v61  ;;  %v7792_v44 = vld [vmem:[%s11114_s0 + $0x138] sm:$0xf]  ;;  %v9082_v61 = vld [vmem:[%s10403_s5 + $0x400] sm:$0xff] }
 0x291   : > { %7105 = vmatpush.bf16.msrb.mxu3 %v9077_v55  ;;  %v7793_v54 = vor.u32 %v8945_v45, %v7792_v44  ;;  %v7797_v55 = vor.u32 %v8929_v46, %v7794_v48  ;;  %v7800_v45 = vld [vmem:[%s11114_s0 + $0x140] sm:$0xf]  ;;  %v8930_v48 = vld [vmem:[%s11114_s0 + $0x144] sm:$0xf] }
 0x292   : > { %7049 = vmatpush.bf16.msrb.mxu0 %v9052_v62  ;;  %v9090_v62 = vld [vmem:[%s10403_s5 + $0x440] sm:$0xff] }
 0x293   : > { %7068 = vmatpush.bf16.msrb.mxu1 %v9060_v58  ;;  %v9091_v58 = vld [vmem:[%s10403_s5 + $0x448] sm:$0xff]  ;;  %v8946_v46 = vld [vmem:[%s11114_s0 + $0x1bc] sm:$0xf0] }
 0x294   : > { %7087 = vmatpush.bf16.msrb.mxu2 %v9068_v56  ;;  %v9099_v56 = vld [vmem:[%s10403_s5 + $0x488] sm:$0xff] }
 0x295   : > { %7106 = vmatpush.bf16.msrb.mxu3 %v9076_v63  ;;  %v9106_v63 = vld [vmem:[%s10403_s5 + $0x4c0] sm:$0xff] }
 0x296   : > { %7050 = vmatpush.bf16.msrb.mxu0 %v9051_v2  ;;  %v9129_v2 = vld [vmem:[%s10403_s5 + $0x578] sm:$0xff] }
 0x297   : > { %7069 = vmatpush.bf16.msrb.mxu1 %v9059_v1  ;;  %v9121_v1 = vld [vmem:[%s10403_s5 + $0x538] sm:$0xff] }
 0x298   : > { %7088 = vmatpush.bf16.msrb.mxu2 %v9067_v0  ;;  %v9137_v0 = vld [vmem:[%s10403_s5 + $0x5b8] sm:$0xff] }
 0x299   : > { %7107 = vmatpush.bf16.msrb.mxu3 %v9075_v3  ;;  %v9145_v3 = vld [vmem:[%s10403_s5 + $0x5f8] sm:$0xff] }
 0x29a   : > { %7051 = vmatpush.bf16.msrb.mxu0 %v9050_v8  ;;  %v9136_v8 = vld [vmem:[%s10403_s5 + $0x5b0] sm:$0xff] }
 0x29b   : > { %7070 = vmatpush.bf16.msrb.mxu1 %v9058_v5  ;;  %v10777_v5 = vld [vmem:[%s4378_s8] ss:$0 sm:$0xff] }
 0x29c   : > { %7089 = vmatpush.bf16.msrb.mxu2 %v9066_v4  ;;  %v7672_v4 = vld [vmem:[%s11114_s0 + $0x40] sm:$0xf] }
 0x29d   : > { %7108 = vmatpush.bf16.msrb.mxu3 %v9074_v9  ;;  %7052 = vmatmul.bf16.vlgmr.msrb.gmra.mxu0 %v7657_v23  ;;  %v7674_v9 = vld [vmem:[%s11114_s0 + $0xc0] sm:$0xf0] }
 0x29e   : > { %7120 = vmatpush.bf16.msra.mxu0 %v9089_v10  ;;  %7071 = vmatmul.bf16.vlgmr.msrb.gmra.mxu1 %v7661_v25  ;;  %v9120_v10 = vld [vmem:[%s10403_s5 + $0x530] sm:$0xff]  ;;  %v9119_v25 = vld [vmem:[%s10403_s5 + $0x528] sm:$0xff] }
 0x29f   : > { %7139 = vmatpush.bf16.msra.mxu1 %v9097_v7  ;;  %7090 = vmatmul.bf16.vlgmr.msrb.gmra.mxu2 %v7665_v26  ;;  %v8898_v7 = vld [vmem:[%s11114_s0 + $0x44] sm:$0xf]  ;;  %v9127_v26 = vld [vmem:[%s10403_s5 + $0x568] sm:$0xff] }
 0x2a0   : > { %7158 = vmatpush.bf16.msra.mxu2 %v9105_v6  ;;  %7109 = vmatmul.bf16.vlgmr.msrb.gmra.mxu3 %v7669_v27  ;;  %v8914_v6 = vld [vmem:[%s11114_s0 + $0xbc] sm:$0xf0]  ;;  %v7677_v21 = vor.u32 %v8898_v7, %v7674_v9  ;;  %v9143_v27 = vld [vmem:[%s10403_s5 + $0x5e8] sm:$0xff] }
 0x2a1   : > { %7177 = vmatpush.bf16.msra.mxu3 %v9113_v12  ;;  %v7680_v12 = vld [vmem:[%s11114_s0 + $0x48] sm:$0xf]  ;;  %v7673_v17 = vor.u32 %v8914_v6, %v7672_v4 }
 0x2a2   : > { %7121 = vmatpush.bf16.msra.mxu0 %v9088_v22  ;;  %v9115_v4 = vld [vmem:[%s10403_s5 + $0x508] sm:$0xff] }
 0x2a3   : > { %7140 = vmatpush.bf16.msra.mxu1 %v9096_v16  ;;  %v7682_v16 = vld [vmem:[%s11114_s0 + $0xc8] sm:$0xf0] }
 0x2a4   : > { %7159 = vmatpush.bf16.msra.mxu2 %v9104_v13  ;;  %v8915_v13 = vld [vmem:[%s11114_s0 + $0xc4] sm:$0xf0] }
 0x2a5   : > { %7178 = vmatpush.bf16.msra.mxu3 %v9112_v24  ;;  %v7681_v22 = vor.u32 %v8915_v13, %v7680_v12  ;;  %v7685_v24 = vor.u32 %v8899_v15, %v7682_v16  ;;  %v9123_v7 = vld [vmem:[%s10403_s5 + $0x548] sm:$0xff]  ;;  %v9114_v12 = vld [vmem:[%s10403_s5 + $0x500] sm:$0xff] }
 0x2a6   : > { %7122 = vmatpush.bf16.msra.mxu0 %v9087_v29  ;;  %v9134_v29 = vld [vmem:[%s10403_s5 + $0x5a0] sm:$0xff] }
 0x2a7   : > { %7141 = vmatpush.bf16.msra.mxu1 %v9095_v30  ;;  %v9118_v30 = vld [vmem:[%s10403_s5 + $0x520] sm:$0xff] }
 0x2a8   : > { %7160 = vmatpush.bf16.msra.mxu2 %v9103_v28  ;;  %v9122_v13 = vld [vmem:[%s10403_s5 + $0x540] sm:$0xff] }
 0x2a9   : > { %7179 = vmatpush.bf16.msra.mxu3 %v9111_v31  ;;  %v9126_v31 = vld [vmem:[%s10403_s5 + $0x560] sm:$0xff] }
 0x2aa   : > { %7123 = vmatpush.bf16.msra.mxu0 %v9086_v33 }
 0x2ab   : > { %7142 = vmatpush.bf16.msra.mxu1 %v9094_v34 }
 0x2ac   : > { %7161 = vmatpush.bf16.msra.mxu2 %v9102_v32  ;;  %v9142_v32 = vld [vmem:[%s10403_s5 + $0x5e0] sm:$0xff] }
 0x2ad   : > { %7180 = vmatpush.bf16.msra.mxu3 %v9110_v35  ;;  %7057 = vmatmul.bf16.gmra.mxu0 %v7785_v51  ;;  %v9133_v35 = vld [vmem:[%s10403_s5 + $0x598] sm:$0xff]  ;;  %v8947_v51 = vld [vmem:[%s11114_s0 + $0x1c4] sm:$0xf0] }
 0x2ae   : > { %7124 = vmatpush.bf16.msra.mxu0 %v9085_v37  ;;  %7076 = vmatmul.bf16.gmra.mxu1 %v7789_v53  ;;  %v9116_v53 = vld [vmem:[%s10403_s5 + $0x510] sm:$0xff] }
 0x2af   : > { %7143 = vmatpush.bf16.msra.mxu1 %v9093_v38  ;;  %7095 = vmatmul.bf16.gmra.mxu2 %v7793_v54  ;;  %v7810_v54 = vld [vmem:[%s11114_s0 + $0x1c8] sm:$0xf0] }
 0x2b0   : > { %7162 = vmatpush.bf16.msra.mxu2 %v9101_v36  ;;  %7114 = vmatmul.bf16.gmra.mxu3 %v7797_v55  ;;  %v9124_v55 = vld [vmem:[%s10403_s5 + $0x550] sm:$0xff] }
 0x2b1   : > { %7181 = vmatpush.bf16.msra.mxu3 %v9109_v41 }
 0x2b2   : > { %7125 = vmatpush.bf16.msra.mxu0 %v9084_v49  ;;  %v7802_v49 = vld [vmem:[%s11114_s0 + $0x1c0] sm:$0xf0] }
 0x2b3   : > { %7144 = vmatpush.bf16.msra.mxu1 %v9092_v50  ;;  %v7808_v50 = vld [vmem:[%s11114_s0 + $0x148] sm:$0xf] }
 0x2b4   : > { %7163 = vmatpush.bf16.msra.mxu2 %v9100_v47  ;;  %v9132_v47 = vld [vmem:[%s10403_s5 + $0x590] sm:$0xff] }
 0x2b5   : > { %7182 = vmatpush.bf16.msra.mxu3 %v9108_v52  ;;  %v8931_v52 = vld [vmem:[%s11114_s0 + $0x14c] sm:$0xf] }
 0x2b6   : > { %7126 = vmatpush.bf16.msra.mxu0 %v9083_v57 }
 0x2b7   : > { %7145 = vmatpush.bf16.msra.mxu1 %v9091_v58 }
 0x2b8   : > { %7164 = vmatpush.bf16.msra.mxu2 %v9099_v56  ;;  %v9140_v56 = vld [vmem:[%s10403_s5 + $0x5d0] sm:$0xff] }
 0x2b9   : > { %7183 = vmatpush.bf16.msra.mxu3 %v9107_v59  ;;  %v7801_v59 = vor.u32 %v8946_v46, %v7800_v45 }
 0x2ba   : > { %7127 = vmatpush.bf16.msra.mxu0 %v9082_v61  ;;  %v6825_v19 = vpop.f32.mrf.mxu0 }
 0x2bb   : > { %7146 = vmatpush.bf16.msra.mxu1 %v9090_v62  ;;  %v6844_v20 = vpop.f32.mrf.mxu1  ;;  %v6826_v23 = vadd.f32 %v10777_v5, %v6825_v19 }
 0x2bc   : > { %7165 = vmatpush.bf16.msra.mxu2 %v9098_v60  ;;  %v9131_v60 = vld [vmem:[%s10403_s5 + $0x588] sm:$0xff] }
 0x2bd   : > { %7184 = vmatpush.bf16.msra.mxu3 %v9106_v63  ;;  %v6845_v28 = vadd.f32 %v6844_v20, %v6826_v23  ;;  %7128 = vmatmul.bf16.vlgmr.msra.gmra.mxu0 %v7673_v17  ;;  %v9153_v17 = vld [vmem:[%s10403_s5 + $0x638] sm:$0xff]  ;;  %v9168_v23 = vld [vmem:[%s10403_s5 + $0x6b0] sm:$0xff] }
 0x2be   : > { %7196 = vmatpush.bf16.msrb.mxu0 %v9121_v1  ;;  %7147 = vmatmul.bf16.vlgmr.msra.gmra.mxu1 %v7677_v21  ;;  %v7809_v1 = vor.u32 %v8947_v51, %v7808_v50  ;;  %v9151_v50 = vld [vmem:[%s10403_s5 + $0x628] sm:$0xff] }
 0x2bf   : > { %7215 = vmatpush.bf16.msrb.mxu1 %v9129_v2  ;;  %7166 = vmatmul.bf16.vlgmr.msra.gmra.mxu2 %v7681_v22  ;;  %v9177_v22 = vld [vmem:[%s10403_s5 + $0x6f8] sm:$0xff] }
 0x2c0   : > { %7234 = vmatpush.bf16.msrb.mxu2 %v9137_v0  ;;  %7185 = vmatmul.bf16.vlgmr.msra.gmra.mxu3 %v7685_v24  ;;  %v7805_v0 = vor.u32 %v8930_v48, %v7802_v49 }
 0x2c1   : > { %7253 = vmatpush.bf16.msrb.mxu3 %v9145_v3  ;;  %v7813_v3 = vor.u32 %v8931_v52, %v7810_v54  ;;  %v9175_v52 = vld [vmem:[%s10403_s5 + $0x6e8] sm:$0xff] }
 0x2c2   : > { %7197 = vmatpush.bf16.msrb.mxu0 %v9120_v10  ;;  %v6863_v33 = vpop.f32.mrf.mxu2  ;;  %v6827_v37 = vpop.f32.mrf.mxu0  ;;  %v9130_v10 = vld [vmem:[%s10403_s5 + $0x580] sm:$0xff] }
 0x2c3   : > { %7216 = vmatpush.bf16.msrb.mxu1 %v9128_v11  ;;  %v6882_v34 = vpop.f32.mrf.mxu3  ;;  %v6864_v36 = vadd.f32 %v6863_v33, %v6845_v28  ;;  %v6846_v38 = vpop.f32.mrf.mxu1  ;;  %v6828_v39 = vadd.f32 %v10777_v5, %v6827_v37  ;;  %v9169_v11 = vld [vmem:[%s10403_s5 + $0x6b8] sm:$0xff]  ;;  %v8916_v28 = vld [vmem:[%s11114_s0 + $0xcc] sm:$0xf0]  ;;  %v7690_v33 = vld [vmem:[%s11114_s0 + $0xd0] sm:$0xf0] }
 0x2c4   : > { %7235 = vmatpush.bf16.msrb.mxu2 %v9136_v8  ;;  %v9139_v8 = vld [vmem:[%s10403_s5 + $0x5c8] sm:$0xff]  ;;  %v7698_v37 = vld [vmem:[%s11114_s0 + $0xd8] sm:$0xf0] }
 0x2c5   : > { %7254 = vmatpush.bf16.msrb.mxu3 %v9144_v14  ;;  %v10816_v41 = vadd.f32 %v6882_v34, %v6864_v36  ;;  %v6847_v44 = vadd.f32 %v6846_v38, %v6828_v39  ;;  %v9138_v14 = vld [vmem:[%s10403_s5 + $0x5c0] sm:$0xff]  ;;  %v7696_v34 = vld [vmem:[%s11114_s0 + $0x58] sm:$0xf]  ;;  %v8901_v36 = vld [vmem:[%s11114_s0 + $0x5c] sm:$0xf] }
 0x2c6   : > { %7198 = vmatpush.bf16.msrb.mxu0 %v9119_v25  ;;  %v7701_v49 = vor.u32 %v8901_v36, %v7698_v37  ;;  %v9193_v36 = vld [vmem:[%s10403_s5 + $0x778] sm:$0xff]  ;;  %v9146_v37 = vld [vmem:[%s10403_s5 + $0x600] sm:$0xff] }
 0x2c7   : > { %7217 = vmatpush.bf16.msrb.mxu1 %v9127_v26  ;;  %v7688_v26 = vld [vmem:[%s11114_s0 + $0x50] sm:$0xf] }
 0x2c8   : > { %7236 = vmatpush.bf16.msrb.mxu2 %v9135_v18  ;;  %v9161_v18 = vld [vmem:[%s10403_s5 + $0x678] sm:$0xff] }
 0x2c9   : > { %7255 = vmatpush.bf16.msrb.mxu3 %v9143_v27 }
 0x2ca   : > { %7199 = vmatpush.bf16.msrb.mxu0 %v9118_v30  ;;  %v6865_v57 = vpop.f32.mrf.mxu2  ;;  %v6830_v62 = vpop.f32.mrf.mxu0  ;;  %v9160_v30 = vld [vmem:[%s10403_s5 + $0x670] sm:$0xff] }
 0x2cb   : > { %7218 = vmatpush.bf16.msrb.mxu1 %v9126_v31  ;;  %v6884_v58 = vpop.f32.mrf.mxu3  ;;  %v6866_v61 = vadd.f32 %v6865_v57, %v6847_v44  ;;  %v6849_v63 = vpop.f32.mrf.mxu1  ;;  %v6831_v2 = vadd.f32 %v10777_v5, %v6830_v62  ;;  %v9176_v31 = vld [vmem:[%s10403_s5 + $0x6f0] sm:$0xff]  ;;  %v9165_v57 = vld [vmem:[%s10403_s5 + $0x698] sm:$0xff] }
 0x2cc   : > { %7237 = vmatpush.bf16.msrb.mxu2 %v9134_v29  ;;  %v9152_v29 = vld [vmem:[%s10403_s5 + $0x630] sm:$0xff] }
 0x2cd   : > { %7256 = vmatpush.bf16.msrb.mxu3 %v9142_v32  ;;  %v10851_v6 = vadd.f32 %v6884_v58, %v6866_v61  ;;  %v6850_v9 = vadd.f32 %v6849_v63, %v6831_v2  ;;  %7133 = vmatmul.bf16.gmra.mxu0 %v7801_v59  ;;  %v9167_v32 = vld [vmem:[%s10403_s5 + $0x6a8] sm:$0xff]  ;;  %v9157_v59 = vld [vmem:[%s10403_s5 + $0x658] sm:$0xff] }
 0x2ce   : > { %7200 = vmatpush.bf16.msrb.mxu0 %v9117_v40  ;;  %7152 = vmatmul.bf16.gmra.mxu1 %v7805_v0  ;;  %v7689_v40 = vor.u32 %v8916_v28, %v7688_v26 }
 0x2cf   : > { %7219 = vmatpush.bf16.msrb.mxu1 %v9125_v42  ;;  %7171 = vmatmul.bf16.gmra.mxu2 %v7809_v1  ;;  %v9159_v42 = vld [vmem:[%s10403_s5 + $0x668] sm:$0xff]  ;;  %v9149_v1 = vld [vmem:[%s10403_s5 + $0x618] sm:$0xff] }
 0x2d0   : > { %7238 = vmatpush.bf16.msrb.mxu2 %v9133_v35  ;;  %7190 = vmatmul.bf16.gmra.mxu3 %v7813_v3  ;;  %v8917_v35 = vld [vmem:[%s11114_s0 + $0xd4] sm:$0xf0] }
 0x2d1   : > { %7257 = vmatpush.bf16.msrb.mxu3 %v9141_v43  ;;  %v7697_v46 = vor.u32 %v8917_v35, %v7696_v34  ;;  %v9173_v3 = vld [vmem:[%s10403_s5 + $0x6d8] sm:$0xff]  ;;  %v9154_v35 = vld [vmem:[%s10403_s5 + $0x640] sm:$0xff] }
 0x2d2   : > { %7201 = vmatpush.bf16.msrb.mxu0 %v9116_v53  ;;  %v6868_v15 = vpop.f32.mrf.mxu2  ;;  %v6832_v20 = vpop.f32.mrf.mxu0  ;;  %v9166_v53 = vld [vmem:[%s10403_s5 + $0x6a0] sm:$0xff] }
 0x2d3   : > { %7220 = vmatpush.bf16.msrb.mxu1 %v9124_v55  ;;  %v6887_v16 = vpop.f32.mrf.mxu3  ;;  %v6869_v19 = vadd.f32 %v6868_v15, %v6850_v9  ;;  %v6851_v21 = vpop.f32.mrf.mxu1  ;;  %v6833_v24 = vadd.f32 %v10777_v5, %v6832_v20  ;;  %v8900_v5 = vld [vmem:[%s11114_s0 + $0x54] sm:$0xf]  ;;  %v9158_v55 = vld [vmem:[%s10403_s5 + $0x660] sm:$0xff] }
 0x2d4   : > { %7239 = vmatpush.bf16.msrb.mxu2 %v9132_v47  ;;  %v7693_v45 = vor.u32 %v8900_v5, %v7690_v33  ;;  %v9156_v9 = vld [vmem:[%s10403_s5 + $0x650] sm:$0xff]  ;;  %v9147_v5 = vld [vmem:[%s10403_s5 + $0x608] sm:$0xff]  ;;  %v9162_v33 = vld [vmem:[%s10403_s5 + $0x680] sm:$0xff] }
 0x2d5   : > { %7258 = vmatpush.bf16.msrb.mxu3 %v9140_v56  ;;  %v10865_v25 = vadd.f32 %v6887_v16, %v6869_v19  ;;  %v6852_v27 = vadd.f32 %v6851_v21, %v6833_v24  ;;  %v9174_v56 = vld [vmem:[%s10403_s5 + $0x6e0] sm:$0xff]  ;;  %v9148_v15 = vld [vmem:[%s10403_s5 + $0x610] sm:$0xff]  ;;  %v7826_v16 = vld [vmem:[%s11114_s0 + $0x1d8] sm:$0xf0] }
 0x2d6   : > { %7202 = vmatpush.bf16.msrb.mxu0 %v9115_v4  ;;  %v9164_v4 = vld [vmem:[%s10403_s5 + $0x690] sm:$0xff]  ;;  %v9155_v21 = vld [vmem:[%s10403_s5 + $0x648] sm:$0xff] }
 0x2d7   : > { %7221 = vmatpush.bf16.msrb.mxu1 %v9123_v7 }
 0x2d8   : > { %7240 = vmatpush.bf16.msrb.mxu2 %v9131_v60 }
 0x2d9   : > { %7259 = vmatpush.bf16.msrb.mxu3 %v9139_v8  ;;  %v7816_v8 = vld [vmem:[%s11114_s0 + $0x150] sm:$0xf] }
 0x2da   : > { %7203 = vmatpush.bf16.msrb.mxu0 %v9114_v12  ;;  %v6870_v38 = vpop.f32.mrf.mxu2  ;;  %v6901_v44 = vpop.f32.mrf.mxu0  ;;  %v7824_v12 = vld [vmem:[%s11114_s0 + $0x158] sm:$0xf] }
 0x2db   : > { %7222 = vmatpush.bf16.msrb.mxu1 %v9122_v13  ;;  %v6889_v39 = vpop.f32.mrf.mxu3  ;;  %v6871_v43 = vadd.f32 %v6870_v38, %v6852_v27  ;;  %v6902_v47 = vadd.f32 %v6901_v44, %v10816_v41  ;;  %v6920_v48 = vpop.f32.mrf.mxu1  ;;  %v9150_v41 = vld [vmem:[%s10403_s5 + $0x620] sm:$0xff]  ;;  %v8949_v13 = vld [vmem:[%s11114_s0 + $0x1d4] sm:$0xf0] }
 0x2dc   : > { %7241 = vmatpush.bf16.msrb.mxu2 %v9130_v10  ;;  %v8932_v10 = vld [vmem:[%s11114_s0 + $0x154] sm:$0xf]  ;;  %v7825_v27 = vor.u32 %v8949_v13, %v7824_v12  ;;  %v9170_v38 = vld [vmem:[%s10403_s5 + $0x6c0] sm:$0xff] }
 0x2dd   : > { %7260 = vmatpush.bf16.msrb.mxu3 %v9138_v14  ;;  %v10898_v51 = vadd.f32 %v6889_v39, %v6871_v43  ;;  %v6921_v54 = vadd.f32 %v6920_v48, %v6902_v47  ;;  %7204 = vmatmul.bf16.vlgmr.msrb.gmra.mxu0 %v7689_v40  ;;  %v8933_v14 = vld [vmem:[%s11114_s0 + $0x15c] sm:$0xf]  ;;  %v9200_v43 = vld [vmem:[%s10403_s5 + $0x7b0] sm:$0xff]  ;;  %v9198_v13 = vld [vmem:[%s10403_s5 + $0x7a0] sm:$0xff] }
 0x2de   : > { %7272 = vmatpush.bf16.msra.mxu0 %v9153_v17  ;;  %7223 = vmatmul.bf16.vlgmr.msrb.gmra.mxu1 %v7693_v45  ;;  %v9172_v17 = vld [vmem:[%s10403_s5 + $0x6d0] sm:$0xff]  ;;  %v9185_v39 = vld [vmem:[%s10403_s5 + $0x738] sm:$0xff] }
 0x2df   : > { %7291 = vmatpush.bf16.msra.mxu1 %v9161_v18  ;;  %7242 = vmatmul.bf16.vlgmr.msrb.gmra.mxu2 %v7697_v46  ;;  %v9163_v18 = vld [vmem:[%s10403_s5 + $0x688] sm:$0xff]  ;;  %v9192_v47 = vld [vmem:[%s10403_s5 + $0x770] sm:$0xff] }
 0x2e0   : > { %7310 = vmatpush.bf16.msra.mxu2 %v9169_v11  ;;  %7261 = vmatmul.bf16.vlgmr.msrb.gmra.mxu3 %v7701_v49  ;;  %v7818_v11 = vld [vmem:[%s11114_s0 + $0x1d0] sm:$0xf0] }
 0x2e1   : > { %7329 = vmatpush.bf16.msra.mxu3 %v9177_v22  ;;  %v7821_v26 = vor.u32 %v8932_v10, %v7818_v11 }
 0x2e2   : > { %7273 = vmatpush.bf16.msra.mxu0 %v9152_v29  ;;  %v6939_v58 = vpop.f32.mrf.mxu2  ;;  %v6903_v62 = vpop.f32.mrf.mxu0 }
 0x2e3   : > { %7292 = vmatpush.bf16.msra.mxu1 %v9160_v30  ;;  %v6940_v60 = vadd.f32 %v6939_v58, %v6921_v54  ;;  %v6958_v61 = vpop.f32.mrf.mxu3  ;;  %v6904_v63 = vadd.f32 %v6903_v62, %v10851_v6  ;;  %v6922_v0 = vpop.f32.mrf.mxu1  ;;  %v8948_v6 = vld [vmem:[%s11114_s0 + $0x1cc] sm:$0xf0]  ;;  %v7829_v30 = vor.u32 %v8933_v14, %v7826_v16  ;;  %v7704_v54 = vld [vmem:[%s11114_s0 + $0x60] sm:$0xf]  ;;  %v7706_v58 = vld [vmem:[%s11114_s0 + $0xe0] sm:$0xf0] }
 0x2e4   : > { %7311 = vmatpush.bf16.msra.mxu2 %v9168_v23  ;;  %v7817_v20 = vor.u32 %v8948_v6, %v7816_v8  ;;  %v7714_v62 = vld [vmem:[%s11114_s0 + $0xe8] sm:$0xf0]  ;;  %v9190_v16 = vld [vmem:[%s10403_s5 + $0x760] sm:$0xff] }
 0x2e5   : > { %7330 = vmatpush.bf16.msra.mxu3 %v9176_v31  ;;  %v10909_v2 = vadd.f32 %v6958_v61, %v6940_v60  ;;  %v6923_v7 = vadd.f32 %v6922_v0, %v6904_v63  ;;  %v8919_v60 = vld [vmem:[%s11114_s0 + $0xe4] sm:$0xf0]  ;;  %v8903_v61 = vld [vmem:[%s11114_s0 + $0x6c] sm:$0xf] }
 0x2e6   : > { %7274 = vmatpush.bf16.msra.mxu0 %v9151_v50  ;;  %v9183_v63 = vld [vmem:[%s10403_s5 + $0x728] sm:$0xff]  ;;  %v7717_v12 = vor.u32 %v8903_v61, %v7714_v62  ;;  %v9202_v61 = vld [vmem:[%s10403_s5 + $0x7c0] sm:$0xff] }
 0x2e7   : > { %7293 = vmatpush.bf16.msra.mxu1 %v9159_v42  ;;  %v9209_v42 = vld [vmem:[%s10403_s5 + $0x7f8] sm:$0xff] }
 0x2e8   : > { %7312 = vmatpush.bf16.msra.mxu2 %v9167_v32  ;;  %v9171_v32 = vld [vmem:[%s10403_s5 + $0x6c8] sm:$0xff] }
 0x2e9   : > { %7331 = vmatpush.bf16.msra.mxu3 %v9175_v52  ;;  %v9184_v52 = vld [vmem:[%s10403_s5 + $0x730] sm:$0xff] }
 0x2ea   : > { %7275 = vmatpush.bf16.msra.mxu0 %v9150_v41  ;;  %v6941_v19 = vpop.f32.mrf.mxu2  ;;  %v6906_v24 = vpop.f32.mrf.mxu0  ;;  %v9199_v41 = vld [vmem:[%s10403_s5 + $0x7a8] sm:$0xff] }
 0x2eb   : > { %7294 = vmatpush.bf16.msra.mxu1 %v9158_v55  ;;  %v6942_v22 = vadd.f32 %v6941_v19, %v6923_v7  ;;  %v6960_v23 = vpop.f32.mrf.mxu3  ;;  %v6907_v28 = vadd.f32 %v6906_v24, %v10865_v25  ;;  %v6925_v29 = vpop.f32.mrf.mxu1  ;;  %v9201_v25 = vld [vmem:[%s10403_s5 + $0x7b8] sm:$0xff]  ;;  %v9208_v55 = vld [vmem:[%s10403_s5 + $0x7f0] sm:$0xff] }
 0x2ec   : > { %7313 = vmatpush.bf16.msra.mxu2 %v9166_v53  ;;  %v9181_v19 = vld [vmem:[%s10403_s5 + $0x718] sm:$0xff] }
 0x2ed   : > { %7332 = vmatpush.bf16.msra.mxu3 %v9174_v56  ;;  %v10944_v31 = vadd.f32 %v6960_v23, %v6942_v22  ;;  %v6926_v34 = vadd.f32 %v6925_v29, %v6907_v28  ;;  %7209 = vmatmul.bf16.gmra.mxu0 %v7817_v20  ;;  %v8902_v56 = vld [vmem:[%s11114_s0 + $0x64] sm:$0xf]  ;;  %v9189_v20 = vld [vmem:[%s10403_s5 + $0x758] sm:$0xff]  ;;  %v9196_v29 = vld [vmem:[%s10403_s5 + $0x790] sm:$0xff] }
 0x2ee   : > { %7276 = vmatpush.bf16.msra.mxu0 %v9149_v1  ;;  %7228 = vmatmul.bf16.gmra.mxu1 %v7821_v26  ;;  %v7709_v6 = vor.u32 %v8902_v56, %v7706_v58  ;;  %v9205_v22 = vld [vmem:[%s10403_s5 + $0x7d8] sm:$0xff]  ;;  %v9194_v56 = vld [vmem:[%s10403_s5 + $0x780] sm:$0xff] }
 0x2ef   : > { %7295 = vmatpush.bf16.msra.mxu1 %v9157_v59  ;;  %7247 = vmatmul.bf16.gmra.mxu2 %v7825_v27  ;;  %v7712_v59 = vld [vmem:[%s11114_s0 + $0x68] sm:$0xf]  ;;  %v9178_v58 = vld [vmem:[%s10403_s5 + $0x700] sm:$0xff] }
 0x2f0   : > { %7314 = vmatpush.bf16.msra.mxu2 %v9165_v57  ;;  %7266 = vmatmul.bf16.gmra.mxu3 %v7829_v30  ;;  %v9191_v57 = vld [vmem:[%s10403_s5 + $0x768] sm:$0xff] }
 0x2f1   : > { %7333 = vmatpush.bf16.msra.mxu3 %v9173_v3  ;;  %v9207_v3 = vld [vmem:[%s10403_s5 + $0x7e8] sm:$0xff] }
 0x2f2   : > { %7277 = vmatpush.bf16.msra.mxu0 %v9148_v15  ;;  %v6944_v40 = vpop.f32.mrf.mxu2  ;;  %v6908_v46 = vpop.f32.mrf.mxu0  ;;  %v9182_v15 = vld [vmem:[%s10403_s5 + $0x720] sm:$0xff] }
 0x2f3   : > { %7296 = vmatpush.bf16.msra.mxu1 %v9156_v9  ;;  %v6945_v44 = vadd.f32 %v6944_v40, %v6926_v34  ;;  %v6963_v45 = vpop.f32.mrf.mxu3  ;;  %v6909_v48 = vadd.f32 %v6908_v46, %v10898_v51  ;;  %v6927_v49 = vpop.f32.mrf.mxu1  ;;  %v8918_v51 = vld [vmem:[%s11114_s0 + $0xdc] sm:$0xf0]  ;;  %v7713_v9 = vor.u32 %v8919_v60, %v7712_v59  ;;  %v9195_v40 = vld [vmem:[%s10403_s5 + $0x788] sm:$0xff] }
 0x2f4   : > { %7315 = vmatpush.bf16.msra.mxu2 %v9164_v4  ;;  %v7705_v1 = vor.u32 %v8918_v51, %v7704_v54  ;;  %v7832_v34 = vld [vmem:[%s11114_s0 + $0x160] sm:$0xf] }
 0x2f5   : > { %7334 = vmatpush.bf16.msra.mxu3 %v9172_v17  ;;  %v10958_v50 = vadd.f32 %v6963_v45, %v6945_v44  ;;  %v6928_v53 = vadd.f32 %v6927_v49, %v6909_v48  ;;  %v9187_v44 = vld [vmem:[%s10403_s5 + $0x748] sm:$0xff]  ;;  %v9186_v59 = vld [vmem:[%s10403_s5 + $0x740] sm:$0xff] }
 0x2f6   : > { %7278 = vmatpush.bf16.msra.mxu0 %v9147_v5  ;;  %v9180_v5 = vld [vmem:[%s10403_s5 + $0x710] sm:$0xff] }
 0x2f7   : > { %7297 = vmatpush.bf16.msra.mxu1 %v9155_v21 }
 0x2f8   : > { %7316 = vmatpush.bf16.msra.mxu2 %v9163_v18  ;;  %v9206_v18 = vld [vmem:[%s10403_s5 + $0x7e0] sm:$0xff] }
 0x2f9   : > { %7335 = vmatpush.bf16.msra.mxu3 %v9171_v32  ;;  %v9188_v32 = vld [vmem:[%s10403_s5 + $0x750] sm:$0xff] }
 0x2fa   : > { %7279 = vmatpush.bf16.msra.mxu0 %v9146_v37  ;;  %v6946_v0 = vpop.f32.mrf.mxu2  ;;  %v6977_v8 = vpop.f32.mrf.mxu0  ;;  %v7840_v37 = vld [vmem:[%s11114_s0 + $0x168] sm:$0xf] }
 0x2fb   : > { %7298 = vmatpush.bf16.msra.mxu1 %v9154_v35  ;;  %v6947_v4 = vadd.f32 %v6946_v0, %v6928_v53  ;;  %v6965_v7 = vpop.f32.mrf.mxu3  ;;  %v6978_v10 = vadd.f32 %v6977_v8, %v10909_v2  ;;  %v6996_v11 = vpop.f32.mrf.mxu1  ;;  %v9197_v2 = vld [vmem:[%s10403_s5 + $0x798] sm:$0xff]  ;;  %v9204_v35 = vld [vmem:[%s10403_s5 + $0x7d0] sm:$0xff] }
 0x2fc   : > { %7317 = vmatpush.bf16.msra.mxu2 %v9162_v33  ;;  %v7720_v8 = vld [vmem:[%s11114_s0 + $0x70] sm:$0xf] }
 0x2fd   : > { %7336 = vmatpush.bf16.msra.mxu3 %v9170_v38  ;;  %v10992_v14 = vadd.f32 %v6965_v7, %v6947_v4  ;;  %v6997_v17 = vadd.f32 %v6996_v11, %v6978_v10  ;;  %7280 = vmatmul.bf16.vlgmr.msra.gmra.mxu0 %v7705_v1  ;;  %v8951_v38 = vld [vmem:[%s11114_s0 + $0x1e4] sm:$0xf0]  ;;  %v7722_v10 = vld [vmem:[%s11114_s0 + $0xf0] sm:$0xf0]  ;;  %v7728_v11 = vld [vmem:[%s11114_s0 + $0x78] sm:$0xf] }
 0x2fe   : > { %7348 = vmatpush.bf16.msrb.mxu0 %v9185_v39  ;;  %7299 = vmatmul.bf16.vlgmr.msra.gmra.mxu1 %v7709_v6  ;;  %v8935_v39 = vld [vmem:[%s11114_s0 + $0x16c] sm:$0xf]  ;;  %v7841_v54 = vor.u32 %v8951_v38, %v7840_v37  ;;  %v8920_v6 = vld [vmem:[%s11114_s0 + $0xec] sm:$0xf0]  ;;  %v7856_v37 = vld [vmem:[%s11114_s0 + $0x178] sm:$0xf] }
 0x2ff   : > { %7367 = vmatpush.bf16.msrb.mxu1 %v9193_v36  ;;  %7318 = vmatmul.bf16.vlgmr.msra.gmra.mxu2 %v7713_v9  ;;  %v7834_v36 = vld [vmem:[%s11114_s0 + $0x1e0] sm:$0xf0]  ;;  %v8904_v9 = vld [vmem:[%s11114_s0 + $0x74] sm:$0xf]  ;;  %v8953_v38 = vld [vmem:[%s11114_s0 + $0x1f4] sm:$0xf0] }
 0x300   : > { %7386 = vmatpush.bf16.msrb.mxu2 %v9201_v25  ;;  %7337 = vmatmul.bf16.vlgmr.msra.gmra.mxu3 %v7717_v12  ;;  %v8934_v25 = vld [vmem:[%s11114_s0 + $0x164] sm:$0xf]  ;;  %v8921_v12 = vld [vmem:[%s11114_s0 + $0xf4] sm:$0xf0] }
 0x301   : > { %7405 = vmatpush.bf16.msrb.mxu3 %v9209_v42  ;;  %v7842_v42 = vld [vmem:[%s11114_s0 + $0x1e8] sm:$0xf0]  ;;  %v7837_v53 = vor.u32 %v8934_v25, %v7834_v36  ;;  %v8936_v25 = vld [vmem:[%s11114_s0 + $0x174] sm:$0xf] }
 0x302   : > { %7349 = vmatpush.bf16.msrb.mxu0 %v9184_v52  ;;  %v7015_v21 = vpop.f32.mrf.mxu2  ;;  %v6979_v26 = vpop.f32.mrf.mxu0  ;;  %v7845_v51 = vor.u32 %v8935_v39, %v7842_v42  ;;  %v7850_v36 = vld [vmem:[%s11114_s0 + $0x1f0] sm:$0xf0]  ;;  %v8937_v39 = vld [vmem:[%s11114_s0 + $0x17c] sm:$0xf] }
 0x303   : > { %7368 = vmatpush.bf16.msrb.mxu1 %v9192_v47  ;;  %v7016_v23 = vadd.f32 %v7015_v21, %v6997_v17  ;;  %v7034_v24 = vpop.f32.mrf.mxu3  ;;  %v6980_v27 = vadd.f32 %v6979_v26, %v10944_v31  ;;  %v6998_v28 = vpop.f32.mrf.mxu1  ;;  %v8950_v31 = vld [vmem:[%s11114_s0 + $0x1dc] sm:$0xf0]  ;;  %v9203_v47 = vld [vmem:[%s10403_s5 + $0x7c8] sm:$0xff] }
 0x304   : > { %7387 = vmatpush.bf16.msrb.mxu2 %v9200_v43  ;;  %v9179_v43 = vld [vmem:[%s10403_s5 + $0x708] sm:$0xff]  ;;  %v7833_v46 = vor.u32 %v8950_v31, %v7832_v34 }
 0x305   : > { %7406 = vmatpush.bf16.msrb.mxu3 %v9208_v55  ;;  %v11003_v30 = vadd.f32 %v7034_v24, %v7016_v23  ;;  %v6999_v33 = vadd.f32 %v6998_v28, %v6980_v27 }
 0x306   : > { %7350 = vmatpush.bf16.msrb.mxu0 %v9183_v63 }
 0x307   : > { %7369 = vmatpush.bf16.msrb.mxu1 %v9191_v57 }
 0x308   : > { %7388 = vmatpush.bf16.msrb.mxu2 %v9199_v41 }
 0x309   : > { %7407 = vmatpush.bf16.msrb.mxu3 %v9207_v3 }
 0x30a   : > { %7351 = vmatpush.bf16.msrb.mxu0 %v9182_v15  ;;  %v7017_v45 = vpop.f32.mrf.mxu2  ;;  %v6982_v52 = vpop.f32.mrf.mxu0 }
 0x30b   : > { %7370 = vmatpush.bf16.msrb.mxu1 %v9190_v16  ;;  %v7018_v48 = vadd.f32 %v7017_v45, %v6999_v33  ;;  %v7036_v49 = vpop.f32.mrf.mxu3  ;;  %v6983_v55 = vadd.f32 %v6982_v52, %v10958_v50  ;;  %v7001_v41 = vpop.f32.mrf.mxu1  ;;  %v7721_v16 = vor.u32 %v8920_v6, %v7720_v8 }
 0x30c   : > { %7389 = vmatpush.bf16.msrb.mxu2 %v9198_v13  ;;  %v8905_v13 = vld [vmem:[%s11114_s0 + $0x7c] sm:$0xf] }
 0x30d   : > { %7408 = vmatpush.bf16.msrb.mxu3 %v9206_v18  ;;  %v7037_v57 = vadd.f32 %v7036_v49, %v7018_v48  ;;  %v7002_v60 = vadd.f32 %v7001_v41, %v6983_v55  ;;  %7285 = vmatmul.bf16.gmra.mxu0 %v7833_v46  ;;  %v7857_v48 = vor.u32 %v8953_v38, %v7856_v37 }
 0x30e   : > { %7352 = vmatpush.bf16.msrb.mxu0 %v9181_v19  ;;  %7304 = vmatmul.bf16.gmra.mxu1 %v7837_v53  ;;  %v7725_v19 = vor.u32 %v8904_v9, %v7722_v10 }
 0x30f   : > { %7371 = vmatpush.bf16.msrb.mxu1 %v9189_v20  ;;  %7323 = vmatmul.bf16.gmra.mxu2 %v7841_v54  ;;  %v7729_v20 = vor.u32 %v8921_v12, %v7728_v11 }
 0x310   : > { %7390 = vmatpush.bf16.msrb.mxu2 %v9197_v2  ;;  %7342 = vmatmul.bf16.gmra.mxu3 %v7845_v51 }
 0x311   : > { %7409 = vmatpush.bf16.msrb.mxu3 %v9205_v22 }
 0x312   : > { %7353 = vmatpush.bf16.msrb.mxu0 %v9180_v5  ;;  %v7020_v50 = vpop.f32.mrf.mxu2  ;;  %v6984_v0 = vpop.f32.mrf.mxu0 }
 0x313   : > { %7372 = vmatpush.bf16.msrb.mxu1 %v9188_v32  ;;  %v7021_v62 = vadd.f32 %v7020_v50, %v7002_v60  ;;  %v7039_v63 = vpop.f32.mrf.mxu3  ;;  %v6985_v1 = vadd.f32 %v6984_v0, %v10992_v14  ;;  %v7003_v3 = vpop.f32.mrf.mxu1  ;;  %v7730_v14 = vld [vmem:[%s11114_s0 + $0xf8] sm:$0xf0] }
 0x314   : > { %7391 = vmatpush.bf16.msrb.mxu2 %v9196_v29  ;;  %v7733_v23 = vor.u32 %v8905_v13, %v7730_v14 }
 0x315   : > { %7410 = vmatpush.bf16.msrb.mxu3 %v9204_v35  ;;  %v7040_v4 = vadd.f32 %v7039_v63, %v7021_v62  ;;  %v7004_v7 = vadd.f32 %v7003_v3, %v6985_v1  ;;  %v8952_v35 = vld [vmem:[%s11114_s0 + $0x1ec] sm:$0xf0] }
 0x316   : > { %7354 = vmatpush.bf16.msrb.mxu0 %v9179_v43 }
 0x317   : > { %7373 = vmatpush.bf16.msrb.mxu1 %v9187_v44 }
 0x318   : > { %7392 = vmatpush.bf16.msrb.mxu2 %v9195_v40  ;;  %v7858_v40 = vld [vmem:[%s11114_s0 + $0x1f8] sm:$0xf0] }
 0x319   : > { %7411 = vmatpush.bf16.msrb.mxu3 %v9203_v47  ;;  %v7853_v47 = vor.u32 %v8936_v25, %v7850_v36  ;;  %v7861_v53 = vor.u32 %v8937_v39, %v7858_v40 }
 0x31a   : > { %7355 = vmatpush.bf16.msrb.mxu0 %v9178_v58  ;;  %v7022_v15 = vpop.f32.mrf.mxu2  ;;  %v7053_v2 = vpop.f32.mrf.mxu0 }
 0x31b   : > { %7374 = vmatpush.bf16.msrb.mxu1 %v9186_v59  ;;  %v7023_v17 = vadd.f32 %v7022_v15, %v7004_v7  ;;  %v7041_v18 = vpop.f32.mrf.mxu3  ;;  %v7054_v21 = vadd.f32 %v7053_v2, %v11003_v30  ;;  %v7072_v22 = vpop.f32.mrf.mxu1  ;;  %v7848_v30 = vld [vmem:[%s11114_s0 + $0x170] sm:$0xf] }
 0x31c   : > { %7393 = vmatpush.bf16.msrb.mxu2 %v9194_v56  ;;  %v7849_v43 = vor.u32 %v8952_v35, %v7848_v30 }
 0x31d   : > { %7412 = vmatpush.bf16.msrb.mxu3 %v9202_v61  ;;  %v7042_v24 = vadd.f32 %v7041_v18, %v7023_v17  ;;  %v7073_v26 = vadd.f32 %v7072_v22, %v7054_v21  ;;  %7356 = vmatmul.bf16.vlgmr.msrb.gmra.mxu0 %v7721_v16 }
 0x31e   : > { %7375 = vmatmul.bf16.vlgmr.msrb.gmra.mxu1 %v7725_v19 }
 0x31f   : > { %7394 = vmatmul.bf16.vlgmr.msrb.gmra.mxu2 %v7729_v20 }
 0x320   : > { %7413 = vmatmul.bf16.vlgmr.msrb.gmra.mxu3 %v7733_v23 }
 0x322   : > { %v7091_v27 = vpop.f32.mrf.mxu2  ;;  %v7055_v5 = vpop.f32.mrf.mxu0 }
 0x323   : > { %v7092_v28 = vadd.f32 %v7091_v27, %v7073_v26  ;;  %v7110_v29 = vpop.f32.mrf.mxu3  ;;  %v7056_v32 = vadd.f32 %v7055_v5, %v7037_v57  ;;  %v7074_v33 = vpop.f32.mrf.mxu1 }
 0x325   : > { %v7111_v34 = vadd.f32 %v7110_v29, %v7092_v28  ;;  %v7075_v31 = vadd.f32 %v7074_v33, %v7056_v32 }
 0x32a   : > { %v7093_v42 = vpop.f32.mrf.mxu2  ;;  %v7058_v46 = vpop.f32.mrf.mxu0 }
 0x32b   : > { %v7094_v44 = vadd.f32 %v7093_v42, %v7075_v31  ;;  %v7112_v45 = vpop.f32.mrf.mxu3  ;;  %v7059_v49 = vadd.f32 %v7058_v46, %v7040_v4  ;;  %v7077_v52 = vpop.f32.mrf.mxu1 }
 0x32d   : > { %v7113_v54 = vadd.f32 %v7112_v45, %v7094_v44  ;;  %v7078_v55 = vadd.f32 %v7077_v52, %v7059_v49  ;;  %7361 = vmatmul.bf16.gmra.mxu0 %v7849_v43 }
 0x32e   : > { %7380 = vmatmul.bf16.gmra.mxu1 %v7853_v47 }
 0x32f   : > { %7399 = vmatmul.bf16.gmra.mxu2 %v7857_v48 }
 0x330   : > { %7418 = vmatmul.bf16.gmra.mxu3 %v7861_v53 }
 0x332   : > { %v7096_v41 = vpop.f32.mrf.mxu2  ;;  %v7060_v57 = vpop.f32.mrf.mxu0 }
 0x333   : > { %v7097_v51 = vadd.f32 %v7096_v41, %v7078_v55  ;;  %v7115_v56 = vpop.f32.mrf.mxu3  ;;  %v7061_v58 = vadd.f32 %v7060_v57, %v7042_v24  ;;  %v7079_v59 = vpop.f32.mrf.mxu1 }
 0x335   : > { %v7116_v60 = vadd.f32 %v7115_v56, %v7097_v51  ;;  %v7080_v61 = vadd.f32 %v7079_v59, %v7061_v58 }
 0x33a   : > { %v7098_v50 = vpop.f32.mrf.mxu2  ;;  %v7129_v0 = vpop.f32.mrf.mxu0 }
 0x33b   : > { %v7099_v62 = vadd.f32 %v7098_v50, %v7080_v61  ;;  %v7117_v63 = vpop.f32.mrf.mxu3  ;;  %v7130_v1 = vadd.f32 %v7129_v0, %v7111_v34  ;;  %v7148_v3 = vpop.f32.mrf.mxu1 }
 0x33d   : > { %v7118_v4 = vadd.f32 %v7117_v63, %v7099_v62  ;;  %v7149_v7 = vadd.f32 %v7148_v3, %v7130_v1 }
 0x342   : > { %v7167_v8 = vpop.f32.mrf.mxu2  ;;  %v7131_v10 = vpop.f32.mrf.mxu0 }
 0x343   : > { %v7168_v6 = vadd.f32 %v7167_v8, %v7149_v7  ;;  %v7186_v9 = vpop.f32.mrf.mxu3  ;;  %v7132_v11 = vadd.f32 %v7131_v10, %v7113_v54  ;;  %v7150_v12 = vpop.f32.mrf.mxu1 }
 0x345   : > { %v7187_v13 = vadd.f32 %v7186_v9, %v7168_v6  ;;  %v7151_v14 = vadd.f32 %v7150_v12, %v7132_v11 }
 0x34a   : > { %v7169_v15 = vpop.f32.mrf.mxu2  ;;  %v7134_v18 = vpop.f32.mrf.mxu0 }
 0x34b   : > { %v7170_v16 = vadd.f32 %v7169_v15, %v7151_v14  ;;  %v7188_v17 = vpop.f32.mrf.mxu3  ;;  %v7135_v2 = vadd.f32 %v7134_v18, %v7116_v60  ;;  %v7153_v19 = vpop.f32.mrf.mxu1 }
 0x34d   : > { %v7189_v20 = vadd.f32 %v7188_v17, %v7170_v16  ;;  %v7154_v21 = vadd.f32 %v7153_v19, %v7135_v2 }
 0x352   : > { %v7172_v22 = vpop.f32.mrf.mxu2  ;;  %v7136_v26 = vpop.f32.mrf.mxu0 }
 0x353   : > { %v7173_v23 = vadd.f32 %v7172_v22, %v7154_v21  ;;  %v7191_v24 = vpop.f32.mrf.mxu3  ;;  %v7137_v27 = vadd.f32 %v7136_v26, %v7118_v4  ;;  %v7155_v28 = vpop.f32.mrf.mxu1 }
 0x355   : > { %v7192_v29 = vadd.f32 %v7191_v24, %v7173_v23  ;;  %v7156_v5 = vadd.f32 %v7155_v28, %v7137_v27 }
 0x35a   : > { %v7174_v32 = vpop.f32.mrf.mxu2  ;;  %v7205_v31 = vpop.f32.mrf.mxu0 }
 0x35b   : > { %v7175_v33 = vadd.f32 %v7174_v32, %v7156_v5  ;;  %v7193_v34 = vpop.f32.mrf.mxu3  ;;  %v7224_v30 = vpop.f32.mrf.mxu1  ;;  %v7206_v57 = vadd.f32 %v7205_v31, %v7187_v13 }
 0x35d   : > { %v7194_v35 = vadd.f32 %v7193_v34, %v7175_v33  ;;  %v7225_v50 = vadd.f32 %v7224_v30, %v7206_v57 }
 0x362   : > { %v7243_v25 = vpop.f32.mrf.mxu2  ;;  %v7207_v37 = vpop.f32.mrf.mxu0 }
 0x363   : > { %v7262_v36 = vpop.f32.mrf.mxu3  ;;  %v7226_v38 = vpop.f32.mrf.mxu1  ;;  %v7208_v61 = vadd.f32 %v7207_v37, %v7189_v20  ;;  %v7244_v62 = vadd.f32 %v7243_v25, %v7225_v50 }
 0x365   : > { %v7227_v63 = vadd.f32 %v7226_v38, %v7208_v61  ;;  %v7263_v8 = vadd.f32 %v7262_v36, %v7244_v62 }
 0x36a   : > { %v7245_v39 = vpop.f32.mrf.mxu2  ;;  %v7210_v42 = vpop.f32.mrf.mxu0 }
 0x36b   : > { %v7264_v40 = vpop.f32.mrf.mxu3  ;;  %v7229_v43 = vpop.f32.mrf.mxu1  ;;  %v7246_v1 = vadd.f32 %v7245_v39, %v7227_v63  ;;  %v7211_v12 = vadd.f32 %v7210_v42, %v7192_v29 }
 0x36d   : > { %v7265_v6 = vadd.f32 %v7264_v40, %v7246_v1  ;;  %v7230_v19 = vadd.f32 %v7229_v43, %v7211_v12 }
 0x372   : > { %v7248_v44 = vpop.f32.mrf.mxu2  ;;  %v7212_v46 = vpop.f32.mrf.mxu0 }
 0x373   : > { %v7267_v45 = vpop.f32.mrf.mxu3  ;;  %v7231_v47 = vpop.f32.mrf.mxu1  ;;  %v7213_v17 = vadd.f32 %v7212_v46, %v7194_v35  ;;  %v7249_v21 = vadd.f32 %v7248_v44, %v7230_v19 }
 0x375   : > { %v7232_v22 = vadd.f32 %v7231_v47, %v7213_v17  ;;  %v7268_v33 = vadd.f32 %v7267_v45, %v7249_v21 }
 0x37a   : > { %v7250_v48 = vpop.f32.mrf.mxu2  ;;  %v7281_v52 = vpop.f32.mrf.mxu0 }
 0x37b   : > { %v7269_v49 = vpop.f32.mrf.mxu3  ;;  %v7300_v53 = vpop.f32.mrf.mxu1  ;;  %v7282_v9 = vadd.f32 %v7281_v52, %v7263_v8  ;;  %v7251_v26 = vadd.f32 %v7250_v48, %v7232_v22 }
 0x37d   : > { %v7301_v14 = vadd.f32 %v7300_v53, %v7282_v9  ;;  %v7270_v31 = vadd.f32 %v7269_v49, %v7251_v26 }
 0x382   : > { %v7319_v54 = vpop.f32.mrf.mxu2  ;;  %v7283_v41 = vpop.f32.mrf.mxu0 }
 0x383   : > { %v7338_v55 = vpop.f32.mrf.mxu3  ;;  %v7302_v51 = vpop.f32.mrf.mxu1  ;;  %v7284_v10 = vadd.f32 %v7283_v41, %v7265_v6  ;;  %v7320_v18 = vadd.f32 %v7319_v54, %v7301_v14 }
 0x385   : > { %v7303_v2 = vadd.f32 %v7302_v51, %v7284_v10  ;;  %v7339_v23 = vadd.f32 %v7338_v55, %v7320_v18 }
 0x38a   : > { %v7321_v56 = vpop.f32.mrf.mxu2  ;;  %v7286_v59 = vpop.f32.mrf.mxu0 }
 0x38b   : > { %v7340_v58 = vpop.f32.mrf.mxu3  ;;  %v7305_v60 = vpop.f32.mrf.mxu1  ;;  %v7322_v20 = vadd.f32 %v7321_v56, %v7303_v2  ;;  %v7287_v30 = vadd.f32 %v7286_v59, %v7268_v33 }
 0x38d   : > { %v7341_v27 = vadd.f32 %v7340_v58, %v7322_v20  ;;  %v7306_v39 = vadd.f32 %v7305_v60, %v7287_v30 }
 0x392   : > { %v7324_v0 = vpop.f32.mrf.mxu2  ;;  %v7288_v4 = vpop.f32.mrf.mxu0 }
 0x393   : > { %v7343_v3 = vpop.f32.mrf.mxu3  ;;  %v7307_v7 = vpop.f32.mrf.mxu1  ;;  %v7289_v25 = vadd.f32 %v7288_v4, %v7270_v31  ;;  %v7325_v44 = vadd.f32 %v7324_v0, %v7306_v39 }
 0x395   : > { %v7308_v46 = vadd.f32 %v7307_v7, %v7289_v25  ;;  %v7344_v49 = vadd.f32 %v7343_v3, %v7325_v44 }
 0x39a   : > { %v7326_v11 = vpop.f32.mrf.mxu2  ;;  %v7357_v15 = vpop.f32.mrf.mxu0 }
 0x39b   : > { %v7345_v13 = vpop.f32.mrf.mxu3  ;;  %v7376_v16 = vpop.f32.mrf.mxu1  ;;  %v7358_v28 = vadd.f32 %v7357_v15, %v7339_v23  ;;  %v7327_v45 = vadd.f32 %v7326_v11, %v7308_v46 }
 0x39d   : > { %v7377_v35 = vadd.f32 %v7376_v16, %v7358_v28  ;;  %v7346_v55 = vadd.f32 %v7345_v13, %v7327_v45 }
 0x3a2   : > { %v7395_v24 = vpop.f32.mrf.mxu2  ;;  %v7359_v32 = vpop.f32.mrf.mxu0 }
 0x3a3   : > { %v7414_v5 = vpop.f32.mrf.mxu3  ;;  %v7378_v29 = vpop.f32.mrf.mxu1  ;;  %v7360_v34 = vadd.f32 %v7359_v32, %v7341_v27  ;;  %v7396_v36 = vadd.f32 %v7395_v24, %v7377_v35 }
 0x3a5   : > { %v7379_v37 = vadd.f32 %v7378_v29, %v7360_v34  ;;  %v7415_v47 = vadd.f32 %v7414_v5, %v7396_v36 }
 0x3aa   : > { %v7397_v38 = vpop.f32.mrf.mxu2  ;;  %v7362_v43 = vpop.f32.mrf.mxu0 }
 0x3ab   : > { %v7398_v40 = vadd.f32 %v7397_v38, %v7379_v37  ;;  %v7416_v42 = vpop.f32.mrf.mxu3  ;;  %v7381_v52 = vpop.f32.mrf.mxu1  ;;  %v7363_v41 = vadd.f32 %v7362_v43, %v7344_v49 }
 0x3ad   : > { %v7417_v48 = vadd.f32 %v7416_v42, %v7398_v40  ;;  %v7382_v58 = vadd.f32 %v7381_v52, %v7363_v41 }
 0x3af   : > { %v9213_v53 = vpack.c.bf16 %v7417_v48, %v7415_v47 }
 0x3b1   : > { %9214 = vst [vmem:[%s4368_s10] sm:$0xff] %v9213_v53  }
 0x3b2   : > { %v7400_v54 = vpop.f32.mrf.mxu2  ;;  %v7364_v56 = vpop.f32.mrf.mxu0 }
 0x3b3   : > { %v7419_v51 = vpop.f32.mrf.mxu3  ;;  %v7365_v57 = vadd.f32 %v7364_v56, %v7346_v55  ;;  %v7383_v59 = vpop.f32.mrf.mxu1  ;;  %v7401_v60 = vadd.f32 %v7400_v54, %v7382_v58 }
 0x3b5   : > { %v7384_v61 = vadd.f32 %v7383_v59, %v7365_v57  ;;  %v7420_v0 = vadd.f32 %v7419_v51, %v7401_v60 }
 0x3b8   : > { %v7460_v3 = vld [vmem:[%s4368_s10] sm:$0xf] (%p9357_p6)  ;;  %v7462_v7 = vld [vmem:[%s4368_s10 + $0x4] sm:$0xf] (%p9357_p6) }
 0x3b9   : > { %7461 = vst [vmem:[%s7443_s18] sm:$0xf] (%p9357_p6), %v7460_v3 }
 0x3ba   : > { %v7402_v50 = vpop.f32.mrf.mxu2  ;;  %7463 = vst [vmem:[%s7443_s18 + $0x10] sm:$0xf] (%p9357_p6), %v7462_v7 }
 0x3bb   : > { %v7403_v62 = vadd.f32 %v7402_v50, %v7384_v61  ;;  %v7421_v63 = vpop.f32.mrf.mxu3 }
 0x3bd   : > { %v7422_v1 = vadd.f32 %v7421_v63, %v7403_v62  ;;  %7438 = sbr.rel (!%p9357_p6) target bundleno = 971 (0x3cb), region = 88 }
 0x3bf   : > { %v9218_v4 = vpack.c.bf16 %v7422_v1, %v7420_v0 }
 0x3c1   : > { %9220 = vst [vmem:[%s4368_s10 + $0x8] sm:$0xff] %v9218_v4  }
 0x3c8   : > { %v7464_v8 = vld [vmem:[%s4368_s10 + $0x8] sm:$0xf]  ;;  %v7466_v6 = vld [vmem:[%s4368_s10 + $0xc] sm:$0xf] }
 0x3c9   : > { %7465 = vst [vmem:[%s7443_s18 + $0x20] sm:$0xf] %v7464_v8 }
 0x3ca   : > { %7467 = vst [vmem:[%s7443_s18 + $0x30] sm:$0xf] %v7466_v6 }
 0x3cb PF: > { %s13_s16 = sadd.s32 1, %s9300_s16   ;;  %s11119_s12 = smov %s9288_s13 }
 0x3cc   : > { %p10_p12 = scmp.ge.s32.totalorder %s13_s16, 6   ;;  %s11120_s13 = smov %s9362_s22 }
 0x3cd   : > { %s11121_s14 = smov %s9296_s15  ;;  %s11122_s15 = smov %s11124_s17 }
 0x3ce   :  { %12 = sbr.rel (!%p10_p12) target bundleno = 3 (0x3), region = 170 }

// kernel: discriminator_forward.9
= control target key start
LH: loop header
LB: loop body
LE: loop exit
PB: predicated region body
PF: predicated region fallthrough
CT: control target
= control target key end

     0   :  { %s1441_s0 = inlined_call_operand.vmem [shape: bf16[16,8192], index: 0, kind: input, shape index: {}]   ;;  %s1442_s1 = inlined_call_operand.vmem [shape: bf16[1,8192], index: 1, kind: input, shape index: {}]   ;;  %s1443_s2 = inlined_call_operand.<no memory space> [shape: f32[1,1], index: 2, kind: input, shape index: {}]   ;;  %s1444_s3 = inlined_call_operand.vmem [shape: f32[16,128], index: 3, kind: output, shape index: {}]  }
   0x1   :  { %v22_v0 = vld [vmem:[%s1441_s0] sm:$0xff]   ;;  %v44_v7 = vld [vmem:[%s1441_s0 + $0x8] sm:$0xff]   ;;  %v66_v13 = vld [vmem:[%s1441_s0 + $0x10] sm:$0xff]  }
   0x2   :  { %v26_v1 = vld [vmem:[%s1442_s1] sm:$0x1]  ;;  %v37_v2 = vld [vmem:[%s1442_s1 + $0x1] sm:$0x1]  ;;  %v24_v3 = vunpack.c.l.bf16 %v22_v0  ;;  %v35_v5 = vunpack.c.h.bf16 %v22_v0  ;;  %v48_v8 = vld [vmem:[%s1442_s1 + $0x2] sm:$0x1]  ;;  %v46_v10 = vunpack.c.l.bf16 %v44_v7  ;;  %v57_v18 = vunpack.c.h.bf16 %v44_v7 }
   0x3   :  { %v27_v4 = vunpack.c.l.bf16 %v26_v1  ;;  %v38_v6 = vunpack.c.l.bf16 %v37_v2  ;;  %v59_v9 = vld [vmem:[%s1442_s1 + $0x3] sm:$0x1]  ;;  %v49_v11 = vunpack.c.l.bf16 %v48_v8  ;;  %v70_v14 = vld [vmem:[%s1442_s1 + $0x4] sm:$0x1]  ;;  %v81_v15 = vld [vmem:[%s1442_s1 + $0x5] sm:$0x1]  ;;  %v68_v27 = vunpack.c.l.bf16 %v66_v13 }
   0x4   :  { %v60_v12 = vunpack.c.l.bf16 %v59_v9  ;;  %v71_v19 = vunpack.c.l.bf16 %v70_v14  ;;  %v92_v20 = vld [vmem:[%s1442_s1 + $0x6] sm:$0x1]  ;;  %v82_v23 = vunpack.c.l.bf16 %v81_v15  ;;  %v103_v24 = vld [vmem:[%s1442_s1 + $0x7] sm:$0x1]  ;;  %v88_v29 = vld [vmem:[%s1441_s0 + $0x18] sm:$0xff]   ;;  %v79_v31 = vunpack.c.h.bf16 %v66_v13 }
   0x5   :  { %v815_v16 = vperm.slane %v27_v4, 0  ;;  %v817_v17 = vperm.slane %v38_v6, 0  ;;  %v822_v21 = vperm.slane %v49_v11, 0  ;;  %v93_v32 = vunpack.c.l.bf16 %v92_v20  ;;  %v114_v33 = vld [vmem:[%s1442_s1 + $0x8] sm:$0x1]  ;;  %v110_v43 = vld [vmem:[%s1441_s0 + $0x20] sm:$0xff]  }
   0x6   :  { %v824_v22 = vperm.slane %v60_v12, 0  ;;  %v831_v28 = vperm.slane %v71_v19, 0  ;;  %v841_v36 = vperm.slane %v82_v23, 0  ;;  %v104_v37 = vunpack.c.l.bf16 %v103_v24  ;;  %v125_v39 = vld [vmem:[%s1442_s1 + $0x9] sm:$0x1]  ;;  %v176_v20 = vld [vmem:[%s1441_s0 + $0x38] sm:$0xff]  }
   0x7   :  { %v29_v25 = vmul.f32 %v815_v16, %v24_v3  ;;  %v40_v26 = vmul.f32 %v817_v17, %v35_v5  ;;  %v51_v30 = vmul.f32 %v822_v21, %v46_v10  ;;  %v90_v38 = vunpack.c.l.bf16 %v88_v29  ;;  %v136_v46 = vld [vmem:[%s1442_s1 + $0xa] sm:$0x1]  ;;  %v147_v52 = vld [vmem:[%s1442_s1 + $0xb] sm:$0x1]  ;;  %v158_v59 = vld [vmem:[%s1442_s1 + $0xc] sm:$0x1] }
   0x8   :  { %v62_v35 = vmul.f32 %v824_v22, %v57_v18  ;;  %v73_v41 = vmul.f32 %v831_v28, %v68_v27  ;;  %v847_v42 = vperm.slane %v93_v32, 0  ;;  %v115_v44 = vunpack.c.l.bf16 %v114_v33  ;;  %v132_v56 = vld [vmem:[%s1441_s0 + $0x28] sm:$0xff]   ;;  %v154_v5 = vld [vmem:[%s1441_s0 + $0x30] sm:$0xff]  }
   0x9   :  { %v42_v34 = vadd.f32 %v40_v26, %v29_v25  ;;  %v101_v45 = vunpack.c.h.bf16 %v88_v29  ;;  %v84_v48 = vmul.f32 %v841_v36, %v79_v31  ;;  %v856_v49 = vperm.slane %v104_v37, 0  ;;  %v169_v1 = vld [vmem:[%s1442_s1 + $0xd] sm:$0x1]  ;;  %v180_v8 = vld [vmem:[%s1442_s1 + $0xe] sm:$0x1]  ;;  %v198_v37 = vld [vmem:[%s1441_s0 + $0x40] sm:$0xff]  }
   0xa   :  { %v126_v50 = vunpack.c.l.bf16 %v125_v39  ;;  %v112_v51 = vunpack.c.l.bf16 %v110_v43  ;;  %v95_v54 = vmul.f32 %v847_v42, %v90_v38  ;;  %v862_v55 = vperm.slane %v115_v44, 0  ;;  %v191_v14 = vld [vmem:[%s1442_s1 + $0xf] sm:$0x1]  ;;  %v202_v25 = vld [vmem:[%s1442_s1 + $0x10] sm:$0x1] }
   0xb   :  { %v53_v40 = vadd.f32 %v51_v30, %v42_v34  ;;  %v137_v57 = vunpack.c.l.bf16 %v136_v46  ;;  %v123_v58 = vunpack.c.h.bf16 %v110_v43  ;;  %v106_v61 = vmul.f32 %v856_v49, %v101_v45  ;;  %v213_v32 = vld [vmem:[%s1442_s1 + $0x11] sm:$0x1] }
   0xc   :  { %v871_v62 = vperm.slane %v126_v50, 0  ;;  %v148_v63 = vunpack.c.l.bf16 %v147_v52  ;;  %v134_v0 = vunpack.c.l.bf16 %v132_v56  ;;  %v117_v3 = vmul.f32 %v862_v55, %v112_v51  ;;  %v220_v52 = vld [vmem:[%s1441_s0 + $0x48] sm:$0xff]  }
   0xd   :  { %v64_v47 = vadd.f32 %v62_v35, %v53_v40  ;;  %v877_v4 = vperm.slane %v137_v57, 0  ;;  %v159_v6 = vunpack.c.l.bf16 %v158_v59  ;;  %v145_v7 = vunpack.c.h.bf16 %v132_v56  ;;  %v224_v40 = vld [vmem:[%s1442_s1 + $0x12] sm:$0x1]  ;;  %v246_v56 = vld [vmem:[%s1442_s1 + $0x14] sm:$0x1] }
   0xe   :  { %v128_v10 = vmul.f32 %v871_v62, %v123_v58  ;;  %v886_v11 = vperm.slane %v148_v63, 0  ;;  %v170_v12 = vunpack.c.l.bf16 %v169_v1  ;;  %v156_v13 = vunpack.c.l.bf16 %v154_v5 }
   0xf   :  { %v75_v53 = vadd.f32 %v73_v41, %v64_v47  ;;  %v139_v18 = vmul.f32 %v877_v4, %v134_v0  ;;  %v892_v19 = vperm.slane %v159_v6, 0  ;;  %v181_v23 = vunpack.c.l.bf16 %v180_v8  ;;  %v235_v47 = vld [vmem:[%s1442_s1 + $0x13] sm:$0x1]  ;;  %v268_v0 = vld [vmem:[%s1442_s1 + $0x16] sm:$0x1] }
  0x10   :  { %v167_v24 = vunpack.c.h.bf16 %v154_v5  ;;  %v150_v27 = vmul.f32 %v886_v11, %v145_v7  ;;  %v901_v29 = vperm.slane %v170_v12, 0  ;;  %v192_v30 = vunpack.c.l.bf16 %v191_v14  ;;  %v242_v7 = vld [vmem:[%s1441_s0 + $0x50] sm:$0xff]  }
  0x11   :  { %v86_v60 = vadd.f32 %v84_v48, %v75_v53  ;;  %v178_v31 = vunpack.c.l.bf16 %v176_v20  ;;  %v161_v34 = vmul.f32 %v892_v19, %v156_v13  ;;  %v907_v35 = vperm.slane %v181_v23, 0  ;;  %v279_v14 = vld [vmem:[%s1442_s1 + $0x17] sm:$0x1] }
  0x12   :  { %v203_v38 = vunpack.c.l.bf16 %v202_v25  ;;  %v189_v39 = vunpack.c.h.bf16 %v176_v20  ;;  %v172_v43 = vmul.f32 %v901_v29, %v167_v24  ;;  %v916_v44 = vperm.slane %v192_v30, 0  ;;  %v23_v25 = vld [vmem:[%s1441_s0 + $0x100] sm:$0xff]  }
  0x13   :  { %v97_v2 = vadd.f32 %v95_v54, %v86_v60  ;;  %v214_v45 = vunpack.c.l.bf16 %v213_v32  ;;  %v200_v46 = vunpack.c.l.bf16 %v198_v37  ;;  %v183_v50 = vmul.f32 %v907_v35, %v178_v31  ;;  %v290_v31 = vld [vmem:[%s1442_s1 + $0x18] sm:$0x1] }
  0x14   :  { %v922_v51 = vperm.slane %v203_v38, 0  ;;  %v225_v53 = vunpack.c.l.bf16 %v224_v40  ;;  %v211_v54 = vunpack.c.h.bf16 %v198_v37  ;;  %v194_v58 = vmul.f32 %v916_v44, %v189_v39  ;;  %v286_v38 = vld [vmem:[%s1441_s0 + $0x60] sm:$0xff]   ;;  %v301_v39 = vld [vmem:[%s1442_s1 + $0x19] sm:$0x1] }
  0x15   :  { %v108_v9 = vadd.f32 %v106_v61, %v97_v2  ;;  %v931_v59 = vperm.slane %v214_v45, 0  ;;  %v236_v60 = vunpack.c.l.bf16 %v235_v47  ;;  %v257_v61 = vld [vmem:[%s1442_s1 + $0x15] sm:$0x1]  ;;  %v222_v63 = vunpack.c.l.bf16 %v220_v52 }
  0x16   :  { %v205_v2 = vmul.f32 %v922_v51, %v200_v46  ;;  %v247_v5 = vunpack.c.l.bf16 %v246_v56  ;;  %v233_v6 = vunpack.c.h.bf16 %v220_v52  ;;  %v258_v8 = vunpack.c.l.bf16 %v257_v61  ;;  %v45_v46 = vld [vmem:[%s1441_s0 + $0x108] sm:$0xff]   ;;  %v323_v61 = vld [vmem:[%s1442_s1 + $0x1b] sm:$0x1] }
  0x17   :  { %v119_v15 = vadd.f32 %v117_v3, %v108_v9  ;;  %v940_v3 = vperm.slane %v225_v53, 0  ;;  %v946_v12 = vperm.slane %v236_v60, 0  ;;  %v269_v13 = vunpack.c.l.bf16 %v268_v0  ;;  %v308_v53 = vld [vmem:[%s1441_s0 + $0x68] sm:$0xff]  }
  0x18   :  { %v244_v23 = vunpack.c.l.bf16 %v242_v7  ;;  %v955_v24 = vperm.slane %v247_v5, 0  ;;  %v280_v30 = vunpack.c.l.bf16 %v279_v14  ;;  %v25_v40 = vunpack.c.l.bf16 %v23_v25 }
  0x19   :  { %v130_v26 = vadd.f32 %v128_v10, %v119_v15  ;;  %v216_v10 = vmul.f32 %v931_v59, %v211_v54  ;;  %v264_v15 = vld [vmem:[%s1441_s0 + $0x58] sm:$0xff]   ;;  %v227_v20 = vmul.f32 %v940_v3, %v222_v63  ;;  %v966_v37 = vperm.slane %v269_v13, 0 }
  0x1a   :  { %v291_v45 = vunpack.c.l.bf16 %v290_v31  ;;  %v288_v52 = vunpack.c.l.bf16 %v286_v38  ;;  %v312_v54 = vld [vmem:[%s1442_s1 + $0x1a] sm:$0x1]  ;;  %v302_v60 = vunpack.c.l.bf16 %v301_v39  ;;  %v334_v63 = vld [vmem:[%s1442_s1 + $0x1c] sm:$0x1]  ;;  %v30_v0 = vmul.f32 %v815_v16, %v25_v40 }
  0x1b   :  { %v141_v33 = vadd.f32 %v139_v18, %v130_v26  ;;  %v255_v26 = vunpack.c.h.bf16 %v242_v7  ;;  %v58_v5 = vunpack.c.h.bf16 %v45_v46  ;;  %v324_v14 = vunpack.c.l.bf16 %v323_v61  ;;  %v89_v40 = vld [vmem:[%s1441_s0 + $0x118] sm:$0xff]  }
  0x1c   :  { %v995_v7 = vperm.slane %v291_v45, 0  ;;  %v1023_v45 = vld [vmem:[%s1441_s0 + $0x78] sm:$0xff]   ;;  %v91_v61 = vunpack.c.l.bf16 %v89_v40 }
  0x1d   :  { %v152_v41 = vadd.f32 %v150_v27, %v141_v33  ;;  %v960_v27 = vperm.slane %v258_v8, 0  ;;  %v238_v33 = vmul.f32 %v946_v12, %v233_v6  ;;  %v310_v8 = vunpack.c.l.bf16 %v308_v53 }
  0x1e   :  { %v293_v39 = vmul.f32 %v995_v7, %v288_v52 }
  0x1f   :  { %v163_v48 = vadd.f32 %v161_v34, %v152_v41  ;;  %v266_v34 = vunpack.c.l.bf16 %v264_v15  ;;  %v260_v47 = vmul.f32 %v960_v27, %v255_v26  ;;  %v335_v26 = vunpack.c.l.bf16 %v334_v63 }
  0x20   :  { %v102_v63 = vunpack.c.h.bf16 %v89_v40  ;;  %v411_v40 = vld [vmem:[%s1442_s1 + $0x23] sm:$0x1] }
  0x21   :  { %v174_v57 = vadd.f32 %v172_v43, %v163_v48  ;;  %v249_v43 = vmul.f32 %v955_v24, %v244_v23  ;;  %v277_v48 = vunpack.c.h.bf16 %v264_v15  ;;  %v330_v15 = vld [vmem:[%s1441_s0 + $0x70] sm:$0xff]   ;;  %v1006_v23 = vperm.slane %v302_v60, 0 }
  0x23   :  { %v185_v1 = vadd.f32 %v183_v50, %v174_v57  ;;  %v979_v50 = vperm.slane %v280_v30, 0  ;;  %v271_v57 = vmul.f32 %v966_v37, %v266_v34  ;;  %v345_v30 = vld [vmem:[%s1442_s1 + $0x1d] sm:$0x1] }
  0x25   :  { %v196_v9 = vadd.f32 %v194_v58, %v185_v1  ;;  %v299_v58 = vunpack.c.h.bf16 %v286_v38  ;;  %v36_v1 = vunpack.c.h.bf16 %v23_v25  ;;  %v282_v13 = vmul.f32 %v979_v50, %v277_v48 }
  0x26   :  { %v321_v25 = vunpack.c.h.bf16 %v308_v53  ;;  %v1030_v53 = vperm.slane %v335_v26, 0  ;;  %v107_v26 = vmul.f32 %v856_v49, %v102_v63 }
  0x27   :  { %v207_v18 = vadd.f32 %v205_v2, %v196_v9  ;;  %v47_v2 = vunpack.c.l.bf16 %v45_v46  ;;  %v313_v9 = vunpack.c.l.bf16 %v312_v54  ;;  %v41_v16 = vmul.f32 %v817_v17, %v36_v1 }
  0x28   :  { %v304_v52 = vmul.f32 %v1006_v23, %v299_v58  ;;  %v343_v54 = vunpack.c.h.bf16 %v330_v15  ;;  %v111_v58 = vld [vmem:[%s1441_s0 + $0x120] sm:$0xff]  }
  0x29   :  { %v218_v32 = vadd.f32 %v216_v10, %v207_v18  ;;  %v67_v10 = vld [vmem:[%s1441_s0 + $0x110] sm:$0xff]   ;;  %v52_v18 = vmul.f32 %v822_v21, %v47_v2  ;;  %v43_v31 = vadd.f32 %v41_v16, %v30_v0  ;;  %v1013_v17 = vperm.slane %v313_v9, 0  ;;  %v378_v9 = vld [vmem:[%s1442_s1 + $0x20] sm:$0x1] }
  0x2a   :  { %v80_v34 = vunpack.c.h.bf16 %v67_v10  ;;  %v332_v21 = vunpack.c.l.bf16 %v330_v15  ;;  %v365_v15 = vunpack.c.h.bf16 %v1023_v45 }
  0x2b   :  { %v229_v41 = vadd.f32 %v227_v20, %v218_v32  ;;  %v63_v32 = vmul.f32 %v824_v22, %v58_v5  ;;  %v356_v22 = vld [vmem:[%s1442_s1 + $0x1e] sm:$0x1]  ;;  %v54_v46 = vadd.f32 %v52_v18, %v43_v31  ;;  %v315_v1 = vmul.f32 %v1013_v17, %v310_v8  ;;  %v389_v18 = vld [vmem:[%s1442_s1 + $0x21] sm:$0x1] }
  0x2c   :  { %v85_v60 = vmul.f32 %v841_v36, %v80_v34  ;;  %v357_v2 = vunpack.c.l.bf16 %v356_v22  ;;  %v374_v36 = vld [vmem:[%s1441_s0 + $0x80] sm:$0xff]   ;;  %v124_v31 = vunpack.c.h.bf16 %v111_v58  ;;  %v379_v34 = vunpack.c.l.bf16 %v378_v9 }
  0x2d   :  { %v240_v56 = vadd.f32 %v238_v33, %v229_v41  ;;  %v69_v33 = vunpack.c.l.bf16 %v67_v10  ;;  %v1018_v41 = vperm.slane %v324_v14, 0  ;;  %v96_v10 = vmul.f32 %v847_v42, %v91_v61 }
  0x2e   :  { %v337_v14 = vmul.f32 %v1030_v53, %v332_v21  ;;  %v390_v21 = vunpack.c.l.bf16 %v389_v18  ;;  %v1080_v63 = vperm.slane %v379_v34, 0  ;;  %v444_v34 = vld [vmem:[%s1442_s1 + $0x26] sm:$0x1] }
  0x2f   :  { %v251_v6 = vadd.f32 %v249_v43, %v240_v56  ;;  %v346_v43 = vunpack.c.l.bf16 %v345_v30  ;;  %v367_v56 = vld [vmem:[%s1442_s1 + $0x1f] sm:$0x1]  ;;  %v326_v5 = vmul.f32 %v1018_v41, %v321_v25  ;;  %v113_v30 = vunpack.c.l.bf16 %v111_v58 }
  0x30   :  { %v368_v16 = vunpack.c.l.bf16 %v367_v56  ;;  %v129_v56 = vmul.f32 %v871_v62, %v124_v31 }
  0x31   :  { %v262_v20 = vadd.f32 %v260_v47, %v251_v6  ;;  %v74_v47 = vmul.f32 %v831_v28, %v69_v33  ;;  %v354_v28 = vunpack.c.l.bf16 %v1023_v45  ;;  %v1042_v6 = vperm.slane %v346_v43, 0 }
  0x32   :  { %v376_v33 = vunpack.c.l.bf16 %v374_v36  ;;  %v118_v49 = vmul.f32 %v862_v55, %v113_v30  ;;  %v1070_v22 = vperm.slane %v368_v16, 0  ;;  %v177_v30 = vld [vmem:[%s1441_s0 + $0x138] sm:$0xff]  }
  0x33   :  { %v273_v38 = vadd.f32 %v271_v57, %v262_v20  ;;  %v65_v57 = vadd.f32 %v63_v32, %v54_v46  ;;  %v400_v20 = vld [vmem:[%s1442_s1 + $0x22] sm:$0x1]  ;;  %v1060_v32 = vperm.slane %v357_v2, 0  ;;  %v387_v46 = vunpack.c.h.bf16 %v374_v36 }
  0x34   :  { %v1085_v2 = vperm.slane %v390_v21, 0  ;;  %v370_v62 = vmul.f32 %v1070_v22, %v365_v15 }
  0x35   :  { %v284_v48 = vadd.f32 %v282_v13, %v273_v38  ;;  %v76_v8 = vadd.f32 %v74_v47, %v65_v57  ;;  %v133_v38 = vld [vmem:[%s1441_s0 + $0x128] sm:$0xff]   ;;  %v359_v55 = vmul.f32 %v1060_v32, %v354_v28  ;;  %v433_v28 = vld [vmem:[%s1442_s1 + $0x25] sm:$0x1] }
  0x36   :  { %v396_v47 = vld [vmem:[%s1441_s0 + $0x88] sm:$0xff]   ;;  %v135_v57 = vunpack.c.l.bf16 %v133_v38  ;;  %v392_v31 = vmul.f32 %v1085_v2, %v387_v46 }
  0x37   :  { %v295_v0 = vadd.f32 %v293_v39, %v284_v48  ;;  %v87_v25 = vadd.f32 %v85_v60, %v76_v8  ;;  %v348_v39 = vmul.f32 %v1042_v6, %v343_v54  ;;  %v401_v48 = vunpack.c.l.bf16 %v400_v20 }
  0x38   :  { %v146_v60 = vunpack.c.h.bf16 %v133_v38  ;;  %v398_v58 = vunpack.c.l.bf16 %v396_v47  ;;  %v140_v36 = vmul.f32 %v877_v4, %v135_v57  ;;  %v409_v15 = vunpack.c.h.bf16 %v396_v47 }
  0x39   :  { %v306_v13 = vadd.f32 %v304_v52, %v295_v0  ;;  %v98_v43 = vadd.f32 %v96_v10, %v87_v25  ;;  %v422_v52 = vld [vmem:[%s1442_s1 + $0x24] sm:$0x1]  ;;  %v412_v0 = vunpack.c.l.bf16 %v411_v40  ;;  %v1089_v8 = vperm.slane %v401_v48, 0 }
  0x3a   :  { %v423_v10 = vunpack.c.l.bf16 %v422_v52  ;;  %v151_v16 = vmul.f32 %v886_v11, %v146_v60  ;;  %v381_v25 = vmul.f32 %v1080_v63, %v376_v33  ;;  %v455_v11 = vld [vmem:[%s1442_s1 + $0x27] sm:$0x1]  ;;  %v179_v48 = vunpack.c.l.bf16 %v177_v30 }
  0x3b   :  { %v317_v42 = vadd.f32 %v315_v1, %v306_v13  ;;  %v109_v54 = vadd.f32 %v107_v26, %v98_v43  ;;  %v155_v1 = vld [vmem:[%s1441_s0 + $0x130] sm:$0xff]   ;;  %v1099_v26 = vperm.slane %v412_v0, 0  ;;  %v403_v21 = vmul.f32 %v1089_v8, %v398_v58  ;;  %v199_v60 = vld [vmem:[%s1441_s0 + $0x140] sm:$0xff]  }
  0x3c   :  { %v418_v13 = vld [vmem:[%s1441_s0 + $0x90] sm:$0xff]   ;;  %v157_v18 = vunpack.c.l.bf16 %v155_v1  ;;  %v168_v20 = vunpack.c.h.bf16 %v155_v1  ;;  %v1113_v43 = vperm.slane %v423_v10, 0  ;;  %v190_v52 = vunpack.c.h.bf16 %v177_v30  ;;  %v488_v10 = vld [vmem:[%s1442_s1 + $0x2a] sm:$0x1] }
  0x3d   :  { %v328_v45 = vadd.f32 %v326_v5, %v317_v42  ;;  %v120_v5 = vadd.f32 %v118_v49, %v109_v54  ;;  %v434_v42 = vunpack.c.l.bf16 %v433_v28  ;;  %v420_v40 = vunpack.c.l.bf16 %v418_v13  ;;  %v440_v49 = vld [vmem:[%s1441_s0 + $0x98] sm:$0xff]  }
  0x3e   :  { %v162_v33 = vmul.f32 %v892_v19, %v157_v18  ;;  %v173_v47 = vmul.f32 %v901_v29, %v168_v20  ;;  %v414_v54 = vmul.f32 %v1099_v26, %v409_v15  ;;  %v456_v57 = vunpack.c.l.bf16 %v455_v11 }
  0x3f   :  { %v339_v61 = vadd.f32 %v337_v14, %v328_v45  ;;  %v131_v14 = vadd.f32 %v129_v56, %v120_v5  ;;  %v466_v45 = vld [vmem:[%s1442_s1 + $0x28] sm:$0x1]  ;;  %v445_v56 = vunpack.c.l.bf16 %v444_v34  ;;  %v184_v1 = vmul.f32 %v907_v35, %v179_v48 }
  0x40   :  { %v425_v29 = vmul.f32 %v1113_v43, %v420_v40  ;;  %v442_v5 = vunpack.c.l.bf16 %v440_v49  ;;  %v195_v35 = vmul.f32 %v916_v44, %v190_v52  ;;  %v453_v20 = vunpack.c.h.bf16 %v440_v49  ;;  %v243_v52 = vld [vmem:[%s1441_s0 + $0x150] sm:$0xff]  }
  0x41   :  { %v350_v9 = vadd.f32 %v348_v39, %v339_v61  ;;  %v142_v38 = vadd.f32 %v140_v36, %v131_v14  ;;  %v431_v61 = vunpack.c.h.bf16 %v418_v13  ;;  %v467_v36 = vunpack.c.l.bf16 %v466_v45 }
  0x42   :  { %v201_v13 = vunpack.c.l.bf16 %v199_v60  ;;  %v212_v14 = vunpack.c.h.bf16 %v199_v60  ;;  %v1140_v18 = vperm.slane %v445_v56, 0  ;;  %v510_v56 = vld [vmem:[%s1442_s1 + $0x2c] sm:$0x1] }
  0x43   :  { %v361_v4 = vadd.f32 %v359_v55, %v350_v9  ;;  %v153_v46 = vadd.f32 %v151_v16, %v142_v38  ;;  %v1126_v55 = vperm.slane %v434_v42, 0  ;;  %v477_v9 = vld [vmem:[%s1442_s1 + $0x29] sm:$0x1]  ;;  %v1152_v38 = vperm.slane %v467_v36, 0 }
  0x44   :  { %v478_v30 = vunpack.c.l.bf16 %v477_v9  ;;  %v206_v42 = vmul.f32 %v922_v51, %v201_v13  ;;  %v217_v40 = vmul.f32 %v931_v59, %v212_v14  ;;  %v245_v9 = vunpack.c.l.bf16 %v243_v52  ;;  %v265_v14 = vld [vmem:[%s1441_s0 + $0x158] sm:$0xff]  }
  0x45   :  { %v372_v39 = vadd.f32 %v370_v62, %v361_v4  ;;  %v164_v0 = vadd.f32 %v162_v33, %v153_v46  ;;  %v462_v62 = vld [vmem:[%s1441_s0 + $0xa0] sm:$0xff]   ;;  %v1142_v4 = vperm.slane %v456_v57, 0  ;;  %v436_v15 = vmul.f32 %v1126_v55, %v431_v61 }
  0x46   :  { %v464_v11 = vunpack.c.l.bf16 %v462_v62  ;;  %v489_v33 = vunpack.c.l.bf16 %v488_v10  ;;  %v511_v13 = vunpack.c.l.bf16 %v510_v56 }
  0x47   :  { %v383_v19 = vadd.f32 %v381_v25, %v372_v39  ;;  %v175_v28 = vadd.f32 %v173_v47, %v164_v0  ;;  %v221_v25 = vld [vmem:[%s1441_s0 + $0x148] sm:$0xff]   ;;  %v447_v47 = vmul.f32 %v1140_v18, %v442_v5  ;;  %v458_v48 = vmul.f32 %v1142_v4, %v453_v20 }
  0x48   :  { %v484_v39 = vld [vmem:[%s1441_s0 + $0xa8] sm:$0xff]   ;;  %v223_v49 = vunpack.c.l.bf16 %v221_v25  ;;  %v234_v45 = vunpack.c.h.bf16 %v221_v25  ;;  %v469_v61 = vmul.f32 %v1152_v38, %v464_v11  ;;  %v554_v11 = vld [vmem:[%s1442_s1 + $0x30] sm:$0x1] }
  0x49   :  { %v394_v58 = vadd.f32 %v392_v31, %v383_v19  ;;  %v499_v31 = vld [vmem:[%s1442_s1 + $0x2b] sm:$0x1]  ;;  %v186_v44 = vadd.f32 %v184_v1, %v175_v28  ;;  %v475_v19 = vunpack.c.h.bf16 %v462_v62  ;;  %v486_v0 = vunpack.c.l.bf16 %v484_v39  ;;  %v532_v5 = vld [vmem:[%s1442_s1 + $0x2e] sm:$0x1]  ;;  %v543_v25 = vld [vmem:[%s1442_s1 + $0x2f] sm:$0x1] }
  0x4a   :  { %v500_v51 = vunpack.c.l.bf16 %v499_v31  ;;  %v228_v57 = vmul.f32 %v940_v3, %v223_v49  ;;  %v1170_v1 = vperm.slane %v489_v33, 0  ;;  %v239_v3 = vmul.f32 %v946_v12, %v234_v45 }
  0x4b   :  { %v405_v16 = vadd.f32 %v403_v21, %v394_v58  ;;  %v197_v21 = vadd.f32 %v195_v35, %v186_v44  ;;  %v521_v58 = vld [vmem:[%s1442_s1 + $0x2d] sm:$0x1]  ;;  %v256_v62 = vunpack.c.h.bf16 %v243_v52  ;;  %v497_v28 = vunpack.c.h.bf16 %v484_v39 }
  0x4c   :  { %v1182_v35 = vperm.slane %v500_v51, 0  ;;  %v522_v20 = vunpack.c.l.bf16 %v521_v58  ;;  %v250_v12 = vmul.f32 %v955_v24, %v245_v9  ;;  %v491_v31 = vmul.f32 %v1170_v1, %v486_v0 }
  0x4d   :  { %v416_v34 = vadd.f32 %v414_v54, %v405_v16  ;;  %v1163_v54 = vperm.slane %v478_v30, 0  ;;  %v208_v59 = vadd.f32 %v206_v42, %v197_v21  ;;  %v533_v42 = vunpack.c.l.bf16 %v532_v5 }
  0x4e   :  { %v261_v39 = vmul.f32 %v960_v27, %v256_v62  ;;  %v267_v21 = vunpack.c.l.bf16 %v265_v14  ;;  %v502_v24 = vmul.f32 %v1182_v35, %v497_v28  ;;  %v1201_v45 = vperm.slane %v511_v13, 0  ;;  %v309_v62 = vld [vmem:[%s1441_s0 + $0x168] sm:$0xff]   ;;  %v576_v13 = vld [vmem:[%s1442_s1 + $0x32] sm:$0x1] }
  0x4f   :  { %v427_v46 = vadd.f32 %v425_v29, %v416_v34  ;;  %v506_v29 = vld [vmem:[%s1441_s0 + $0xb0] sm:$0xff]   ;;  %v219_v36 = vadd.f32 %v217_v40, %v208_v59  ;;  %v480_v16 = vmul.f32 %v1163_v54, %v475_v19  ;;  %v528_v34 = vld [vmem:[%s1441_s0 + $0xb8] sm:$0xff]   ;;  %v278_v40 = vunpack.c.h.bf16 %v265_v14 }
  0x50   :  { %v508_v44 = vunpack.c.l.bf16 %v506_v29  ;;  %v1206_v51 = vperm.slane %v522_v20, 0  ;;  %v272_v19 = vmul.f32 %v966_v37, %v267_v21  ;;  %v530_v27 = vunpack.c.l.bf16 %v528_v34 }
  0x51   :  { %v438_v60 = vadd.f32 %v436_v15, %v427_v46  ;;  %v230_v15 = vadd.f32 %v228_v57, %v219_v36  ;;  %v544_v46 = vunpack.c.l.bf16 %v543_v25  ;;  %v1209_v59 = vperm.slane %v533_v42, 0 }
  0x52   :  { %v555_v57 = vunpack.c.l.bf16 %v554_v11  ;;  %v283_v58 = vmul.f32 %v979_v50, %v278_v40  ;;  %v513_v37 = vmul.f32 %v1201_v45, %v508_v44  ;;  %v587_v50 = vld [vmem:[%s1442_s1 + $0x33] sm:$0x1]  ;;  %v322_v11 = vunpack.c.h.bf16 %v309_v62 }
  0x53   :  { %v449_v10 = vadd.f32 %v447_v47, %v438_v60  ;;  %v241_v33 = vadd.f32 %v239_v3, %v230_v15  ;;  %v287_v47 = vld [vmem:[%s1441_s0 + $0x160] sm:$0xff]   ;;  %v565_v60 = vld [vmem:[%s1442_s1 + $0x31] sm:$0x1]  ;;  %v541_v3 = vunpack.c.h.bf16 %v528_v34  ;;  %v1219_v9 = vperm.slane %v544_v46, 0 }
  0x54   :  { %v300_v5 = vunpack.c.h.bf16 %v287_v47  ;;  %v566_v28 = vunpack.c.l.bf16 %v565_v60  ;;  %v535_v25 = vmul.f32 %v1209_v59, %v530_v27  ;;  %v311_v34 = vunpack.c.l.bf16 %v309_v62  ;;  %v331_v40 = vld [vmem:[%s1441_s0 + $0x170] sm:$0xff]  }
  0x55   :  { %v460_v30 = vadd.f32 %v458_v48, %v449_v10  ;;  %v519_v48 = vunpack.c.h.bf16 %v506_v29  ;;  %v252_v52 = vadd.f32 %v250_v12, %v241_v33  ;;  %v289_v29 = vunpack.c.l.bf16 %v287_v47  ;;  %v594_v27 = vld [vmem:[%s1441_s0 + $0xd0] sm:$0xff]  }
  0x56   :  { %v1233_v12 = vperm.slane %v555_v57, 0  ;;  %v305_v42 = vmul.f32 %v1006_v23, %v300_v5  ;;  %v546_v33 = vmul.f32 %v1219_v9, %v541_v3  ;;  %v588_v21 = vunpack.c.l.bf16 %v587_v50  ;;  %v609_v57 = vld [vmem:[%s1442_s1 + $0x35] sm:$0x1]  ;;  %v631_v62 = vld [vmem:[%s1442_s1 + $0x37] sm:$0x1] }
  0x57   :  { %v471_v49 = vadd.f32 %v469_v61, %v460_v30  ;;  %v550_v61 = vld [vmem:[%s1441_s0 + $0xc0] sm:$0xff]   ;;  %v263_v0 = vadd.f32 %v261_v39, %v252_v52  ;;  %v524_v10 = vmul.f32 %v1206_v51, %v519_v48  ;;  %v572_v30 = vld [vmem:[%s1441_s0 + $0xc8] sm:$0xff]   ;;  %v577_v39 = vunpack.c.l.bf16 %v576_v13 }
  0x58   :  { %v552_v15 = vunpack.c.l.bf16 %v550_v61  ;;  %v316_v47 = vmul.f32 %v1013_v17, %v311_v34  ;;  %v574_v52 = vunpack.c.l.bf16 %v572_v30  ;;  %v620_v17 = vld [vmem:[%s1442_s1 + $0x36] sm:$0x1] }
  0x59   :  { %v482_v56 = vadd.f32 %v480_v16, %v471_v49  ;;  %v274_v14 = vadd.f32 %v272_v19, %v263_v0  ;;  %v294_v16 = vmul.f32 %v995_v7, %v289_v29  ;;  %v563_v49 = vunpack.c.h.bf16 %v550_v61 }
  0x5a   :  { %v557_v23 = vmul.f32 %v1233_v12, %v552_v15  ;;  %v327_v61 = vmul.f32 %v1018_v41, %v322_v11  ;;  %v333_v0 = vunpack.c.l.bf16 %v331_v40  ;;  %v1263_v5 = vperm.slane %v577_v39, 0  ;;  %v616_v15 = vld [vmem:[%s1441_s0 + $0xd8] sm:$0xff]  }
  0x5b   :  { %v493_v36 = vadd.f32 %v491_v31, %v482_v56  ;;  %v598_v31 = vld [vmem:[%s1442_s1 + $0x34] sm:$0x1]  ;;  %v285_v44 = vadd.f32 %v283_v58, %v274_v14  ;;  %v353_v56 = vld [vmem:[%s1441_s0 + $0x178] sm:$0xff]   ;;  %v344_v58 = vunpack.c.h.bf16 %v331_v40  ;;  %v596_v41 = vunpack.c.l.bf16 %v594_v27 }
  0x5c   :  { %v599_v19 = vunpack.c.l.bf16 %v598_v31  ;;  %v355_v13 = vunpack.c.l.bf16 %v353_v56  ;;  %v610_v14 = vunpack.c.l.bf16 %v609_v57  ;;  %v632_v11 = vunpack.c.l.bf16 %v631_v62 }
  0x5d   :  { %v504_v20 = vadd.f32 %v502_v24, %v493_v36  ;;  %v1246_v24 = vperm.slane %v566_v28, 0  ;;  %v296_v46 = vadd.f32 %v294_v16, %v285_v44  ;;  %v585_v36 = vunpack.c.h.bf16 %v572_v30 }
  0x5e   :  { %v338_v28 = vmul.f32 %v1030_v53, %v333_v0  ;;  %v621_v16 = vunpack.c.l.bf16 %v620_v17  ;;  %v349_v31 = vmul.f32 %v1042_v6, %v344_v58  ;;  %v366_v44 = vunpack.c.h.bf16 %v353_v56  ;;  %v638_v0 = vld [vmem:[%s1441_s0 + $0xe0] sm:$0xff]  }
  0x5f   :  { %v515_v7 = vadd.f32 %v513_v37, %v504_v20  ;;  %v307_v60 = vadd.f32 %v305_v42, %v296_v46  ;;  %v1265_v37 = vperm.slane %v588_v21, 0  ;;  %v568_v3 = vmul.f32 %v1246_v24, %v563_v49  ;;  %v375_v20 = vld [vmem:[%s1441_s0 + $0x180] sm:$0xff]  }
  0x60   :  { %v579_v42 = vmul.f32 %v1263_v5, %v574_v52  ;;  %v360_v21 = vmul.f32 %v1060_v32, %v355_v13  ;;  %v377_v40 = vunpack.c.l.bf16 %v375_v20  ;;  %v1287_v46 = vperm.slane %v610_v14, 0  ;;  %v653_v52 = vld [vmem:[%s1442_s1 + $0x39] sm:$0x1]  ;;  %v419_v13 = vld [vmem:[%s1441_s0 + $0x190] sm:$0xff]  }
  0x61   :  { %v526_v48 = vadd.f32 %v524_v10, %v515_v7  ;;  %v318_v10 = vadd.f32 %v316_v47, %v307_v60  ;;  %v590_v34 = vmul.f32 %v1265_v37, %v585_v36  ;;  %v607_v7 = vunpack.c.h.bf16 %v594_v27 }
  0x62   :  { %v618_v6 = vunpack.c.l.bf16 %v616_v15  ;;  %v1289_v47 = vperm.slane %v621_v16, 0  ;;  %v371_v32 = vmul.f32 %v1070_v22, %v366_v44  ;;  %v388_v56 = vunpack.c.h.bf16 %v375_v20 }
  0x63   :  { %v537_v29 = vadd.f32 %v535_v25, %v526_v48  ;;  %v1275_v25 = vperm.slane %v599_v19, 0  ;;  %v329_v30 = vadd.f32 %v327_v61, %v318_v10  ;;  %v397_v48 = vld [vmem:[%s1441_s0 + $0x188] sm:$0xff]   ;;  %v629_v57 = vunpack.c.h.bf16 %v616_v15  ;;  %v664_v61 = vld [vmem:[%s1442_s1 + $0x3a] sm:$0x1] }
  0x64   :  { %v1299_v17 = vperm.slane %v632_v11, 0  ;;  %v399_v36 = vunpack.c.l.bf16 %v397_v48  ;;  %v612_v22 = vmul.f32 %v1287_v46, %v607_v7  ;;  %v623_v62 = vmul.f32 %v1289_v47, %v618_v6 }
  0x65   :  { %v548_v50 = vadd.f32 %v546_v33, %v537_v29  ;;  %v642_v33 = vld [vmem:[%s1442_s1 + $0x38] sm:$0x1]  ;;  %v340_v39 = vadd.f32 %v338_v28, %v329_v30  ;;  %v382_v29 = vmul.f32 %v1080_v63, %v377_v40  ;;  %v654_v10 = vunpack.c.l.bf16 %v653_v52  ;;  %v675_v28 = vld [vmem:[%s1442_s1 + $0x3b] sm:$0x1] }
  0x66   :  { %v643_v60 = vunpack.c.l.bf16 %v642_v33  ;;  %v665_v63 = vunpack.c.l.bf16 %v664_v61  ;;  %v393_v14 = vmul.f32 %v1085_v2, %v388_v56  ;;  %v410_v16 = vunpack.c.h.bf16 %v397_v48 }
  0x67   :  { %v559_v53 = vadd.f32 %v557_v23, %v548_v50  ;;  %v601_v23 = vmul.f32 %v1275_v25, %v596_v41  ;;  %v351_v19 = vadd.f32 %v349_v31, %v340_v39  ;;  %v660_v50 = vld [vmem:[%s1441_s0 + $0xe8] sm:$0xff]   ;;  %v634_v15 = vmul.f32 %v1299_v17, %v629_v57  ;;  %v708_v57 = vld [vmem:[%s1442_s1 + $0x3e] sm:$0x1] }
  0x68   :  { %v640_v30 = vunpack.c.l.bf16 %v638_v0  ;;  %v1321_v31 = vperm.slane %v643_v60, 0  ;;  %v676_v44 = vunpack.c.l.bf16 %v675_v28  ;;  %v421_v11 = vunpack.c.l.bf16 %v419_v13 }
  0x69   :  { %v570_v49 = vadd.f32 %v568_v3, %v559_v53  ;;  %v362_v58 = vadd.f32 %v360_v21, %v351_v19  ;;  %v686_v53 = vld [vmem:[%s1442_s1 + $0x3c] sm:$0x1]  ;;  %v651_v33 = vunpack.c.h.bf16 %v638_v0  ;;  %v1327_v39 = vperm.slane %v654_v10, 0 }
  0x6a   :  { %v662_v2 = vunpack.c.l.bf16 %v660_v50  ;;  %v441_v21 = vld [vmem:[%s1441_s0 + $0x198] sm:$0xff]   ;;  %v1332_v40 = vperm.slane %v665_v63, 0  ;;  %v415_v48 = vmul.f32 %v1099_v26, %v410_v16  ;;  %v645_v52 = vmul.f32 %v1321_v31, %v640_v30 }
  0x6b   :  { %v581_v27 = vadd.f32 %v579_v42, %v570_v49  ;;  %v373_v41 = vadd.f32 %v371_v32, %v362_v58  ;;  %v697_v49 = vld [vmem:[%s1442_s1 + $0x3d] sm:$0x1]  ;;  %v673_v19 = vunpack.c.h.bf16 %v660_v50  ;;  %v687_v32 = vunpack.c.l.bf16 %v686_v53 }
  0x6c   :  { %v1339_v56 = vperm.slane %v676_v44, 0  ;;  %v426_v61 = vmul.f32 %v1113_v43, %v421_v11  ;;  %v443_v26 = vunpack.c.l.bf16 %v441_v21  ;;  %v656_v58 = vmul.f32 %v1327_v39, %v651_v33 }
  0x6d   :  { %v592_v3 = vadd.f32 %v590_v34, %v581_v27  ;;  %v384_v42 = vadd.f32 %v382_v29, %v373_v41  ;;  %v404_v34 = vmul.f32 %v1089_v8, %v399_v36  ;;  %v432_v8 = vunpack.c.h.bf16 %v419_v13  ;;  %v682_v27 = vld [vmem:[%s1441_s0 + $0xf0] sm:$0xff]   ;;  %v463_v36 = vld [vmem:[%s1441_s0 + $0x1a0] sm:$0xff]  }
  0x6e   :  { %v698_v29 = vunpack.c.l.bf16 %v697_v49  ;;  %v454_v28 = vunpack.c.h.bf16 %v441_v21  ;;  %v684_v13 = vunpack.c.l.bf16 %v682_v27  ;;  %v1357_v50 = vperm.slane %v687_v32, 0 }
  0x6f   :  { %v603_v20 = vadd.f32 %v601_v23, %v592_v3  ;;  %v395_v6 = vadd.f32 %v393_v14, %v384_v42  ;;  %v667_v3 = vmul.f32 %v1332_v40, %v662_v2  ;;  %v437_v10 = vmul.f32 %v1126_v55, %v432_v8  ;;  %v704_v14 = vld [vmem:[%s1441_s0 + $0xf8] sm:$0xff]   ;;  %v485_v42 = vld [vmem:[%s1441_s0 + $0x1a8] sm:$0xff]  }
  0x70   :  { %v709_v63 = vunpack.c.l.bf16 %v708_v57  ;;  %v678_v41 = vmul.f32 %v1339_v56, %v673_v19  ;;  %v695_v44 = vunpack.c.h.bf16 %v682_v27  ;;  %v1364_v53 = vperm.slane %v698_v29, 0 }
  0x71   :  { %v614_v7 = vadd.f32 %v612_v22, %v603_v20  ;;  %v406_v60 = vadd.f32 %v404_v34, %v395_v6  ;;  %v719_v22 = vld [vmem:[%s1442_s1 + $0x3f] sm:$0x1]  ;;  %v448_v20 = vmul.f32 %v1140_v18, %v443_v26  ;;  %v459_v11 = vmul.f32 %v1142_v4, %v454_v28  ;;  %v507_v4 = vld [vmem:[%s1441_s0 + $0x1b0] sm:$0xff]  }
  0x72   :  { %v720_v55 = vunpack.c.l.bf16 %v719_v22  ;;  %v689_v2 = vmul.f32 %v1357_v50, %v684_v13  ;;  %v706_v21 = vunpack.c.l.bf16 %v704_v14  ;;  %v1371_v49 = vperm.slane %v709_v63, 0 }
  0x73   :  { %v625_v23 = vadd.f32 %v623_v62, %v614_v7  ;;  %v417_v62 = vadd.f32 %v415_v48, %v406_v60  ;;  %v476_v7 = vunpack.c.h.bf16 %v463_v36  ;;  %v487_v48 = vunpack.c.l.bf16 %v485_v42 }
  0x74   :  { %v1375_v19 = vperm.slane %v720_v55, 0  ;;  %v498_v57 = vunpack.c.h.bf16 %v485_v42 }
  0x75   :  { %v636_v0 = vadd.f32 %v634_v15, %v625_v23  ;;  %v428_v16 = vadd.f32 %v426_v61, %v417_v62  ;;  %v465_v15 = vunpack.c.l.bf16 %v463_v36  ;;  %v700_v23 = vmul.f32 %v1364_v53, %v695_v44  ;;  %v529_v36 = vld [vmem:[%s1441_s0 + $0x1b8] sm:$0xff]  }
  0x76   :  { %v481_v27 = vmul.f32 %v1163_v54, %v476_v7  ;;  %v711_v61 = vmul.f32 %v1371_v49, %v706_v21  ;;  %v503_v22 = vmul.f32 %v1182_v35, %v498_v57  ;;  %v520_v62 = vunpack.c.h.bf16 %v507_v4 }
  0x77   :  { %v647_v43 = vadd.f32 %v645_v52, %v636_v0  ;;  %v439_v34 = vadd.f32 %v437_v10, %v428_v16  ;;  %v470_v6 = vmul.f32 %v1152_v38, %v465_v15  ;;  %v717_v52 = vunpack.c.h.bf16 %v704_v14  ;;  %v573_v15 = vld [vmem:[%s1441_s0 + $0x1c8] sm:$0xff]  }
  0x78   :  { %v492_v38 = vmul.f32 %v1170_v1, %v487_v48  ;;  %v509_v0 = vunpack.c.l.bf16 %v507_v4  ;;  %v551_v1 = vld [vmem:[%s1441_s0 + $0x1c0] sm:$0xff]   ;;  %v542_v14 = vunpack.c.h.bf16 %v529_v36  ;;  %v586_v7 = vunpack.c.h.bf16 %v573_v15 }
  0x79   :  { %v658_v30 = vadd.f32 %v656_v58, %v647_v43  ;;  %v450_v18 = vadd.f32 %v448_v20, %v439_v34  ;;  %v722_v29 = vmul.f32 %v1375_v19, %v717_v52  ;;  %v531_v43 = vunpack.c.l.bf16 %v529_v36 }
  0x7a   :  { %v514_v28 = vmul.f32 %v1201_v45, %v509_v0  ;;  %v553_v35 = vunpack.c.l.bf16 %v551_v1  ;;  %v564_v44 = vunpack.c.h.bf16 %v551_v1  ;;  %v575_v34 = vunpack.c.l.bf16 %v573_v15 }
  0x7b   :  { %v669_v33 = vadd.f32 %v667_v3, %v658_v30  ;;  %v461_v32 = vadd.f32 %v459_v11, %v450_v18  ;;  %v536_v20 = vmul.f32 %v1209_v59, %v531_v43  ;;  %v547_v30 = vmul.f32 %v1219_v9, %v542_v14  ;;  %v617_v9 = vld [vmem:[%s1441_s0 + $0x1d8] sm:$0xff]  }
  0x7c   :  { %v558_v42 = vmul.f32 %v1233_v12, %v553_v35  ;;  %v569_v59 = vmul.f32 %v1246_v24, %v564_v44  ;;  %v591_v12 = vmul.f32 %v1265_v37, %v586_v7  ;;  %v639_v24 = vld [vmem:[%s1441_s0 + $0x1e0] sm:$0xff]   ;;  %v630_v4 = vunpack.c.h.bf16 %v617_v9  ;;  %v661_v37 = vld [vmem:[%s1441_s0 + $0x1e8] sm:$0xff]  }
  0x7d   :  { %v680_v8 = vadd.f32 %v678_v41, %v669_v33  ;;  %v472_v26 = vadd.f32 %v470_v6, %v461_v32  ;;  %v525_v41 = vmul.f32 %v1206_v51, %v520_v62  ;;  %v595_v51 = vld [vmem:[%s1441_s0 + $0x1d0] sm:$0xff]   ;;  %v641_v57 = vunpack.c.l.bf16 %v639_v24 }
  0x7e   :  { %v597_v21 = vunpack.c.l.bf16 %v595_v51  ;;  %v608_v6 = vunpack.c.h.bf16 %v595_v51  ;;  %v663_v0 = vunpack.c.l.bf16 %v661_v37  ;;  %v767_v35 = vmov 0  }
  0x7f   :  { %v691_v60 = vadd.f32 %v689_v2, %v680_v8  ;;  %v483_v3 = vadd.f32 %v481_v27, %v472_v26  ;;  %v580_v2 = vmul.f32 %v1263_v5, %v575_v34  ;;  %764 = vset.pattern.permute.xlu1 %v767_v35  ;;  %765 = vset.pattern.permute.xlu0 %v767_v35 }
  0x80   :  { %v602_v8 = vmul.f32 %v1275_v25, %v597_v21  ;;  %v613_v5 = vmul.f32 %v1287_v46, %v608_v6  ;;  %v635_v25 = vmul.f32 %v1299_v17, %v630_v4  ;;  %v683_v46 = vld [vmem:[%s1441_s0 + $0x1f0] sm:$0xff]   ;;  %v705_v17 = vld [vmem:[%s1441_s0 + $0x1f8] sm:$0xff]  }
  0x81   :  { %v702_v58 = vadd.f32 %v700_v23, %v691_v60  ;;  %v494_v10 = vadd.f32 %v492_v38, %v483_v3  ;;  %v619_v23 = vunpack.c.l.bf16 %v617_v9  ;;  %v646_v38 = vmul.f32 %v1321_v31, %v641_v57 }
  0x82   :  { %v668_v3 = vmul.f32 %v1332_v40, %v663_v0  ;;  %v707_v43 = vunpack.c.l.bf16 %v705_v17  ;;  %v718_v1 = vunpack.c.h.bf16 %v705_v17 }
  0x83   :  { %v713_v54 = vadd.f32 %v711_v61, %v702_v58  ;;  %v505_v63 = vadd.f32 %v503_v22, %v494_v10  ;;  %v624_v27 = vmul.f32 %v1289_v47, %v619_v23  ;;  %v652_v61 = vunpack.c.h.bf16 %v639_v24 }
  0x84   :  { %v685_v22 = vunpack.c.l.bf16 %v683_v46  ;;  %v712_v40 = vmul.f32 %v1371_v49, %v707_v43  ;;  %v723_v14 = vmul.f32 %v1375_v19, %v718_v1 }
  0x85   :  { %v724_v13 = vadd.f32 %v722_v29, %v713_v54  ;;  %v516_v16 = vadd.f32 %v514_v28, %v505_v63  ;;  %v657_v47 = vmul.f32 %v1327_v39, %v652_v61  ;;  %v674_v29 = vunpack.c.h.bf16 %v661_v37 }
  0x86   :  { %v696_v54 = vunpack.c.h.bf16 %v683_v46  ;;  %v690_v28 = vmul.f32 %v1357_v50, %v685_v22 }
  0x87   :  { %737 = vadd.xlane.f32.xlu0 %v724_v13  ;;  %v527_v45 = vadd.f32 %v525_v41, %v516_v16  ;;  %v679_v31 = vmul.f32 %v1339_v56, %v674_v29  ;;  %v8_v56 = vstv %s1443_s2 }
  0x88   :  { %v701_v39 = vmul.f32 %v1364_v53, %v696_v54  ;;  %9 = vst [vmem:[#allocation3] sm:$0x1] %v8_v56 }
  0x89   :  { %v538_v55 = vadd.f32 %v536_v20, %v527_v45 }
  0x8b   :  { %v549_v11 = vadd.f32 %v547_v30, %v538_v55 }
  0x8d   :  { %v560_v33 = vadd.f32 %v558_v42, %v549_v11 }
  0x8f   :  { %v571_v18 = vadd.f32 %v569_v59, %v560_v33  ;;  %v766_v50 = vld [vmem:[#allocation3] ss:$0 sm:$0xff] }
  0x91   :  { %v582_v48 = vadd.f32 %v580_v2, %v571_v18 }
  0x93   :  { %v593_v52 = vadd.f32 %v591_v12, %v582_v48 }
  0x95   :  { %v604_v32 = vadd.f32 %v602_v8, %v593_v52 }
  0x97   :  { %v615_v60 = vadd.f32 %v613_v5, %v604_v32 }
  0x99   :  { %v626_v26 = vadd.f32 %v624_v27, %v615_v60 }
  0x9b   :  { %v637_v58 = vadd.f32 %v635_v25, %v626_v26 }
  0x9d   :  { %v648_v36 = vadd.f32 %v646_v38, %v637_v58 }
  0x9f   :  { %v659_v62 = vadd.f32 %v657_v47, %v648_v36 }
  0xa1   :  { %v670_v10 = vadd.f32 %v668_v3, %v659_v62 }
  0xa3   :  { %v681_v13 = vadd.f32 %v679_v31, %v670_v10 }
  0xa5   :  { %v692_v63 = vadd.f32 %v690_v28, %v681_v13 }
  0xa7   :  { %v703_v41 = vadd.f32 %v701_v39, %v692_v63 }
  0xa9   :  { %v714_v16 = vadd.f32 %v712_v40, %v703_v41 }
  0xab   :  { %v725_v20 = vadd.f32 %v723_v14, %v714_v16 }
  0xad   :  { %739 = vadd.xlane.f32.xlu0 %v725_v20 }
  0xfa   :  { %v738_v53 = vpop.xlane.xlu0 %737 }
  0xfb   :  { %v745_v15 = vadd.f32 %v766_v50, %v738_v53 }
  0xfd   :  { %749 = vperm.xlu1 %764, %v745_v15  }
 0x120   :  { %v740_v45 = vpop.xlane.xlu0 %739 }
 0x121   :  { %v746_v49 = vadd.f32 %v766_v50, %v740_v45 }
 0x123   :  { %754 = vperm.xlu1 %764, %v746_v49  }
 0x16f   :  { %v750_v30 = vpop.permute.xlu1 %749 }
 0x170   :  { %757 = vst [vmem:[%s1444_s3] sm:$0xff] %v750_v30 }
 0x195   :  { %v755_v19 = vpop.permute.xlu1 %754 }
 0x196   :  { %758 = vst [vmem:[%s1444_s3 + $0x8] sm:$0xff] %v755_v19 }

</bundles_post_ra>
